<compile_context>
chip_gen: v7x
topology: tpu7x:2x2x1
jax: 0.10.0
libtpu: 0.0.40
codegen_flags: <defaults>
</compile_context>

<pallas_src>
import jax
import jax.numpy as jnp
from jax.experimental import pallas as pl
from jax.experimental.pallas import tpu as pltpu


# ------------------------------ Conv block --------------------------------- #

def _conv_block(p_ref, col_ref, w_ref, b_ref, y):
    """conv3x3 (same padding) -> 2x2 maxpool -> bias + ReLU, one MXU matmul.

    p_ref:   (bt, H+2, W+2, Cin)  padded-activation VMEM scratch
    col_ref: (bt*H*W, 9*Cin)      im2col VMEM scratch
    w_ref:   (9*Cin, Cout)        BN-folded, im2col-reshaped weights
    b_ref:   (1, Cout)            BN-folded bias
    y:       (bt, H, W, Cin)      input activation (f32 value)
    returns  (bt, H//2, W//2, Cout) f32
    """
    bt, Hp, Wp, Cin = p_ref.shape
    H, W = Hp - 2, Wp - 2
    Cout = w_ref.shape[-1]
    M = bt * H * W
    cdt = p_ref.dtype

    # --- stage input into the padded scratch: zero only the 1-pixel halo ---
    zrow = jnp.zeros((bt, 1, Wp, Cin), cdt)
    zcol = jnp.zeros((bt, Hp, 1, Cin), cdt)
    p_ref[:, 0:1, :, :] = zrow
    p_ref[:, Hp - 1:Hp, :, :] = zrow
    p_ref[:, :, 0:1, :] = zcol
    p_ref[:, :, Wp - 1:Wp, :] = zcol
    p_ref[:, 1:H + 1, 1:W + 1, :] = y.astype(cdt)

    # --- im2col: (bt*H*W, 9*Cin) tile, tap order dy-major to match weights ---
    if 9 * Cin <= 128:
        # Narrow-channel layer (layer 1, K=27): assemble once, single aligned
        # store (avoids 9 tiny stores at 3-lane offsets).
        taps = [p_ref[:, dy:dy + H, dx:dx + W, :].reshape(M, Cin)
                for dy in range(3) for dx in range(3)]
        col_ref[...] = jnp.concatenate(taps, axis=-1)
    else:
        # Wide-channel layers: 9 strided stores at Cin-aligned lane offsets.
        for t, (dy, dx) in enumerate([(dy, dx)
                                      for dy in range(3) for dx in range(3)]):
            col_ref[:, t * Cin:(t + 1) * Cin] = (
                p_ref[:, dy:dy + H, dx:dx + W, :].reshape(M, Cin))

    # --- single MXU matmul, K = 9*Cin, f32 accumulation ---
    acc = jnp.dot(col_ref[...], w_ref[...],
                  preferred_element_type=jnp.float32)          # (M, Cout)

    # --- 2x2/2 maxpool FIRST (rows then cols), then bias + ReLU on 1/4 data ---
    a = acc.reshape(bt * (H // 2), 2, W, Cout).max(axis=1)      # pool rows
    a = a.reshape(bt * (H // 2), W // 2, 2, Cout).max(axis=2)   # pool cols
    a = jnp.maximum(a + b_ref[...], 0.0)                        # bias + ReLU
    return a.reshape(bt, H // 2, W // 2, Cout)


# ------------------------------ Fused kernel -------------------------------- #

def _make_kernel(with_feat, zdim):
    def kernel(x_ref, w1, b1, w2, b2, w3, b3, w4, b4, fcw, fcb, *rest):
        if with_feat:
            feat_ref, out_ref = rest[0], rest[1]
            p1, c1, p2, c2, p3, c3, p4, c4 = rest[2:]
        else:
            out_ref = rest[0]
            p1, c1, p2, c2, p3, c3, p4, c4 = rest[1:]

        y = _conv_block(p1, c1, w1, b1, x_ref[...])
        y = _conv_block(p2, c2, w2, b2, y)
        y = _conv_block(p3, c3, w3, b3, y)
        y = _conv_block(p4, c4, w4, b4, y)

        bt = y.shape[0]
        feat = y.reshape(bt, -1)                                # (bt, zdim) f32

        if with_feat:
            fpad = feat_ref.shape[-1]
            if fpad == zdim:
                feat_ref[...] = feat.reshape(bt, 1, fpad)
            else:
                feat_ref[...] = jnp.zeros_like(feat_ref)
                feat_ref[:, :, 0:zdim] = feat.reshape(bt, 1, zdim)

        logits = jnp.dot(feat.astype(fcw.dtype), fcw[...],
                         preferred_element_type=jnp.float32) + fcb[...]
        out_ref[...] = logits.reshape(bt, 1, -1).astype(out_ref.dtype)

    return kernel


# ------------------------------- Parameters -------------------------------- #

def init_params(key, x_dim=3, hid_dim=64, z_dim=64, num_classes=80):
    """Deterministic synthetic parameters (shapes match the PyTorch module)."""
    in_chs = [x_dim, hid_dim, hid_dim, hid_dim]
    out_chs = [hid_dim, hid_dim, hid_dim, z_dim]
    eps = 1e-5
    blocks = []
    for cin, cout in zip(in_chs, out_chs):
        key, kw = jax.random.split(key)
        w = jax.random.normal(kw, (3, 3, cin, cout), jnp.float32) * 0.1
        # TODO(synk): BatchNorm is implemented in inference mode (running
        # stats), not training-mode batch statistics.
        gamma = jnp.ones((cout,), jnp.float32)
        beta = jnp.zeros((cout,), jnp.float32)
        mean = jnp.zeros((cout,), jnp.float32)
        var = jnp.ones((cout,), jnp.float32)
        scale = gamma / jnp.sqrt(var + eps)
        bias = beta - mean * scale
        blocks.append((w, scale, bias))
    key, kw, kb = jax.random.split(key, 3)
    fc_w = jax.random.normal(kw, (z_dim, num_classes), jnp.float32) * 0.1
    fc_b = jax.random.normal(kb, (num_classes,), jnp.float32) * 0.1
    return {"blocks": blocks, "fc_w": fc_w, "fc_b": fc_b}


def fold_params(params, compute_dtype=jnp.float32):
    """Fold BN into conv weights, reshape to im2col (9*Cin, Cout), pad fc."""
    blocks = []
    for (w, scale, bias) in params["blocks"]:
        kh, kw, cin, cout = w.shape
        w2d = (w * scale[None, None, None, :]).reshape(kh * kw * cin, cout)
        blocks.append((w2d.astype(compute_dtype),
                       bias.reshape(1, cout).astype(jnp.float32)))
    fc_w, fc_b = params["fc_w"], params["fc_b"]
    n = fc_w.shape[1]
    n_pad = pl.cdiv(n, 128) * 128
    fc_w = jnp.pad(fc_w, ((0, 0), (0, n_pad - n))).astype(compute_dtype)
    fc_b = jnp.pad(fc_b, (0, n_pad - n)).reshape(1, n_pad).astype(jnp.float32)
    return {"blocks": blocks, "fc_w": fc_w, "fc_b": fc_b,
            "num_classes": n, "compute_dtype": compute_dtype}


# -------------------------------- Wrapper ----------------------------------- #

def net_forward(kparams, x_nchw, is_feat=False, batch_tile=1):
    """Matches Net.forward with Location=False (default); one fused kernel."""
    x = jnp.transpose(x_nchw, (0, 2, 3, 1)).astype(jnp.float32)  # NCHW -> NHWC
    B, H, W, Cin = x.shape
    if H % 16 or W % 16:
        raise ValueError("H, W must be divisible by 16 (4 maxpool-2 stages)")
    bt = batch_tile if (batch_tile > 0 and B % batch_tile == 0) else 1
    nb = B // bt

    (w1, b1), (w2, b2), (w3, b3), (w4, b4) = kparams["blocks"]
    ch1, ch2, ch3, ch4 = (w.shape[1] for w in (w1, w2, w3, w4))
    fcw, fcb = kparams["fc_w"], kparams["fc_b"]
    zdim = (H // 16) * (W // 16) * ch4
    assert fcw.shape[0] == zdim, (fcw.shape, zdim)
    npad = fcw.shape[1]
    fpad = pl.cdiv(zdim, 128) * 128
    cdt = kparams["compute_dtype"]

    # Per-batch-tile input block; weights resident at block 0 for every step.
    x_spec = pl.BlockSpec((bt, H, W, Cin), lambda b: (b, 0, 0, 0))

    def w_spec(a):
        return pl.BlockSpec(a.shape, lambda b: (0, 0))

    in_specs = [x_spec] + [w_spec(a)
                           for a in (w1, b1, w2, b2, w3, b3, w4, b4, fcw, fcb)]

    logits_spec = pl.BlockSpec((bt, 1, npad), lambda b: (b, 0, 0))
    if is_feat:
        out_shape = (jax.ShapeDtypeStruct((B, 1, fpad), jnp.float32),
                     jax.ShapeDtypeStruct((B, 1, npad), jnp.float32))
        out_specs = (pl.BlockSpec((bt, 1, fpad), lambda b: (b, 0, 0)),
                     logits_spec)
    else:
        out_shape = jax.ShapeDtypeStruct((B, 1, npad), jnp.float32)
        out_specs = logits_spec

    # Per-grid-step scratch (padded activations + im2col tiles).  At bt=1 and
    # 16x16 input this is <2 MiB, far below the 32 MiB scoped limit set below
    # (and v7x's 64 MiB physical VMEM); scale `batch_tile` down if larger
    # images blow the budget.
    scratch_shapes = [
        pltpu.VMEM((bt, H + 2, W + 2, Cin), cdt),
        pltpu.VMEM((bt * H * W, 9 * Cin), cdt),
        pltpu.VMEM((bt, H // 2 + 2, W // 2 + 2, ch1), cdt),
        pltpu.VMEM((bt * (H // 2) * (W // 2), 9 * ch1), cdt),
        pltpu.VMEM((bt, H // 4 + 2, W // 4 + 2, ch2), cdt),
        pltpu.VMEM((bt * (H // 4) * (W // 4), 9 * ch2), cdt),
        pltpu.VMEM((bt, H // 8 + 2, W // 8 + 2, ch3), cdt),
        pltpu.VMEM((bt * (H // 8) * (W // 8), 9 * ch3), cdt),
    ]

    fn = pl.pallas_call(
        _make_kernel(is_feat, zdim),
        out_shape=out_shape,
        grid_spec=pltpu.PrefetchScalarGridSpec(
            num_scalar_prefetch=0,
            grid=(nb,),
            in_specs=in_specs,
            out_specs=out_specs,
            scratch_shapes=scratch_shapes),
        compiler_params=pltpu.CompilerParams(
            dimension_semantics=("parallel",),
            vmem_limit_bytes=32 * 1024 * 1024),
    )
    res = fn(x, w1, b1, w2, b2, w3, b3, w4, b4, fcw, fcb)

    if is_feat:
        featp, logitsp = res
        return featp[:, 0, :zdim], logitsp[:, 0, :kparams["num_classes"]]
    return res[:, 0, :kparams["num_classes"]]


# --------------------------- Pure-JAX reference ----------------------------- #

def net_reference(params, x_nchw):
    x = jnp.transpose(x_nchw, (0, 2, 3, 1)).astype(jnp.float32)
    for (w, scale, bias) in params["blocks"]:
        y = jax.lax.conv_general_dilated(
            x, w, window_strides=(1, 1), padding=((1, 1), (1, 1)),
            dimension_numbers=("NHWC", "HWIO", "NHWC"))
        y = jnp.maximum(y * scale + bias, 0.0)
        x = jax.lax.reduce_window(y, -jnp.inf, jax.lax.max,
                                  (1, 2, 2, 1), (1, 2, 2, 1), "VALID")
    feat = x.reshape(x.shape[0], -1)
    return feat, feat @ params["fc_w"] + params["fc_b"]


# ---------------------------------- Main ------------------------------------ #

if __name__ == "__main__":
    key = jax.random.PRNGKey(0)
    key, kx = jax.random.split(key)
    # PyTorch-style NCHW input: batch=2, channels=3, 16x16 spatial.
    x = jax.random.normal(kx, (2, 3, 16, 16), jnp.float32)

    params = init_params(key)
    kparams = fold_params(params)            # f32 compute (correctness path)

    ref_feat, ref_logits = net_reference(params, x)

    # Default path (is_feat=False): logits-only kernel.
    logits = jax.block_until_ready(net_forward(kparams, x))
    assert logits.shape == (2, 80), logits.shape
    assert jnp.allclose(logits, ref_logits, atol=1e-4, rtol=1e-4), \
        float(jnp.max(jnp.abs(logits - ref_logits)))

    # is_feat=True path: lane-padded feature output variant.
    feat, logits2 = net_forward(kparams, x, is_feat=True)
    jax.block_until_ready((feat, logits2))
    assert feat.shape == (2, 64), feat.shape
    assert jnp.allclose(feat, ref_feat, atol=1e-4, rtol=1e-4), \
        float(jnp.max(jnp.abs(feat - ref_feat)))
    assert jnp.allclose(logits2, ref_logits, atol=1e-4, rtol=1e-4), \
        float(jnp.max(jnp.abs(logits2 - ref_logits)))

    print("KERNEL_OK")
</pallas_src>

<mosaic_0001>
module attributes {stable_mosaic.version = 11 : i64} {
  func.func @kernel(%arg0: i32, %arg1: memref<1x16x16x3xf32, #tpu.memory_space<vmem>>, %arg2: memref<27x64xf32, #tpu.memory_space<vmem>>, %arg3: memref<1x64xf32, #tpu.memory_space<vmem>>, %arg4: memref<576x64xf32, #tpu.memory_space<vmem>>, %arg5: memref<1x64xf32, #tpu.memory_space<vmem>>, %arg6: memref<576x64xf32, #tpu.memory_space<vmem>>, %arg7: memref<1x64xf32, #tpu.memory_space<vmem>>, %arg8: memref<576x64xf32, #tpu.memory_space<vmem>>, %arg9: memref<1x64xf32, #tpu.memory_space<vmem>>, %arg10: memref<64x128xf32, #tpu.memory_space<vmem>>, %arg11: memref<1x128xf32, #tpu.memory_space<vmem>>, %arg12: memref<1x1x128xf32, #tpu.memory_space<vmem>>, %arg13: memref<1x18x18x3xf32, #tpu.memory_space<vmem>>, %arg14: memref<256x27xf32, #tpu.memory_space<vmem>>, %arg15: memref<1x10x10x64xf32, #tpu.memory_space<vmem>>, %arg16: memref<64x576xf32, #tpu.memory_space<vmem>>, %arg17: memref<1x6x6x64xf32, #tpu.memory_space<vmem>>, %arg18: memref<16x576xf32, #tpu.memory_space<vmem>>, %arg19: memref<1x4x4x64xf32, #tpu.memory_space<vmem>>, %arg20: memref<4x576xf32, #tpu.memory_space<vmem>>) attributes {dimension_semantics = [#tpu.dimension_semantics<parallel>], iteration_bounds = array<i64: 2>, scalar_prefetch = 0 : i64, scratch_operands = 8 : i64, tpu.core_type = #tpu.core_type<tc>, window_params = [{transform_indices = @transform_0, window_bounds = array<i64: 1, 16, 16, 3>}, {pipeline_mode = #tpu.pipeline_mode<synchronous>, transform_indices = @transform_1, window_bounds = array<i64: 27, 64>}, {pipeline_mode = #tpu.pipeline_mode<synchronous>, transform_indices = @transform_2, window_bounds = array<i64: 1, 64>}, {pipeline_mode = #tpu.pipeline_mode<synchronous>, transform_indices = @transform_3, window_bounds = array<i64: 576, 64>}, {pipeline_mode = #tpu.pipeline_mode<synchronous>, transform_indices = @transform_4, window_bounds = array<i64: 1, 64>}, {pipeline_mode = #tpu.pipeline_mode<synchronous>, transform_indices = @transform_5, window_bounds = array<i64: 576, 64>}, {pipeline_mode = #tpu.pipeline_mode<synchronous>, transform_indices = @transform_6, window_bounds = array<i64: 1, 64>}, {pipeline_mode = #tpu.pipeline_mode<synchronous>, transform_indices = @transform_7, window_bounds = array<i64: 576, 64>}, {pipeline_mode = #tpu.pipeline_mode<synchronous>, transform_indices = @transform_8, window_bounds = array<i64: 1, 64>}, {pipeline_mode = #tpu.pipeline_mode<synchronous>, transform_indices = @transform_9, window_bounds = array<i64: 64, 128>}, {pipeline_mode = #tpu.pipeline_mode<synchronous>, transform_indices = @transform_10, window_bounds = array<i64: 1, 128>}, {transform_indices = @transform_11, window_bounds = array<i64: 1, 1, 128>}]} {
    %c0 = arith.constant 0 : index
    %c0_0 = arith.constant 0 : index
    %c0_1 = arith.constant 0 : index
    %c0_2 = arith.constant 0 : index
    %0 = vector.load %arg1[%c0, %c0_0, %c0_1, %c0_2] : memref<1x16x16x3xf32, #tpu.memory_space<vmem>>, vector<1x16x16x3xf32>
    %cst = arith.constant 0.000000e+00 : f32
    %1 = vector.broadcast %cst : f32 to vector<1x1x18x3xf32>
    %cst_3 = arith.constant 0.000000e+00 : f32
    %2 = vector.broadcast %cst_3 : f32 to vector<1x18x1x3xf32>
    %c0_4 = arith.constant 0 : index
    %c0_5 = arith.constant 0 : index
    %c0_6 = arith.constant 0 : index
    %c0_7 = arith.constant 0 : index
    %3 = vector.load %arg13[%c0_4, %c0_5, %c0_6, %c0_7] : memref<1x18x18x3xf32, #tpu.memory_space<vmem>>, vector<1x1x18x3xf32>
    tpu.vector_store %arg13[%c0_4, %c0_5, %c0_6, %c0_7], %1 {strides = array<i32>} : memref<1x18x18x3xf32, #tpu.memory_space<vmem>>, vector<1x1x18x3xf32>,
    %c0_8 = arith.constant 0 : index
    %c17 = arith.constant 17 : index
    %c0_9 = arith.constant 0 : index
    %c0_10 = arith.constant 0 : index
    %4 = vector.load %arg13[%c0_8, %c17, %c0_9, %c0_10] : memref<1x18x18x3xf32, #tpu.memory_space<vmem>>, vector<1x1x18x3xf32>
    tpu.vector_store %arg13[%c0_8, %c17, %c0_9, %c0_10], %1 {strides = array<i32>} : memref<1x18x18x3xf32, #tpu.memory_space<vmem>>, vector<1x1x18x3xf32>,
    %c0_11 = arith.constant 0 : index
    %c0_12 = arith.constant 0 : index
    %c0_13 = arith.constant 0 : index
    %c0_14 = arith.constant 0 : index
    %5 = vector.load %arg13[%c0_11, %c0_12, %c0_13, %c0_14] : memref<1x18x18x3xf32, #tpu.memory_space<vmem>>, vector<1x18x1x3xf32>
    tpu.vector_store %arg13[%c0_11, %c0_12, %c0_13, %c0_14], %2 {strides = array<i32>} : memref<1x18x18x3xf32, #tpu.memory_space<vmem>>, vector<1x18x1x3xf32>,
    %c0_15 = arith.constant 0 : index
    %c0_16 = arith.constant 0 : index
    %c17_17 = arith.constant 17 : index
    %c0_18 = arith.constant 0 : index
    %6 = vector.load %arg13[%c0_15, %c0_16, %c17_17, %c0_18] : memref<1x18x18x3xf32, #tpu.memory_space<vmem>>, vector<1x18x1x3xf32>
    tpu.vector_store %arg13[%c0_15, %c0_16, %c17_17, %c0_18], %2 {strides = array<i32>} : memref<1x18x18x3xf32, #tpu.memory_space<vmem>>, vector<1x18x1x3xf32>,
    %c0_19 = arith.constant 0 : index
    %c1 = arith.constant 1 : index
    %c1_20 = arith.constant 1 : index
    %c0_21 = arith.constant 0 : index
    %7 = vector.load %arg13[%c0_19, %c1, %c1_20, %c0_21] : memref<1x18x18x3xf32, #tpu.memory_space<vmem>>, vector<1x16x16x3xf32>
    tpu.vector_store %arg13[%c0_19, %c1, %c1_20, %c0_21], %0 {strides = array<i32>} : memref<1x18x18x3xf32, #tpu.memory_space<vmem>>, vector<1x16x16x3xf32>,
    %c0_22 = arith.constant 0 : index
    %c0_23 = arith.constant 0 : index
    %c0_24 = arith.constant 0 : index
    %c0_25 = arith.constant 0 : index
    %8 = vector.load %arg13[%c0_22, %c0_23, %c0_24, %c0_25] : memref<1x18x18x3xf32, #tpu.memory_space<vmem>>, vector<1x16x16x3xf32>
    %9 = vector.shape_cast %8 : vector<1x16x16x3xf32> to vector<256x3xf32>
    %c0_26 = arith.constant 0 : index
    %c0_27 = arith.constant 0 : index
    %c1_28 = arith.constant 1 : index
    %c0_29 = arith.constant 0 : index
    %10 = vector.load %arg13[%c0_26, %c0_27, %c1_28, %c0_29] : memref<1x18x18x3xf32, #tpu.memory_space<vmem>>, vector<1x16x16x3xf32>
    %11 = vector.shape_cast %10 : vector<1x16x16x3xf32> to vector<256x3xf32>
    %c0_30 = arith.constant 0 : index
    %c0_31 = arith.constant 0 : index
    %c2 = arith.constant 2 : index
    %c0_32 = arith.constant 0 : index
    %12 = vector.load %arg13[%c0_30, %c0_31, %c2, %c0_32] : memref<1x18x18x3xf32, #tpu.memory_space<vmem>>, vector<1x16x16x3xf32>
    %13 = vector.shape_cast %12 : vector<1x16x16x3xf32> to vector<256x3xf32>
    %c0_33 = arith.constant 0 : index
    %c1_34 = arith.constant 1 : index
    %c0_35 = arith.constant 0 : index
    %c0_36 = arith.constant 0 : index
    %14 = vector.load %arg13[%c0_33, %c1_34, %c0_35, %c0_36] : memref<1x18x18x3xf32, #tpu.memory_space<vmem>>, vector<1x16x16x3xf32>
    %15 = vector.shape_cast %14 : vector<1x16x16x3xf32> to vector<256x3xf32>
    %c0_37 = arith.constant 0 : index
    %c1_38 = arith.constant 1 : index
    %c1_39 = arith.constant 1 : index
    %c0_40 = arith.constant 0 : index
    %16 = vector.load %arg13[%c0_37, %c1_38, %c1_39, %c0_40] : memref<1x18x18x3xf32, #tpu.memory_space<vmem>>, vector<1x16x16x3xf32>
    %17 = vector.shape_cast %16 : vector<1x16x16x3xf32> to vector<256x3xf32>
    %c0_41 = arith.constant 0 : index
    %c1_42 = arith.constant 1 : index
    %c2_43 = arith.constant 2 : index
    %c0_44 = arith.constant 0 : index
    %18 = vector.load %arg13[%c0_41, %c1_42, %c2_43, %c0_44] : memref<1x18x18x3xf32, #tpu.memory_space<vmem>>, vector<1x16x16x3xf32>
    %19 = vector.shape_cast %18 : vector<1x16x16x3xf32> to vector<256x3xf32>
    %c0_45 = arith.constant 0 : index
    %c2_46 = arith.constant 2 : index
    %c0_47 = arith.constant 0 : index
    %c0_48 = arith.constant 0 : index
    %20 = vector.load %arg13[%c0_45, %c2_46, %c0_47, %c0_48] : memref<1x18x18x3xf32, #tpu.memory_space<vmem>>, vector<1x16x16x3xf32>
    %21 = vector.shape_cast %20 : vector<1x16x16x3xf32> to vector<256x3xf32>
    %c0_49 = arith.constant 0 : index
    %c2_50 = arith.constant 2 : index
    %c1_51 = arith.constant 1 : index
    %c0_52 = arith.constant 0 : index
    %22 = vector.load %arg13[%c0_49, %c2_50, %c1_51, %c0_52] : memref<1x18x18x3xf32, #tpu.memory_space<vmem>>, vector<1x16x16x3xf32>
    %23 = vector.shape_cast %22 : vector<1x16x16x3xf32> to vector<256x3xf32>
    %c0_53 = arith.constant 0 : index
    %c2_54 = arith.constant 2 : index
    %c2_55 = arith.constant 2 : index
    %c0_56 = arith.constant 0 : index
    %24 = vector.load %arg13[%c0_53, %c2_54, %c2_55, %c0_56] : memref<1x18x18x3xf32, #tpu.memory_space<vmem>>, vector<1x16x16x3xf32>
    %25 = vector.shape_cast %24 : vector<1x16x16x3xf32> to vector<256x3xf32>
    %26 = tpu.concatenate %9, %11, %13, %15, %17, %19, %21, %23, %25 in 1 : vector<256x3xf32>, vector<256x3xf32>, vector<256x3xf32>, vector<256x3xf32>, vector<256x3xf32>, vector<256x3xf32>, vector<256x3xf32>, vector<256x3xf32>, vector<256x3xf32> -> vector<256x27xf32>
    %c0_57 = arith.constant 0 : index
    %c0_58 = arith.constant 0 : index
    %27 = vector.load %arg14[%c0_57, %c0_58] : memref<256x27xf32, #tpu.memory_space<vmem>>, vector<256x27xf32>
    tpu.vector_store %arg14[%c0_57, %c0_58], %26 {strides = array<i32>} : memref<256x27xf32, #tpu.memory_space<vmem>>, vector<256x27xf32>,
    %c0_59 = arith.constant 0 : index
    %c0_60 = arith.constant 0 : index
    %28 = vector.load %arg14[%c0_59, %c0_60] : memref<256x27xf32, #tpu.memory_space<vmem>>, vector<256x27xf32>
    %c0_61 = arith.constant 0 : index
    %c0_62 = arith.constant 0 : index
    %29 = vector.load %arg2[%c0_61, %c0_62] : memref<27x64xf32, #tpu.memory_space<vmem>>, vector<27x64xf32>
    %cst_63 = arith.constant dense<0.000000e+00> : vector<256x64xf32>
    %30 = tpu.matmul %28, %29, %cst_63 {dimension_numbers = #tpu.dot_dimension_numbers<[1], [0], [0], [1], [0, 0, 1, 1], [], []>} : vector<256x27xf32>, vector<27x64xf32>, vector<256x64xf32> -> vector<256x64xf32>
    %31 = vector.shape_cast %30 : vector<256x64xf32> to vector<8x2x16x64xf32>
    %cst_64 = arith.constant dense<0xFF800000> : vector<8x16x64xf32>
    %32 = vector.multi_reduction <maximumf>, %31, %cst_64 [1] : vector<8x2x16x64xf32> to vector<8x16x64xf32>
    %33 = vector.shape_cast %32 : vector<8x16x64xf32> to vector<8x8x2x64xf32>
    %cst_65 = arith.constant dense<0xFF800000> : vector<8x8x64xf32>
    %34 = vector.multi_reduction <maximumf>, %33, %cst_65 [2] : vector<8x8x2x64xf32> to vector<8x8x64xf32>
    %c0_66 = arith.constant 0 : index
    %c0_67 = arith.constant 0 : index
    %35 = vector.load %arg3[%c0_66, %c0_67] : memref<1x64xf32, #tpu.memory_space<vmem>>, vector<1x64xf32>
    %36 = vector.shape_cast %35 : vector<1x64xf32> to vector<1x1x64xf32>
    %37 = vector.broadcast %36 : vector<1x1x64xf32> to vector<8x8x64xf32>
    %38 = arith.addf %34, %37 : vector<8x8x64xf32>
    %cst_68 = arith.constant 0.000000e+00 : f32
    %39 = vector.broadcast %cst_68 : f32 to vector<8x8x64xf32>
    %40 = arith.maximumf %38, %39 : vector<8x8x64xf32>
    %41 = vector.shape_cast %40 : vector<8x8x64xf32> to vector<1x8x8x64xf32>
    %cst_69 = arith.constant 0.000000e+00 : f32
    %42 = vector.broadcast %cst_69 : f32 to vector<1x1x10x64xf32>
    %cst_70 = arith.constant 0.000000e+00 : f32
    %43 = vector.broadcast %cst_70 : f32 to vector<1x10x1x64xf32>
    %c0_71 = arith.constant 0 : index
    %c0_72 = arith.constant 0 : index
    %c0_73 = arith.constant 0 : index
    %c0_74 = arith.constant 0 : index
    %44 = vector.load %arg15[%c0_71, %c0_72, %c0_73, %c0_74] : memref<1x10x10x64xf32, #tpu.memory_space<vmem>>, vector<1x1x10x64xf32>
    tpu.vector_store %arg15[%c0_71, %c0_72, %c0_73, %c0_74], %42 {strides = array<i32>} : memref<1x10x10x64xf32, #tpu.memory_space<vmem>>, vector<1x1x10x64xf32>,
    %c0_75 = arith.constant 0 : index
    %c9 = arith.constant 9 : index
    %c0_76 = arith.constant 0 : index
    %c0_77 = arith.constant 0 : index
    %45 = vector.load %arg15[%c0_75, %c9, %c0_76, %c0_77] : memref<1x10x10x64xf32, #tpu.memory_space<vmem>>, vector<1x1x10x64xf32>
    tpu.vector_store %arg15[%c0_75, %c9, %c0_76, %c0_77], %42 {strides = array<i32>} : memref<1x10x10x64xf32, #tpu.memory_space<vmem>>, vector<1x1x10x64xf32>,
    %c0_78 = arith.constant 0 : index
    %c0_79 = arith.constant 0 : index
    %c0_80 = arith.constant 0 : index
    %c0_81 = arith.constant 0 : index
    %46 = vector.load %arg15[%c0_78, %c0_79, %c0_80, %c0_81] : memref<1x10x10x64xf32, #tpu.memory_space<vmem>>, vector<1x10x1x64xf32>
    tpu.vector_store %arg15[%c0_78, %c0_79, %c0_80, %c0_81], %43 {strides = array<i32>} : memref<1x10x10x64xf32, #tpu.memory_space<vmem>>, vector<1x10x1x64xf32>,
    %c0_82 = arith.constant 0 : index
    %c0_83 = arith.constant 0 : index
    %c9_84 = arith.constant 9 : index
    %c0_85 = arith.constant 0 : index
    %47 = vector.load %arg15[%c0_82, %c0_83, %c9_84, %c0_85] : memref<1x10x10x64xf32, #tpu.memory_space<vmem>>, vector<1x10x1x64xf32>
    tpu.vector_store %arg15[%c0_82, %c0_83, %c9_84, %c0_85], %43 {strides = array<i32>} : memref<1x10x10x64xf32, #tpu.memory_space<vmem>>, vector<1x10x1x64xf32>,
    %c0_86 = arith.constant 0 : index
    %c1_87 = arith.constant 1 : index
    %c1_88 = arith.constant 1 : index
    %c0_89 = arith.constant 0 : index
    %48 = vector.load %arg15[%c0_86, %c1_87, %c1_88, %c0_89] : memref<1x10x10x64xf32, #tpu.memory_space<vmem>>, vector<1x8x8x64xf32>
    tpu.vector_store %arg15[%c0_86, %c1_87, %c1_88, %c0_89], %41 {strides = array<i32>} : memref<1x10x10x64xf32, #tpu.memory_space<vmem>>, vector<1x8x8x64xf32>,
    %c0_90 = arith.constant 0 : index
    %c0_91 = arith.constant 0 : index
    %c0_92 = arith.constant 0 : index
    %c0_93 = arith.constant 0 : index
    %49 = vector.load %arg15[%c0_90, %c0_91, %c0_92, %c0_93] : memref<1x10x10x64xf32, #tpu.memory_space<vmem>>, vector<1x8x8x64xf32>
    %50 = vector.shape_cast %49 : vector<1x8x8x64xf32> to vector<64x64xf32>
    %c0_94 = arith.constant 0 : index
    %c0_95 = arith.constant 0 : index
    %51 = vector.load %arg16[%c0_94, %c0_95] : memref<64x576xf32, #tpu.memory_space<vmem>>, vector<64x64xf32>
    tpu.vector_store %arg16[%c0_94, %c0_95], %50 {strides = array<i32>} : memref<64x576xf32, #tpu.memory_space<vmem>>, vector<64x64xf32>,
    %c0_96 = arith.constant 0 : index
    %c0_97 = arith.constant 0 : index
    %c1_98 = arith.constant 1 : index
    %c0_99 = arith.constant 0 : index
    %52 = vector.load %arg15[%c0_96, %c0_97, %c1_98, %c0_99] : memref<1x10x10x64xf32, #tpu.memory_space<vmem>>, vector<1x8x8x64xf32>
    %53 = vector.shape_cast %52 : vector<1x8x8x64xf32> to vector<64x64xf32>
    %c0_100 = arith.constant 0 : index
    %c64 = arith.constant 64 : index
    %54 = vector.load %arg16[%c0_100, %c64] : memref<64x576xf32, #tpu.memory_space<vmem>>, vector<64x64xf32>
    tpu.vector_store %arg16[%c0_100, %c64], %53 {strides = array<i32>} : memref<64x576xf32, #tpu.memory_space<vmem>>, vector<64x64xf32>,
    %c0_101 = arith.constant 0 : index
    %c0_102 = arith.constant 0 : index
    %c2_103 = arith.constant 2 : index
    %c0_104 = arith.constant 0 : index
    %55 = vector.load %arg15[%c0_101, %c0_102, %c2_103, %c0_104] : memref<1x10x10x64xf32, #tpu.memory_space<vmem>>, vector<1x8x8x64xf32>
    %56 = vector.shape_cast %55 : vector<1x8x8x64xf32> to vector<64x64xf32>
    %c0_105 = arith.constant 0 : index
    %c128 = arith.constant 128 : index
    %57 = vector.load %arg16[%c0_105, %c128] : memref<64x576xf32, #tpu.memory_space<vmem>>, vector<64x64xf32>
    tpu.vector_store %arg16[%c0_105, %c128], %56 {strides = array<i32>} : memref<64x576xf32, #tpu.memory_space<vmem>>, vector<64x64xf32>,
    %c0_106 = arith.constant 0 : index
    %c1_107 = arith.constant 1 : index
    %c0_108 = arith.constant 0 : index
    %c0_109 = arith.constant 0 : index
    %58 = vector.load %arg15[%c0_106, %c1_107, %c0_108, %c0_109] : memref<1x10x10x64xf32, #tpu.memory_space<vmem>>, vector<1x8x8x64xf32>
    %59 = vector.shape_cast %58 : vector<1x8x8x64xf32> to vector<64x64xf32>
    %c0_110 = arith.constant 0 : index
    %c192 = arith.constant 192 : index
    %60 = vector.load %arg16[%c0_110, %c192] : memref<64x576xf32, #tpu.memory_space<vmem>>, vector<64x64xf32>
    tpu.vector_store %arg16[%c0_110, %c192], %59 {strides = array<i32>} : memref<64x576xf32, #tpu.memory_space<vmem>>, vector<64x64xf32>,
    %c0_111 = arith.constant 0 : index
    %c1_112 = arith.constant 1 : index
    %c1_113 = arith.constant 1 : index
    %c0_114 = arith.constant 0 : index
    %61 = vector.load %arg15[%c0_111, %c1_112, %c1_113, %c0_114] : memref<1x10x10x64xf32, #tpu.memory_space<vmem>>, vector<1x8x8x64xf32>
    %62 = vector.shape_cast %61 : vector<1x8x8x64xf32> to vector<64x64xf32>
    %c0_115 = arith.constant 0 : index
    %c256 = arith.constant 256 : index
    %63 = vector.load %arg16[%c0_115, %c256] : memref<64x576xf32, #tpu.memory_space<vmem>>, vector<64x64xf32>
    tpu.vector_store %arg16[%c0_115, %c256], %62 {strides = array<i32>} : memref<64x576xf32, #tpu.memory_space<vmem>>, vector<64x64xf32>,
    %c0_116 = arith.constant 0 : index
    %c1_117 = arith.constant 1 : index
    %c2_118 = arith.constant 2 : index
    %c0_119 = arith.constant 0 : index
    %64 = vector.load %arg15[%c0_116, %c1_117, %c2_118, %c0_119] : memref<1x10x10x64xf32, #tpu.memory_space<vmem>>, vector<1x8x8x64xf32>
    %65 = vector.shape_cast %64 : vector<1x8x8x64xf32> to vector<64x64xf32>
    %c0_120 = arith.constant 0 : index
    %c320 = arith.constant 320 : index
    %66 = vector.load %arg16[%c0_120, %c320] : memref<64x576xf32, #tpu.memory_space<vmem>>, vector<64x64xf32>
    tpu.vector_store %arg16[%c0_120, %c320], %65 {strides = array<i32>} : memref<64x576xf32, #tpu.memory_space<vmem>>, vector<64x64xf32>,
    %c0_121 = arith.constant 0 : index
    %c2_122 = arith.constant 2 : index
    %c0_123 = arith.constant 0 : index
    %c0_124 = arith.constant 0 : index
    %67 = vector.load %arg15[%c0_121, %c2_122, %c0_123, %c0_124] : memref<1x10x10x64xf32, #tpu.memory_space<vmem>>, vector<1x8x8x64xf32>
    %68 = vector.shape_cast %67 : vector<1x8x8x64xf32> to vector<64x64xf32>
    %c0_125 = arith.constant 0 : index
    %c384 = arith.constant 384 : index
    %69 = vector.load %arg16[%c0_125, %c384] : memref<64x576xf32, #tpu.memory_space<vmem>>, vector<64x64xf32>
    tpu.vector_store %arg16[%c0_125, %c384], %68 {strides = array<i32>} : memref<64x576xf32, #tpu.memory_space<vmem>>, vector<64x64xf32>,
    %c0_126 = arith.constant 0 : index
    %c2_127 = arith.constant 2 : index
    %c1_128 = arith.constant 1 : index
    %c0_129 = arith.constant 0 : index
    %70 = vector.load %arg15[%c0_126, %c2_127, %c1_128, %c0_129] : memref<1x10x10x64xf32, #tpu.memory_space<vmem>>, vector<1x8x8x64xf32>
    %71 = vector.shape_cast %70 : vector<1x8x8x64xf32> to vector<64x64xf32>
    %c0_130 = arith.constant 0 : index
    %c448 = arith.constant 448 : index
    %72 = vector.load %arg16[%c0_130, %c448] : memref<64x576xf32, #tpu.memory_space<vmem>>, vector<64x64xf32>
    tpu.vector_store %arg16[%c0_130, %c448], %71 {strides = array<i32>} : memref<64x576xf32, #tpu.memory_space<vmem>>, vector<64x64xf32>,
    %c0_131 = arith.constant 0 : index
    %c2_132 = arith.constant 2 : index
    %c2_133 = arith.constant 2 : index
    %c0_134 = arith.constant 0 : index
    %73 = vector.load %arg15[%c0_131, %c2_132, %c2_133, %c0_134] : memref<1x10x10x64xf32, #tpu.memory_space<vmem>>, vector<1x8x8x64xf32>
    %74 = vector.shape_cast %73 : vector<1x8x8x64xf32> to vector<64x64xf32>
    %c0_135 = arith.constant 0 : index
    %c512 = arith.constant 512 : index
    %75 = vector.load %arg16[%c0_135, %c512] : memref<64x576xf32, #tpu.memory_space<vmem>>, vector<64x64xf32>
    tpu.vector_store %arg16[%c0_135, %c512], %74 {strides = array<i32>} : memref<64x576xf32, #tpu.memory_space<vmem>>, vector<64x64xf32>,
    %c0_136 = arith.constant 0 : index
    %c0_137 = arith.constant 0 : index
    %76 = vector.load %arg16[%c0_136, %c0_137] : memref<64x576xf32, #tpu.memory_space<vmem>>, vector<64x576xf32>
    %c0_138 = arith.constant 0 : index
    %c0_139 = arith.constant 0 : index
    %77 = vector.load %arg4[%c0_138, %c0_139] : memref<576x64xf32, #tpu.memory_space<vmem>>, vector<576x64xf32>
    %cst_140 = arith.constant dense<0.000000e+00> : vector<64x64xf32>
    %78 = tpu.matmul %76, %77, %cst_140 {dimension_numbers = #tpu.dot_dimension_numbers<[1], [0], [0], [1], [0, 0, 1, 1], [], []>} : vector<64x576xf32>, vector<576x64xf32>, vector<64x64xf32> -> vector<64x64xf32>
    %79 = vector.shape_cast %78 : vector<64x64xf32> to vector<4x2x8x64xf32>
    %cst_141 = arith.constant dense<0xFF800000> : vector<4x8x64xf32>
    %80 = vector.multi_reduction <maximumf>, %79, %cst_141 [1] : vector<4x2x8x64xf32> to vector<4x8x64xf32>
    %81 = vector.shape_cast %80 : vector<4x8x64xf32> to vector<4x4x2x64xf32>
    %cst_142 = arith.constant dense<0xFF800000> : vector<4x4x64xf32>
    %82 = vector.multi_reduction <maximumf>, %81, %cst_142 [2] : vector<4x4x2x64xf32> to vector<4x4x64xf32>
    %c0_143 = arith.constant 0 : index
    %c0_144 = arith.constant 0 : index
    %83 = vector.load %arg5[%c0_143, %c0_144] : memref<1x64xf32, #tpu.memory_space<vmem>>, vector<1x64xf32>
    %84 = vector.shape_cast %83 : vector<1x64xf32> to vector<1x1x64xf32>
    %85 = vector.broadcast %84 : vector<1x1x64xf32> to vector<4x4x64xf32>
    %86 = arith.addf %82, %85 : vector<4x4x64xf32>
    %cst_145 = arith.constant 0.000000e+00 : f32
    %87 = vector.broadcast %cst_145 : f32 to vector<4x4x64xf32>
    %88 = arith.maximumf %86, %87 : vector<4x4x64xf32>
    %89 = vector.shape_cast %88 : vector<4x4x64xf32> to vector<1x4x4x64xf32>
    %cst_146 = arith.constant 0.000000e+00 : f32
    %90 = vector.broadcast %cst_146 : f32 to vector<1x1x6x64xf32>
    %cst_147 = arith.constant 0.000000e+00 : f32
    %91 = vector.broadcast %cst_147 : f32 to vector<1x6x1x64xf32>
    %c0_148 = arith.constant 0 : index
    %c0_149 = arith.constant 0 : index
    %c0_150 = arith.constant 0 : index
    %c0_151 = arith.constant 0 : index
    %92 = vector.load %arg17[%c0_148, %c0_149, %c0_150, %c0_151] : memref<1x6x6x64xf32, #tpu.memory_space<vmem>>, vector<1x1x6x64xf32>
    tpu.vector_store %arg17[%c0_148, %c0_149, %c0_150, %c0_151], %90 {strides = array<i32>} : memref<1x6x6x64xf32, #tpu.memory_space<vmem>>, vector<1x1x6x64xf32>,
    %c0_152 = arith.constant 0 : index
    %c5 = arith.constant 5 : index
    %c0_153 = arith.constant 0 : index
    %c0_154 = arith.constant 0 : index
    %93 = vector.load %arg17[%c0_152, %c5, %c0_153, %c0_154] : memref<1x6x6x64xf32, #tpu.memory_space<vmem>>, vector<1x1x6x64xf32>
    tpu.vector_store %arg17[%c0_152, %c5, %c0_153, %c0_154], %90 {strides = array<i32>} : memref<1x6x6x64xf32, #tpu.memory_space<vmem>>, vector<1x1x6x64xf32>,
    %c0_155 = arith.constant 0 : index
    %c0_156 = arith.constant 0 : index
    %c0_157 = arith.constant 0 : index
    %c0_158 = arith.constant 0 : index
    %94 = vector.load %arg17[%c0_155, %c0_156, %c0_157, %c0_158] : memref<1x6x6x64xf32, #tpu.memory_space<vmem>>, vector<1x6x1x64xf32>
    tpu.vector_store %arg17[%c0_155, %c0_156, %c0_157, %c0_158], %91 {strides = array<i32>} : memref<1x6x6x64xf32, #tpu.memory_space<vmem>>, vector<1x6x1x64xf32>,
    %c0_159 = arith.constant 0 : index
    %c0_160 = arith.constant 0 : index
    %c5_161 = arith.constant 5 : index
    %c0_162 = arith.constant 0 : index
    %95 = vector.load %arg17[%c0_159, %c0_160, %c5_161, %c0_162] : memref<1x6x6x64xf32, #tpu.memory_space<vmem>>, vector<1x6x1x64xf32>
    tpu.vector_store %arg17[%c0_159, %c0_160, %c5_161, %c0_162], %91 {strides = array<i32>} : memref<1x6x6x64xf32, #tpu.memory_space<vmem>>, vector<1x6x1x64xf32>,
    %c0_163 = arith.constant 0 : index
    %c1_164 = arith.constant 1 : index
    %c1_165 = arith.constant 1 : index
    %c0_166 = arith.constant 0 : index
    %96 = vector.load %arg17[%c0_163, %c1_164, %c1_165, %c0_166] : memref<1x6x6x64xf32, #tpu.memory_space<vmem>>, vector<1x4x4x64xf32>
    tpu.vector_store %arg17[%c0_163, %c1_164, %c1_165, %c0_166], %89 {strides = array<i32>} : memref<1x6x6x64xf32, #tpu.memory_space<vmem>>, vector<1x4x4x64xf32>,
    %c0_167 = arith.constant 0 : index
    %c0_168 = arith.constant 0 : index
    %c0_169 = arith.constant 0 : index
    %c0_170 = arith.constant 0 : index
    %97 = vector.load %arg17[%c0_167, %c0_168, %c0_169, %c0_170] : memref<1x6x6x64xf32, #tpu.memory_space<vmem>>, vector<1x4x4x64xf32>
    %98 = vector.shape_cast %97 : vector<1x4x4x64xf32> to vector<16x64xf32>
    %c0_171 = arith.constant 0 : index
    %c0_172 = arith.constant 0 : index
    %99 = vector.load %arg18[%c0_171, %c0_172] : memref<16x576xf32, #tpu.memory_space<vmem>>, vector<16x64xf32>
    tpu.vector_store %arg18[%c0_171, %c0_172], %98 {strides = array<i32>} : memref<16x576xf32, #tpu.memory_space<vmem>>, vector<16x64xf32>,
    %c0_173 = arith.constant 0 : index
    %c0_174 = arith.constant 0 : index
    %c1_175 = arith.constant 1 : index
    %c0_176 = arith.constant 0 : index
    %100 = vector.load %arg17[%c0_173, %c0_174, %c1_175, %c0_176] : memref<1x6x6x64xf32, #tpu.memory_space<vmem>>, vector<1x4x4x64xf32>
    %101 = vector.shape_cast %100 : vector<1x4x4x64xf32> to vector<16x64xf32>
    %c0_177 = arith.constant 0 : index
    %c64_178 = arith.constant 64 : index
    %102 = vector.load %arg18[%c0_177, %c64_178] : memref<16x576xf32, #tpu.memory_space<vmem>>, vector<16x64xf32>
    tpu.vector_store %arg18[%c0_177, %c64_178], %101 {strides = array<i32>} : memref<16x576xf32, #tpu.memory_space<vmem>>, vector<16x64xf32>,
    %c0_179 = arith.constant 0 : index
    %c0_180 = arith.constant 0 : index
    %c2_181 = arith.constant 2 : index
    %c0_182 = arith.constant 0 : index
    %103 = vector.load %arg17[%c0_179, %c0_180, %c2_181, %c0_182] : memref<1x6x6x64xf32, #tpu.memory_space<vmem>>, vector<1x4x4x64xf32>
    %104 = vector.shape_cast %103 : vector<1x4x4x64xf32> to vector<16x64xf32>
    %c0_183 = arith.constant 0 : index
    %c128_184 = arith.constant 128 : index
    %105 = vector.load %arg18[%c0_183, %c128_184] : memref<16x576xf32, #tpu.memory_space<vmem>>, vector<16x64xf32>
    tpu.vector_store %arg18[%c0_183, %c128_184], %104 {strides = array<i32>} : memref<16x576xf32, #tpu.memory_space<vmem>>, vector<16x64xf32>,
    %c0_185 = arith.constant 0 : index
    %c1_186 = arith.constant 1 : index
    %c0_187 = arith.constant 0 : index
    %c0_188 = arith.constant 0 : index
    %106 = vector.load %arg17[%c0_185, %c1_186, %c0_187, %c0_188] : memref<1x6x6x64xf32, #tpu.memory_space<vmem>>, vector<1x4x4x64xf32>
    %107 = vector.shape_cast %106 : vector<1x4x4x64xf32> to vector<16x64xf32>
    %c0_189 = arith.constant 0 : index
    %c192_190 = arith.constant 192 : index
    %108 = vector.load %arg18[%c0_189, %c192_190] : memref<16x576xf32, #tpu.memory_space<vmem>>, vector<16x64xf32>
    tpu.vector_store %arg18[%c0_189, %c192_190], %107 {strides = array<i32>} : memref<16x576xf32, #tpu.memory_space<vmem>>, vector<16x64xf32>,
    %c0_191 = arith.constant 0 : index
    %c1_192 = arith.constant 1 : index
    %c1_193 = arith.constant 1 : index
    %c0_194 = arith.constant 0 : index
    %109 = vector.load %arg17[%c0_191, %c1_192, %c1_193, %c0_194] : memref<1x6x6x64xf32, #tpu.memory_space<vmem>>, vector<1x4x4x64xf32>
    %110 = vector.shape_cast %109 : vector<1x4x4x64xf32> to vector<16x64xf32>
    %c0_195 = arith.constant 0 : index
    %c256_196 = arith.constant 256 : index
    %111 = vector.load %arg18[%c0_195, %c256_196] : memref<16x576xf32, #tpu.memory_space<vmem>>, vector<16x64xf32>
    tpu.vector_store %arg18[%c0_195, %c256_196], %110 {strides = array<i32>} : memref<16x576xf32, #tpu.memory_space<vmem>>, vector<16x64xf32>,
    %c0_197 = arith.constant 0 : index
    %c1_198 = arith.constant 1 : index
    %c2_199 = arith.constant 2 : index
    %c0_200 = arith.constant 0 : index
    %112 = vector.load %arg17[%c0_197, %c1_198, %c2_199, %c0_200] : memref<1x6x6x64xf32, #tpu.memory_space<vmem>>, vector<1x4x4x64xf32>
    %113 = vector.shape_cast %112 : vector<1x4x4x64xf32> to vector<16x64xf32>
    %c0_201 = arith.constant 0 : index
    %c320_202 = arith.constant 320 : index
    %114 = vector.load %arg18[%c0_201, %c320_202] : memref<16x576xf32, #tpu.memory_space<vmem>>, vector<16x64xf32>
    tpu.vector_store %arg18[%c0_201, %c320_202], %113 {strides = array<i32>} : memref<16x576xf32, #tpu.memory_space<vmem>>, vector<16x64xf32>,
    %c0_203 = arith.constant 0 : index
    %c2_204 = arith.constant 2 : index
    %c0_205 = arith.constant 0 : index
    %c0_206 = arith.constant 0 : index
    %115 = vector.load %arg17[%c0_203, %c2_204, %c0_205, %c0_206] : memref<1x6x6x64xf32, #tpu.memory_space<vmem>>, vector<1x4x4x64xf32>
    %116 = vector.shape_cast %115 : vector<1x4x4x64xf32> to vector<16x64xf32>
    %c0_207 = arith.constant 0 : index
    %c384_208 = arith.constant 384 : index
    %117 = vector.load %arg18[%c0_207, %c384_208] : memref<16x576xf32, #tpu.memory_space<vmem>>, vector<16x64xf32>
    tpu.vector_store %arg18[%c0_207, %c384_208], %116 {strides = array<i32>} : memref<16x576xf32, #tpu.memory_space<vmem>>, vector<16x64xf32>,
    %c0_209 = arith.constant 0 : index
    %c2_210 = arith.constant 2 : index
    %c1_211 = arith.constant 1 : index
    %c0_212 = arith.constant 0 : index
    %118 = vector.load %arg17[%c0_209, %c2_210, %c1_211, %c0_212] : memref<1x6x6x64xf32, #tpu.memory_space<vmem>>, vector<1x4x4x64xf32>
    %119 = vector.shape_cast %118 : vector<1x4x4x64xf32> to vector<16x64xf32>
    %c0_213 = arith.constant 0 : index
    %c448_214 = arith.constant 448 : index
    %120 = vector.load %arg18[%c0_213, %c448_214] : memref<16x576xf32, #tpu.memory_space<vmem>>, vector<16x64xf32>
    tpu.vector_store %arg18[%c0_213, %c448_214], %119 {strides = array<i32>} : memref<16x576xf32, #tpu.memory_space<vmem>>, vector<16x64xf32>,
    %c0_215 = arith.constant 0 : index
    %c2_216 = arith.constant 2 : index
    %c2_217 = arith.constant 2 : index
    %c0_218 = arith.constant 0 : index
    %121 = vector.load %arg17[%c0_215, %c2_216, %c2_217, %c0_218] : memref<1x6x6x64xf32, #tpu.memory_space<vmem>>, vector<1x4x4x64xf32>
    %122 = vector.shape_cast %121 : vector<1x4x4x64xf32> to vector<16x64xf32>
    %c0_219 = arith.constant 0 : index
    %c512_220 = arith.constant 512 : index
    %123 = vector.load %arg18[%c0_219, %c512_220] : memref<16x576xf32, #tpu.memory_space<vmem>>, vector<16x64xf32>
    tpu.vector_store %arg18[%c0_219, %c512_220], %122 {strides = array<i32>} : memref<16x576xf32, #tpu.memory_space<vmem>>, vector<16x64xf32>,
    %c0_221 = arith.constant 0 : index
    %c0_222 = arith.constant 0 : index
    %124 = vector.load %arg18[%c0_221, %c0_222] : memref<16x576xf32, #tpu.memory_space<vmem>>, vector<16x576xf32>
    %c0_223 = arith.constant 0 : index
    %c0_224 = arith.constant 0 : index
    %125 = vector.load %arg6[%c0_223, %c0_224] : memref<576x64xf32, #tpu.memory_space<vmem>>, vector<576x64xf32>
    %cst_225 = arith.constant dense<0.000000e+00> : vector<16x64xf32>
    %126 = tpu.matmul %124, %125, %cst_225 {dimension_numbers = #tpu.dot_dimension_numbers<[1], [0], [0], [1], [0, 0, 1, 1], [], []>} : vector<16x576xf32>, vector<576x64xf32>, vector<16x64xf32> -> vector<16x64xf32>
    %127 = vector.shape_cast %126 : vector<16x64xf32> to vector<2x2x4x64xf32>
    %cst_226 = arith.constant dense<0xFF800000> : vector<2x4x64xf32>
    %128 = vector.multi_reduction <maximumf>, %127, %cst_226 [1] : vector<2x2x4x64xf32> to vector<2x4x64xf32>
    %129 = vector.shape_cast %128 : vector<2x4x64xf32> to vector<2x2x2x64xf32>
    %cst_227 = arith.constant dense<0xFF800000> : vector<2x2x64xf32>
    %130 = vector.multi_reduction <maximumf>, %129, %cst_227 [2] : vector<2x2x2x64xf32> to vector<2x2x64xf32>
    %c0_228 = arith.constant 0 : index
    %c0_229 = arith.constant 0 : index
    %131 = vector.load %arg7[%c0_228, %c0_229] : memref<1x64xf32, #tpu.memory_space<vmem>>, vector<1x64xf32>
    %132 = vector.shape_cast %131 : vector<1x64xf32> to vector<1x1x64xf32>
    %133 = vector.broadcast %132 : vector<1x1x64xf32> to vector<2x2x64xf32>
    %134 = arith.addf %130, %133 : vector<2x2x64xf32>
    %cst_230 = arith.constant 0.000000e+00 : f32
    %135 = vector.broadcast %cst_230 : f32 to vector<2x2x64xf32>
    %136 = arith.maximumf %134, %135 : vector<2x2x64xf32>
    %137 = vector.shape_cast %136 : vector<2x2x64xf32> to vector<1x2x2x64xf32>
    %cst_231 = arith.constant 0.000000e+00 : f32
    %138 = vector.broadcast %cst_231 : f32 to vector<1x1x4x64xf32>
    %cst_232 = arith.constant 0.000000e+00 : f32
    %139 = vector.broadcast %cst_232 : f32 to vector<1x4x1x64xf32>
    %c0_233 = arith.constant 0 : index
    %c0_234 = arith.constant 0 : index
    %c0_235 = arith.constant 0 : index
    %c0_236 = arith.constant 0 : index
    %140 = vector.load %arg19[%c0_233, %c0_234, %c0_235, %c0_236] : memref<1x4x4x64xf32, #tpu.memory_space<vmem>>, vector<1x1x4x64xf32>
    tpu.vector_store %arg19[%c0_233, %c0_234, %c0_235, %c0_236], %138 {strides = array<i32>} : memref<1x4x4x64xf32, #tpu.memory_space<vmem>>, vector<1x1x4x64xf32>,
    %c0_237 = arith.constant 0 : index
    %c3 = arith.constant 3 : index
    %c0_238 = arith.constant 0 : index
    %c0_239 = arith.constant 0 : index
    %141 = vector.load %arg19[%c0_237, %c3, %c0_238, %c0_239] : memref<1x4x4x64xf32, #tpu.memory_space<vmem>>, vector<1x1x4x64xf32>
    tpu.vector_store %arg19[%c0_237, %c3, %c0_238, %c0_239], %138 {strides = array<i32>} : memref<1x4x4x64xf32, #tpu.memory_space<vmem>>, vector<1x1x4x64xf32>,
    %c0_240 = arith.constant 0 : index
    %c0_241 = arith.constant 0 : index
    %c0_242 = arith.constant 0 : index
    %c0_243 = arith.constant 0 : index
    %142 = vector.load %arg19[%c0_240, %c0_241, %c0_242, %c0_243] : memref<1x4x4x64xf32, #tpu.memory_space<vmem>>, vector<1x4x1x64xf32>
    tpu.vector_store %arg19[%c0_240, %c0_241, %c0_242, %c0_243], %139 {strides = array<i32>} : memref<1x4x4x64xf32, #tpu.memory_space<vmem>>, vector<1x4x1x64xf32>,
    %c0_244 = arith.constant 0 : index
    %c0_245 = arith.constant 0 : index
    %c3_246 = arith.constant 3 : index
    %c0_247 = arith.constant 0 : index
    %143 = vector.load %arg19[%c0_244, %c0_245, %c3_246, %c0_247] : memref<1x4x4x64xf32, #tpu.memory_space<vmem>>, vector<1x4x1x64xf32>
    tpu.vector_store %arg19[%c0_244, %c0_245, %c3_246, %c0_247], %139 {strides = array<i32>} : memref<1x4x4x64xf32, #tpu.memory_space<vmem>>, vector<1x4x1x64xf32>,
    %c0_248 = arith.constant 0 : index
    %c1_249 = arith.constant 1 : index
    %c1_250 = arith.constant 1 : index
    %c0_251 = arith.constant 0 : index
    %144 = vector.load %arg19[%c0_248, %c1_249, %c1_250, %c0_251] : memref<1x4x4x64xf32, #tpu.memory_space<vmem>>, vector<1x2x2x64xf32>
    tpu.vector_store %arg19[%c0_248, %c1_249, %c1_250, %c0_251], %137 {strides = array<i32>} : memref<1x4x4x64xf32, #tpu.memory_space<vmem>>, vector<1x2x2x64xf32>,
    %c0_252 = arith.constant 0 : index
    %c0_253 = arith.constant 0 : index
    %c0_254 = arith.constant 0 : index
    %c0_255 = arith.constant 0 : index
    %145 = vector.load %arg19[%c0_252, %c0_253, %c0_254, %c0_255] : memref<1x4x4x64xf32, #tpu.memory_space<vmem>>, vector<1x2x2x64xf32>
    %146 = vector.shape_cast %145 : vector<1x2x2x64xf32> to vector<4x64xf32>
    %c0_256 = arith.constant 0 : index
    %c0_257 = arith.constant 0 : index
    %147 = vector.load %arg20[%c0_256, %c0_257] : memref<4x576xf32, #tpu.memory_space<vmem>>, vector<4x64xf32>
    tpu.vector_store %arg20[%c0_256, %c0_257], %146 {strides = array<i32>} : memref<4x576xf32, #tpu.memory_space<vmem>>, vector<4x64xf32>,
    %c0_258 = arith.constant 0 : index
    %c0_259 = arith.constant 0 : index
    %c1_260 = arith.constant 1 : index
    %c0_261 = arith.constant 0 : index
    %148 = vector.load %arg19[%c0_258, %c0_259, %c1_260, %c0_261] : memref<1x4x4x64xf32, #tpu.memory_space<vmem>>, vector<1x2x2x64xf32>
    %149 = vector.shape_cast %148 : vector<1x2x2x64xf32> to vector<4x64xf32>
    %c0_262 = arith.constant 0 : index
    %c64_263 = arith.constant 64 : index
    %150 = vector.load %arg20[%c0_262, %c64_263] : memref<4x576xf32, #tpu.memory_space<vmem>>, vector<4x64xf32>
    tpu.vector_store %arg20[%c0_262, %c64_263], %149 {strides = array<i32>} : memref<4x576xf32, #tpu.memory_space<vmem>>, vector<4x64xf32>,
    %c0_264 = arith.constant 0 : index
    %c0_265 = arith.constant 0 : index
    %c2_266 = arith.constant 2 : index
    %c0_267 = arith.constant 0 : index
    %151 = vector.load %arg19[%c0_264, %c0_265, %c2_266, %c0_267] : memref<1x4x4x64xf32, #tpu.memory_space<vmem>>, vector<1x2x2x64xf32>
    %152 = vector.shape_cast %151 : vector<1x2x2x64xf32> to vector<4x64xf32>
    %c0_268 = arith.constant 0 : index
    %c128_269 = arith.constant 128 : index
    %153 = vector.load %arg20[%c0_268, %c128_269] : memref<4x576xf32, #tpu.memory_space<vmem>>, vector<4x64xf32>
    tpu.vector_store %arg20[%c0_268, %c128_269], %152 {strides = array<i32>} : memref<4x576xf32, #tpu.memory_space<vmem>>, vector<4x64xf32>,
    %c0_270 = arith.constant 0 : index
    %c1_271 = arith.constant 1 : index
    %c0_272 = arith.constant 0 : index
    %c0_273 = arith.constant 0 : index
    %154 = vector.load %arg19[%c0_270, %c1_271, %c0_272, %c0_273] : memref<1x4x4x64xf32, #tpu.memory_space<vmem>>, vector<1x2x2x64xf32>
    %155 = vector.shape_cast %154 : vector<1x2x2x64xf32> to vector<4x64xf32>
    %c0_274 = arith.constant 0 : index
    %c192_275 = arith.constant 192 : index
    %156 = vector.load %arg20[%c0_274, %c192_275] : memref<4x576xf32, #tpu.memory_space<vmem>>, vector<4x64xf32>
    tpu.vector_store %arg20[%c0_274, %c192_275], %155 {strides = array<i32>} : memref<4x576xf32, #tpu.memory_space<vmem>>, vector<4x64xf32>,
    %c0_276 = arith.constant 0 : index
    %c1_277 = arith.constant 1 : index
    %c1_278 = arith.constant 1 : index
    %c0_279 = arith.constant 0 : index
    %157 = vector.load %arg19[%c0_276, %c1_277, %c1_278, %c0_279] : memref<1x4x4x64xf32, #tpu.memory_space<vmem>>, vector<1x2x2x64xf32>
    %158 = vector.shape_cast %157 : vector<1x2x2x64xf32> to vector<4x64xf32>
    %c0_280 = arith.constant 0 : index
    %c256_281 = arith.constant 256 : index
    %159 = vector.load %arg20[%c0_280, %c256_281] : memref<4x576xf32, #tpu.memory_space<vmem>>, vector<4x64xf32>
    tpu.vector_store %arg20[%c0_280, %c256_281], %158 {strides = array<i32>} : memref<4x576xf32, #tpu.memory_space<vmem>>, vector<4x64xf32>,
    %c0_282 = arith.constant 0 : index
    %c1_283 = arith.constant 1 : index
    %c2_284 = arith.constant 2 : index
    %c0_285 = arith.constant 0 : index
    %160 = vector.load %arg19[%c0_282, %c1_283, %c2_284, %c0_285] : memref<1x4x4x64xf32, #tpu.memory_space<vmem>>, vector<1x2x2x64xf32>
    %161 = vector.shape_cast %160 : vector<1x2x2x64xf32> to vector<4x64xf32>
    %c0_286 = arith.constant 0 : index
    %c320_287 = arith.constant 320 : index
    %162 = vector.load %arg20[%c0_286, %c320_287] : memref<4x576xf32, #tpu.memory_space<vmem>>, vector<4x64xf32>
    tpu.vector_store %arg20[%c0_286, %c320_287], %161 {strides = array<i32>} : memref<4x576xf32, #tpu.memory_space<vmem>>, vector<4x64xf32>,
    %c0_288 = arith.constant 0 : index
    %c2_289 = arith.constant 2 : index
    %c0_290 = arith.constant 0 : index
    %c0_291 = arith.constant 0 : index
    %163 = vector.load %arg19[%c0_288, %c2_289, %c0_290, %c0_291] : memref<1x4x4x64xf32, #tpu.memory_space<vmem>>, vector<1x2x2x64xf32>
    %164 = vector.shape_cast %163 : vector<1x2x2x64xf32> to vector<4x64xf32>
    %c0_292 = arith.constant 0 : index
    %c384_293 = arith.constant 384 : index
    %165 = vector.load %arg20[%c0_292, %c384_293] : memref<4x576xf32, #tpu.memory_space<vmem>>, vector<4x64xf32>
    tpu.vector_store %arg20[%c0_292, %c384_293], %164 {strides = array<i32>} : memref<4x576xf32, #tpu.memory_space<vmem>>, vector<4x64xf32>,
    %c0_294 = arith.constant 0 : index
    %c2_295 = arith.constant 2 : index
    %c1_296 = arith.constant 1 : index
    %c0_297 = arith.constant 0 : index
    %166 = vector.load %arg19[%c0_294, %c2_295, %c1_296, %c0_297] : memref<1x4x4x64xf32, #tpu.memory_space<vmem>>, vector<1x2x2x64xf32>
    %167 = vector.shape_cast %166 : vector<1x2x2x64xf32> to vector<4x64xf32>
    %c0_298 = arith.constant 0 : index
    %c448_299 = arith.constant 448 : index
    %168 = vector.load %arg20[%c0_298, %c448_299] : memref<4x576xf32, #tpu.memory_space<vmem>>, vector<4x64xf32>
    tpu.vector_store %arg20[%c0_298, %c448_299], %167 {strides = array<i32>} : memref<4x576xf32, #tpu.memory_space<vmem>>, vector<4x64xf32>,
    %c0_300 = arith.constant 0 : index
    %c2_301 = arith.constant 2 : index
    %c2_302 = arith.constant 2 : index
    %c0_303 = arith.constant 0 : index
    %169 = vector.load %arg19[%c0_300, %c2_301, %c2_302, %c0_303] : memref<1x4x4x64xf32, #tpu.memory_space<vmem>>, vector<1x2x2x64xf32>
    %170 = vector.shape_cast %169 : vector<1x2x2x64xf32> to vector<4x64xf32>
    %c0_304 = arith.constant 0 : index
    %c512_305 = arith.constant 512 : index
    %171 = vector.load %arg20[%c0_304, %c512_305] : memref<4x576xf32, #tpu.memory_space<vmem>>, vector<4x64xf32>
    tpu.vector_store %arg20[%c0_304, %c512_305], %170 {strides = array<i32>} : memref<4x576xf32, #tpu.memory_space<vmem>>, vector<4x64xf32>,
    %c0_306 = arith.constant 0 : index
    %c0_307 = arith.constant 0 : index
    %172 = vector.load %arg20[%c0_306, %c0_307] : memref<4x576xf32, #tpu.memory_space<vmem>>, vector<4x576xf32>
    %c0_308 = arith.constant 0 : index
    %c0_309 = arith.constant 0 : index
    %173 = vector.load %arg8[%c0_308, %c0_309] : memref<576x64xf32, #tpu.memory_space<vmem>>, vector<576x64xf32>
    %cst_310 = arith.constant dense<0.000000e+00> : vector<4x64xf32>
    %174 = tpu.matmul %172, %173, %cst_310 {dimension_numbers = #tpu.dot_dimension_numbers<[1], [0], [0], [1], [0, 0, 1, 1], [], []>} : vector<4x576xf32>, vector<576x64xf32>, vector<4x64xf32> -> vector<4x64xf32>
    %175 = vector.shape_cast %174 : vector<4x64xf32> to vector<1x2x2x64xf32>
    %cst_311 = arith.constant dense<0xFF800000> : vector<1x2x64xf32>
    %176 = vector.multi_reduction <maximumf>, %175, %cst_311 [1] : vector<1x2x2x64xf32> to vector<1x2x64xf32>
    %177 = vector.shape_cast %176 : vector<1x2x64xf32> to vector<1x1x2x64xf32>
    %cst_312 = arith.constant dense<0xFF800000> : vector<1x1x64xf32>
    %178 = vector.multi_reduction <maximumf>, %177, %cst_312 [2] : vector<1x1x2x64xf32> to vector<1x1x64xf32>
    %c0_313 = arith.constant 0 : index
    %c0_314 = arith.constant 0 : index
    %179 = vector.load %arg9[%c0_313, %c0_314] : memref<1x64xf32, #tpu.memory_space<vmem>>, vector<1x64xf32>
    %180 = vector.shape_cast %179 : vector<1x64xf32> to vector<1x1x64xf32>
    %181 = arith.addf %178, %180 : vector<1x1x64xf32>
    %cst_315 = arith.constant 0.000000e+00 : f32
    %182 = vector.broadcast %cst_315 : f32 to vector<1x1x64xf32>
    %183 = arith.maximumf %181, %182 : vector<1x1x64xf32>
    %184 = vector.shape_cast %183 : vector<1x1x64xf32> to vector<1x1x1x64xf32>
    %185 = vector.shape_cast %184 : vector<1x1x1x64xf32> to vector<1x64xf32>
    %c0_316 = arith.constant 0 : index
    %c0_317 = arith.constant 0 : index
    %186 = vector.load %arg10[%c0_316, %c0_317] : memref<64x128xf32, #tpu.memory_space<vmem>>, vector<64x128xf32>
    %cst_318 = arith.constant dense<0.000000e+00> : vector<1x128xf32>
    %187 = tpu.matmul %185, %186, %cst_318 {dimension_numbers = #tpu.dot_dimension_numbers<[1], [0], [0], [1], [0, 0, 1, 1], [], []>} : vector<1x64xf32>, vector<64x128xf32>, vector<1x128xf32> -> vector<1x128xf32>
    %c0_319 = arith.constant 0 : index
    %c0_320 = arith.constant 0 : index
    %188 = vector.load %arg11[%c0_319, %c0_320] : memref<1x128xf32, #tpu.memory_space<vmem>>, vector<1x128xf32>
    %189 = arith.addf %187, %188 : vector<1x128xf32>
    %190 = vector.shape_cast %189 : vector<1x128xf32> to vector<1x1x128xf32>
    %c0_321 = arith.constant 0 : index
    %c0_322 = arith.constant 0 : index
    %c0_323 = arith.constant 0 : index
    %191 = vector.load %arg12[%c0_321, %c0_322, %c0_323] : memref<1x1x128xf32, #tpu.memory_space<vmem>>, vector<1x1x128xf32>
    tpu.vector_store %arg12[%c0_321, %c0_322, %c0_323], %190 {strides = array<i32>} : memref<1x1x128xf32, #tpu.memory_space<vmem>>, vector<1x1x128xf32>,
    return
  }
  func.func @transform_0(%arg0: i32) -> (i32, i32, i32, i32) {
    %c0_i32 = arith.constant 0 : i32
    %c0_i32_0 = arith.constant 0 : i32
    %c0_i32_1 = arith.constant 0 : i32
    %c0_i32_2 = arith.constant 0 : i32
    return %arg0, %c0_i32, %c0_i32_0, %c0_i32_1 : i32, i32, i32, i32
  }
  func.func @transform_1(%arg0: i32) -> (i32, i32) {
    %c0_i32 = arith.constant 0 : i32
    %c0_i32_0 = arith.constant 0 : i32
    %c0_i32_1 = arith.constant 0 : i32
    return %c0_i32, %c0_i32_0 : i32, i32
  }
  func.func @transform_2(%arg0: i32) -> (i32, i32) {
    %c0_i32 = arith.constant 0 : i32
    %c0_i32_0 = arith.constant 0 : i32
    %c0_i32_1 = arith.constant 0 : i32
    return %c0_i32, %c0_i32_0 : i32, i32
  }
  func.func @transform_3(%arg0: i32) -> (i32, i32) {
    %c0_i32 = arith.constant 0 : i32
    %c0_i32_0 = arith.constant 0 : i32
    %c0_i32_1 = arith.constant 0 : i32
    return %c0_i32, %c0_i32_0 : i32, i32
  }
  func.func @transform_4(%arg0: i32) -> (i32, i32) {
    %c0_i32 = arith.constant 0 : i32
    %c0_i32_0 = arith.constant 0 : i32
    %c0_i32_1 = arith.constant 0 : i32
    return %c0_i32, %c0_i32_0 : i32, i32
  }
  func.func @transform_5(%arg0: i32) -> (i32, i32) {
    %c0_i32 = arith.constant 0 : i32
    %c0_i32_0 = arith.constant 0 : i32
    %c0_i32_1 = arith.constant 0 : i32
    return %c0_i32, %c0_i32_0 : i32, i32
  }
  func.func @transform_6(%arg0: i32) -> (i32, i32) {
    %c0_i32 = arith.constant 0 : i32
    %c0_i32_0 = arith.constant 0 : i32
    %c0_i32_1 = arith.constant 0 : i32
    return %c0_i32, %c0_i32_0 : i32, i32
  }
  func.func @transform_7(%arg0: i32) -> (i32, i32) {
    %c0_i32 = arith.constant 0 : i32
    %c0_i32_0 = arith.constant 0 : i32
    %c0_i32_1 = arith.constant 0 : i32
    return %c0_i32, %c0_i32_0 : i32, i32
  }
  func.func @transform_8(%arg0: i32) -> (i32, i32) {
    %c0_i32 = arith.constant 0 : i32
    %c0_i32_0 = arith.constant 0 : i32
    %c0_i32_1 = arith.constant 0 : i32
    return %c0_i32, %c0_i32_0 : i32, i32
  }
  func.func @transform_9(%arg0: i32) -> (i32, i32) {
    %c0_i32 = arith.constant 0 : i32
    %c0_i32_0 = arith.constant 0 : i32
    %c0_i32_1 = arith.constant 0 : i32
    return %c0_i32, %c0_i32_0 : i32, i32
  }
  func.func @transform_10(%arg0: i32) -> (i32, i32) {
    %c0_i32 = arith.constant 0 : i32
    %c0_i32_0 = arith.constant 0 : i32
    %c0_i32_1 = arith.constant 0 : i32
    return %c0_i32, %c0_i32_0 : i32, i32
  }
  func.func @transform_11(%arg0: i32) -> (i32, i32, i32) {
    %c0_i32 = arith.constant 0 : i32
    %c0_i32_0 = arith.constant 0 : i32
    %c0_i32_1 = arith.constant 0 : i32
    return %arg0, %c0_i32, %c0_i32_0 : i32, i32, i32
  }
}

</mosaic_0001>

<bundles_post_ra>
// kernel: tpu_custom_call.1
= control target key start
LH: loop header
LB: loop body
LE: loop exit
PB: predicated region body
PF: predicated region fallthrough
CT: control target
= control target key end

     0   :  { %s9730_s0 = inlined_call_operand.vmem [shape: f32[2,16,16,3], index: 0, kind: input, shape index: {}]   ;;  %s9731_s1 = inlined_call_operand.vmem [shape: f32[27,64], index: 1, kind: input, shape index: {}]   ;;  %s9732_s2 = inlined_call_operand.vmem [shape: f32[1,64], index: 2, kind: input, shape index: {}]   ;;  %s9733_s3 = inlined_call_operand.vmem [shape: f32[576,64], index: 3, kind: input, shape index: {}]   ;;  %s9734_s4 = inlined_call_operand.vmem [shape: f32[1,64], index: 4, kind: input, shape index: {}]   ;;  %s9735_s5 = inlined_call_operand.vmem [shape: f32[576,64], index: 5, kind: input, shape index: {}]   ;;  %s9736_s6 = inlined_call_operand.vmem [shape: f32[1,64], index: 6, kind: input, shape index: {}]   ;;  %s9737_s7 = inlined_call_operand.vmem [shape: f32[576,64], index: 7, kind: input, shape index: {}]   ;;  %s9738_s8 = inlined_call_operand.vmem [shape: f32[1,64], index: 8, kind: input, shape index: {}]   ;;  %s9739_s9 = inlined_call_operand.vmem [shape: f32[64,128], index: 9, kind: input, shape index: {}]   ;;  %s9740_s10 = inlined_call_operand.vmem [shape: f32[1,128], index: 10, kind: input, shape index: {}]   ;;  %s9741_s11 = inlined_call_operand.hbm [shape: f32[2,1,128], index: 11, kind: output, shape index: {}]  }
   0x1   :  { %9761 = sst [smem:[#allocation13_spill]] %s9730_s0 }
   0x2   :  { %9762 = sst [smem:[#allocation14_spill]] %s9731_s1 }
   0x3   :  { %16 = vsyncpa [#allocation11], 0 }
   0x4   :  { %18 = vsyncpa [#allocation11 + $0x1], 0  ;;  %s6914_s17 = smov 0   ;;  %s6916_s18 = smov 0  }
   0x5   :  { %s6918_s19 = smov 0   ;;  %s6920_s20 = smov 0  }
   0x6 LB: > { %s6935_s21 = sadd.s32 4294967295, %s6837_s20   ;;  %s5880_s22 = sadd.s32 4294967294, %s6837_s20   ;;  %s6837_s20 = sphi %s6920_s20, %s10003_s20   ;;  %s6833_s19 = sphi %s6918_s19, %s10002_s19   ;;  %s6829_s18 = sphi %s6916_s18, %s10001_s18   ;;  %s6825_s17 = sphi %s6914_s17, %s10000_s17  }
   0x7   : > { %s6939_s23 = sadd.s32 1, %s6837_s20   ;;  %s267_s24 = sadd.s32 1, %s6833_s19 }
   0x8   : > { %s264_s25 = ssub.s32 %s6837_s20, %s6939_s23  ;;  %p277_p0 = scmp.ne.s32.totalorder %s6833_s19, %s6829_s18 }
   0x9   : > { %p265_p1 = scmp.eq.s32.totalorder %s264_s25, 0  ;;  %p278_p2 = scmp.eq.s32.totalorder %s6935_s21, 1 }
   0xa   : > { %p283_p3 = scmp.ne.s32.totalorder %s6829_s18, %s6825_s17  ;;  %p284_p4 = scmp.eq.s32.totalorder %s5880_s22, 1 }
   0xb   : > { %s6950_s26 = scalar_select %p265_p1, %s6833_s19, %s267_s24  }
   0xc   : > { %p6952_p5 = por %p278_p2, %p277_p0  ;;  %p6956_p6 = por %p284_p4, %p283_p3 }
   0xd   : > { %p5883_p7 = scmp.ge.s32.totalorder %s6837_s20, 1  ;;  %p340_p8 = scmp.lt.s32.totalorder %s6837_s20, 3 }
   0xf   : > { %p341_p9 = pnand %p5883_p7, %p340_p8 }
  0x10   : > { %vm416_vm0 = vcmask (!%p341_p9), 23552   ;;  %vm419_vm1 = vcmask (!%p341_p9), 17408   ;;  %vm425_vm2 = vcmask (!%p341_p9), 16384   ;;  %v6839_v0 = vmov (!%p341_p9), 0.0   ;;  %p379_p10 = scmp.lt.s32.totalorder (!%p341_p9), %s6935_s21, 1  ;;  %s9765_s0 = sld [smem:[#allocation13_spill]] (!%p341_p9) }
  0x11   : > { %344 = sbr.rel (%p341_p9) target bundleno = 2361 (0x939), region = 64  ;;  %417 = vst.msk [vmem:[#allocation2] sm:$0xff] (!%p341_p9), %vm416_vm0, %v6839_v0  ;;  %418 = vst.msk [vmem:[#allocation2 + $0x8] sm:$0xff] (!%p341_p9), %vm416_vm0, %v6839_v0  ;;  %s9748_s15 = smov (!%p341_p9), 6   ;;  %vm2236_vm3 = vcmask (!%p341_p9), 1042432   ;;  %vm6848_vm4 = vmmov (!%p341_p9), 1  }
  0x12   : > { %422 = vst.msk [vmem:[#allocation2 + $0x198] sm:$0xff] (!%p341_p9), %vm416_vm0, %v6839_v0  ;;  %423 = vst.msk [vmem:[#allocation2 + $0x1a0] sm:$0xff] (!%p341_p9), %vm416_vm0, %v6839_v0  ;;  %s9744_s16 = smov (!%p341_p9), 3   ;;  %s6842_s22 = smov (!%p341_p9), 9   ;;  %vm1840_vm6 = vcmask (!%p341_p9), 48128   ;;  %vm1873_vm7 = vcmask (!%p341_p9), 72704  }
  0x13   : > { %420 = vst.msk [vmem:[#allocation2 + $0x10] sm:$0x3] (!%p341_p9), %vm419_vm1, %v6839_v0  ;;  %424 = vst.msk [vmem:[#allocation2 + $0x1a8] sm:$0x3] (!%p341_p9), %vm419_vm1, %v6839_v0  ;;  %s6843_s24 = smov (!%p341_p9), 12   ;;  %s9742_s25 = smov (!%p341_p9), 15  }
  0x14   : > { %427 = vst.msk [vmem:[#allocation2 + $0x18] sm:$0x1] (!%p341_p9), %vm425_vm2, %v6839_v0  ;;  %428 = vst.msk [vmem:[#allocation2 + $0x30] sm:$0x1] (!%p341_p9), %vm425_vm2, %v6839_v0  ;;  %s9766_s1 = sld [smem:[#allocation14_spill]] (!%p341_p9)  ;;  %s9770_s12 = smov (!%p341_p9), 18  }
  0x15   : > { %429 = vst.msk [vmem:[#allocation2 + $0x48] sm:$0x1] (!%p341_p9), %vm425_vm2, %v6839_v0  ;;  %430 = vst.msk [vmem:[#allocation2 + $0x60] sm:$0x1] (!%p341_p9), %vm425_vm2, %v6839_v0  ;;  %vm1906_vm8 = vcmask (!%p341_p9), 97280   ;;  %vm1939_vm9 = vcmask (!%p341_p9), 121856  }
  0x16   : > { %431 = vst.msk [vmem:[#allocation2 + $0x78] sm:$0x1] (!%p341_p9), %vm425_vm2, %v6839_v0  ;;  %432 = vst.msk [vmem:[#allocation2 + $0x90] sm:$0x1] (!%p341_p9), %vm425_vm2, %v6839_v0  ;;  %vm1972_vm10 = vcmask (!%p341_p9), 146432   ;;  %vm2005_vm11 = vcmask (!%p341_p9), 171008  }
  0x17   : > { %433 = vst.msk [vmem:[#allocation2 + $0xa8] sm:$0x1] (!%p341_p9), %vm425_vm2, %v6839_v0  ;;  %434 = vst.msk [vmem:[#allocation2 + $0xc0] sm:$0x1] (!%p341_p9), %vm425_vm2, %v6839_v0  ;;  %vm2038_vm12 = vcmask (!%p341_p9), 195584   ;;  %vm2071_vm13 = vcmask (!%p341_p9), 220160  }
  0x18   : > { %435 = vst.msk [vmem:[#allocation2 + $0xd8] sm:$0x1] %vm425_vm2, %v6839_v0  ;;  %436 = vst.msk [vmem:[#allocation2 + $0xf0] sm:$0x1] %vm425_vm2, %v6839_v0  ;;  %s380_s29 = scalar_select %p379_p10, %s6935_s21, 1  ;;  %v559_v4 = vld [vmem:[#allocation2 + $0x2] sm:$0xff] }
  0x19   : > { %437 = vst.msk [vmem:[#allocation2 + $0x108] sm:$0x1] %vm425_vm2, %v6839_v0  ;;  %438 = vst.msk [vmem:[#allocation2 + $0x120] sm:$0x1] %vm425_vm2, %v6839_v0  ;;  %v527_v5 = vld [vmem:[#allocation2 + $0x1] sm:$0xff]  ;;  %944 = vrot.lane.b32.xlu1 %v559_v4, %s9748_s15  ;;  %vm9753_vm14 = vcmask 523264  }
  0x1a   : > { %439 = vst.msk [vmem:[#allocation2 + $0x138] sm:$0x1] %vm425_vm2, %v6839_v0  ;;  %440 = vst.msk [vmem:[#allocation2 + $0x150] sm:$0x1] %vm425_vm2, %v6839_v0  ;;  %s5937_s30 = sshll.u32 %s380_s29, 8  ;;  %v528_v6 = vld [vmem:[#allocation2 + $0x9] sm:$0xff]  ;;  %816 = vrot.lane.b32.xlu0 %v527_v5, %s9744_s16 }
  0x1b   : > { %441 = vst.msk [vmem:[#allocation2 + $0x168] sm:$0x1] %vm425_vm2, %v6839_v0  ;;  %442 = vst.msk [vmem:[#allocation2 + $0x180] sm:$0x1] %vm425_vm2, %v6839_v0  ;;  %s7049_s14 = scalar_lea.vmem %s9765_s0, %s5937_s30  ;;  %s9746_s29 = smov 18   ;;  %v2136_v26 = vld [vmem:[%s9766_s1] sm:$0xff] }
  0x1c   : > { %445 = vst.msk [vmem:[#allocation2 + $0x29] sm:$0x1] %vm425_vm2, %v6839_v0  ;;  %446 = vst.msk [vmem:[#allocation2 + $0x41] sm:$0x1] %vm425_vm2, %v6839_v0  ;;  %v384_v1 = vld [vmem:[%s7049_s14] sm:$0xff]  ;;  %v385_v2 = vld [vmem:[%s7049_s14 + $0x8] sm:$0xff] }
  0x1d   : > { %447 = vst.msk [vmem:[#allocation2 + $0x59] sm:$0x1] %vm425_vm2, %v6839_v0  ;;  %448 = vst.msk [vmem:[#allocation2 + $0x71] sm:$0x1] %vm425_vm2, %v6839_v0  ;;  %v386_v3 = vld [vmem:[%s7049_s14 + $0x10] sm:$0xff]  ;;  %v387_v8 = vld [vmem:[%s7049_s14 + $0x18] sm:$0xff] }
  0x1e   : > { %449 = vst.msk [vmem:[#allocation2 + $0x89] sm:$0x1] %vm425_vm2, %v6839_v0  ;;  %450 = vst.msk [vmem:[#allocation2 + $0xa1] sm:$0x1] %vm425_vm2, %v6839_v0  ;;  %v388_v9 = vld [vmem:[%s7049_s14 + $0x20] sm:$0xff]  ;;  %v389_v10 = vld [vmem:[%s7049_s14 + $0x28] sm:$0xff]  ;;  %818 = vrot.lane.b32.xlu0 %v528_v6, %s9744_s16 }
  0x1f   : > { %451 = vst.msk [vmem:[#allocation2 + $0xb9] sm:$0x1] %vm425_vm2, %v6839_v0  ;;  %452 = vst.msk [vmem:[#allocation2 + $0xd1] sm:$0x1] %vm425_vm2, %v6839_v0  ;;  %v390_v11 = vld [vmem:[%s7049_s14 + $0x30] sm:$0xff]  ;;  %v391_v12 = vld [vmem:[%s7049_s14 + $0x38] sm:$0xff] }
  0x20   : > { %453 = vst.msk [vmem:[#allocation2 + $0xe9] sm:$0x1] %vm425_vm2, %v6839_v0  ;;  %454 = vst.msk [vmem:[#allocation2 + $0x101] sm:$0x1] %vm425_vm2, %v6839_v0  ;;  %v392_v13 = vld [vmem:[%s7049_s14 + $0x40] sm:$0xff]  ;;  %v393_v14 = vld [vmem:[%s7049_s14 + $0x48] sm:$0xff] }
  0x21   : > { %455 = vst.msk [vmem:[#allocation2 + $0x119] sm:$0x1] %vm425_vm2, %v6839_v0  ;;  %456 = vst.msk [vmem:[#allocation2 + $0x131] sm:$0x1] %vm425_vm2, %v6839_v0  ;;  %v394_v20 = vld [vmem:[%s7049_s14 + $0x50] sm:$0xff]  ;;  %v395_v23 = vld [vmem:[%s7049_s14 + $0x58] sm:$0xff] }
  0x22   : > { %457 = vst.msk [vmem:[#allocation2 + $0x149] sm:$0x1] %vm425_vm2, %v6839_v0  ;;  %458 = vst.msk [vmem:[#allocation2 + $0x161] sm:$0x1] %vm425_vm2, %v6839_v0  ;;  %s6846_s30 = smov 21   ;;  %v2137_v27 = vld [vmem:[%s9766_s1 + $0x8] sm:$0xff] }
  0x23   : > { %459 = vst.msk [vmem:[#allocation2 + $0x179] sm:$0x1] %vm425_vm2, %v6839_v0  ;;  %460 = vst.msk [vmem:[#allocation2 + $0x191] sm:$0x1] %vm425_vm2, %v6839_v0  ;;  %v6417_v28 = vpack.c.bf16 %v2137_v27, %v2136_v26  ;;  %v2138_v31 = vld [vmem:[%s9766_s1 + $0x10] sm:$0xff]  ;;  %v396_v35 = vld [vmem:[%s7049_s14 + $0x60] sm:$0xff] }
  0x24   : > { %444 = vst.msk [vmem:[#allocation2 + $0x11] sm:$0x1] %vm425_vm2, %v6839_v0  ;;  %426 = vst.msk [vmem:[#allocation2] sm:$0x1] %vm425_vm2, %v6839_v0  ;;  %v2139_v32 = vld [vmem:[%s9766_s1 + $0x18] sm:$0x7] }
  0x25   : > { %443 = vst.msk [vmem:[#allocation2 + $0x198] sm:$0x1] %vm425_vm2, %v6839_v0  ;;  %461 = vst.msk [vmem:[#allocation2 + $0x1a9] sm:$0x1] %vm425_vm2, %v6839_v0  ;;  %6418 = vmatprep.subr.bf16.mxu0 %v6417_v28  ;;  %v6421_v33 = vpack.c.bf16 %v2139_v32, %v2138_v31  ;;  %v397_v37 = vld [vmem:[%s7049_s14 + $0x68] sm:$0xff]  ;;  %v398_v43 = vld [vmem:[%s7049_s14 + $0x70] sm:$0xff] }
  0x26   : > { %463 = vst.msk [vmem:[#allocation2 + $0x19] sm:$0xff] %vm416_vm0, %v384_v1  ;;  %464 = vst.msk [vmem:[#allocation2 + $0x21] sm:$0xff] %vm416_vm0, %v385_v2  ;;  %6420 = vmatpush3.bf16.msra.mxu0 %v6417_v28  ;;  %v399_v45 = vld [vmem:[%s7049_s14 + $0x78] sm:$0xff]  ;;  %v400_v51 = vld [vmem:[%s7049_s14 + $0x80] sm:$0xff]  ;;  %vm9752_vm15 = vcmask 517120   ;;  %vm9750_vm1 = vcmask 516096  }
  0x27   : > { %465 = vst.msk [vmem:[#allocation2 + $0x31] sm:$0xff] %vm416_vm0, %v386_v3  ;;  %466 = vst.msk [vmem:[#allocation2 + $0x39] sm:$0xff] %vm416_vm0, %v387_v8  ;;  %v401_v57 = vld [vmem:[%s7049_s14 + $0x88] sm:$0xff]  ;;  %vm9751_vm2 = vcmask 1041409  }
  0x28   : > { %467 = vst.msk [vmem:[#allocation2 + $0x49] sm:$0xff] %vm416_vm0, %v388_v9  ;;  %468 = vst.msk [vmem:[#allocation2 + $0x51] sm:$0xff] %vm416_vm0, %v389_v10  ;;  %v496_v26 = vld [vmem:[#allocation2 + $0x8] sm:$0xff] }
  0x29   : > { %469 = vst.msk [vmem:[#allocation2 + $0x61] sm:$0xff] %vm416_vm0, %v390_v11  ;;  %470 = vst.msk [vmem:[#allocation2 + $0x69] sm:$0xff] %vm416_vm0, %v391_v12 }
  0x2a   : > { %471 = vst.msk [vmem:[#allocation2 + $0x79] sm:$0xff] %vm416_vm0, %v392_v13  ;;  %472 = vst.msk [vmem:[#allocation2 + $0x81] sm:$0xff] %vm416_vm0, %v393_v14  ;;  %v402_v13 = vld [vmem:[%s7049_s14 + $0x90] sm:$0xff] }
  0x2b   : > { %v560_v7 = vld [vmem:[#allocation2 + $0xa] sm:$0xff]  ;;  %473 = vst.msk [vmem:[#allocation2 + $0x91] sm:$0xff] %vm416_vm0, %v394_v20  ;;  %474 = vst.msk [vmem:[#allocation2 + $0x99] sm:$0xff] %vm416_vm0, %v395_v23  ;;  %v495_v12 = vld [vmem:[#allocation2] sm:$0xff] }
  0x2c   : > { %946 = vrot.lane.b32.xlu1 %v560_v7, %s9748_s15  ;;  %vm6422_vm5 = vmpackc.low %vm2236_vm3, %vm6848_vm4  ;;  %475 = vst.msk [vmem:[#allocation2 + $0xa9] sm:$0xff] %vm416_vm0, %v396_v35  ;;  %vm3544_vm3 = vcmask 1042434   ;;  %vm9760_vm4 = vcmask 1043459  }
  0x2d   : > { %v7075_v15 = vld [vmem:[#allocation2 + $0x20] sm:$0xff]  ;;  %v7077_v16 = vld [vmem:[#allocation2 + $0x18] sm:$0xff]  ;;  %6423 = vmatprep.subr.msk.bf16.mxu0 %vm6422_vm5, %v6421_v33  ;;  %476 = vst.msk [vmem:[#allocation2 + $0xb1] sm:$0xff] %vm416_vm0, %v397_v37  ;;  %477 = vst.msk [vmem:[#allocation2 + $0xc1] sm:$0xff] %vm416_vm0, %v398_v43 }
  0x2e   : > { %1072 = vrot.lane.b32.xlu0 %v7077_v16, %s6842_s22  ;;  %v623_v17 = vld [vmem:[#allocation2 + $0x19] sm:$0xff]  ;;  %v624_v18 = vld [vmem:[#allocation2 + $0x21] sm:$0xff]  ;;  %v7091_v22 = vld [vmem:[#allocation2 + $0x30] sm:$0xff]  ;;  %6426 = vmatpush3.bf16.msk.msra.mxu0 %vm6422_vm5, %v6421_v33  ;;  %478 = vst.msk [vmem:[#allocation2 + $0xc9] sm:$0xff] %vm416_vm0, %v399_v45  ;;  %vm9757_vm5 = vcmask 1044484  }
  0x2f   : > { %v655_v19 = vld [vmem:[#allocation2 + $0x1a] sm:$0xff]  ;;  %v656_v21 = vld [vmem:[#allocation2 + $0x22] sm:$0xff]  ;;  %v720_v25 = vld [vmem:[#allocation2 + $0x31] sm:$0xff]  ;;  %479 = vst.msk [vmem:[#allocation2 + $0xd9] sm:$0xff] %vm416_vm0, %v400_v51 }
  0x30   : > { %1074 = vrot.lane.b32.xlu1 %v7075_v15, %s6842_s22  ;;  %v7101_v24 = vld [vmem:[#allocation2 + $0x38] sm:$0xff]  ;;  %v7131_v36 = vld [vmem:[#allocation2 + $0x48] sm:$0xff]  ;;  %v7141_v38 = vld [vmem:[#allocation2 + $0x50] sm:$0xff]  ;;  %480 = vst.msk [vmem:[#allocation2 + $0xe1] sm:$0xff] %vm416_vm0, %v401_v57 }
  0x31   : > { %v721_v29 = vld [vmem:[#allocation2 + $0x39] sm:$0xff]  ;;  %v722_v39 = vld [vmem:[#allocation2 + $0x49] sm:$0xff]  ;;  %v723_v40 = vld [vmem:[#allocation2 + $0x51] sm:$0xff]  ;;  %481 = vst.msk [vmem:[#allocation2 + $0xf1] sm:$0xff] %vm416_vm0, %v402_v13 }
  0x32   : > { %1200 = vrot.lane.b32.xlu0 %v623_v17, %s6843_s24  ;;  %v752_v30 = vld [vmem:[#allocation2 + $0x32] sm:$0xff]  ;;  %v753_v34 = vld [vmem:[#allocation2 + $0x3a] sm:$0xff]  ;;  %v754_v41 = vld [vmem:[#allocation2 + $0x4a] sm:$0xff]  ;;  %3450 = vst.msk [vmem:[#allocation4] sm:$0xff] %vm9753_vm14, %v6839_v0 }
  0x33   : > { %v755_v42 = vld [vmem:[#allocation2 + $0x52] sm:$0xff]  ;;  %v7159_v44 = vld [vmem:[#allocation2 + $0x60] sm:$0xff]  ;;  %v7169_v46 = vld [vmem:[#allocation2 + $0x68] sm:$0xff]  ;;  %3453 = vst.msk [vmem:[#allocation4 + $0x90] sm:$0xff] %vm9753_vm14, %v6839_v0 }
  0x34   : > { %820 = vrot.lane.b32.xlu1 %v623_v17, %s9744_s16  ;;  %v724_v47 = vld [vmem:[#allocation2 + $0x61] sm:$0xff]  ;;  %v725_v48 = vld [vmem:[#allocation2 + $0x69] sm:$0xff]  ;;  %v7187_v54 = vld [vmem:[#allocation2 + $0x78] sm:$0xff]  ;;  %3451 = vst.msk [vmem:[#allocation4 + $0x8] sm:$0x3] %vm9752_vm15, %v6839_v0 }
  0x35   : > { %v756_v49 = vld [vmem:[#allocation2 + $0x62] sm:$0xff]  ;;  %v757_v50 = vld [vmem:[#allocation2 + $0x6a] sm:$0xff]  ;;  %v726_v61 = vld [vmem:[#allocation2 + $0x79] sm:$0xff]  ;;  %3454 = vst.msk [vmem:[#allocation4 + $0x98] sm:$0x3] %vm9752_vm15, %v6839_v0 }
  0x36   : > { %1202 = vrot.lane.b32.xlu0 %v624_v18, %s6843_s24  ;;  %v7203_v60 = vld [vmem:[#allocation2 + $0x80] sm:$0xff]  ;;  %v7235_v20 = vld [vmem:[#allocation2 + $0x90] sm:$0xff]  ;;  %v7306_v13 = vld [vmem:[#allocation2 + $0xa8] sm:$0xff]  ;;  %3457 = vst.msk [vmem:[#allocation4 + $0x10] sm:$0x1] %vm9750_vm1, %v6839_v0 }
  0x37   : > { %v727_v3 = vld [vmem:[#allocation2 + $0x81] sm:$0xff]  ;;  %3456 = vst.msk [vmem:[#allocation4] sm:$0x1] %vm9750_vm1, %v6839_v0  ;;  %3458 = vst.msk [vmem:[#allocation4 + $0x20] sm:$0x1] %vm9750_vm1, %v6839_v0 }
  0x38   : > { %1328 = vrot.lane.b32.xlu1 %v655_v19, %s9742_s25  ;;  %v758_v4 = vld [vmem:[#allocation2 + $0x7a] sm:$0xff]  ;;  %v759_v9 = vld [vmem:[#allocation2 + $0x82] sm:$0xff]  ;;  %3459 = vst.msk [vmem:[#allocation4 + $0x30] sm:$0x1] %vm9750_vm1, %v6839_v0  ;;  %3460 = vst.msk [vmem:[#allocation4 + $0x40] sm:$0x1] %vm9750_vm1, %v6839_v0 }
  0x39   : > { %3461 = vst.msk [vmem:[#allocation4 + $0x50] sm:$0x1] %vm9750_vm1, %v6839_v0  ;;  %3462 = vst.msk [vmem:[#allocation4 + $0x60] sm:$0x1] %vm9750_vm1, %v6839_v0 }
  0x3a   : > { %822 = vrot.lane.b32.xlu0 %v624_v18, %s9744_s16  ;;  %s6847_s16 = smov 24   ;;  %3463 = vst.msk [vmem:[#allocation4 + $0x70] sm:$0x1] %vm9750_vm1, %v6839_v0  ;;  %3464 = vst.msk [vmem:[#allocation4 + $0x80] sm:$0x1] %vm9750_vm1, %v6839_v0 }
  0x3b   : > { %3465 = vst.msk [vmem:[#allocation4 + $0x90] sm:$0x1] %vm9750_vm1, %v6839_v0  ;;  %3466 = vst.msk [vmem:[#allocation4 + $0x9] sm:$0x1] %vm9750_vm1, %v6839_v0 }
  0x3c   : > { %948 = vrot.lane.b32.xlu1 %v655_v19, %s9748_s15  ;;  %3467 = vst.msk [vmem:[#allocation4 + $0x19] sm:$0x1] %vm9750_vm1, %v6839_v0  ;;  %3468 = vst.msk [vmem:[#allocation4 + $0x29] sm:$0x1] %vm9750_vm1, %v6839_v0 }
  0x3d   : > { %3469 = vst.msk [vmem:[#allocation4 + $0x39] sm:$0x1] %vm9750_vm1, %v6839_v0  ;;  %3470 = vst.msk [vmem:[#allocation4 + $0x49] sm:$0x1] %vm9750_vm1, %v6839_v0 }
  0x3e   : > { %1330 = vrot.lane.b32.xlu0 %v656_v21, %s9742_s25  ;;  %s9767_s25 = smov 3   ;;  %3471 = vst.msk [vmem:[#allocation4 + $0x59] sm:$0x1] %vm9750_vm1, %v6839_v0  ;;  %3472 = vst.msk [vmem:[#allocation4 + $0x69] sm:$0x1] %vm9750_vm1, %v6839_v0 }
  0x3f   : > { %3473 = vst.msk [vmem:[#allocation4 + $0x79] sm:$0x1] %vm9750_vm1, %v6839_v0  ;;  %3474 = vst.msk [vmem:[#allocation4 + $0x89] sm:$0x1] %vm9750_vm1, %v6839_v0 }
  0x40   : > { %1456 = vrot.lane.b32.xlu1 %v7091_v22, %s9746_s29  ;;  %3475 = vst.msk [vmem:[#allocation4 + $0x99] sm:$0x1] %vm9750_vm1, %v6839_v0  ;;  %4657 = vst.msk [vmem:[#allocation6 + $0x8] sm:$0x1] %vm9750_vm1, %v6839_v0 }
  0x41   : > { %4658 = vst.msk [vmem:[#allocation6 + $0x10] sm:$0x1] %vm9750_vm1, %v6839_v0  ;;  %4659 = vst.msk [vmem:[#allocation6 + $0x18] sm:$0x1] %vm9750_vm1, %v6839_v0 }
  0x42   : > { %950 = vrot.lane.b32.xlu0 %v656_v21, %s9748_s15  ;;  %s9768_s15 = smov 15   ;;  %4660 = vst.msk [vmem:[#allocation6 + $0x20] sm:$0x1] %vm9750_vm1, %v6839_v0  ;;  %4663 = vst.msk [vmem:[#allocation6 + $0xd] sm:$0x1] %vm9750_vm1, %v6839_v0 }
  0x43   : > { %4664 = vst.msk [vmem:[#allocation6 + $0x15] sm:$0x1] %vm9750_vm1, %v6839_v0  ;;  %4665 = vst.msk [vmem:[#allocation6 + $0x1d] sm:$0x1] %vm9750_vm1, %v6839_v0 }
  0x44   : > { %1076 = vrot.lane.b32.xlu1 %v7091_v22, %s6842_s22  ;;  %4666 = vst.msk [vmem:[#allocation6 + $0x25] sm:$0x1] %vm9750_vm1, %v6839_v0  ;;  %5255 = vst.msk [vmem:[#allocation8 + $0x4] sm:$0x1] %vm9750_vm1, %v6839_v0 }
  0x45   : > { %5256 = vst.msk [vmem:[#allocation8 + $0x8] sm:$0x1] %vm9750_vm1, %v6839_v0  ;;  %5259 = vst.msk [vmem:[#allocation8 + $0x7] sm:$0x1] %vm9750_vm1, %v6839_v0 }
  0x46   : > { %1458 = vrot.lane.b32.xlu0 %v7101_v24, %s9746_s29  ;;  %s9769_s29 = smov 6   ;;  %5260 = vst.msk [vmem:[#allocation8 + $0xb] sm:$0x1] %vm9750_vm1, %v6839_v0  ;;  %vm9756_vm1 = vcmask 1045509  }
  0x48   : > { %1584 = vrot.lane.b32.xlu1 %v720_v25, %s6846_s30 }
  0x4a   : > { %1078 = vrot.lane.b32.xlu0 %v7101_v24, %s6842_s22 }
  0x4c   : > { %1204 = vrot.lane.b32.xlu1 %v720_v25, %s6843_s24 }
  0x4e   : > { %1586 = vrot.lane.b32.xlu0 %v721_v29, %s6846_s30 }
  0x50   : > { %1712 = vrot.lane.b32.xlu1 %v752_v30, %s6847_s16 }
  0x52   : > { %824 = vrot.lane.b32.xlu0 %v720_v25, %s9767_s25 }
  0x54   : > { %1206 = vrot.lane.b32.xlu1 %v721_v29, %s6843_s24 }
  0x56   : > { %1332 = vrot.lane.b32.xlu0 %v752_v30, %s9768_s15 }
  0x58   : > { %1714 = vrot.lane.b32.xlu1 %v753_v34, %s6847_s16 }
  0x5a   : > { %826 = vrot.lane.b32.xlu0 %v721_v29, %s9767_s25  ;;  %v403_v29 = vld [vmem:[%s7049_s14 + $0x98] sm:$0xff] }
  0x5b   : > { %482 = vst.msk [vmem:[#allocation2 + $0xf9] sm:$0xff] %vm416_vm0, %v403_v29  ;;  %v7334_v29 = vld [vmem:[#allocation2 + $0xb0] sm:$0xff] }
  0x5c   : > { %952 = vrot.lane.b32.xlu1 %v752_v30, %s9769_s29 }
  0x5e   : > { %1334 = vrot.lane.b32.xlu0 %v753_v34, %s9768_s15 }
  0x60   : > { %1460 = vrot.lane.b32.xlu1 %v7131_v36, %s9770_s12 }
  0x62   : > { %954 = vrot.lane.b32.xlu0 %v753_v34, %s9769_s29 }
  0x64   : > { %1080 = vrot.lane.b32.xlu1 %v7131_v36, %s6842_s22 }
  0x66   : > { %1462 = vrot.lane.b32.xlu0 %v7141_v38, %s9770_s12 }
  0x68   : > { %1588 = vrot.lane.b32.xlu1 %v722_v39, %s6846_s30 }
  0x6a   : > { %1082 = vrot.lane.b32.xlu0 %v7141_v38, %s6842_s22 }
  0x6c   : > { %1208 = vrot.lane.b32.xlu1 %v722_v39, %s6843_s24 }
  0x6e   : > { %1590 = vrot.lane.b32.xlu0 %v723_v40, %s6846_s30 }
  0x70   : > { %1716 = vrot.lane.b32.xlu1 %v754_v41, %s6847_s16 }
  0x72   : > { %828 = vrot.lane.b32.xlu0 %v722_v39, %s9767_s25  ;;  %v7260_v39 = vld [vmem:[#allocation2 + $0x98] sm:$0xff] }
  0x74   : > { %1210 = vrot.lane.b32.xlu1 %v723_v40, %s6843_s24 }
  0x76   : > { %1336 = vrot.lane.b32.xlu0 %v754_v41, %s9768_s15 }
  0x78   : > { %1718 = vrot.lane.b32.xlu1 %v755_v42, %s6847_s16 }
  0x7a   : > { %830 = vrot.lane.b32.xlu0 %v723_v40, %s9767_s25  ;;  %v728_v40 = vld [vmem:[#allocation2 + $0x91] sm:$0xff] }
  0x7c   : > { %956 = vrot.lane.b32.xlu1 %v754_v41, %s9769_s29 }
  0x7e   : > { %1338 = vrot.lane.b32.xlu0 %v755_v42, %s9768_s15 }
  0x80   : > { %1464 = vrot.lane.b32.xlu1 %v7159_v44, %s9770_s12 }
  0x82   : > { %958 = vrot.lane.b32.xlu0 %v755_v42, %s9769_s29 }
  0x84   : > { %1084 = vrot.lane.b32.xlu1 %v7159_v44, %s6842_s22 }
  0x86   : > { %1466 = vrot.lane.b32.xlu0 %v7169_v46, %s9770_s12 }
  0x88   : > { %1592 = vrot.lane.b32.xlu1 %v724_v47, %s6846_s30 }
  0x8a   : > { %1086 = vrot.lane.b32.xlu0 %v7169_v46, %s6842_s22 }
  0x8b   : > { %v945_v52 = vpop.permute.xlu1 %944 }
  0x8c   : > { %1212 = vrot.lane.b32.xlu1 %v724_v47, %s6843_s24  ;;  %v817_v53 = vpop.permute.xlu0 %816 }
  0x8d   : > { %v1808_v14 = vsel %vm416_vm0, %v495_v12, %v817_v53 }
  0x8e   : > { %1594 = vrot.lane.b32.xlu0 %v725_v48, %s6846_s30  ;;  %v1841_v19 = vsel %vm1840_vm6, %v1808_v14, %v945_v52 }
  0x90   : > { %1720 = vrot.lane.b32.xlu1 %v756_v49, %s6847_s16  ;;  %v7191_v56 = vpop.permute.xlu0 %818 }
  0x91   : > { %v1809_v31 = vsel %vm416_vm0, %v496_v26, %v7191_v56  ;;  %v760_v56 = vld [vmem:[#allocation2 + $0x92] sm:$0xff] }
  0x92   : > { %832 = vrot.lane.b32.xlu0 %v724_v47, %s9767_s25 }
  0x94   : > { %1214 = vrot.lane.b32.xlu1 %v725_v48, %s6843_s24 }
  0x96   : > { %1340 = vrot.lane.b32.xlu0 %v756_v49, %s9768_s15 }
  0x98   : > { %1722 = vrot.lane.b32.xlu1 %v757_v50, %s6847_s16 }
  0x9a   : > { %834 = vrot.lane.b32.xlu0 %v725_v48, %s9767_s25 }
  0x9c   : > { %960 = vrot.lane.b32.xlu1 %v756_v49, %s9769_s29 }
  0x9e   : > { %v7189_v55 = vpop.permute.xlu1 %946  ;;  %1342 = vrot.lane.b32.xlu0 %v757_v50, %s9768_s15 }
  0x9f   : > { %v1842_v37 = vsel %vm1840_vm6, %v1809_v31, %v7189_v55  ;;  %v729_v55 = vld [vmem:[#allocation2 + $0x99] sm:$0xff] }
  0xa0   : > { %1468 = vrot.lane.b32.xlu1 %v7187_v54, %s9770_s12  ;;  %v1073_v59 = vpop.permute.xlu0 %1072 }
  0xa1   : > { %v1874_v21 = vsel %vm1873_vm7, %v1841_v19, %v1073_v59 }
  0xa2   : > { %v7198_v58 = vpop.permute.xlu1 %1074  ;;  %962 = vrot.lane.b32.xlu0 %v757_v50, %s9769_s29 }
  0xa3   : > { %v1875_v41 = vsel %vm1873_vm7, %v1842_v37, %v7198_v58 }
  0xa4   : > { %1088 = vrot.lane.b32.xlu1 %v7187_v54, %s6842_s22  ;;  %v1201_v62 = vpop.permute.xlu0 %1200 }
  0xa5   : > { %v1907_v27 = vsel %vm1906_vm8, %v1874_v21, %v1201_v62 }
  0xa6   : > { %v7205_v63 = vpop.permute.xlu1 %820  ;;  %1470 = vrot.lane.b32.xlu0 %v7203_v60, %s9770_s12 }
  0xa8   : > { %1596 = vrot.lane.b32.xlu1 %v726_v61, %s6846_s30  ;;  %v7210_v1 = vpop.permute.xlu0 %1202 }
  0xa9   : > { %v1908_v45 = vsel %vm1906_vm8, %v1875_v41, %v7210_v1  ;;  %v761_v1 = vld [vmem:[#allocation2 + $0x9a] sm:$0xff]  ;;  %v731_v41 = vld [vmem:[#allocation2 + $0xb1] sm:$0xff] }
  0xaa   : > { %v1329_v2 = vpop.permute.xlu1 %1328  ;;  %1090 = vrot.lane.b32.xlu0 %v7203_v60, %s6842_s22 }
  0xab   : > { %v1940_v28 = vsel %vm1939_vm9, %v1907_v27, %v1329_v2 }
  0xac   : > { %1216 = vrot.lane.b32.xlu1 %v726_v61, %s6843_s24  ;;  %v7215_v5 = vpop.permute.xlu0 %822 }
  0xae   : > { %v7217_v6 = vpop.permute.xlu1 %948  ;;  %1598 = vrot.lane.b32.xlu0 %v727_v3, %s6846_s30 }
  0xb0   : > { %1724 = vrot.lane.b32.xlu1 %v758_v4, %s6847_s16  ;;  %v1331_v7 = vpop.permute.xlu0 %1330 }
  0xb1   : > { %v1941_v47 = vsel %vm1939_vm9, %v1908_v45, %v1331_v7 }
  0xb2   : > { %v1457_v8 = vpop.permute.xlu1 %1456  ;;  %836 = vrot.lane.b32.xlu0 %v726_v61, %s9767_s25 }
  0xb3   : > { %v1973_v30 = vsel %vm1972_vm10, %v1940_v28, %v1457_v8 }
  0xb4   : > { %1218 = vrot.lane.b32.xlu1 %v727_v3, %s6843_s24  ;;  %v7223_v10 = vpop.permute.xlu0 %950 }
  0xb6   : > { %v7225_v11 = vpop.permute.xlu1 %1076  ;;  %1344 = vrot.lane.b32.xlu0 %v758_v4, %s9768_s15 }
  0xb8   : > { %1726 = vrot.lane.b32.xlu1 %v759_v9, %s6847_s16  ;;  %v1459_v17 = vpop.permute.xlu0 %1458 }
  0xb9   : > { %v1974_v48 = vsel %vm1972_vm10, %v1941_v47, %v1459_v17 }
  0xba   : > { %v1585_v18 = vpop.permute.xlu1 %1584  ;;  %838 = vrot.lane.b32.xlu0 %v727_v3, %s9767_s25 }
  0xbb   : > { %v2006_v32 = vsel %vm2005_vm11, %v1973_v30, %v1585_v18  ;;  %v730_v30 = vld [vmem:[#allocation2 + $0xa9] sm:$0xff] }
  0xbc   : > { %964 = vrot.lane.b32.xlu1 %v758_v4, %s9769_s29  ;;  %v7238_v23 = vpop.permute.xlu0 %1078  ;;  %v404_v4 = vld [vmem:[%s7049_s14 + $0xa0] sm:$0xff] }
  0xbd   : > { %483 = vst.msk [vmem:[#allocation2 + $0x109] sm:$0xff] %vm416_vm0, %v404_v4 }
  0xbe   : > { %v7240_v25 = vpop.permute.xlu1 %1204  ;;  %1346 = vrot.lane.b32.xlu0 %v759_v9, %s9768_s15 }
  0xc0   : > { %1472 = vrot.lane.b32.xlu1 %v7235_v20, %s9770_s12  ;;  %v1587_v33 = vpop.permute.xlu0 %1586 }
  0xc1   : > { %v2007_v49 = vsel %vm2005_vm11, %v1974_v48, %v1587_v33 }
  0xc2   : > { %v1713_v34 = vpop.permute.xlu1 %1712  ;;  %966 = vrot.lane.b32.xlu0 %v759_v9, %s9769_s29  ;;  %v1810_v9 = vsel %vm416_vm0, %v7077_v16, %v7205_v63  ;;  %v405_v63 = vld [vmem:[%s7049_s14 + $0xa8] sm:$0xff] }
  0xc3   : > { %v2039_v35 = vsel %vm2038_vm12, %v2006_v32, %v1713_v34  ;;  %v1843_v12 = vsel %vm1840_vm6, %v1810_v9, %v7217_v6  ;;  %484 = vst.msk [vmem:[#allocation2 + $0x111] sm:$0xff] %vm416_vm0, %v405_v63  ;;  %v7408_v63 = vld [vmem:[#allocation2 + $0xc8] sm:$0xff] }
  0xc4   : > { %2072 = vst.msk [vmem:[#allocation3] sm:$0xff] %vm2071_vm13, %v2039_v35  ;;  %1092 = vrot.lane.b32.xlu1 %v7235_v20, %s6842_s22  ;;  %v7264_v42 = vpop.permute.xlu0 %824  ;;  %v1876_v14 = vsel %vm1873_vm7, %v1843_v12, %v7225_v11 }
  0xc5   : > { %v1909_v19 = vsel %vm1906_vm8, %v1876_v14, %v7240_v25  ;;  %v1811_v25 = vsel %vm416_vm0, %v7075_v15, %v7215_v5 }
  0xc6   : > { %v7266_v43 = vpop.permute.xlu1 %1206  ;;  %1474 = vrot.lane.b32.xlu0 %v7260_v39, %s9770_s12  ;;  %v1844_v28 = vsel %vm1840_vm6, %v1811_v25, %v7223_v10 }
  0xc7   : > { %v1877_v31 = vsel %vm1873_vm7, %v1844_v28, %v7238_v23 }
  0xc8   : > { %1600 = vrot.lane.b32.xlu1 %v728_v40, %s6846_s30  ;;  %v1333_v50 = vpop.permute.xlu0 %1332  ;;  %v1910_v15 = vsel %vm1906_vm8, %v1877_v31, %v7266_v43  ;;  %v762_v43 = vld [vmem:[#allocation2 + $0xaa] sm:$0xff] }
  0xc9   : > { %v1942_v16 = vsel %vm1939_vm9, %v1909_v19, %v1333_v50  ;;  %v733_v31 = vld [vmem:[#allocation2 + $0xc9] sm:$0xff] }
  0xca   : > { %v1715_v51 = vpop.permute.xlu1 %1714  ;;  %1094 = vrot.lane.b32.xlu0 %v7260_v39, %s6842_s22 }
  0xcb   : > { %v2040_v52 = vsel %vm2038_vm12, %v2007_v49, %v1715_v51  ;;  %v2104_v53 = vld [vmem:[#allocation3] sm:$0xff] }
  0xcc   : > { %2073 = vst.msk [vmem:[#allocation3 + $0x8] sm:$0xff] %vm2071_vm13, %v2040_v52  ;;  %1220 = vrot.lane.b32.xlu1 %v728_v40, %s6843_s24  ;;  %6284 = vmatprep.mubr.msk.f32.mxu0 %vm2071_vm13, %v2104_v53  ;;  %v7282_v57 = vpop.permute.xlu0 %826  ;;  %v763_v51 = vld [vmem:[#allocation2 + $0xb2] sm:$0xff] }
  0xce   : > { %v7284_v58 = vpop.permute.xlu1 %952  ;;  %1602 = vrot.lane.b32.xlu0 %v729_v55, %s6846_s30 }
  0xd0   : > { %1728 = vrot.lane.b32.xlu1 %v760_v56, %s6847_s16  ;;  %v1335_v59 = vpop.permute.xlu0 %1334 }
  0xd1   : > { %v1943_v5 = vsel %vm1939_vm9, %v1910_v15, %v1335_v59 }
  0xd2   : > { %v1461_v61 = vpop.permute.xlu1 %1460  ;;  %840 = vrot.lane.b32.xlu0 %v728_v40, %s9767_s25 }
  0xd3   : > { %v2105_v62 = vld [vmem:[#allocation3 + $0x8] sm:$0xff]  ;;  %v1975_v6 = vsel %vm1972_vm10, %v1942_v16, %v1461_v61  ;;  %v1812_v61 = vsel %vm416_vm0, %v7091_v22, %v7264_v42 }
  0xd4   : > { %1222 = vrot.lane.b32.xlu1 %v729_v55, %s6843_s24  ;;  %6285 = vmatmul.mubr.msk.f32.vlgmr.msra.gmra.mrb[0].mxu0 %vm2071_vm13, %v2105_v62  ;;  %v7291_v2 = vpop.permute.xlu0 %954  ;;  %v1845_v62 = vsel %vm1840_vm6, %v1812_v61, %v7284_v58  ;;  %v407_v42 = vld [vmem:[%s7049_s14 + $0xb8] sm:$0xff] }
  0xd5   : > { %486 = vst.msk [vmem:[#allocation2 + $0x129] sm:$0xff] %vm416_vm0, %v407_v42  ;;  %v7482_v42 = vld [vmem:[#allocation2 + $0xe0] sm:$0xff] }
  0xd6   : > { %v7293_v3 = vpop.permute.xlu1 %1080  ;;  %1348 = vrot.lane.b32.xlu0 %v760_v56, %s9768_s15 }
  0xd7   : > { %v1878_v4 = vsel %vm1873_vm7, %v1845_v62, %v7293_v3 }
  0xd8   : > { %1730 = vrot.lane.b32.xlu1 %v761_v1, %s6847_s16  ;;  %v1463_v7 = vpop.permute.xlu0 %1462 }
  0xd9   : > { %v1976_v10 = vsel %vm1972_vm10, %v1943_v5, %v1463_v7 }
  0xda   : > { %v1589_v8 = vpop.permute.xlu1 %1588  ;;  %842 = vrot.lane.b32.xlu0 %v729_v55, %s9767_s25  ;;  %v406_v55 = vld [vmem:[%s7049_s14 + $0xb0] sm:$0xff] }
  0xdb   : > { %v2008_v11 = vsel %vm2005_vm11, %v1975_v6, %v1589_v8  ;;  %485 = vst.msk [vmem:[#allocation2 + $0x121] sm:$0xff] %vm416_vm0, %v406_v55  ;;  %v732_v6 = vld [vmem:[#allocation2 + $0xc1] sm:$0xff] }
  0xdc   : > { %968 = vrot.lane.b32.xlu1 %v760_v56, %s9769_s29  ;;  %v7310_v17 = vpop.permute.xlu0 %1082 }
  0xde   : > { %v7312_v18 = vpop.permute.xlu1 %1208  ;;  %1350 = vrot.lane.b32.xlu0 %v761_v1, %s9768_s15 }
  0xdf   : > { %v1911_v9 = vsel %vm1906_vm8, %v1878_v4, %v7312_v18  ;;  %v1813_v18 = vsel %vm416_vm0, %v7101_v24, %v7282_v57 }
  0xe0   : > { %1476 = vrot.lane.b32.xlu1 %v7306_v13, %s9770_s12  ;;  %v1591_v21 = vpop.permute.xlu0 %1590  ;;  %v1846_v16 = vsel %vm1840_vm6, %v1813_v18, %v7291_v2 }
  0xe1   : > { %v2009_v34 = vsel %vm2005_vm11, %v1976_v10, %v1591_v21 }
  0xe2   : > { %v1717_v26 = vpop.permute.xlu1 %1716  ;;  %970 = vrot.lane.b32.xlu0 %v761_v1, %s9769_s29  ;;  %v7380_v1 = vld [vmem:[#allocation2 + $0xc0] sm:$0xff] }
  0xe3   : > { %v2041_v27 = vsel %vm2038_vm12, %v2008_v11, %v1717_v26  ;;  %v1879_v11 = vsel %vm1873_vm7, %v1846_v16, %v7310_v17 }
  0xe4   : > { %2074 = vst.msk [vmem:[#allocation3 + $0x10] sm:$0xff] %vm2071_vm13, %v2041_v27  ;;  %1096 = vrot.lane.b32.xlu1 %v7306_v13, %s6842_s22  ;;  %v7338_v32 = vpop.permute.xlu0 %828 }
  0xe6   : > { %v7340_v33 = vpop.permute.xlu1 %1210  ;;  %1478 = vrot.lane.b32.xlu0 %v7334_v29, %s9770_s12 }
  0xe7   : > { %v1912_v24 = vsel %vm1906_vm8, %v1879_v11, %v7340_v33  ;;  %v764_v33 = vld [vmem:[#allocation2 + $0xc2] sm:$0xff] }
  0xe8   : > { %1604 = vrot.lane.b32.xlu1 %v730_v30, %s6846_s30  ;;  %v1337_v35 = vpop.permute.xlu0 %1336  ;;  %v735_v11 = vld [vmem:[#allocation2 + $0xe1] sm:$0xff] }
  0xe9   : > { %v1944_v22 = vsel %vm1939_vm9, %v1911_v9, %v1337_v35 }
  0xea   : > { %v1719_v23 = vpop.permute.xlu1 %1718  ;;  %1098 = vrot.lane.b32.xlu0 %v7334_v29, %s6842_s22 }
  0xeb   : > { %v2042_v37 = vsel %vm2038_vm12, %v2009_v34, %v1719_v23  ;;  %v2106_v40 = vld [vmem:[#allocation3 + $0x10] sm:$0xff]  ;;  %v765_v23 = vld [vmem:[#allocation2 + $0xca] sm:$0xff] }
  0xec   : > { %2075 = vst.msk [vmem:[#allocation3 + $0x18] sm:$0xff] %vm2071_vm13, %v2042_v37  ;;  %1224 = vrot.lane.b32.xlu1 %v730_v30, %s6843_s24  ;;  %6287 = vmatprep.mubr.msk.f32.mxu0 %vm2071_vm13, %v2106_v40  ;;  %v7356_v45 = vpop.permute.xlu0 %830 }
  0xee   : > { %v7358_v47 = vpop.permute.xlu1 %956  ;;  %1606 = vrot.lane.b32.xlu0 %v731_v41, %s6846_s30 }
  0xf0   : > { %1732 = vrot.lane.b32.xlu1 %v762_v43, %s6847_s16  ;;  %v1339_v48 = vpop.permute.xlu0 %1338 }
  0xf1   : > { %v1945_v57 = vsel %vm1939_vm9, %v1912_v24, %v1339_v48 }
  0xf2   : > { %v1465_v49 = vpop.permute.xlu1 %1464  ;;  %844 = vrot.lane.b32.xlu0 %v730_v30, %s9767_s25 }
  0xf3   : > { %v2107_v50 = vld [vmem:[#allocation3 + $0x18] sm:$0xff]  ;;  %v1977_v58 = vsel %vm1972_vm10, %v1944_v22, %v1465_v49  ;;  %v1814_v49 = vsel %vm416_vm0, %v7131_v36, %v7338_v32 }
  0xf4   : > { %1226 = vrot.lane.b32.xlu1 %v731_v41, %s6843_s24  ;;  %6288 = vmatmul.mubr.msk.f32.gmra.mrb[2].mxu0 %vm2071_vm13, %v2107_v50  ;;  %v7365_v52 = vpop.permute.xlu0 %958  ;;  %v1847_v50 = vsel %vm1840_vm6, %v1814_v49, %v7358_v47  ;;  %v409_v32 = vld [vmem:[%s7049_s14 + $0xc8] sm:$0xff] }
  0xf5   : > { %488 = vst.msk [vmem:[#allocation2 + $0x141] sm:$0xff] %vm416_vm0, %v409_v32  ;;  %v705_v32 = vld [vmem:[#allocation2 + $0xf8] sm:$0xff] }
  0xf6   : > { %v7367_v53 = vpop.permute.xlu1 %1084  ;;  %1352 = vrot.lane.b32.xlu0 %v762_v43, %s9768_s15 }
  0xf7   : > { %v1880_v55 = vsel %vm1873_vm7, %v1847_v50, %v7367_v53 }
  0xf8   : > { %1734 = vrot.lane.b32.xlu1 %v763_v51, %s6847_s16  ;;  %v1467_v56 = vpop.permute.xlu0 %1466 }
  0xf9   : > { %v1978_v2 = vsel %vm1972_vm10, %v1945_v57, %v1467_v56 }
  0xfa   : > { %v1593_v59 = vpop.permute.xlu1 %1592  ;;  %846 = vrot.lane.b32.xlu0 %v731_v41, %s9767_s25  ;;  %v408_v41 = vld [vmem:[%s7049_s14 + $0xc0] sm:$0xff] }
  0xfb   : > { %v2010_v3 = vsel %vm2005_vm11, %v1977_v58, %v1593_v59  ;;  %487 = vst.msk [vmem:[#allocation2 + $0x139] sm:$0xff] %vm416_vm0, %v408_v41  ;;  %v734_v58 = vld [vmem:[#allocation2 + $0xd9] sm:$0xff] }
  0xfc   : > { %972 = vrot.lane.b32.xlu1 %v762_v43, %s9769_s29  ;;  %v7384_v7 = vpop.permute.xlu0 %1086 }
  0xfe   : > { %v7386_v8 = vpop.permute.xlu1 %1212  ;;  %1354 = vrot.lane.b32.xlu0 %v763_v51, %s9768_s15 }
  0xff   : > { %v1913_v61 = vsel %vm1906_vm8, %v1880_v55, %v7386_v8  ;;  %v1815_v8 = vsel %vm416_vm0, %v7141_v38, %v7356_v45 }
 0x100   : > { %1480 = vrot.lane.b32.xlu1 %v7380_v1, %s9770_s12  ;;  %v1595_v12 = vpop.permute.xlu0 %1594  ;;  %v1848_v22 = vsel %vm1840_vm6, %v1815_v8, %v7365_v52 }
 0x101   : > { %v2011_v27 = vsel %vm2005_vm11, %v1978_v2, %v1595_v12 }
 0x102   : > { %v1721_v14 = vpop.permute.xlu1 %1720  ;;  %974 = vrot.lane.b32.xlu0 %v763_v51, %s9769_s29  ;;  %v7454_v51 = vld [vmem:[#allocation2 + $0xd8] sm:$0xff] }
 0x103   : > { %v2043_v19 = vsel %vm2038_vm12, %v2010_v3, %v1721_v14  ;;  %v1881_v3 = vsel %vm1873_vm7, %v1848_v22, %v7384_v7 }
 0x104   : > { %2076 = vst.msk [vmem:[#allocation3 + $0x20] sm:$0xff] %vm2071_vm13, %v2043_v19  ;;  %1100 = vrot.lane.b32.xlu1 %v7380_v1, %s6842_s22  ;;  %v7412_v21 = vpop.permute.xlu0 %832 }
 0x106   : > { %v7414_v26 = vpop.permute.xlu1 %1214  ;;  %1482 = vrot.lane.b32.xlu0 %v7408_v63, %s9770_s12 }
 0x107   : > { %v1914_v38 = vsel %vm1906_vm8, %v1881_v3, %v7414_v26  ;;  %v766_v26 = vld [vmem:[#allocation2 + $0xda] sm:$0xff] }
 0x108   : > { %1608 = vrot.lane.b32.xlu1 %v732_v6, %s6846_s30  ;;  %v1341_v25 = vpop.permute.xlu0 %1340  ;;  %v737_v3 = vld [vmem:[#allocation2 + $0xf9] sm:$0xff] }
 0x109   : > { %v1946_v36 = vsel %vm1939_vm9, %v1913_v61, %v1341_v25 }
 0x10a   : > { %v1723_v17 = vpop.permute.xlu1 %1722  ;;  %1102 = vrot.lane.b32.xlu0 %v7408_v63, %s6842_s22 }
 0x10b   : > { %v2044_v28 = vsel %vm2038_vm12, %v2011_v27, %v1723_v17  ;;  %v2108_v30 = vld [vmem:[#allocation3 + $0x20] sm:$0xff]  ;;  %v767_v17 = vld [vmem:[#allocation2 + $0xe2] sm:$0xff] }
 0x10c   : > { %2077 = vst.msk [vmem:[#allocation3 + $0x28] sm:$0xff] %vm2071_vm13, %v2044_v28  ;;  %1228 = vrot.lane.b32.xlu1 %v732_v6, %s6843_s24  ;;  %6290 = vmatprep.mubr.msk.f32.mxu0 %vm2071_vm13, %v2108_v30  ;;  %v7430_v15 = vpop.permute.xlu0 %834 }
 0x10e   : > { %v7432_v5 = vpop.permute.xlu1 %960  ;;  %1610 = vrot.lane.b32.xlu0 %v733_v31, %s6846_s30 }
 0x110   : > { %1736 = vrot.lane.b32.xlu1 %v764_v33, %s6847_s16  ;;  %v1343_v10 = vpop.permute.xlu0 %1342 }
 0x111   : > { %v1947_v45 = vsel %vm1939_vm9, %v1914_v38, %v1343_v10 }
 0x112   : > { %v1469_v34 = vpop.permute.xlu1 %1468  ;;  %848 = vrot.lane.b32.xlu0 %v732_v6, %s9767_s25 }
 0x113   : > { %v2109_v35 = vld [vmem:[#allocation3 + $0x28] sm:$0xff]  ;;  %v1979_v47 = vsel %vm1972_vm10, %v1946_v36, %v1469_v34  ;;  %v1816_v34 = vsel %vm416_vm0, %v7159_v44, %v7412_v21 }
 0x114   : > { %1230 = vrot.lane.b32.xlu1 %v733_v31, %s6843_s24  ;;  %6291 = vmatmul.mubr.msk.f32.gmra.mrb[4].mxu0 %vm2071_vm13, %v2109_v35  ;;  %v7439_v37 = vpop.permute.xlu0 %962  ;;  %v1849_v35 = vsel %vm1840_vm6, %v1816_v34, %v7432_v5  ;;  %v411_v21 = vld [vmem:[%s7049_s14 + $0xd8] sm:$0xff] }
 0x115   : > { %490 = vst.msk [vmem:[#allocation2 + $0x159] sm:$0xff] %vm416_vm0, %v411_v21 }
 0x116   : > { %v7441_v40 = vpop.permute.xlu1 %1088  ;;  %1356 = vrot.lane.b32.xlu0 %v764_v33, %s9768_s15 }
 0x117   : > { %v1882_v41 = vsel %vm1873_vm7, %v1849_v35, %v7441_v40 }
 0x118   : > { %1738 = vrot.lane.b32.xlu1 %v765_v23, %s6847_s16  ;;  %v1471_v43 = vpop.permute.xlu0 %1470 }
 0x119   : > { %v1980_v52 = vsel %vm1972_vm10, %v1947_v45, %v1471_v43 }
 0x11a   : > { %v1597_v48 = vpop.permute.xlu1 %1596  ;;  %850 = vrot.lane.b32.xlu0 %v733_v31, %s9767_s25  ;;  %v410_v31 = vld [vmem:[%s7049_s14 + $0xd0] sm:$0xff] }
 0x11b   : > { %v2012_v53 = vsel %vm2005_vm11, %v1979_v47, %v1597_v48  ;;  %489 = vst.msk [vmem:[#allocation2 + $0x151] sm:$0xff] %vm416_vm0, %v410_v31  ;;  %v736_v47 = vld [vmem:[#allocation2 + $0xf1] sm:$0xff] }
 0x11c   : > { %976 = vrot.lane.b32.xlu1 %v764_v33, %s9769_s29  ;;  %v7458_v56 = vpop.permute.xlu0 %1090 }
 0x11e   : > { %v7460_v59 = vpop.permute.xlu1 %1216  ;;  %1358 = vrot.lane.b32.xlu0 %v765_v23, %s9768_s15 }
 0x11f   : > { %v1915_v49 = vsel %vm1906_vm8, %v1882_v41, %v7460_v59  ;;  %v1817_v59 = vsel %vm416_vm0, %v7169_v46, %v7430_v15 }
 0x120   : > { %1484 = vrot.lane.b32.xlu1 %v7454_v51, %s9770_s12  ;;  %v1599_v62 = vpop.permute.xlu0 %1598  ;;  %v1850_v36 = vsel %vm1840_vm6, %v1817_v59, %v7439_v37 }
 0x121   : > { %v2013_v7 = vsel %vm2005_vm11, %v1980_v52, %v1599_v62 }
 0x122   : > { %v1725_v4 = vpop.permute.xlu1 %1724  ;;  %978 = vrot.lane.b32.xlu0 %v765_v23, %s9769_s29  ;;  %v704_v23 = vld [vmem:[#allocation2 + $0xf0] sm:$0xff] }
 0x123   : > { %v2045_v9 = vsel %vm2038_vm12, %v2012_v53, %v1725_v4  ;;  %v1883_v53 = vsel %vm1873_vm7, %v1850_v36, %v7458_v56  ;;  %v739_v36 = vld [vmem:[#allocation2 + $0x111] sm:$0xff] }
 0x124   : > { %2078 = vst.msk [vmem:[#allocation3 + $0x30] sm:$0xff] %vm2071_vm13, %v2045_v9  ;;  %1104 = vrot.lane.b32.xlu1 %v7454_v51, %s6842_s22  ;;  %v7486_v12 = vpop.permute.xlu0 %836 }
 0x126   : > { %v7488_v14 = vpop.permute.xlu1 %1218  ;;  %1486 = vrot.lane.b32.xlu0 %v7482_v42, %s9770_s12 }
 0x127   : > { %v1916_v46 = vsel %vm1906_vm8, %v1883_v53, %v7488_v14  ;;  %v768_v14 = vld [vmem:[#allocation2 + $0xf2] sm:$0xff] }
 0x128   : > { %1612 = vrot.lane.b32.xlu1 %v734_v58, %s6846_s30  ;;  %v1345_v19 = vpop.permute.xlu0 %1344 }
 0x129   : > { %v1948_v44 = vsel %vm1939_vm9, %v1915_v49, %v1345_v19  ;;  %v738_v49 = vld [vmem:[#allocation2 + $0x109] sm:$0xff] }
 0x12a   : > { %v1727_v18 = vpop.permute.xlu1 %1726  ;;  %1106 = vrot.lane.b32.xlu0 %v7482_v42, %s6842_s22 }
 0x12b   : > { %v2046_v16 = vsel %vm2038_vm12, %v2013_v7, %v1727_v18  ;;  %v2110_v6 = vld [vmem:[#allocation3 + $0x30] sm:$0xff] }
 0x12c   : > { %2079 = vst.msk [vmem:[#allocation3 + $0x38] sm:$0xff] %vm2071_vm13, %v2046_v16  ;;  %1232 = vrot.lane.b32.xlu1 %v734_v58, %s6843_s24  ;;  %6293 = vmatprep.mubr.msk.f32.mxu0 %vm2071_vm13, %v2110_v6  ;;  %v7508_v24 = vpop.permute.xlu0 %838  ;;  %v769_v18 = vld [vmem:[#allocation2 + $0xfa] sm:$0xff] }
 0x12e   : > { %v7510_v57 = vpop.permute.xlu1 %964  ;;  %1614 = vrot.lane.b32.xlu0 %v735_v11, %s6846_s30 }
 0x130   : > { %1740 = vrot.lane.b32.xlu1 %v766_v26, %s6847_s16  ;;  %v1347_v2 = vpop.permute.xlu0 %1346 }
 0x131   : > { %v1949_v15 = vsel %vm1939_vm9, %v1916_v46, %v1347_v2  ;;  %v1818_v2 = vsel %vm416_vm0, %v7187_v54, %v7486_v12 }
 0x132   : > { %v1473_v27 = vpop.permute.xlu1 %1472  ;;  %852 = vrot.lane.b32.xlu0 %v734_v58, %s9767_s25 }
 0x133   : > { %v2111_v25 = vld [vmem:[#allocation3 + $0x38] sm:$0xff]  ;;  %v1981_v5 = vsel %vm1972_vm10, %v1948_v44, %v1473_v27  ;;  %v1851_v27 = vsel %vm1840_vm6, %v1818_v2, %v7510_v57 }
 0x134   : > { %1234 = vrot.lane.b32.xlu1 %v735_v11, %s6843_s24  ;;  %6294 = vmatmul.mubr.msk.f32.gmra.mrb[6].mxu0 %vm2071_vm13, %v2111_v25  ;;  %v7517_v28 = vpop.permute.xlu0 %966  ;;  %v706_v25 = vld [vmem:[#allocation2 + $0x108] sm:$0xff] }
 0x136   : > { %v7519_v30 = vpop.permute.xlu1 %1092  ;;  %1360 = vrot.lane.b32.xlu0 %v766_v26, %s9768_s15 }
 0x138   : > { %1742 = vrot.lane.b32.xlu1 %v767_v17, %s6847_s16  ;;  %v1475_v33 = vpop.permute.xlu0 %1474 }
 0x139   : > { %v1982_v37 = vsel %vm1972_vm10, %v1949_v15, %v1475_v33 }
 0x13a   : > { %v1601_v10 = vpop.permute.xlu1 %1600  ;;  %854 = vrot.lane.b32.xlu0 %v735_v11, %s9767_s25 }
 0x13b   : > { %v2014_v40 = vsel %vm2005_vm11, %v1981_v5, %v1601_v10 }
 0x13c   : > { %980 = vrot.lane.b32.xlu1 %v766_v26, %s9769_s29  ;;  %v7534_v43 = vpop.permute.xlu0 %1094 }
 0x13e   : > { %v7536_v48 = vpop.permute.xlu1 %1220  ;;  %1362 = vrot.lane.b32.xlu0 %v767_v17, %s9768_s15 }
 0x140   : > { %1488 = vrot.lane.b32.xlu1 %v704_v23, %s9770_s12  ;;  %v1603_v50 = vpop.permute.xlu0 %1602 }
 0x141   : > { %v2015_v9 = vsel %vm2005_vm11, %v1982_v37, %v1603_v50 }
 0x142   : > { %v1729_v55 = vpop.permute.xlu1 %1728  ;;  %982 = vrot.lane.b32.xlu0 %v767_v17, %s9769_s29  ;;  %v1884_v17 = vsel %vm1873_vm7, %v1851_v27, %v7519_v30 }
 0x143   : > { %v2047_v61 = vsel %vm2038_vm12, %v2014_v40, %v1729_v55  ;;  %v1917_v10 = vsel %vm1906_vm8, %v1884_v17, %v7536_v48  ;;  %v707_v48 = vld [vmem:[#allocation2 + $0x110] sm:$0xff]  ;;  %v412_v40 = vld [vmem:[%s7049_s14 + $0xe0] sm:$0xff] }
 0x144   : > { %2080 = vst.msk [vmem:[#allocation3 + $0x40] sm:$0xff] %vm2071_vm13, %v2047_v61  ;;  %1108 = vrot.lane.b32.xlu1 %v704_v23, %s6842_s22  ;;  %v7558_v62 = vpop.permute.xlu0 %840  ;;  %v1819_v23 = vsel %vm416_vm0, %v7203_v60, %v7508_v24 }
 0x145   : > { %v1852_v41 = vsel %vm1840_vm6, %v1819_v23, %v7517_v28  ;;  %491 = vst.msk [vmem:[#allocation2 + $0x169] sm:$0xff] %vm416_vm0, %v412_v40  ;;  %v773_v40 = vld [vmem:[#allocation2 + $0x12a] sm:$0xff] }
 0x146   : > { %v7560_v4 = vpop.permute.xlu1 %1222  ;;  %1490 = vrot.lane.b32.xlu0 %v705_v32, %s9770_s12  ;;  %v1885_v44 = vsel %vm1873_vm7, %v1852_v41, %v7534_v43  ;;  %v741_v41 = vld [vmem:[#allocation2 + $0x129] sm:$0xff] }
 0x147   : > { %v1918_v60 = vsel %vm1906_vm8, %v1885_v44, %v7560_v4 }
 0x148   : > { %1616 = vrot.lane.b32.xlu1 %v736_v47, %s6846_s30  ;;  %v1349_v8 = vpop.permute.xlu0 %1348 }
 0x149   : > { %v1950_v54 = vsel %vm1939_vm9, %v1917_v10, %v1349_v8  ;;  %v740_v10 = vld [vmem:[#allocation2 + $0x121] sm:$0xff] }
 0x14a   : > { %v1731_v22 = vpop.permute.xlu1 %1730  ;;  %1110 = vrot.lane.b32.xlu0 %v705_v32, %s6842_s22  ;;  %v770_v32 = vld [vmem:[#allocation2 + $0x10a] sm:$0xff] }
 0x14b   : > { %v2048_v56 = vsel %vm2038_vm12, %v2015_v9, %v1731_v22  ;;  %v2112_v58 = vld [vmem:[#allocation3 + $0x40] sm:$0xff] }
 0x14c   : > { %2081 = vst.msk [vmem:[#allocation3 + $0x48] sm:$0xff] %vm2071_vm13, %v2048_v56  ;;  %1236 = vrot.lane.b32.xlu1 %v736_v47, %s6843_s24  ;;  %6296 = vmatprep.mubr.msk.f32.mxu0 %vm2071_vm13, %v2112_v58  ;;  %v7574_v38 = vpop.permute.xlu0 %842  ;;  %v771_v9 = vld [vmem:[#allocation2 + $0x112] sm:$0xff] }
 0x14e   : > { %v7576_v45 = vpop.permute.xlu1 %968  ;;  %1618 = vrot.lane.b32.xlu0 %v737_v3, %s6846_s30 }
 0x150   : > { %1744 = vrot.lane.b32.xlu1 %v768_v14, %s6847_s16  ;;  %v1351_v52 = vpop.permute.xlu0 %1350 }
 0x151   : > { %v1951_v24 = vsel %vm1939_vm9, %v1918_v60, %v1351_v52 }
 0x152   : > { %v1477_v7 = vpop.permute.xlu1 %1476  ;;  %856 = vrot.lane.b32.xlu0 %v736_v47, %s9767_s25  ;;  %v413_v47 = vld [vmem:[%s7049_s14 + $0xe8] sm:$0xff] }
 0x153   : > { %v2113_v19 = vld [vmem:[#allocation3 + $0x48] sm:$0xff]  ;;  %v1983_v12 = vsel %vm1972_vm10, %v1950_v54, %v1477_v7  ;;  %492 = vst.msk [vmem:[#allocation2 + $0x171] sm:$0xff] %vm416_vm0, %v413_v47 }
 0x154   : > { %1238 = vrot.lane.b32.xlu1 %v737_v3, %s6843_s24  ;;  %6297 = vmatmul.mubr.msk.f32.gmra.mrb[8].mxu0 %vm2071_vm13, %v2113_v19  ;;  %v7587_v16 = vpop.permute.xlu0 %970 }
 0x156   : > { %v7589_v6 = vpop.permute.xlu1 %1096  ;;  %1364 = vrot.lane.b32.xlu0 %v768_v14, %s9768_s15 }
 0x158   : > { %1746 = vrot.lane.b32.xlu1 %v769_v18, %s6847_s16  ;;  %v1479_v11 = vpop.permute.xlu0 %1478 }
 0x159   : > { %v1984_v28 = vsel %vm1972_vm10, %v1951_v24, %v1479_v11  ;;  %v414_v11 = vld [vmem:[%s7049_s14 + $0xf0] sm:$0xff] }
 0x15a   : > { %v1605_v26 = vpop.permute.xlu1 %1604  ;;  %858 = vrot.lane.b32.xlu0 %v737_v3, %s9767_s25  ;;  %v1820_v3 = vsel %vm416_vm0, %v7235_v20, %v7558_v62  ;;  %v708_v62 = vld [vmem:[#allocation2 + $0x120] sm:$0xff]  ;;  %493 = vst.msk [vmem:[#allocation2 + $0x181] sm:$0xff] %vm416_vm0, %v414_v11 }
 0x15b   : > { %v2016_v57 = vsel %vm2005_vm11, %v1983_v12, %v1605_v26  ;;  %v1853_v20 = vsel %vm1840_vm6, %v1820_v3, %v7576_v45 }
 0x15c   : > { %984 = vrot.lane.b32.xlu1 %v768_v14, %s9769_s29  ;;  %v7602_v31 = vpop.permute.xlu0 %1098  ;;  %v1886_v14 = vsel %vm1873_vm7, %v1853_v20, %v7589_v6  ;;  %v711_v20 = vld [vmem:[#allocation2 + $0x140] sm:$0xff] }
 0x15e   : > { %v7604_v33 = vpop.permute.xlu1 %1224  ;;  %1366 = vrot.lane.b32.xlu0 %v769_v18, %s9768_s15 }
 0x15f   : > { %v1919_v19 = vsel %vm1906_vm8, %v1886_v14, %v7604_v33  ;;  %v709_v33 = vld [vmem:[#allocation2 + $0x128] sm:$0xff] }
 0x160   : > { %1492 = vrot.lane.b32.xlu1 %v706_v25, %s9770_s12  ;;  %v1607_v34 = vpop.permute.xlu0 %1606 }
 0x161   : > { %v2017_v50 = vsel %vm2005_vm11, %v1984_v28, %v1607_v34 }
 0x162   : > { %v1733_v35 = vpop.permute.xlu1 %1732  ;;  %986 = vrot.lane.b32.xlu0 %v769_v18, %s9769_s29 }
 0x163   : > { %v2049_v30 = vsel %vm2038_vm12, %v2016_v57, %v1733_v35 }
 0x164   : > { %2082 = vst.msk [vmem:[#allocation3 + $0x50] sm:$0xff] %vm2071_vm13, %v2049_v30  ;;  %1112 = vrot.lane.b32.xlu1 %v706_v25, %s6842_s22  ;;  %v7624_v21 = vpop.permute.xlu0 %844  ;;  %v1821_v25 = vsel %vm416_vm0, %v7260_v39, %v7574_v38 }
 0x165   : > { %v1854_v17 = vsel %vm1840_vm6, %v1821_v25, %v7587_v16  ;;  %v774_v25 = vld [vmem:[#allocation2 + $0x13a] sm:$0xff] }
 0x166   : > { %v7626_v5 = vpop.permute.xlu1 %1226  ;;  %1494 = vrot.lane.b32.xlu0 %v707_v48, %s9770_s12  ;;  %v1887_v54 = vsel %vm1873_vm7, %v1854_v17, %v7602_v31 }
 0x167   : > { %v1920_v39 = vsel %vm1906_vm8, %v1887_v54, %v7626_v5  ;;  %v415_v5 = vld [vmem:[%s7049_s14 + $0xf8] sm:$0xff] }
 0x168   : > { %1620 = vrot.lane.b32.xlu1 %v738_v49, %s6846_s30  ;;  %v7636_v43 = vpop.permute.xlu0 %1352  ;;  %494 = vst.msk [vmem:[#allocation2 + $0x189] sm:$0xff] %vm416_vm0, %v415_v5 }
 0x169   : > { %v1952_v18 = vsel %vm1939_vm9, %v1919_v19, %v7636_v43 }
 0x16a   : > { %v1735_v55 = vpop.permute.xlu1 %1734  ;;  %1114 = vrot.lane.b32.xlu0 %v707_v48, %s6842_s22  ;;  %v772_v48 = vld [vmem:[#allocation2 + $0x122] sm:$0xff] }
 0x16b   : > { %v2050_v61 = vsel %vm2038_vm12, %v2017_v50, %v1735_v55  ;;  %v2114_v59 = vld [vmem:[#allocation3 + $0x50] sm:$0xff] }
 0x16c   : > { %2083 = vst.msk [vmem:[#allocation3 + $0x58] sm:$0xff] %vm2071_vm13, %v2050_v61  ;;  %1240 = vrot.lane.b32.xlu1 %v738_v49, %s6843_s24  ;;  %6299 = vmatprep.mubr.msk.f32.mxu0 %vm2071_vm13, %v2114_v59  ;;  %v7645_v53 = vpop.permute.xlu0 %846  ;;  %v1822_v59 = vsel %vm416_vm0, %v7306_v13, %v7624_v21 }
 0x16e   : > { %v7647_v4 = vpop.permute.xlu1 %972  ;;  %1622 = vrot.lane.b32.xlu0 %v739_v36, %s6846_s30 }
 0x170   : > { %1748 = vrot.lane.b32.xlu1 %v770_v32, %s6847_s16  ;;  %v7652_v46 = vpop.permute.xlu0 %1354 }
 0x171   : > { %v1953_v38 = vsel %vm1939_vm9, %v1920_v39, %v7652_v46  ;;  %v775_v39 = vld [vmem:[#allocation2 + $0x142] sm:$0xff] }
 0x172   : > { %v1481_v15 = vpop.permute.xlu1 %1480  ;;  %860 = vrot.lane.b32.xlu0 %v738_v49, %s9767_s25 }
 0x173   : > { %v2115_v37 = vld [vmem:[#allocation3 + $0x58] sm:$0xff]  ;;  %v1985_v45 = vsel %vm1972_vm10, %v1952_v18, %v1481_v15 }
 0x174   : > { %1242 = vrot.lane.b32.xlu1 %v739_v36, %s6843_s24  ;;  %6300 = vmatmul.mubr.msk.f32.gmra.mrb[10].mxu0 %vm2071_vm13, %v2115_v37  ;;  %v7657_v8 = vpop.permute.xlu0 %974 }
 0x176   : > { %v7659_v22 = vpop.permute.xlu1 %1100  ;;  %1368 = vrot.lane.b32.xlu0 %v770_v32, %s9768_s15 }
 0x178   : > { %1750 = vrot.lane.b32.xlu1 %v771_v9, %s6847_s16  ;;  %v7663_v56 = vpop.permute.xlu0 %1482 }
 0x179   : > { %v1986_v16 = vsel %vm1972_vm10, %v1953_v38, %v7663_v56 }
 0x17a   : > { %v1609_v58 = vpop.permute.xlu1 %1608  ;;  %862 = vrot.lane.b32.xlu0 %v739_v36, %s9767_s25  ;;  %v1855_v36 = vsel %vm1840_vm6, %v1822_v59, %v7647_v4 }
 0x17b   : > { %v2018_v6 = vsel %vm2005_vm11, %v1985_v45, %v1609_v58  ;;  %v1888_v47 = vsel %vm1873_vm7, %v1855_v36, %v7659_v22  ;;  %v1823_v58 = vsel %vm416_vm0, %v7334_v29, %v7645_v53 }
 0x17c   : > { %988 = vrot.lane.b32.xlu1 %v770_v32, %s9769_s29  ;;  %v7738_v52 = vpop.permute.xlu0 %1102  ;;  %v710_v32 = vld [vmem:[#allocation2 + $0x138] sm:$0xff]  ;;  %v1856_v3 = vsel %vm1840_vm6, %v1823_v58, %v7657_v8 }
 0x17d   : > { %v1889_v14 = vsel %vm1873_vm7, %v1856_v3, %v7738_v52 }
 0x17e   : > { %v7740_v7 = vpop.permute.xlu1 %1228  ;;  %1370 = vrot.lane.b32.xlu0 %v771_v9, %s9768_s15 }
 0x17f   : > { %v1921_v37 = vsel %vm1906_vm8, %v1888_v47, %v7740_v7 }
 0x180   : > { %1496 = vrot.lane.b32.xlu1 %v708_v62, %s9770_s12  ;;  %v1611_v26 = vpop.permute.xlu0 %1610 }
 0x181   : > { %v2019_v31 = vsel %vm2005_vm11, %v1986_v16, %v1611_v26 }
 0x182   : > { %v1737_v2 = vpop.permute.xlu1 %1736  ;;  %990 = vrot.lane.b32.xlu0 %v771_v9, %s9769_s29 }
 0x183   : > { %v2051_v27 = vsel %vm2038_vm12, %v2018_v6, %v1737_v2 }
 0x184   : > { %2084 = vst.msk [vmem:[#allocation3 + $0x60] sm:$0xff] %vm2071_vm13, %v2051_v27  ;;  %1116 = vrot.lane.b32.xlu1 %v708_v62, %s6842_s22  ;;  %v7763_v12 = vpop.permute.xlu0 %848  ;;  %v742_v62 = vld [vmem:[#allocation2 + $0x139] sm:$0xff]  ;;  %v743_v27 = vld [vmem:[#allocation2 + $0x141] sm:$0xff] }
 0x186   : > { %v7765_v57 = vpop.permute.xlu1 %1230  ;;  %1498 = vrot.lane.b32.xlu0 %v709_v33, %s9770_s12 }
 0x187   : > { %v1922_v29 = vsel %vm1906_vm8, %v1889_v14, %v7765_v57 }
 0x188   : > { %1624 = vrot.lane.b32.xlu1 %v740_v10, %s6846_s30  ;;  %v1357_v34 = vpop.permute.xlu0 %1356 }
 0x189   : > { %v1954_v13 = vsel %vm1939_vm9, %v1921_v37, %v1357_v34  ;;  %v7893_v37 = vld [vmem:[#allocation2 + $0x151] sm:$0xff] }
 0x18a   : > { %v1739_v35 = vpop.permute.xlu1 %1738  ;;  %1118 = vrot.lane.b32.xlu0 %v709_v33, %s6842_s22 }
 0x18b   : > { %v2052_v30 = vsel %vm2038_vm12, %v2019_v31, %v1739_v35  ;;  %v2116_v23 = vld [vmem:[#allocation3 + $0x60] sm:$0xff]  ;;  %v1824_v35 = vsel %vm416_vm0, %v7380_v1, %v7763_v12  ;;  %v6849_v12 = vmov 1983009808  }
 0x18c   : > { %2085 = vst.msk [vmem:[#allocation3 + $0x68] sm:$0xff] %vm2071_vm13, %v2052_v30  ;;  %1244 = vrot.lane.b32.xlu1 %v740_v10, %s6843_s24  ;;  %6302 = vmatprep.mubr.msk.f32.mxu0 %vm2071_vm13, %v2116_v23  ;;  %v7781_v49 = vpop.permute.xlu0 %850  ;;  %v712_v23 = vld [vmem:[#allocation2 + $0x150] sm:$0xff] }
 0x18d   : > { %v1825_v59 = vsel %vm416_vm0, %v7408_v63, %v7781_v49 }
 0x18e   : > { %v7783_v44 = vpop.permute.xlu1 %976  ;;  %1626 = vrot.lane.b32.xlu0 %v741_v41, %s6846_s30 }
 0x18f   : > { %v1857_v30 = vsel %vm1840_vm6, %v1824_v35, %v7783_v44  ;;  %v2534_v44 = vlaneseq }
 0x190   : > { %1752 = vrot.lane.b32.xlu1 %v772_v48, %s6847_s16  ;;  %v1359_v60 = vpop.permute.xlu0 %1358 }
 0x191   : > { %v1955_v53 = vsel %vm1939_vm9, %v1922_v29, %v1359_v60 }
 0x192   : > { %v1485_v24 = vpop.permute.xlu1 %1484  ;;  %864 = vrot.lane.b32.xlu0 %v740_v10, %s9767_s25 }
 0x193   : > { %v2117_v28 = vld [vmem:[#allocation3 + $0x68] sm:$0xff]  ;;  %v1987_v21 = vsel %vm1972_vm10, %v1954_v13, %v1485_v24  ;;  %v2532_v24 = vunpack.c.l.s4 %v6849_v12 }
 0x194   : > { %1246 = vrot.lane.b32.xlu1 %v741_v41, %s6843_s24  ;;  %6303 = vmatmul.mubr.msk.f32.gmra.mrb[12].mxu0 %vm2071_vm13, %v2117_v28  ;;  %v7792_v50 = vpop.permute.xlu0 %978 }
 0x195   : > { %v2533_v36 = vunpack.c.0.s8 %v2532_v24  ;;  %v1858_v47 = vsel %vm1840_vm6, %v1825_v59, %v7792_v50 }
 0x196   : > { %v7794_v43 = vpop.permute.xlu1 %1104  ;;  %1372 = vrot.lane.b32.xlu0 %v772_v48, %s9768_s15 }
 0x198   : > { %1754 = vrot.lane.b32.xlu1 %v773_v40, %s6847_s16  ;;  %v1487_v55 = vpop.permute.xlu0 %1486 }
 0x199   : > { %v1988_v8 = vsel %vm1972_vm10, %v1955_v53, %v1487_v55 }
 0x19a   : > { %v1613_v61 = vpop.permute.xlu1 %1612  ;;  %866 = vrot.lane.b32.xlu0 %v741_v41, %s9767_s25  ;;  %v1890_v41 = vsel %vm1873_vm7, %v1857_v30, %v7794_v43 }
 0x19b   : > { %v2020_v4 = vsel %vm2005_vm11, %v1987_v21, %v1613_v61 }
 0x19c   : > { %992 = vrot.lane.b32.xlu1 %v772_v48, %s9769_s29  ;;  %v7807_v46 = vpop.permute.xlu0 %1106 }
 0x19d   : > { %v1891_v13 = vsel %vm1873_vm7, %v1858_v47, %v7807_v46 }
 0x19e   : > { %v7809_v15 = vpop.permute.xlu1 %1232  ;;  %1374 = vrot.lane.b32.xlu0 %v773_v40, %s9768_s15 }
 0x19f   : > { %v1923_v60 = vsel %vm1906_vm8, %v1890_v41, %v7809_v15  ;;  %v713_v15 = vld [vmem:[#allocation2 + $0x158] sm:$0xff] }
 0x1a0   : > { %1500 = vrot.lane.b32.xlu1 %v710_v32, %s9770_s12  ;;  %v1615_v9 = vpop.permute.xlu0 %1614 }
 0x1a1   : > { %v2021_v52 = vsel %vm2005_vm11, %v1988_v8, %v1615_v9 }
 0x1a2   : > { %v1741_v56 = vpop.permute.xlu1 %1740  ;;  %994 = vrot.lane.b32.xlu0 %v773_v40, %s9769_s29 }
 0x1a3   : > { %v2053_v22 = vsel %vm2038_vm12, %v2020_v4, %v1741_v56 }
 0x1a4   : > { %2086 = vst.msk [vmem:[#allocation3 + $0x70] sm:$0xff] %vm2071_vm13, %v2053_v22  ;;  %1120 = vrot.lane.b32.xlu1 %v710_v32, %s6842_s22  ;;  %v7829_v7 = vpop.permute.xlu0 %852  ;;  %v2535_v32 = vshrl.u32 %v2534_v44, 7 }
 0x1a6   : > { %v7831_v19 = vpop.permute.xlu1 %1234  ;;  %1502 = vrot.lane.b32.xlu0 %v711_v20, %s9770_s12  ;;  %v7904_v56 = vsub.s32 %v2533_v36, %v2535_v32 }
 0x1a7   : > { %v7836_v18 = vpop.f32.mrb[0].mxu0  ;;  %v1924_v49 = vsel %vm1906_vm8, %v1891_v13, %v7831_v19 }
 0x1a8   : > { %1628 = vrot.lane.b32.xlu1 %v742_v62, %s6846_s30  ;;  %v7841_v11 = vpop.f32.mrb[1].mxu0  ;;  %v1361_v45 = vpop.permute.xlu0 %1360  ;;  %v2469_v50 = vsel %vm9753_vm14, %v7836_v18, -inf }
 0x1a9   : > { %v1956_v1 = vsel %vm1939_vm9, %v1923_v60, %v1361_v45  ;;  %v2466_v3 = vsel %vm9753_vm14, %v7841_v11, -inf }
 0x1aa   : > { %v1743_v6 = vpop.permute.xlu1 %1742  ;;  %1122 = vrot.lane.b32.xlu0 %v711_v20, %s6842_s22 }
 0x1ab   : > { %v2054_v26 = vsel %vm2038_vm12, %v2021_v52, %v1743_v6  ;;  %v2118_v2 = vld [vmem:[#allocation3 + $0x70] sm:$0xff] }
 0x1ac   : > { %2087 = vst.msk [vmem:[#allocation3 + $0x78] sm:$0xff] %vm2071_vm13, %v2054_v26  ;;  %1248 = vrot.lane.b32.xlu1 %v742_v62, %s6843_s24  ;;  %6305 = vmatprep.mubr.msk.f32.mxu0 %vm2071_vm13, %v2118_v2  ;;  %v7849_v17 = vpop.permute.xlu0 %854  ;;  %v7927_v26 = vld [vmem:[#allocation2 + $0x159] sm:$0xff] }
 0x1ad   : > { %v7929_v2 = vld [vmem:[#allocation2 + $0x152] sm:$0xff] }
 0x1ae   : > { %v7851_v33 = vpop.permute.xlu1 %980  ;;  %1630 = vrot.lane.b32.xlu0 %v743_v27, %s6846_s30 }
 0x1b0   : > { %1756 = vrot.lane.b32.xlu1 %v774_v25, %s6847_s16  ;;  %v1363_v10 = vpop.permute.xlu0 %1362 }
 0x1b1   : > { %v1957_v4 = vsel %vm1939_vm9, %v1924_v49, %v1363_v10 }
 0x1b2   : > { %v1489_v54 = vpop.permute.xlu1 %1488  ;;  %868 = vrot.lane.b32.xlu0 %v742_v62, %s9767_s25 }
 0x1b3   : > { %v2119_v57 = vld [vmem:[#allocation3 + $0x78] sm:$0xff]  ;;  %v1989_v28 = vsel %vm1972_vm10, %v1956_v1, %v1489_v54 }
 0x1b4   : > { %1250 = vrot.lane.b32.xlu1 %v743_v27, %s6843_s24  ;;  %6306 = vmatmul.mubr.msk.f32.gmra.mrb[14].mxu0 %vm2071_vm13, %v2119_v57  ;;  %v7858_v38 = vpop.permute.xlu0 %982 }
 0x1b6   : > { %v7860_v16 = vpop.permute.xlu1 %1108  ;;  %1376 = vrot.lane.b32.xlu0 %v774_v25, %s9768_s15 }
 0x1b8   : > { %1758 = vrot.lane.b32.xlu1 %v775_v39, %s6847_s16  ;;  %v1491_v31 = vpop.permute.xlu0 %1490 }
 0x1b9   : > { %v1990_v46 = vsel %vm1972_vm10, %v1957_v4, %v1491_v31 }
 0x1ba   : > { %v1617_v34 = vpop.permute.xlu1 %1616  ;;  %870 = vrot.lane.b32.xlu0 %v743_v27, %s9767_s25 }
 0x1bb   : > { %v2022_v40 = vsel %vm2005_vm11, %v1989_v28, %v1617_v34 }
 0x1bc   : > { %996 = vrot.lane.b32.xlu1 %v774_v25, %s9769_s29  ;;  %v7873_v48 = vpop.permute.xlu0 %1110 }
 0x1be   : > { %v7875_v5 = vpop.permute.xlu1 %1236  ;;  %1378 = vrot.lane.b32.xlu0 %v775_v39, %s9768_s15 }
 0x1c0   : > { %1504 = vrot.lane.b32.xlu1 %v712_v23, %s9770_s12  ;;  %v1619_v43 = vpop.permute.xlu0 %1618 }
 0x1c1   : > { %v2023_v20 = vsel %vm2005_vm11, %v1990_v46, %v1619_v43 }
 0x1c2   : > { %v1745_v55 = vpop.permute.xlu1 %1744  ;;  %998 = vrot.lane.b32.xlu0 %v775_v39, %s9769_s29 }
 0x1c3   : > { %v2055_v61 = vsel %vm2038_vm12, %v2022_v40, %v1745_v55 }
 0x1c4   : > { %2088 = vst.msk [vmem:[#allocation3 + $0x80] sm:$0xff] %vm2071_vm13, %v2055_v61  ;;  %1124 = vrot.lane.b32.xlu1 %v712_v23, %s6842_s22  ;;  %v7897_v21 = vpop.permute.xlu0 %856 }
 0x1c6   : > { %v7899_v63 = vpop.permute.xlu1 %1238  ;;  %1506 = vrot.lane.b32.xlu0 %v713_v15, %s9770_s12 }
 0x1c7   : > { %v6289_v9 = vpop.f32.mrb[2].mxu0 }
 0x1c8   : > { %1632 = vrot.lane.b32.xlu1 %v7893_v37, %s6846_s30  ;;  %v2470_v22 = vsel %vm9753_vm14, %v6289_v9, -inf  ;;  %v2316_v58 = vpop.f32.mrb[3].mxu0  ;;  %v7917_v19 = vpop.permute.xlu0 %1364 }
 0x1c9   : > { %v2471_v62 = vmax.f32 %v2469_v50, %v2470_v22  ;;  %v2467_v14 = vsel %vm9753_vm14, %v2316_v58, -inf }
 0x1ca   : > { %v1747_v29 = vpop.permute.xlu1 %1746  ;;  %v2468_v53 = vmax.f32 %v2466_v3, %v2467_v14  ;;  %1126 = vrot.lane.b32.xlu0 %v713_v15, %s6842_s22 }
 0x1cb   : > { %v2056_v8 = vsel %vm2038_vm12, %v2023_v20, %v1747_v29  ;;  %v2120_v18 = vld [vmem:[#allocation3 + $0x80] sm:$0xff]  ;;  %v2547_v52 = vcombine.high %v2471_v62, %v2471_v62  ;;  %v2554_v45 = vrot.slane %v2471_v62, %v7904_v56  ;;  %v7958_v20 = vld [vmem:[#allocation2 + $0x15a] sm:$0xff] }
 0x1cc   : > { %2089 = vst.msk [vmem:[#allocation3 + $0x88] sm:$0xff] %vm2071_vm13, %v2056_v8  ;;  %1252 = vrot.lane.b32.xlu1 %v7893_v37, %s6843_s24  ;;  %v2530_v11 = vcombine.high %v2468_v53, %v2468_v53  ;;  %v2537_v6 = vrot.slane %v2468_v53, %v7904_v56  ;;  %6308 = vmatprep.mubr.msk.f32.mxu0 %vm2071_vm13, %v2120_v18  ;;  %v7933_v54 = vpop.permute.xlu0 %858 }
 0x1cd   : > { %v2561_v27 = vrot.slane %v2547_v52, %v7904_v56  ;;  %v2562_v25 = vcombine.high %v2554_v45, %v2554_v45  ;;  %v2895_v10 = vsel %vm9752_vm15, %v2554_v45, -inf }
 0x1ce   : > { %v7935_v57 = vpop.permute.xlu1 %984  ;;  %v2896_v39 = vrot.slane %v2895_v10, 4  ;;  %v2544_v31 = vrot.slane %v2530_v11, %v7904_v56  ;;  %v2545_v34 = vcombine.high %v2537_v6, %v2537_v6  ;;  %v2867_v35 = vsel %vm9752_vm15, %v2537_v6, -inf  ;;  %1634 = vrot.lane.b32.xlu0 %v7927_v26, %s6846_s30 }
 0x1cf   : > { %v2563_v30 = vcombine.high %v2561_v27, %v2561_v27  ;;  %v2902_v23 = vsel %vm9752_vm15, %v2562_v25, -inf  ;;  %v2909_v41 = vsel %vm9752_vm15, %v2561_v27, -inf  ;;  %v2868_v60 = vrot.slane %v2867_v35, 4 }
 0x1d0   : > { %1760 = vrot.lane.b32.xlu1 %v7929_v2, %s6847_s16  ;;  %v2897_v1 = vmax.f32 %v2895_v10, %v2896_v39  ;;  %v2903_v12 = vrot.slane %v2902_v23, 4  ;;  %v2910_v24 = vrot.slane %v2909_v41, 4  ;;  %v2546_v44 = vcombine.high %v2544_v31, %v2544_v31  ;;  %v7948_v61 = vpop.permute.xlu0 %1366 }
 0x1d1   : > { %v2916_v28 = vsel %vm9752_vm15, %v2563_v30, -inf  ;;  %v2869_v40 = vmax.f32 %v2867_v35, %v2868_v60  ;;  %v2874_v43 = vsel %vm9752_vm15, %v2545_v34, -inf  ;;  %v2881_v55 = vsel %vm9752_vm15, %v2544_v31, -inf }
 0x1d2   : > { %v7950_v59 = vpop.permute.xlu1 %1492  ;;  %v2898_v36 = vrot.slane %v2897_v1, 2  ;;  %v2904_v32 = vmax.f32 %v2902_v23, %v2903_v12  ;;  %v2911_v47 = vmax.f32 %v2909_v41, %v2910_v24  ;;  %v2917_v15 = vrot.slane %v2916_v28, 4  ;;  %872 = vrot.lane.b32.xlu0 %v7893_v37, %s9767_s25 }
 0x1d3   : > { %v2121_v13 = vld [vmem:[#allocation3 + $0x88] sm:$0xff]  ;;  %v2870_v49 = vrot.slane %v2869_v40, 2  ;;  %v2875_v4 = vrot.slane %v2874_v43, 4  ;;  %v2882_v9 = vrot.slane %v2881_v55, 4  ;;  %v2888_v50 = vsel %vm9752_vm15, %v2546_v44, -inf }
 0x1d4   : > { %1254 = vrot.lane.b32.xlu1 %v7927_v26, %s6843_s24  ;;  %v2899_v46 = vmax.f32 %v2897_v1, %v2898_v36  ;;  %v2905_v22 = vrot.slane %v2904_v32, 2  ;;  %v2912_v58 = vrot.slane %v2911_v47, 2  ;;  %v2918_v3 = vmax.f32 %v2916_v28, %v2917_v15  ;;  %6309 = vmatmul.mubr.msk.f32.gmra.mrb[16].mxu0 %vm2071_vm13, %v2121_v13  ;;  %v7960_v8 = vpop.permute.xlu0 %986  ;;  %v7973_v28 = vld [vmem:[%s9732_s2] ss:$0 sm:$0xff] }
 0x1d5   : > { %v2871_v62 = vmax.f32 %v2869_v40, %v2870_v49  ;;  %v2876_v14 = vmax.f32 %v2874_v43, %v2875_v4  ;;  %v2883_v29 = vmax.f32 %v2881_v55, %v2882_v9  ;;  %v2889_v53 = vrot.slane %v2888_v50, 4 }
 0x1d6   : > { %v7962_v18 = vpop.permute.xlu1 %1112  ;;  %v2900_v37 = vrot.slane %v2899_v46, 1  ;;  %v2906_v52 = vmax.f32 %v2904_v32, %v2905_v22  ;;  %v2913_v45 = vmax.f32 %v2911_v47, %v2912_v58  ;;  %v2919_v11 = vrot.slane %v2918_v3, 2  ;;  %1380 = vrot.lane.b32.xlu0 %v7929_v2, %s9768_s15 }
 0x1d7   : > { %v2872_v6 = vrot.slane %v2871_v62, 1  ;;  %v2877_v27 = vrot.slane %v2876_v14, 2  ;;  %v2884_v25 = vrot.slane %v2883_v29, 2  ;;  %v2890_v10 = vmax.f32 %v2888_v50, %v2889_v53  ;;  %v714_v50 = vld [vmem:[#allocation2 + $0x168] sm:$0xff] }
 0x1d8   : > { %1762 = vrot.lane.b32.xlu1 %v7958_v20, %s6847_s16  ;;  %v2907_v39 = vrot.slane %v2906_v52, 1  ;;  %v2914_v31 = vrot.slane %v2913_v45, 1  ;;  %v2920_v34 = vmax.f32 %v2918_v3, %v2919_v11  ;;  %v7968_v41 = vpop.permute.xlu0 %1494  ;;  %v2901_v1 = vmax.f32 %v2899_v46, %v2900_v37 }
 0x1d9   : > { %v2878_v35 = vmax.f32 %v2876_v14, %v2877_v27  ;;  %v2885_v30 = vmax.f32 %v2883_v29, %v2884_v25  ;;  %v2891_v23 = vrot.slane %v2890_v10, 2  ;;  %v2873_v44 = vmax.f32 %v2871_v62, %v2872_v6 }
 0x1da   : > { %v1621_v60 = vpop.permute.xlu1 %1620  ;;  %v2908_v12 = vmax.f32 %v2906_v52, %v2907_v39  ;;  %v2921_v24 = vrot.slane %v2920_v34, 1  ;;  %874 = vrot.lane.b32.xlu0 %v7927_v26, %s9767_s25  ;;  %v1826_v36 = vsel %vm416_vm0, %v7454_v51, %v7829_v7  ;;  %v1827_v32 = vsel %vm416_vm0, %v7482_v42, %v7849_v17 }
 0x1db   : > { %v2879_v40 = vrot.slane %v2878_v35, 1  ;;  %v2886_v43 = vrot.slane %v2885_v30, 1  ;;  %v2892_v55 = vmax.f32 %v2890_v10, %v2891_v23  ;;  %v2915_v47 = vmax.f32 %v2913_v45, %v2914_v31 }
 0x1dc   : > { %1000 = vrot.lane.b32.xlu1 %v7929_v2, %s9769_s29  ;;  %v2922_v15 = vmax.f32 %v2920_v34, %v2921_v24  ;;  %v7985_v9 = vpop.permute.xlu0 %1114  ;;  %v1859_v2 = vsel %vm1840_vm6, %v1826_v36, %v7851_v33  ;;  %v3326_v51 = vadd.f32 %v7973_v28, %v2901_v1  ;;  %v3327_v7 = vadd.f32 %v7973_v28, %v2908_v12 }
 0x1dd   : > { %v2880_v13 = vmax.f32 %v2878_v35, %v2879_v40  ;;  %v2887_v49 = vmax.f32 %v2885_v30, %v2886_v43  ;;  %v2893_v4 = vrot.slane %v2892_v55, 1  ;;  %v3322_v42 = vadd.f32 %v7973_v28, %v2873_v44  ;;  %v715_v35 = vld [vmem:[#allocation2 + $0x170] sm:$0xff] }
 0x1de   : > { %v7987_v26 = vpop.permute.xlu1 %1240  ;;  %v1892_v17 = vsel %vm1873_vm7, %v1859_v2, %v7860_v16  ;;  %1382 = vrot.lane.b32.xlu0 %v7958_v20, %s9768_s15  ;;  %v1860_v33 = vsel %vm1840_vm6, %v1827_v32, %v7858_v38  ;;  %v3328_v62 = vadd.f32 %v7973_v28, %v2915_v47  ;;  %v3329_v16 = vadd.f32 %v7973_v28, %v2922_v15 }
 0x1df   : > { %v2894_v46 = vmax.f32 %v2892_v55, %v2893_v4  ;;  %v3323_v22 = vadd.f32 %v7973_v28, %v2880_v13  ;;  %v3324_v58 = vadd.f32 %v7973_v28, %v2887_v49  ;;  %v1925_v3 = vsel %vm1906_vm8, %v1892_v17, %v7875_v5 }
 0x1e0   : > { %1508 = vrot.lane.b32.xlu1 %v714_v50, %s9770_s12  ;;  %v1623_v37 = vpop.permute.xlu0 %1622  ;;  %v3390_v45 = vmax.f32 %v3326_v51, 0.0  ;;  %v3391_v11 = vmax.f32 %v3327_v7, 0.0  ;;  %v3386_v6 = vmax.f32 %v3322_v42, 0.0  ;;  %v1958_v38 = vsel %vm1939_vm9, %v1925_v3, %v7917_v19 }
 0x1e1   : > { %v3325_v14 = vadd.f32 %v7973_v28, %v2894_v46  ;;  %v3387_v29 = vmax.f32 %v3323_v22, 0.0  ;;  %v3388_v53 = vmax.f32 %v3324_v58, 0.0  ;;  %v1991_v10 = vsel %vm1972_vm10, %v1958_v38, %v7950_v59  ;;  %v778_v46 = vld [vmem:[#allocation2 + $0x16a] sm:$0xff] }
 0x1e2   : > { %v1749_v52 = vpop.permute.xlu1 %1748  ;;  %1002 = vrot.lane.b32.xlu0 %v7958_v20, %s9769_s29  ;;  %v1893_v39 = vsel %vm1873_vm7, %v1860_v33, %v7873_v48  ;;  %v3392_v31 = vmax.f32 %v3328_v62, 0.0  ;;  %v2024_v34 = vsel %vm2005_vm11, %v1991_v10, %v1621_v60  ;;  %v3393_v19 = vmax.f32 %v3329_v16, 0.0  ;;  %v746_v20 = vld [vmem:[#allocation2 + $0x169] sm:$0xff] }
 0x1e3   : > { %v3389_v5 = vmax.f32 %v3325_v14, 0.0  ;;  %v3540_v27 = vrot.slane %v3387_v29, 7  ;;  %v3543_v25 = vrot.slane %v3388_v53, 6  ;;  %v2057_v1 = vsel %vm2038_vm12, %v2024_v34, %v1749_v52  ;;  %v779_v53 = vld [vmem:[#allocation2 + $0x172] sm:$0xff] }
 0x1e4   : > { %1128 = vrot.lane.b32.xlu1 %v714_v50, %s6842_s22  ;;  %v8020_v59 = vpop.permute.xlu0 %860  ;;  %v1926_v48 = vsel %vm1906_vm8, %v1893_v39, %v7899_v63  ;;  %v3549_v24 = vrot.slane %v3390_v45, 4  ;;  %2090 = vst.msk [vmem:[#allocation3 + $0x90] sm:$0xff] %vm2071_vm13, %v2057_v1  ;;  %v3552_v44 = vrot.slane %v3391_v11, 3  ;;  %v3555_v36 = vrot.slane %v3392_v31, 2  ;;  %v6757_v45 = vld [vmem:[#allocation2 + $0xf0] sm:$0xff] }
 0x1e5   : > { %v3542_v30 = vsel %vm9751_vm2, %v3540_v27, %v3386_v6  ;;  %v3546_v23 = vrot.slane %v3389_v5, 5  ;;  %vm9755_vm2 = vcmask 1046534   ;;  %v1959_v43 = vsel %vm1939_vm9, %v1926_v48, %v7948_v61  ;;  %v748_v48 = vld [vmem:[#allocation2 + $0x181] sm:$0xff] }
 0x1e6   : > { %v8022_v12 = vpop.permute.xlu1 %1242  ;;  %v3545_v60 = vsel %vm3544_vm3, %v3543_v25, %v3542_v30  ;;  %1510 = vrot.lane.b32.xlu0 %v715_v35, %s9770_s12  ;;  %vm9754_vm15 = vcmask 1047559   ;;  %v1992_v32 = vsel %vm1972_vm10, %v1959_v43, %v7968_v41  ;;  %v3558_v15 = vrot.slane %v3393_v19, 1  ;;  %v747_v41 = vld [vmem:[#allocation2 + $0x171] sm:$0xff]  ;;  %v716_v25 = vld [vmem:[#allocation2 + $0x180] sm:$0xff]  ;;  %v717_v30 = vld [vmem:[#allocation2 + $0x188] sm:$0xff] }
 0x1e7   : > { %v3548_v40 = vsel %vm9760_vm4, %v3546_v23, %v3545_v60  ;;  %v8031_v55 = vpop.f32.mrb[4].mxu0  ;;  %v2025_v61 = vsel %vm2005_vm11, %v1992_v32, %v1623_v37  ;;  %v1828_v11 = vsel %vm416_vm0, %v6757_v45, %v7897_v21 }
 0x1e8   : > { %v3551_v63 = vsel %vm9757_vm5, %v3549_v24, %v3548_v40  ;;  %1636 = vrot.lane.b32.xlu1 %v746_v20, %s6846_s30  ;;  %v8038_v47 = vpop.f32.mrb[5].mxu0  ;;  %v1369_v49 = vpop.permute.xlu0 %1368  ;;  %v1861_v6 = vsel %vm1840_vm6, %v1828_v11, %v7935_v57 }
 0x1e9   : > { %v3554_v13 = vsel %vm9756_vm1, %v3552_v44, %v3551_v63  ;;  %v1894_v38 = vsel %vm1873_vm7, %v1861_v6, %v7962_v18  ;;  %v2472_v43 = vsel %vm9753_vm14, %v8038_v47, -inf }
 0x1ea   : > { %v1751_v4 = vpop.permute.xlu1 %1750  ;;  %v3557_v50 = vsel %vm9755_vm2, %v3555_v36, %v3554_v13  ;;  %1130 = vrot.lane.b32.xlu0 %v715_v35, %s6842_s22  ;;  %v1927_v10 = vsel %vm1906_vm8, %v1894_v38, %v7987_v26  ;;  %v6758_v35 = vld [vmem:[#allocation2 + $0xf8] sm:$0xff] }
 0x1eb   : > { %v2058_v2 = vsel %vm2038_vm12, %v2025_v61, %v1751_v4  ;;  %v3560_v51 = vsel %vm9754_vm15, %v3558_v15, %v3557_v50  ;;  %v2122_v7 = vld [vmem:[#allocation3 + $0x90] sm:$0xff]  ;;  %v1960_v21 = vsel %vm1939_vm9, %v1927_v10, %v1369_v49  ;;  %v1829_v19 = vsel %vm416_vm0, %v6758_v35, %v7933_v54 }
 0x1ec   : > { %2091 = vst.msk [vmem:[#allocation3 + $0x98] sm:$0xff] %vm2071_vm13, %v2058_v2  ;;  %1256 = vrot.lane.b32.xlu1 %v746_v20, %s6843_s24  ;;  %v8049_v42 = vpop.permute.xlu0 %862  ;;  %6311 = vmatprep.mubr.msk.f32.mxu0 %vm2071_vm13, %v2122_v7  ;;  %v1862_v26 = vsel %vm1840_vm6, %v1829_v19, %v7960_v8  ;;  %v2475_v8 = vsel %vm9753_vm14, %v8031_v55, -inf  ;;  %v749_v2 = vld [vmem:[#allocation2 + $0x189] sm:$0xff] }
 0x1ed   : > { %3668 = vst.msk [vmem:[#allocation4 + $0x11] sm:$0xff] %vm9753_vm14, %v3560_v51  ;;  %v1895_v23 = vsel %vm1873_vm7, %v1862_v26, %v7985_v9 }
 0x1ee   : > { %v8051_v17 = vpop.permute.xlu1 %988  ;;  %1638 = vrot.lane.b32.xlu0 %v747_v41, %s6846_s30  ;;  %v1928_v54 = vsel %vm1906_vm8, %v1895_v23, %v8022_v12 }
 0x1f0   : > { %1764 = vrot.lane.b32.xlu1 %v778_v46, %s6847_s16  ;;  %v1371_v22 = vpop.permute.xlu0 %1370 }
 0x1f1   : > { %v1961_v24 = vsel %vm1939_vm9, %v1928_v54, %v1371_v22 }
 0x1f2   : > { %v1497_v58 = vpop.permute.xlu1 %1496  ;;  %876 = vrot.lane.b32.xlu0 %v746_v20, %s9767_s25 }
 0x1f3   : > { %v2123_v33 = vld [vmem:[#allocation3 + $0x98] sm:$0xff]  ;;  %v1993_v39 = vsel %vm1972_vm10, %v1960_v21, %v1497_v58 }
 0x1f4   : > { %6312 = vmatmul.mubr.msk.f32.gmra.mrb[18].mxu0 %vm2071_vm13, %v2123_v33  ;;  %v8058_v3 = vld [vmem:[#allocation4 + $0x10] sm:$0xff]  ;;  %1258 = vrot.lane.b32.xlu1 %v747_v41, %s6843_s24  ;;  %v8064_v14 = vpop.permute.xlu0 %990 }
 0x1f5   : > { %v3742_v62 = vld [vmem:[#allocation4 + $0x12] sm:$0xff]  ;;  %3685 = vst.msk [vmem:[#allocation5 + $0x28] sm:$0xff] %vm9753_vm14, %v8058_v3 }
 0x1f6   : > { %3750 = vst.msk [vmem:[#allocation5 + $0x30] sm:$0xff] %vm9753_vm14, %v3742_v62  ;;  %v3805_v16 = vld [vmem:[#allocation4 + $0x11] sm:$0xff]  ;;  %v8066_v29 = vpop.permute.xlu1 %1116  ;;  %1384 = vrot.lane.b32.xlu0 %v778_v46, %s9768_s15 }
 0x1f7   : > { %3813 = vst.msk [vmem:[#allocation5 + $0x10] sm:$0xff] %vm9753_vm14, %v3805_v16  ;;  %v780_v58 = vld [vmem:[#allocation2 + $0x182] sm:$0xff] }
 0x1f8   : > { %1766 = vrot.lane.b32.xlu1 %v779_v53, %s6847_s16  ;;  %v1499_v37 = vpop.permute.xlu0 %1498 }
 0x1f9   : > { %v1994_v44 = vsel %vm1972_vm10, %v1961_v24, %v1499_v37 }
 0x1fa   : > { %v1625_v52 = vpop.permute.xlu1 %1624  ;;  %878 = vrot.lane.b32.xlu0 %v747_v41, %s9767_s25 }
 0x1fb   : > { %v2026_v57 = vsel %vm2005_vm11, %v1993_v39, %v1625_v52 }
 0x1fc   : > { %1004 = vrot.lane.b32.xlu1 %v778_v46, %s9769_s29  ;;  %v8079_v5 = vpop.permute.xlu0 %1118 }
 0x1fe   : > { %v8081_v27 = vpop.permute.xlu1 %1244  ;;  %1386 = vrot.lane.b32.xlu0 %v779_v53, %s9768_s15 }
 0x200   : > { %1512 = vrot.lane.b32.xlu1 %v716_v25, %s9770_s12  ;;  %v1627_v31 = vpop.permute.xlu0 %1626 }
 0x201   : > { %v2027_v12 = vsel %vm2005_vm11, %v1994_v44, %v1627_v31 }
 0x202   : > { %v1753_v18 = vpop.permute.xlu1 %1752  ;;  %1006 = vrot.lane.b32.xlu0 %v779_v53, %s9769_s29 }
 0x203   : > { %v2059_v34 = vsel %vm2038_vm12, %v2026_v57, %v1753_v18 }
 0x204   : > { %2092 = vst.msk [vmem:[#allocation3 + $0xa0] sm:$0xff] %vm2071_vm13, %v2059_v34  ;;  %1132 = vrot.lane.b32.xlu1 %v716_v25, %s6842_s22  ;;  %v8100_v1 = vpop.permute.xlu0 %864 }
 0x206   : > { %v8102_v20 = vpop.permute.xlu1 %1246  ;;  %1514 = vrot.lane.b32.xlu0 %v717_v30, %s9770_s12 }
 0x207   : > { %v6295_v60 = vpop.f32.mrb[6].mxu0 }
 0x208   : > { %v2476_v9 = vsel %vm9753_vm14, %v6295_v60, -inf  ;;  %1640 = vrot.lane.b32.xlu1 %v748_v48, %s6846_s30  ;;  %v2336_v40 = vpop.f32.mrb[7].mxu0  ;;  %v8117_v32 = vpop.permute.xlu0 %1372 }
 0x209   : > { %v2477_v36 = vmax.f32 %v2475_v8, %v2476_v9  ;;  %v2473_v63 = vsel %vm9753_vm14, %v2336_v40, -inf  ;;  %vm9771_vm14 = vcmask 517120  }
 0x20a   : > { %v1755_v15 = vpop.permute.xlu1 %1754  ;;  %v2474_v13 = vmax.f32 %v2472_v43, %v2473_v63  ;;  %1134 = vrot.lane.b32.xlu0 %v717_v30, %s6842_s22  ;;  %vm9772_vm15 = vmmov %vm9771_vm14  ;;  %v781_v43 = vld [vmem:[#allocation2 + $0x18a] sm:$0xff]  ;;  %s5934_s22 = sshll.u32 %s6935_s21, 4  ;;  %s6853_s21 = smov [#allocation10]  }
 0x20b   : > { %v2060_v55 = vsel %vm2038_vm12, %v2027_v12, %v1755_v15  ;;  %v2124_v61 = vld [vmem:[#allocation3 + $0xa0] sm:$0xff]  ;;  %v2581_v49 = vcombine.high %v2477_v36, %v2477_v36  ;;  %v2588_v4 = vrot.slane %v2477_v36, %v7904_v56  ;;  %vm9773_vm2 = vmmov %vm9771_vm14  ;;  %s6779_s1 = sshll.u32 %s6853_s21, 4  ;;  %s6780_s1 = int_to_ptr.vmem [resolvable:$false] %s6779_s1 }
 0x20c   : > { %2093 = vst.msk [vmem:[#allocation3 + $0xa8] sm:$0xff] %vm2071_vm13, %v2060_v55  ;;  %6314 = vmatprep.mubr.msk.f32.mxu0 %vm2071_vm13, %v2124_v61  ;;  %v2564_v47 = vcombine.high %v2474_v13, %v2474_v13  ;;  %v2571_v50 = vrot.slane %v2474_v13, %v7904_v56  ;;  %1260 = vrot.lane.b32.xlu1 %v748_v48, %s6843_s24  ;;  %v8128_v46 = vpop.permute.xlu0 %866  ;;  %vm9774_vm1 = vmmov %vm9773_vm2  ;;  %s6781_s0 = scalar_lea.vmem %s6780_s1, 32 }
 0x20d   : > { %v2595_v51 = vrot.slane %v2581_v49, %v7904_v56  ;;  %v2596_v41 = vcombine.high %v2588_v4, %v2588_v4  ;;  %v2951_v7 = vsel %vm9771_vm14, %v2588_v4, -inf  ;;  %vm9775_vm14 = vmmov %vm9774_vm1 }
 0x20e   : > { %v8130_v22 = vpop.permute.xlu1 %992  ;;  %v2952_v33 = vrot.slane %v2951_v7, 4  ;;  %v2578_v62 = vrot.slane %v2564_v47, %v7904_v56  ;;  %v2579_v16 = vcombine.high %v2571_v50, %v2571_v50  ;;  %v2923_v53 = vsel %vm9772_vm15, %v2571_v50, -inf  ;;  %1642 = vrot.lane.b32.xlu0 %v749_v2, %s6846_s30  ;;  %vm9776_vm5 = vmmov %vm9774_vm1 }
 0x20f   : > { %v2597_v37 = vcombine.high %v2595_v51, %v2595_v51  ;;  %v2958_v52 = vsel %vm9773_vm2, %v2596_v41, -inf  ;;  %v2965_v45 = vsel %vm9774_vm1, %v2595_v51, -inf  ;;  %v2924_v11 = vrot.slane %v2923_v53, 4  ;;  %vm9777_vm15 = vmmov %vm9774_vm1 }
 0x210   : > { %v2953_v6 = vmax.f32 %v2951_v7, %v2952_v33  ;;  %v2959_v38 = vrot.slane %v2958_v52, 4  ;;  %v2966_v25 = vrot.slane %v2965_v45, 4  ;;  %v2580_v10 = vcombine.high %v2578_v62, %v2578_v62  ;;  %1768 = vrot.lane.b32.xlu1 %v780_v58, %s6847_s16  ;;  %v8141_v18 = vpop.permute.xlu0 %1374 }
 0x211   : > { %v2972_v21 = vsel %vm9775_vm14, %v2597_v37, -inf  ;;  %v2925_v39 = vmax.f32 %v2923_v53, %v2924_v11  ;;  %v2930_v57 = vsel %vm9776_vm5, %v2579_v16, -inf  ;;  %v2937_v31 = vsel %vm9777_vm15, %v2578_v62, -inf  ;;  %v718_v62 = vld [vmem:[#allocation2 + $0x198] sm:$0xff] }
 0x212   : > { %v8143_v34 = vpop.permute.xlu1 %1500  ;;  %v2954_v35 = vrot.slane %v2953_v6, 2  ;;  %v2960_v19 = vmax.f32 %v2958_v52, %v2959_v38  ;;  %v2967_v26 = vmax.f32 %v2965_v45, %v2966_v25  ;;  %v2973_v30 = vrot.slane %v2972_v21, 4  ;;  %1262 = vrot.lane.b32.xlu0 %v749_v2, %s6843_s24 }
 0x213   : > { %v2125_v23 = vld [vmem:[#allocation3 + $0xa8] sm:$0xff]  ;;  %v2926_v48 = vrot.slane %v2925_v39, 2  ;;  %v2931_v54 = vrot.slane %v2930_v57, 4  ;;  %v2938_v24 = vrot.slane %v2937_v31, 4  ;;  %v2944_v60 = vsel %vm9774_vm1, %v2580_v10, -inf }
 0x214   : > { %6315 = vmatmul.mubr.msk.f32.gmra.mrb[20].mxu0 %vm2071_vm13, %v2125_v23  ;;  %v2955_v8 = vmax.f32 %v2953_v6, %v2954_v35  ;;  %v2961_v44 = vrot.slane %v2960_v19, 2  ;;  %v2968_v9 = vrot.slane %v2967_v26, 2  ;;  %v2974_v40 = vmax.f32 %v2972_v21, %v2973_v30  ;;  %1388 = vrot.lane.b32.xlu1 %v780_v58, %s9768_s15  ;;  %v8149_v13 = vpop.permute.xlu0 %994  ;;  %v719_v6 = vld [vmem:[#allocation2 + $0x1a0] sm:$0xff] }
 0x215   : > { %v2927_v12 = vmax.f32 %v2925_v39, %v2926_v48  ;;  %v2932_v36 = vmax.f32 %v2930_v57, %v2931_v54  ;;  %v2939_v63 = vmax.f32 %v2937_v31, %v2938_v24  ;;  %v2945_v15 = vrot.slane %v2944_v60, 4  ;;  %v6759_v39 = vld [vmem:[#allocation2 + $0x108] sm:$0xff]  ;;  %v750_v54 = vld [vmem:[#allocation2 + $0x199] sm:$0xff] }
 0x216   : > { %v8151_v55 = vpop.permute.xlu1 %1120  ;;  %v2956_v61 = vrot.slane %v2955_v8, 1  ;;  %v2962_v49 = vmax.f32 %v2960_v19, %v2961_v44  ;;  %v2969_v4 = vmax.f32 %v2967_v26, %v2968_v9  ;;  %v2975_v47 = vrot.slane %v2974_v40, 2  ;;  %1770 = vrot.lane.b32.xlu0 %v781_v43, %s6847_s16  ;;  %v6760_v26 = vld [vmem:[#allocation2 + $0x110] sm:$0xff] }
 0x217   : > { %v2928_v50 = vrot.slane %v2927_v12, 1  ;;  %v2933_v2 = vrot.slane %v2932_v36, 2  ;;  %v2940_v51 = vrot.slane %v2939_v63, 2  ;;  %v2946_v41 = vmax.f32 %v2944_v60, %v2945_v15 }
 0x218   : > { %v2963_v7 = vrot.slane %v2962_v49, 1  ;;  %v2970_v58 = vrot.slane %v2969_v4, 1  ;;  %v2976_v33 = vmax.f32 %v2974_v40, %v2975_v47  ;;  %1390 = vrot.lane.b32.xlu1 %v781_v43, %s9768_s15  ;;  %v2957_v16 = vmax.f32 %v2955_v8, %v2956_v61  ;;  %v8155_v45 = vpop.permute.xlu0 %1502  ;;  %v751_v40 = vld [vmem:[#allocation2 + $0x1a1] sm:$0xff]  ;;  %s9758_s15 = smov 64  }
 0x219   : > { %v2934_v53 = vmax.f32 %v2932_v36, %v2933_v2  ;;  %v2941_v37 = vmax.f32 %v2939_v63, %v2940_v51  ;;  %v2947_v52 = vrot.slane %v2946_v41, 2  ;;  %v2929_v21 = vmax.f32 %v2927_v12, %v2928_v50  ;;  %v782_v47 = vld [vmem:[#allocation2 + $0x19a] sm:$0xff] }
 0x21a   : > { %v1629_v11 = vpop.permute.xlu1 %1628  ;;  %v2964_v38 = vmax.f32 %v2962_v49, %v2963_v7  ;;  %v2971_v25 = vmax.f32 %v2969_v4, %v2970_v58  ;;  %v2977_v10 = vrot.slane %v2976_v33, 1  ;;  %v1830_v57 = vsel %vm416_vm0, %v6759_v39, %v8020_v59  ;;  %1516 = vrot.lane.b32.xlu0 %v718_v62, %s9770_s12  ;;  %v783_v58 = vld [vmem:[#allocation2 + $0x1a2] sm:$0xff]  ;;  %v3692_v39 = vld [vmem:[#allocation4 + $0x1] sm:$0xff] }
 0x21b   : > { %v2935_v31 = vrot.slane %v2934_v53, 1  ;;  %v2942_v35 = vrot.slane %v2941_v37, 1  ;;  %v2948_v19 = vmax.f32 %v2946_v41, %v2947_v52  ;;  %v1831_v30 = vsel %vm416_vm0, %v6760_v26, %v8049_v42 }
 0x21c   : > { %v1863_v23 = vsel %vm1840_vm6, %v1830_v57, %v8051_v17  ;;  %v2978_v48 = vmax.f32 %v2976_v33, %v2977_v10  ;;  %1518 = vrot.lane.b32.xlu1 %v719_v6, %s9770_s12  ;;  %v1864_v24 = vsel %vm1840_vm6, %v1831_v30, %v8064_v14  ;;  %v8167_v44 = vpop.permute.xlu0 %1122  ;;  %v3334_v42 = vadd.f32 %v7973_v28, %v2957_v16  ;;  %v3990_v6 = vld [vmem:[%s9733_s3] sm:$0xff]  ;;  %v4009_v57 = vld [vmem:[%s9733_s3 + $0x98] sm:$0xff]  ;;  %v3992_v30 = vld [vmem:[%s9733_s3 + $0x10] sm:$0xff]  ;;  %s9688_s12 = scalar_lea.hbm %s9741_s11, %s5934_s22 }
 0x21d   : > { %v2936_v59 = vmax.f32 %v2934_v53, %v2935_v31  ;;  %v2943_v60 = vmax.f32 %v2941_v37, %v2942_v35  ;;  %v2949_v8 = vrot.slane %v2948_v19, 1  ;;  %v3335_v43 = vadd.f32 %v7973_v28, %v2964_v38  ;;  %v3991_v38 = vld [vmem:[%s9733_s3 + $0x8] sm:$0xff] }
 0x21e   : > { %v8169_v9 = vpop.permute.xlu1 %1248  ;;  %v3336_v17 = vadd.f32 %v7973_v28, %v2971_v25  ;;  %v3330_v12 = vadd.f32 %v7973_v28, %v2929_v21  ;;  %v1896_v36 = vsel %vm1873_vm7, %v1863_v23, %v8066_v29  ;;  %1644 = vrot.lane.b32.xlu0 %v750_v54, %s6846_s30  ;;  %v1897_v61 = vsel %vm1873_vm7, %v1864_v24, %v8079_v5  ;;  %v3993_v23 = vld [vmem:[%s9733_s3 + $0x18] sm:$0xff] }
 0x21f   : > { %v2950_v14 = vmax.f32 %v2948_v19, %v2949_v8  ;;  %v3331_v63 = vadd.f32 %v7973_v28, %v2936_v59  ;;  %v3332_v15 = vadd.f32 %v7973_v28, %v2943_v60  ;;  %v1929_v49 = vsel %vm1906_vm8, %v1896_v36, %v8081_v27  ;;  %v4006_v27 = vld [vmem:[%s9733_s3 + $0x80] sm:$0xff]  ;;  %v4011_v8 = vld [vmem:[%s9733_s3 + $0xa8] sm:$0xff] }
 0x220   : > { %v3337_v4 = vadd.f32 %v7973_v28, %v2978_v48  ;;  %1646 = vrot.lane.b32.xlu1 %v751_v40, %s6846_s30  ;;  %v1962_v51 = vsel %vm1939_vm9, %v1929_v49, %v8117_v32  ;;  %v1631_v41 = vpop.permute.xlu0 %1630  ;;  %v3398_v33 = vmax.f32 %v3334_v42, 0.0  ;;  %v3399_v5 = vmax.f32 %v3335_v43, 0.0  ;;  %v4010_v48 = vld [vmem:[%s9733_s3 + $0xa0] sm:$0xff]  ;;  %v4055_v42 = vld [vmem:[%s9733_s3 + $0x208] sm:$0xff] }
 0x221   : > { %v3333_v29 = vadd.f32 %v7973_v28, %v2950_v14  ;;  %v3395_v50 = vmax.f32 %v3331_v63, 0.0  ;;  %v3396_v2 = vmax.f32 %v3332_v15, 0.0  ;;  %v3400_v62 = vmax.f32 %v3336_v17, 0.0  ;;  %v4007_v28 = vld [vmem:[%s9733_s3 + $0x88] sm:$0xff]  ;;  %v4054_v40 = vld [vmem:[%s9733_s3 + $0x200] sm:$0xff] }
 0x222   : > { %v1757_v7 = vpop.permute.xlu1 %1756  ;;  %v3394_v16 = vmax.f32 %v3330_v12, 0.0  ;;  %v1995_v32 = vsel %vm1972_vm10, %v1962_v51, %v8143_v34  ;;  %1772 = vrot.lane.b32.xlu0 %v782_v47, %s6847_s16  ;;  %v1930_v25 = vsel %vm1906_vm8, %v1897_v61, %v8102_v20  ;;  %v3401_v10 = vmax.f32 %v3337_v4, 0.0  ;;  %v4008_v34 = vld [vmem:[%s9733_s3 + $0x90] sm:$0xff]  ;;  %v3994_v51 = vld [vmem:[%s9733_s3 + $0x20] sm:$0xff] }
 0x223   : > { %v3397_v53 = vmax.f32 %v3333_v29, 0.0  ;;  %v3561_v37 = vrot.slane %v3395_v50, 7  ;;  %v3563_v52 = vrot.slane %v3396_v2, 6  ;;  %v2028_v21 = vsel %vm2005_vm11, %v1995_v32, %v1629_v11  ;;  %v4056_v4 = vld [vmem:[%s9733_s3 + $0x210] sm:$0xff] }
 0x224   : > { %1774 = vrot.lane.b32.xlu1 %v783_v58, %s6847_s16  ;;  %vm9778_vm2 = vcmask 1041409   ;;  %v2061_v19 = vsel %vm2038_vm12, %v2028_v21, %v1757_v7  ;;  %v8216_v20 = vpop.permute.xlu0 %868  ;;  %v6427_v11 = vpack.c.bf16 %v4007_v28, %v4006_v27  ;;  %v3567_v54 = vrot.slane %v3398_v33, 4  ;;  %v3995_v7 = vld [vmem:[%s9733_s3 + $0x28] sm:$0xff]  ;;  %s9786_s16 = smov 64  }
 0x225   : > { %v3562_v31 = vsel %vm9778_vm2, %v3561_v37, %v3394_v16  ;;  %v3565_v35 = vrot.slane %v3397_v53, 5  ;;  %v3569_v24 = vrot.slane %v3399_v5, 3  ;;  %2094 = vst.msk [vmem:[#allocation3 + $0xb0] sm:$0xff] %vm2071_vm13, %v2061_v19  ;;  %v6429_v60 = vpack.c.bf16 %v3991_v38, %v3990_v6  ;;  %v3741_v16 = vld [vmem:[#allocation4 + $0x2] sm:$0xff]  ;;  %v3693_v28 = vld [vmem:[#allocation4 + $0x11] sm:$0xff] }
 0x226   : > { %v8218_v26 = vpop.permute.xlu1 %1250  ;;  %v3564_v59 = vsel %vm3544_vm3, %v3563_v52, %v3562_v31  ;;  %v3571_v43 = vrot.slane %v3400_v62, 2  ;;  %v1963_v12 = vsel %vm1939_vm9, %v1930_v25, %v8141_v18  ;;  %3773 = vrot.lane.b32.xlu0 %v8058_v3, %s9758_s15  ;;  %6428 = vmatprep.subr.bf16.mxu1 %v6427_v11  ;;  %v6431_v14 = vpack.c.bf16 %v4009_v57, %v4008_v34  ;;  %v4057_v3 = vld [vmem:[%s9733_s3 + $0x218] sm:$0xff]  ;;  %v4058_v37 = vld [vmem:[%s9733_s3 + $0x220] sm:$0xff]  ;;  %v4059_v52 = vld [vmem:[%s9733_s3 + $0x228] sm:$0xff] }
 0x227   : > { %v3566_v17 = vsel %vm9760_vm4, %v3565_v35, %v3564_v59  ;;  %v8243_v36 = vpop.f32.mrb[8].mxu0  ;;  %v3573_v63 = vrot.slane %v3401_v10, 1  ;;  %vm9779_vm5 = vcmask 1044484   ;;  %v1996_v61 = vsel %vm1972_vm10, %v1963_v12, %v8155_v45  ;;  %6430 = vmatpush3.bf16.msra.mxu1 %v6429_v60  ;;  %v4013_v62 = vld [vmem:[%s9733_s3 + $0xb8] sm:$0xff]  ;;  %v3676_v6 = vld [vmem:[#allocation4] sm:$0xff]  ;;  %v4014_v57 = vld [vmem:[%s9733_s3 + $0xc0] sm:$0xff] }
 0x228   : > { %v3568_v15 = vsel %vm9779_vm5, %v3567_v54, %v3566_v17  ;;  %3708 = vrot.lane.b32.xlu1 %v3692_v39, %s9758_s15  ;;  %v8251_v49 = vpop.f32.mrb[9].mxu0  ;;  %v6433_v18 = vpack.c.bf16 %v3993_v23, %v3992_v30  ;;  %vm9780_vm14 = vcmask 1045509   ;;  %v2029_v29 = vsel %vm2005_vm11, %v1996_v61, %v1631_v41  ;;  %v8261_v50 = vpop.permute.xlu0 %1376  ;;  %6432 = vmatprep.subr.bf16.mxu1 %v6431_v14  ;;  %v4012_v41 = vld [vmem:[%s9733_s3 + $0xb0] sm:$0xff]  ;;  %v3997_v34 = vld [vmem:[%s9733_s3 + $0x38] sm:$0xff]  ;;  %v4015_v35 = vld [vmem:[%s9733_s3 + $0xc8] sm:$0xff] }
 0x229   : > { %v3570_v47 = vsel %vm9780_vm14, %v3569_v24, %v3568_v15  ;;  %v6435_v2 = vpack.c.bf16 %v4011_v8, %v4010_v48  ;;  %v6491_v58 = vpack.c.bf16 %v4055_v42, %v4054_v40  ;;  %vm9781_vm15 = vcmask 1046534   ;;  %v3996_v39 = vld [vmem:[%s9733_s3 + $0x30] sm:$0xff]  ;;  %v4061_v11 = vld [vmem:[%s9733_s3 + $0x238] sm:$0xff]  ;;  %v3998_v54 = vld [vmem:[%s9733_s3 + $0x40] sm:$0xff] }
 0x22a   : > { %v1759_v45 = vpop.permute.xlu1 %1758  ;;  %v3572_v33 = vsel %vm9781_vm15, %v3571_v43, %v3570_v47  ;;  %vm9782_vm1 = vcmask 1047559   ;;  %v6495_v53 = vpack.c.bf16 %v4057_v3, %v4056_v4  ;;  %vm9783_vm2 = vcmask 523264   ;;  %v4060_v19 = vld [vmem:[%s9733_s3 + $0x230] sm:$0xff]  ;;  %v3999_v24 = vld [vmem:[%s9733_s3 + $0x48] sm:$0xff]  ;;  %v4017_v40 = vld [vmem:[%s9733_s3 + $0xd8] sm:$0xff] }
 0x22b   : > { %v2062_v5 = vsel %vm2038_vm12, %v2029_v29, %v1759_v45  ;;  %v3574_v27 = vsel %vm9782_vm1, %v3573_v63, %v3572_v33  ;;  %6492 = vmatprep.subr.bf16.mxu0 %v6491_v58  ;;  %3749 = vst.msk [vmem:[#allocation5 + $0x8] sm:$0xff] %vm9783_vm2, %v3741_v16  ;;  %vm9784_vm5 = vmmov %vm9783_vm2  ;;  %6434 = vmatpush3.bf16.msra.mxu1 %v6433_v18  ;;  %v4016_v8 = vld [vmem:[%s9733_s3 + $0xd0] sm:$0xff]  ;;  %v4001_v47 = vld [vmem:[%s9733_s3 + $0x58] sm:$0xff] }
 0x22c   : > { %2095 = vst.msk [vmem:[#allocation3 + $0xb8] sm:$0xff] %vm2071_vm13, %v2062_v5  ;;  %3710 = vrot.lane.b32.xlu1 %v3693_v28, %s9758_s15  ;;  %v6437_v32 = vpack.c.bf16 %v3995_v7, %v3994_v51  ;;  %v2126_v38 = vld [vmem:[#allocation3 + $0xb0] sm:$0xff]  ;;  %v8288_v25 = vpop.permute.xlu0 %870  ;;  %6436 = vmatprep.subr.bf16.mxu1 %v6435_v2  ;;  %v6439_v21 = vpack.c.bf16 %v4013_v62, %v4012_v41  ;;  %vm9785_vm14 = vmmov %vm9783_vm2  ;;  %v4000_v3 = vld [vmem:[%s9733_s3 + $0x50] sm:$0xff]  ;;  %s377_s15 = sand.u32 1, %s6829_s18  }
 0x22d   : > { %3669 = vst.msk [vmem:[#allocation4 + $0x21] sm:$0xff] %vm9784_vm5, %v3574_v27  ;;  %6494 = vmatpush3.bf16.msra.mxu0 %v6491_v58  ;;  %6317 = vmatprep.mubr.msk.f32.mxu0 %vm2071_vm13, %v2126_v38  ;;  %v6499_v31 = vpack.c.bf16 %v4059_v52, %v4058_v37  ;;  %v6441_v48 = vpack.c.bf16 %v3997_v34, %v3996_v39  ;;  %vm9787_vm15 = vmmov %vm9783_vm2  ;;  %v4018_v29 = vld [vmem:[%s9733_s3 + $0xe0] sm:$0xff]  ;;  %v4019_v45 = vld [vmem:[%s9733_s3 + $0xe8] sm:$0xff]  ;;  %s378_s24 = scalar_lea.vmem [#allocation10], %s377_s15  ;;  %s5813_s14 = scalar_lea.sflag [#allocation11], %s377_s15 }
 0x22e   : > { %v8290_v10 = vpop.permute.xlu1 %996  ;;  %3684 = vst.msk [vmem:[#allocation5] sm:$0xff] %vm9785_vm14, %v3676_v6  ;;  %6496 = vmatprep.subr.bf16.mxu0 %v6495_v53  ;;  %v6443_v60 = vpack.c.bf16 %v4015_v35, %v4014_v57  ;;  %v6503_v42 = vpack.c.bf16 %v4061_v11, %v4060_v19  ;;  %vm9788_vm1 = vmmov %vm9783_vm2  ;;  %v6445_v18 = vpack.c.bf16 %v3999_v24, %v3998_v54  ;;  %v4002_v33 = vld [vmem:[%s9733_s3 + $0x60] sm:$0xff]  ;;  %v4003_v5 = vld [vmem:[%s9733_s3 + $0x68] sm:$0xff]  ;;  %s5825_s30 = sshll.u32 %s378_s24, 4  ;;  %s9690_s30 = int_to_ptr.vmem [resolvable:$true] %s5825_s30 }
 0x22f   : > { %6438 = vmatpush3.bf16.msra.mxu1 %v6437_v32  ;;  %vm9789_vm2 = vmmov %vm9788_vm1  ;;  %v6447_v4 = vpack.c.bf16 %v4017_v40, %v4016_v8  ;;  %v6449_v7 = vpack.c.bf16 %v4001_v47, %v4000_v3  ;;  %v6451_v58 = vpack.c.bf16 %v4019_v45, %v4018_v29  ;;  %v6761_v41 = vld [vmem:[#allocation2 + $0x120] sm:$0xff]  ;;  %v4020_v16 = vld [vmem:[%s9733_s3 + $0xf0] sm:$0xff]  ;;  %s6775_s13 = scalar_lea.vmem %s9690_s30, 16  ;;  %p6782_p0 = scmp.lt.s32.totalorder %s9690_s30, %s6780_s1 }
 0x230   : > { %v8312_v30 = vpop.permute.xlu0 %1378  ;;  %6440 = vmatprep.subr.bf16.mxu1 %v6439_v21  ;;  %vm9790_vm5 = vmmov %vm9788_vm1  ;;  %v1832_v62 = vsel %vm416_vm0, %v6761_v41, %v8100_v1  ;;  %v4021_v27 = vld [vmem:[%s9733_s3 + $0xf8] sm:$0xff]  ;;  %v6453_v1 = vpack.c.bf16 %v4003_v5, %v4002_v33  ;;  %v4004_v38 = vld [vmem:[%s9733_s3 + $0x70] sm:$0xff]  ;;  %p6776_p11 = scmp.ne.s32.totalorder %s9690_s30, %s6775_s13  ;;  %p6783_p1 = scmp.lt.s32.totalorder %s6781_s0, %s6775_s13 }
 0x231   : > { %6498 = vmatpush3.bf16.msra.mxu0 %v6495_v53  ;;  %vm9791_vm14 = vmmov %vm9788_vm1  ;;  %v1865_v28 = vsel %vm1840_vm6, %v1832_v62, %v8130_v22  ;;  %v6455_v6 = vpack.c.bf16 %v4021_v27, %v4020_v16  ;;  %v4005_v22 = vld [vmem:[%s9733_s3 + $0x78] sm:$0xff]  ;;  %v520_v21 = vld [vmem:[#allocation2 + $0x128] sm:$0xff] }
 0x232   : > { %v8314_v23 = vpop.permute.xlu1 %1504  ;;  %6500 = vmatprep.subr.bf16.mxu0 %v6499_v31  ;;  %v1898_v53 = vsel %vm1873_vm7, %v1865_v28, %v8151_v55  ;;  %v1833_v19 = vsel %vm416_vm0, %v520_v21, %v8128_v46  ;;  %p6777_p12 = pnand %p6776_p11, %p6952_p5  ;;  %p6784_p2 = por %p6783_p1, %p6782_p0 }
 0x233   : > { %v2127_v59 = vld [vmem:[#allocation3 + $0xb8] sm:$0xff]  ;;  %6442 = vmatpush3.bf16.msra.mxu1 %v6441_v48  ;;  %v1931_v32 = vsel %vm1906_vm8, %v1898_v53, %v8169_v9 }
 0x234   : > { %v3758_v43 = vld [vmem:[#allocation4 + $0x20] sm:$0xff]  ;;  %6318 = vmatmul.mubr.msk.f32.gmra.mrb[22].mxu0 %vm2071_vm13, %v2127_v59  ;;  %v8336_v15 = vpop.permute.xlu0 %998  ;;  %6444 = vmatprep.subr.bf16.mxu1 %v6443_v60  ;;  %v1964_v55 = vsel %vm1939_vm9, %v1931_v32, %v8261_v50  ;;  %v1866_v50 = vsel %vm1840_vm6, %v1833_v19, %v8149_v13  ;;  %p6778_p13 = pneg %p6777_p12 }
 0x235   : > { %v3694_v17 = vld [vmem:[#allocation4 + $0x21] sm:$0xff]  ;;  %3775 = vrot.lane.b32.xlu0 %v3758_v43, %s9786_s16  ;;  %3686 = vst.msk [vmem:[#allocation5 + $0x50] sm:$0xff] %vm9788_vm1, %v3758_v43  ;;  %6502 = vmatpush3.bf16.msra.mxu0 %v6499_v31  ;;  %v1997_v39 = vsel %vm1972_vm10, %v1964_v55, %v8314_v23  ;;  %v6457_v31 = vpack.c.bf16 %v4005_v22, %v4004_v38 }
 0x236   : > { %v3934_v12 = vld [vmem:[#allocation4 + $0x22] sm:$0xff]  ;;  %3712 = vrot.lane.b32.xlu1 %v3694_v17, %s9786_s16  ;;  %v8338_v61 = vpop.permute.xlu1 %1124  ;;  %6504 = vmatprep.subr.bf16.mxu0 %v6503_v42  ;;  %v1899_v11 = vsel %vm1873_vm7, %v1866_v50, %v8167_v44  ;;  %p6785_p3 = pnand %p6784_p2, %p6778_p13 }
 0x237   : > { %3942 = vst.msk [vmem:[#allocation5 + $0x20] sm:$0xff] %vm9787_vm15, %v3934_v12  ;;  %v8334_v14 = vld [vmem:[#allocation4 + $0x21] sm:$0xff]  ;;  %6446 = vmatpush3.bf16.msra.mxu1 %v6445_v18  ;;  %v1932_v54 = vsel %vm1906_vm8, %v1899_v11, %v8218_v26  ;;  %vm9792_vm15 = vmmov %vm9788_vm1 }
 0x238   : > { %3751 = vst.msk [vmem:[#allocation5 + $0x58] sm:$0xff] %vm9789_vm2, %v3934_v12  ;;  %v3870_v63 = vld [vmem:[#allocation4 + $0x20] sm:$0xff]  ;;  %v1507_v2 = vpop.permute.xlu0 %1506  ;;  %6448 = vmatprep.subr.bf16.mxu1 %v6447_v4  ;;  %v1965_v24 = vsel %vm1939_vm9, %v1932_v54, %v8312_v30  ;;  %v2481_v59 = vsel %vm9792_vm15, %v8243_v36, -inf  ;;  %vm9793_vm2 = vmmov %vm9788_vm1 }
 0x239   : > { %3814 = vst.msk [vmem:[#allocation5 + $0x38] sm:$0xff] %vm9790_vm5, %v8334_v14  ;;  %6506 = vmatpush3.bf16.msra.mxu0 %v6503_v42  ;;  %v1998_v13 = vsel %vm1972_vm10, %v1965_v24, %v1507_v2  ;;  %v2478_v8 = vsel %vm9793_vm2, %v8251_v49, -inf  ;;  %vm9794_vm5 = vmmov %vm9788_vm1 }
 0x23a   : > { %3878 = vst.msk [vmem:[#allocation5 + $0x18] sm:$0xff] %vm9791_vm14, %v3870_v63  ;;  %v1633_v51 = vpop.permute.xlu1 %1632  ;;  %vm9795_vm14 = vcmask 517120  }
 0x23b   : > { %6450 = vmatpush3.bf16.msra.mxu1 %v6449_v7  ;;  %v2030_v34 = vsel %vm2005_vm11, %v1997_v39, %v1633_v51  ;;  %vm9796_vm15 = vmmov %vm9795_vm14 }
 0x23c   : > { %v8373_v37 = vpop.permute.xlu0 %1126  ;;  %6452 = vmatprep.subr.bf16.mxu1 %v6451_v58 }
 0x23e   : > { %v8375_v52 = vpop.permute.xlu1 %1252 }
 0x23f   : > { %6454 = vmatpush3.bf16.msra.mxu1 %v6453_v1 }
 0x240   : > { %v1635_v9 = vpop.permute.xlu0 %1634  ;;  %6456 = vmatprep.subr.bf16.mxu1 %v6455_v6 }
 0x241   : > { %v2031_v40 = vsel %vm2005_vm11, %v1998_v13, %v1635_v9 }
 0x242   : > { %v1761_v57 = vpop.permute.xlu1 %1760 }
 0x243   : > { %v2063_v35 = vsel %vm2038_vm12, %v2030_v34, %v1761_v57  ;;  %6458 = vmatpush3.bf16.msra.mxu1 %v6457_v31 }
 0x244   : > { %2096 = vst.msk [vmem:[#allocation3 + $0xc0] sm:$0xff] %vm2071_vm13, %v2063_v35  ;;  %v8398_v23 = vpop.permute.xlu0 %872 }
 0x246   : > { %v8400_v48 = vpop.permute.xlu1 %1254 }
 0x247   : > { %v6301_v46 = vpop.f32.mrb[10].mxu0 }
 0x248   : > { %v2482_v60 = vsel %vm9788_vm1, %v6301_v46, -inf  ;;  %v2356_v44 = vpop.f32.mrb[11].mxu0  ;;  %v8414_v43 = vpop.permute.xlu0 %1380  ;;  %vm9797_vm1 = vmmov %vm9795_vm14 }
 0x249   : > { %v2483_v42 = vmax.f32 %v2481_v59, %v2482_v60  ;;  %v2479_v26 = vsel %vm9794_vm5, %v2356_v44, -inf  ;;  %vm9798_vm2 = vmmov %vm9797_vm1 }
 0x24a   : > { %v1763_v30 = vpop.permute.xlu1 %1762  ;;  %v2480_v17 = vmax.f32 %v2478_v8, %v2479_v26  ;;  %vm9799_vm5 = vmmov %vm9797_vm1 }
 0x24b   : > { %v2064_v12 = vsel %vm2038_vm12, %v2031_v40, %v1763_v30  ;;  %v2128_v36 = vld [vmem:[#allocation3 + $0xc0] sm:$0xff]  ;;  %v2615_v63 = vcombine.high %v2483_v42, %v2483_v42  ;;  %v2622_v18 = vrot.slane %v2483_v42, %v7904_v56  ;;  %vm9801_vm4 = vmmov %vm9797_vm1 }
 0x24c   : > { %2097 = vst.msk [vmem:[#allocation3 + $0xc8] sm:$0xff] %vm2071_vm13, %v2064_v12  ;;  %6320 = vmatprep.mubr.msk.f32.mxu0 %vm2071_vm13, %v2128_v36  ;;  %v2598_v49 = vcombine.high %v2480_v17, %v2480_v17  ;;  %v2605_v4 = vrot.slane %v2480_v17, %v7904_v56  ;;  %v8423_v45 = vpop.permute.xlu0 %874 }
 0x24d   : > { %v2629_v3 = vrot.slane %v2615_v63, %v7904_v56  ;;  %v2630_v47 = vcombine.high %v2622_v18, %v2622_v18  ;;  %v3007_v29 = vsel %vm9795_vm14, %v2622_v18, -inf  ;;  %vm9800_vm14 = vmmov %vm9797_vm1 }
 0x24e   : > { %v8425_v2 = vpop.permute.xlu1 %1000  ;;  %v3008_v51 = vrot.slane %v3007_v29, 4  ;;  %v2612_v7 = vrot.slane %v2598_v49, %v7904_v56  ;;  %v2613_v58 = vcombine.high %v2605_v4, %v2605_v4  ;;  %v2979_v33 = vsel %vm9796_vm15, %v2605_v4, -inf  ;;  %vm9802_vm15 = vmmov %vm9797_vm1 }
 0x24f   : > { %v2631_v5 = vcombine.high %v2629_v3, %v2629_v3  ;;  %v3014_v41 = vsel %vm9797_vm1, %v2630_v47, -inf  ;;  %v3021_v62 = vsel %vm9798_vm2, %v2629_v3, -inf  ;;  %v2980_v16 = vrot.slane %v2979_v33, 4 }
 0x250   : > { %v3009_v27 = vmax.f32 %v3007_v29, %v3008_v51  ;;  %v3015_v28 = vrot.slane %v3014_v41, 4  ;;  %v3022_v53 = vrot.slane %v3021_v62, 4  ;;  %v2614_v1 = vcombine.high %v2612_v7, %v2612_v7  ;;  %v8434_v55 = vpop.permute.xlu0 %1382  ;;  %v521_v29 = vld [vmem:[#allocation2 + $0x138] sm:$0xff] }
 0x251   : > { %v3028_v32 = vsel %vm9799_vm5, %v2631_v5, -inf  ;;  %v2981_v6 = vmax.f32 %v2979_v33, %v2980_v16  ;;  %v2986_v38 = vsel %vm9800_vm14, %v2613_v58, -inf  ;;  %v2993_v22 = vsel %vm9801_vm4, %v2612_v7, -inf }
 0x252   : > { %v3010_v21 = vrot.slane %v3009_v27, 2  ;;  %v3016_v39 = vmax.f32 %v3014_v41, %v3015_v28  ;;  %v3023_v34 = vmax.f32 %v3021_v62, %v3022_v53  ;;  %v3029_v9 = vrot.slane %v3028_v32, 4  ;;  %v8436_v57 = vpop.permute.xlu1 %1508 }
 0x253   : > { %v2129_v31 = vld [vmem:[#allocation3 + $0xc8] sm:$0xff]  ;;  %v2982_v35 = vrot.slane %v2981_v6, 2  ;;  %v2987_v19 = vrot.slane %v2986_v38, 4  ;;  %v2994_v50 = vrot.slane %v2993_v22, 4  ;;  %v3000_v11 = vsel %vm9802_vm15, %v2614_v1, -inf }
 0x254   : > { %6321 = vmatmul.mubr.msk.f32.gmra.mrb[24].mxu0 %vm2071_vm13, %v2129_v31  ;;  %v3011_v54 = vmax.f32 %v3009_v27, %v3010_v21  ;;  %v3017_v24 = vrot.slane %v3016_v39, 2  ;;  %v3024_v46 = vrot.slane %v3023_v34, 2  ;;  %v3030_v59 = vmax.f32 %v3028_v32, %v3029_v9  ;;  %v8440_v40 = vpop.permute.xlu0 %1002 }
 0x255   : > { %v2983_v13 = vmax.f32 %v2981_v6, %v2982_v35  ;;  %v2988_v60 = vmax.f32 %v2986_v38, %v2987_v19  ;;  %v2995_v44 = vmax.f32 %v2993_v22, %v2994_v50  ;;  %v3001_v8 = vrot.slane %v3000_v11, 4  ;;  %v522_v38 = vld [vmem:[#allocation2 + $0x140] sm:$0xff] }
 0x256   : > { %v3012_v42 = vrot.slane %v3011_v54, 1  ;;  %v3018_v26 = vmax.f32 %v3016_v39, %v3017_v24  ;;  %v3025_v30 = vmax.f32 %v3023_v34, %v3024_v46  ;;  %v3031_v17 = vrot.slane %v3030_v59, 2  ;;  %v8442_v12 = vpop.permute.xlu1 %1128  ;;  %v8455_v35 = vld [vmem:[%s9732_s2] ss:$0 sm:$0xff] }
 0x257   : > { %v2984_v36 = vrot.slane %v2983_v13, 1  ;;  %v2989_v63 = vrot.slane %v2988_v60, 2  ;;  %v2996_v18 = vrot.slane %v2995_v44, 2  ;;  %v3002_v49 = vmax.f32 %v3000_v11, %v3001_v8 }
 0x258   : > { %v3019_v4 = vrot.slane %v3018_v26, 1  ;;  %v3026_v3 = vrot.slane %v3025_v30, 1  ;;  %v3032_v47 = vmax.f32 %v3030_v59, %v3031_v17  ;;  %v8444_v33 = vpop.permute.xlu0 %1510  ;;  %v3013_v5 = vmax.f32 %v3011_v54, %v3012_v42 }
 0x259   : > { %v2990_v51 = vmax.f32 %v2988_v60, %v2989_v63  ;;  %v2997_v7 = vmax.f32 %v2995_v44, %v2996_v18  ;;  %v3003_v58 = vrot.slane %v3002_v49, 2  ;;  %v2985_v16 = vmax.f32 %v2983_v13, %v2984_v36 }
 0x25a   : > { %v3020_v41 = vmax.f32 %v3018_v26, %v3019_v4  ;;  %v3033_v62 = vrot.slane %v3032_v47, 1  ;;  %v1637_v27 = vpop.permute.xlu1 %1636  ;;  %v1834_v32 = vsel %vm416_vm0, %v521_v29, %v8216_v20  ;;  %v3027_v6 = vmax.f32 %v3025_v30, %v3026_v3 }
 0x25b   : > { %v2991_v28 = vrot.slane %v2990_v51, 1  ;;  %v2998_v53 = vrot.slane %v2997_v7, 1  ;;  %v3004_v1 = vmax.f32 %v3002_v49, %v3003_v58  ;;  %v1867_v31 = vsel %vm1840_vm6, %v1834_v32, %v8290_v10 }
 0x25c   : > { %v3034_v22 = vmax.f32 %v3032_v47, %v3033_v62  ;;  %v8448_v9 = vpop.permute.xlu0 %1130  ;;  %v3342_v19 = vadd.f32 %v8455_v35, %v3013_v5  ;;  %v3343_v20 = vadd.f32 %v8455_v35, %v3020_v41  ;;  %v3338_v50 = vadd.f32 %v8455_v35, %v2985_v16 }
 0x25d   : > { %v2992_v21 = vmax.f32 %v2990_v51, %v2991_v28  ;;  %v2999_v39 = vmax.f32 %v2997_v7, %v2998_v53  ;;  %v3005_v34 = vrot.slane %v3004_v1, 1  ;;  %v1900_v54 = vsel %vm1873_vm7, %v1867_v31, %v8338_v61 }
 0x25e   : > { %v8460_v11 = vpop.permute.xlu1 %1256  ;;  %v1835_v59 = vsel %vm416_vm0, %v522_v38, %v8288_v25  ;;  %v1933_v13 = vsel %vm1906_vm8, %v1900_v54, %v8375_v52  ;;  %v3344_v60 = vadd.f32 %v8455_v35, %v3027_v6  ;;  %v3345_v44 = vadd.f32 %v8455_v35, %v3034_v22 }
 0x25f   : > { %v3006_v24 = vmax.f32 %v3004_v1, %v3005_v34  ;;  %v3339_v46 = vadd.f32 %v8455_v35, %v2992_v21  ;;  %v3340_v10 = vadd.f32 %v8455_v35, %v2999_v39  ;;  %v3406_v30 = vmax.f32 %v3342_v19, 0.0 }
 0x260   : > { %v1639_v61 = vpop.permute.xlu0 %1638  ;;  %v3407_v17 = vmax.f32 %v3343_v20, 0.0  ;;  %v3402_v36 = vmax.f32 %v3338_v50, 0.0  ;;  %v1966_v63 = vsel %vm1939_vm9, %v1933_v13, %v8414_v43  ;;  %v1868_v3 = vsel %vm1840_vm6, %v1835_v59, %v8336_v15 }
 0x261   : > { %v3341_v8 = vadd.f32 %v8455_v35, %v3006_v24  ;;  %v3403_v42 = vmax.f32 %v3339_v46, 0.0  ;;  %v3404_v26 = vmax.f32 %v3340_v10, 0.0  ;;  %v1999_v52 = vsel %vm1972_vm10, %v1966_v63, %v8436_v57 }
 0x262   : > { %v1765_v18 = vpop.permute.xlu1 %1764  ;;  %v3408_v47 = vmax.f32 %v3344_v60, 0.0  ;;  %v2032_v29 = vsel %vm2005_vm11, %v1999_v52, %v1637_v27  ;;  %v3409_v51 = vmax.f32 %v3345_v44, 0.0  ;;  %vm9803_vm4 = vcmask 1041409  }
 0x263   : > { %v3405_v25 = vmax.f32 %v3341_v8, 0.0  ;;  %v3575_v49 = vrot.slane %v3403_v42, 7  ;;  %v3577_v4 = vrot.slane %v3404_v26, 6  ;;  %v2065_v5 = vsel %vm2038_vm12, %v2032_v29, %v1765_v18  ;;  %v523_v26 = vld [vmem:[#allocation2 + $0x150] sm:$0xff] }
 0x264   : > { %v8482_v43 = vpop.permute.xlu0 %876  ;;  %v1901_v41 = vsel %vm1873_vm7, %v1868_v3, %v8373_v37  ;;  %v3581_v62 = vrot.slane %v3406_v30, 4  ;;  %2098 = vst.msk [vmem:[#allocation3 + $0xd0] sm:$0xff] %vm2071_vm13, %v2065_v5  ;;  %v3583_v27 = vrot.slane %v3407_v17, 3  ;;  %vm9804_vm1 = vcmask 1043459  }
 0x265   : > { %v3576_v7 = vsel %vm9803_vm4, %v3575_v49, %v3402_v36  ;;  %v3579_v58 = vrot.slane %v3405_v25, 5  ;;  %v1934_v16 = vsel %vm1906_vm8, %v1901_v41, %v8400_v48  ;;  %v3585_v1 = vrot.slane %v3408_v47, 2 }
 0x266   : > { %v3578_v57 = vsel %vm3544_vm3, %v3577_v4, %v3576_v7  ;;  %v8488_v15 = vpop.permute.xlu1 %1258  ;;  %vm9805_vm2 = vcmask 1044484   ;;  %v1967_v37 = vsel %vm1939_vm9, %v1934_v16, %v8434_v55  ;;  %v3587_v38 = vrot.slane %v3409_v51, 1  ;;  %v524_v4 = vld [vmem:[#allocation2 + $0x158] sm:$0xff] }
 0x267   : > { %v3580_v28 = vsel %vm9804_vm1, %v3579_v58, %v3578_v57  ;;  %v8493_v53 = vpop.f32.mrb[12].mxu0  ;;  %vm9806_vm5 = vcmask 1045509   ;;  %v2000_v21 = vsel %vm1972_vm10, %v1967_v37, %v8444_v33  ;;  %vm9807_vm14 = vcmask 1046534  }
 0x268   : > { %v3582_v32 = vsel %vm9805_vm2, %v3581_v62, %v3580_v28  ;;  %v8498_v6 = vpop.f32.mrb[13].mxu0  ;;  %v1385_v48 = vpop.permute.xlu0 %1384  ;;  %v2033_v34 = vsel %vm2005_vm11, %v2000_v21, %v1639_v61  ;;  %vm9808_vm15 = vcmask 1047559   ;;  %vm9809_vm4 = vcmask 523264  }
 0x269   : > { %v3584_v22 = vsel %vm9806_vm5, %v3583_v27, %v3582_v32  ;;  %vm9810_vm1 = vmmov %vm9809_vm4  ;;  %v1836_v17 = vsel %vm416_vm0, %v523_v26, %v8398_v23 }
 0x26a   : > { %v3586_v39 = vsel %vm9807_vm14, %v3585_v1, %v3584_v22  ;;  %v1767_v31 = vpop.permute.xlu1 %1766  ;;  %vm9811_vm2 = vmmov %vm9810_vm1  ;;  %v1869_v36 = vsel %vm1840_vm6, %v1836_v17, %v8425_v2  ;;  %v1837_v2 = vsel %vm416_vm0, %v524_v4, %v8423_v45 }
 0x26b   : > { %v3588_v19 = vsel %vm9808_vm15, %v3587_v38, %v3586_v39  ;;  %v2066_v20 = vsel %vm2038_vm12, %v2033_v34, %v1767_v31  ;;  %v2130_v55 = vld [vmem:[#allocation3 + $0xd0] sm:$0xff]  ;;  %vm9812_vm5 = vmmov %vm9810_vm1  ;;  %v1902_v18 = vsel %vm1873_vm7, %v1869_v36, %v8442_v12  ;;  %v1870_v12 = vsel %vm1840_vm6, %v1837_v2, %v8440_v40  ;;  %v6764_v39 = vld [vmem:[#allocation2 + $0x170] sm:$0xff] }
 0x26c   : > { %3670 = vst.msk [vmem:[#allocation4 + $0x31] sm:$0xff] %vm9809_vm4, %v3588_v19  ;;  %v8509_v50 = vpop.permute.xlu0 %878  ;;  %6323 = vmatprep.mubr.msk.f32.mxu0 %vm2071_vm13, %v2130_v55  ;;  %vm9813_vm14 = vmmov %vm9810_vm1  ;;  %v1935_v49 = vsel %vm1906_vm8, %v1902_v18, %v8460_v11  ;;  %v1903_v11 = vsel %vm1873_vm7, %v1870_v12, %v8448_v9 }
 0x26d   : > { %2099 = vst.msk [vmem:[#allocation3 + $0xd8] sm:$0xff] %vm2071_vm13, %v2066_v20  ;;  %vm9814_vm15 = vmmov %vm9810_vm1  ;;  %v1968_v52 = vsel %vm1939_vm9, %v1935_v49, %v1385_v48  ;;  %v1936_v58 = vsel %vm1906_vm8, %v1903_v11, %v8488_v15  ;;  %v6763_v48 = vld [vmem:[#allocation2 + $0x168] sm:$0xff]  ;;  %v1839_v34 = vsel %vm416_vm0, %v6764_v39, %v8509_v50 }
 0x26e   : > { %v8512_v33 = vpop.permute.xlu1 %1004  ;;  %vm9815_vm4 = vmmov %vm9810_vm1 }
 0x26f   : > { %v2487_v62 = vsel %vm9815_vm4, %v8493_v53, -inf }
 0x270   : > { %v1387_v54 = vpop.permute.xlu0 %1386 }
 0x271   : > { %v1969_v41 = vsel %vm1939_vm9, %v1936_v58, %v1387_v54 }
 0x272   : > { %v1513_v24 = vpop.permute.xlu1 %1512 }
 0x273   : > { %v3759_v46 = vld [vmem:[#allocation4 + $0x30] sm:$0xff]  ;;  %v2001_v3 = vsel %vm1972_vm10, %v1968_v52, %v1513_v24 }
 0x274   : > { %v3695_v10 = vld [vmem:[#allocation4 + $0x31] sm:$0xff]  ;;  %3777 = vrot.lane.b32.xlu0 %v3759_v46, %s9786_s16  ;;  %3687 = vst.msk [vmem:[#allocation5 + $0x78] sm:$0xff] %vm9810_vm1, %v3759_v46  ;;  %v8520_v44 = vpop.permute.xlu0 %1006 }
 0x275   : > { %v2131_v59 = vld [vmem:[#allocation3 + $0xd8] sm:$0xff]  ;;  %3714 = vrot.lane.b32.xlu1 %v3695_v10, %s9786_s16  ;;  %v3871_v8 = vld [vmem:[#allocation4 + $0x30] sm:$0xff] }
 0x276   : > { %v3935_v13 = vld [vmem:[#allocation4 + $0x32] sm:$0xff]  ;;  %6324 = vmatmul.mubr.msk.f32.gmra.mrb[26].mxu0 %vm2071_vm13, %v2131_v59  ;;  %v8526_v42 = vpop.permute.xlu1 %1132  ;;  %3879 = vst.msk [vmem:[#allocation5 + $0x40] sm:$0xff] %vm9814_vm15, %v3871_v8 }
 0x277   : > { %v8517_v60 = vld [vmem:[#allocation4 + $0x31] sm:$0xff]  ;;  %3943 = vst.msk [vmem:[#allocation5 + $0x48] sm:$0xff] %vm9811_vm2, %v3935_v13  ;;  %vm9816_vm2 = vmmov %vm9810_vm1 }
 0x278   : > { %3752 = vst.msk [vmem:[#allocation5 + $0x80] sm:$0xff] %vm9812_vm5, %v3935_v13  ;;  %v1515_v61 = vpop.permute.xlu0 %1514  ;;  %v2484_v9 = vsel %vm9816_vm2, %v8498_v6, -inf  ;;  %vm9817_vm5 = vmmov %vm9810_vm1  ;;  %v1838_v6 = vsel %vm416_vm0, %v6763_v48, %v8482_v43 }
 0x279   : > { %3815 = vst.msk [vmem:[#allocation5 + $0x60] sm:$0xff] %vm9813_vm14, %v8517_v60  ;;  %v2002_v40 = vsel %vm1972_vm10, %v1969_v41, %v1515_v61  ;;  %v8580_v20 = vsel %vm1840_vm6, %v1838_v6, %v8512_v33  ;;  %vm9818_vm14 = vcmask 517120  }
 0x27a   : > { %v1641_v30 = vpop.permute.xlu1 %1640  ;;  %vm9819_vm0 = vmmov %vm9818_vm14 }
 0x27b   : > { %v2034_v23 = vsel %vm2005_vm11, %v2001_v3, %v1641_v30  ;;  %vm9820_vm15 = vmmov %vm9819_vm0 }
 0x27c   : > { %v8533_v63 = vpop.permute.xlu0 %1134  ;;  %vm9821_vm4 = vmmov %vm9819_vm0 }
 0x27d   : > { %vm9822_vm2 = vmmov %vm9819_vm0 }
 0x27e   : > { %v8537_v25 = vpop.permute.xlu1 %1260 }
 0x280   : > { %v1643_v47 = vpop.permute.xlu0 %1642 }
 0x281   : > { %v2035_v27 = vsel %vm2005_vm11, %v2002_v40, %v1643_v47 }
 0x282   : > { %v1769_v29 = vpop.permute.xlu1 %1768 }
 0x283   : > { %v2067_v51 = vsel %vm2038_vm12, %v2034_v23, %v1769_v29 }
 0x284   : > { %2100 = vst.msk [vmem:[#allocation3 + $0xe0] sm:$0xff] %vm2071_vm13, %v2067_v51  ;;  %v8552_v7 = vpop.permute.xlu0 %1262 }
 0x286   : > { %v8556_v5 = vpop.permute.xlu1 %1388 }
 0x287   : > { %v6307_v45 = vpop.f32.mrb[14].mxu0 }
 0x288   : > { %v2488_v57 = vsel %vm9810_vm1, %v6307_v45, -inf  ;;  %v2376_v16 = vpop.f32.mrb[15].mxu0  ;;  %v1771_v1 = vpop.permute.xlu0 %1770  ;;  %vm3732_vm1 = vcmask 1048064  }
 0x289   : > { %v2489_v28 = vmax.f32 %v2487_v62, %v2488_v57  ;;  %v2485_v15 = vsel %vm9817_vm5, %v2376_v16, -inf  ;;  %v2068_v37 = vsel %vm2038_vm12, %v2035_v27, %v1771_v1  ;;  %vm9823_vm5 = vmmov %vm9819_vm0 }
 0x28a   : > { %v2486_v32 = vmax.f32 %v2484_v9, %v2485_v15  ;;  %v8568_v38 = vpop.permute.xlu1 %1390  ;;  %2101 = vst.msk [vmem:[#allocation3 + $0xe8] sm:$0xff] %vm2071_vm13, %v2068_v37 }
 0x28b   : > { %v2649_v53 = vcombine.high %v2489_v28, %v2489_v28  ;;  %v2656_v22 = vrot.slane %v2489_v28, %v7904_v56  ;;  %v2132_v21 = vld [vmem:[#allocation3 + $0xe0] sm:$0xff] }
 0x28c   : > { %v2632_v31 = vcombine.high %v2486_v32, %v2486_v32  ;;  %v2639_v19 = vrot.slane %v2486_v32, %v7904_v56  ;;  %6326 = vmatprep.mubr.msk.f32.mxu0 %vm2071_vm13, %v2132_v21  ;;  %v8584_v46 = vpop.permute.xlu0 %1516 }
 0x28d   : > { %v2663_v55 = vrot.slane %v2649_v53, %v7904_v56  ;;  %v2664_v54 = vcombine.high %v2656_v22, %v2656_v22  ;;  %v3063_v24 = vsel %vm9818_vm14, %v2656_v22, -inf  ;;  %vm9824_vm14 = vmmov %vm9819_vm0 }
 0x28e   : > { %v3064_v43 = vrot.slane %v3063_v24, 4  ;;  %v2646_v10 = vrot.slane %v2632_v31, %v7904_v56  ;;  %v2647_v50 = vcombine.high %v2639_v19, %v2639_v19  ;;  %v3035_v59 = vsel %vm9819_vm0, %v2639_v19, -inf  ;;  %v8588_v13 = vpop.permute.xlu1 %1518 }
 0x28f   : > { %v2665_v8 = vcombine.high %v2663_v55, %v2663_v55  ;;  %v3070_v26 = vsel %vm9820_vm15, %v2664_v54, -inf  ;;  %v3077_v33 = vsel %vm9821_vm4, %v2663_v55, -inf  ;;  %v3036_v61 = vrot.slane %v3035_v59, 4 }
 0x290   : > { %v3065_v30 = vmax.f32 %v3063_v24, %v3064_v43  ;;  %v3071_v17 = vrot.slane %v3070_v26, 4  ;;  %v3078_v36 = vrot.slane %v3077_v33, 4  ;;  %v2648_v18 = vcombine.high %v2646_v10, %v2646_v10  ;;  %v8595_v47 = vpop.permute.xlu0 %1644 }
 0x291   : > { %v3084_v49 = vsel %vm9822_vm2, %v2665_v8, -inf  ;;  %v3037_v4 = vmax.f32 %v3035_v59, %v3036_v61  ;;  %v3042_v52 = vsel %vm9823_vm5, %v2647_v50, -inf  ;;  %v3049_v3 = vsel %vm9824_vm14, %v2646_v10, -inf  ;;  %v2133_v11 = vld [vmem:[#allocation3 + $0xe8] sm:$0xff] }
 0x292   : > { %v3066_v23 = vrot.slane %v3065_v30, 2  ;;  %v3072_v29 = vmax.f32 %v3070_v26, %v3071_v17  ;;  %v3079_v2 = vmax.f32 %v3077_v33, %v3078_v36  ;;  %v3085_v51 = vrot.slane %v3084_v49, 4  ;;  %v8597_v12 = vpop.permute.xlu1 %1646  ;;  %6327 = vmatmul.mubr.msk.f32.gmra.mrb[28].mxu0 %vm2071_vm13, %v2133_v11 }
 0x293   : > { %v3038_v58 = vrot.slane %v3037_v4, 2  ;;  %v3043_v41 = vrot.slane %v3042_v52, 4  ;;  %v3050_v45 = vrot.slane %v3049_v3, 4  ;;  %v3056_v62 = vsel %vm9819_vm0, %v2648_v18, -inf }
 0x294   : > { %v3067_v40 = vmax.f32 %v3065_v30, %v3066_v23  ;;  %v3073_v57 = vrot.slane %v3072_v29, 2  ;;  %v3080_v16 = vrot.slane %v3079_v2, 2  ;;  %v3086_v9 = vmax.f32 %v3084_v49, %v3085_v51  ;;  %v1773_v32 = vpop.permute.xlu0 %1772 }
 0x295   : > { %v3039_v27 = vmax.f32 %v3037_v4, %v3038_v58  ;;  %v3044_v28 = vmax.f32 %v3042_v52, %v3043_v41  ;;  %v3051_v15 = vmax.f32 %v3049_v3, %v3050_v45  ;;  %v3057_v1 = vrot.slane %v3056_v62, 4 }
 0x296   : > { %v3068_v37 = vrot.slane %v3067_v40, 1  ;;  %v3074_v53 = vmax.f32 %v3072_v29, %v3073_v57  ;;  %v3081_v22 = vmax.f32 %v3079_v2, %v3080_v16  ;;  %v3087_v21 = vrot.slane %v3086_v9, 2  ;;  %v8601_v48 = vpop.permute.xlu1 %1774 }
 0x297   : > { %v3040_v6 = vrot.slane %v3039_v27, 1  ;;  %v3045_v39 = vrot.slane %v3044_v28, 2  ;;  %v3052_v31 = vrot.slane %v3051_v15, 2  ;;  %v3058_v19 = vmax.f32 %v3056_v62, %v3057_v1 }
 0x298   : > { %v3069_v55 = vmax.f32 %v3067_v40, %v3068_v37  ;;  %v3075_v54 = vrot.slane %v3074_v53, 1  ;;  %v3082_v24 = vrot.slane %v3081_v22, 1  ;;  %v3088_v43 = vmax.f32 %v3086_v9, %v3087_v21  ;;  %v3774_v26 = vpop.permute.xlu0 %3773 }
 0x299   : > { %v1872_v10 = vsel %vm1840_vm6, %v1839_v34, %v8520_v44  ;;  %v3046_v50 = vmax.f32 %v3044_v28, %v3045_v39  ;;  %v3053_v59 = vmax.f32 %v3051_v15, %v3052_v31  ;;  %v3059_v8 = vrot.slane %v3058_v19, 2  ;;  %3797 = vst.msk [vmem:[#allocation5 + $0x8] sm:$0xff] %vm3732_vm1, %v3774_v26 }
 0x29a   : > { %v1904_v33 = vsel %vm1873_vm7, %v8580_v20, %v8526_v42  ;;  %v3076_v61 = vmax.f32 %v3074_v53, %v3075_v54  ;;  %v3089_v30 = vrot.slane %v3088_v43, 1  ;;  %v3041_v17 = vmax.f32 %v3039_v27, %v3040_v6  ;;  %v3709_v36 = vpop.permute.xlu1 %3708 }
 0x29b   : > { %v3083_v18 = vmax.f32 %v3081_v22, %v3082_v24  ;;  %v3047_v49 = vrot.slane %v3046_v50, 1  ;;  %v3054_v4 = vrot.slane %v3053_v59, 1  ;;  %v3060_v52 = vmax.f32 %v3058_v19, %v3059_v8  ;;  %3733 = vst.msk [vmem:[#allocation5] sm:$0xff] %vm3732_vm1, %v3709_v36 }
 0x29c   : > { %v1905_v44 = vsel %vm1873_vm7, %v1872_v10, %v8533_v63  ;;  %v1937_v34 = vsel %vm1906_vm8, %v1904_v33, %v8537_v25  ;;  %v3090_v3 = vmax.f32 %v3088_v43, %v3089_v30  ;;  %v3350_v42 = vadd.f32 %v8455_v35, %v3069_v55 }
 0x29d   : > { %v1938_v20 = vsel %vm1906_vm8, %v1905_v44, %v8552_v7  ;;  %v3048_v23 = vmax.f32 %v3046_v50, %v3047_v49  ;;  %v3055_v29 = vmax.f32 %v3053_v59, %v3054_v4  ;;  %v3061_v2 = vrot.slane %v3060_v52, 1  ;;  %v3959_v4 = vld [vmem:[#allocation5 + $0x48] sm:$0xff] }
 0x29e   : > { %v1970_v51 = vsel %vm1939_vm9, %v1937_v34, %v8556_v5  ;;  %v3351_v11 = vadd.f32 %v8455_v35, %v3076_v61  ;;  %v3346_v58 = vadd.f32 %v8455_v35, %v3041_v17  ;;  %v1971_v63 = vsel %vm1939_vm9, %v1938_v20, %v8568_v38  ;;  %v3711_v25 = vpop.permute.xlu1 %3710 }
 0x29f   : > { %v3352_v41 = vadd.f32 %v8455_v35, %v3083_v18  ;;  %v3062_v45 = vmax.f32 %v3060_v52, %v3061_v2  ;;  %v3347_v62 = vadd.f32 %v8455_v35, %v3048_v23  ;;  %v3348_v7 = vadd.f32 %v8455_v35, %v3055_v29  ;;  %3734 = vst.msk [vmem:[#allocation5 + $0x28] sm:$0xff] %vm3732_vm1, %v3711_v25  ;;  %v3954_v18 = vld [vmem:[#allocation5 + $0x20] sm:$0xff] }
 0x2a0   : > { %v3353_v40 = vadd.f32 %v8455_v35, %v3090_v3  ;;  %v3414_v5 = vmax.f32 %v3350_v42, 0.0  ;;  %v2003_v57 = vsel %vm1972_vm10, %v1970_v51, %v8584_v46  ;;  %v2004_v16 = vsel %vm1972_vm10, %v1971_v63, %v8588_v13  ;;  %v3951_v15 = vld [vmem:[#allocation5 + $0x8] sm:$0xff] }
 0x2a1   : > { %v3349_v38 = vadd.f32 %v8455_v35, %v3062_v45  ;;  %v3411_v9 = vmax.f32 %v3347_v62, 0.0  ;;  %v3412_v27 = vmax.f32 %v3348_v7, 0.0  ;;  %v2036_v28 = vsel %vm2005_vm11, %v2003_v57, %v8595_v47  ;;  %4150 = vmatprep.mubr.f32.mxu1 %v3951_v15 }
 0x2a2   : > { %v3415_v1 = vmax.f32 %v3351_v11, 0.0  ;;  %v3410_v37 = vmax.f32 %v3346_v58, 0.0  ;;  %v2037_v53 = vsel %vm2005_vm11, %v2004_v16, %v8597_v12  ;;  %v2069_v22 = vsel %vm2038_vm12, %v2036_v28, %v1773_v32  ;;  %v3950_v46 = vld [vmem:[#allocation5] sm:$0xff] }
 0x2a3   : > { %v3413_v21 = vmax.f32 %v3349_v38, 0.0  ;;  %v3589_v6 = vrot.slane %v3411_v9, 7  ;;  %v3591_v13 = vrot.slane %v3412_v27, 6  ;;  %2102 = vst.msk [vmem:[#allocation3 + $0xf0] sm:$0xff] %vm2071_vm13, %v2069_v22  ;;  %v2070_v39 = vsel %vm2038_vm12, %v2037_v53, %v8601_v48  ;;  %4151 = vmatmul.mubr.f32.vlgmr.msra.gmra.mrb[0].mxu1 %v3950_v46 }
 0x2a4   : > { %v3416_v47 = vmax.f32 %v3352_v41, 0.0  ;;  %2103 = vst.msk [vmem:[#allocation3 + $0xf8] sm:$0xff] %vm2071_vm13, %v2070_v39  ;;  %v3417_v31 = vmax.f32 %v3353_v40, 0.0  ;;  %vm9825_vm6 = vcmask 1041409   ;;  %v3595_v55 = vrot.slane %v3414_v5, 4 }
 0x2a5   : > { %v3590_v19 = vsel %vm9825_vm6, %v3589_v6, %v3410_v37  ;;  %v3593_v12 = vrot.slane %v3413_v21, 5  ;;  %v3597_v43 = vrot.slane %v3415_v1, 3  ;;  %vm9826_vm7 = vcmask 1043459  }
 0x2a6   : > { %v3592_v32 = vsel %vm3544_vm3, %v3591_v13, %v3590_v19  ;;  %v3599_v50 = vrot.slane %v3416_v47, 2  ;;  %vm9827_vm8 = vcmask 1044484   ;;  %v3601_v26 = vrot.slane %v3417_v31, 1  ;;  %v3955_v52 = vld [vmem:[#allocation5 + $0x28] sm:$0xff] }
 0x2a7   : > { %v3776_v54 = vpop.permute.xlu0 %3775  ;;  %v3594_v10 = vsel %vm9826_vm7, %v3593_v12, %v3592_v32  ;;  %v6310_v48 = vpop.f32.mrb[16].mxu0  ;;  %vm9828_vm9 = vcmask 1045509   ;;  %vm9829_vm10 = vcmask 1046534   ;;  %vm9830_vm11 = vcmask 1047559  }
 0x2a8   : > { %v3713_v24 = vpop.permute.xlu1 %3712  ;;  %3798 = vst.msk [vmem:[#allocation5 + $0x30] sm:$0xff] %vm3732_vm1, %v3776_v54  ;;  %v3596_v59 = vsel %vm9827_vm8, %v3595_v55, %v3594_v10  ;;  %v2386_v8 = vpop.f32.mrb[17].mxu0  ;;  %vm9831_vm12 = vcmask 523264  }
 0x2a9   : > { %3735 = vst.msk [vmem:[#allocation5 + $0x50] sm:$0xff] %vm3732_vm1, %v3713_v24  ;;  %v3598_v33 = vsel %vm9828_vm9, %v3597_v43, %v3596_v59  ;;  %vm9832_vm15 = vmmov %vm9831_vm12 }
 0x2aa   : > { %v3600_v61 = vsel %vm9829_vm10, %v3599_v50, %v3598_v33  ;;  %v2134_v30 = vld [vmem:[#allocation3 + $0xf0] sm:$0xff]  ;;  %vm9833_vm4 = vmmov %vm9831_vm12 }
 0x2ab   : > { %v3602_v17 = vsel %vm9830_vm11, %v3601_v26, %v3600_v61  ;;  %6329 = vmatprep.mubr.msk.f32.mxu0 %vm2071_vm13, %v2134_v30  ;;  %v2135_v36 = vld [vmem:[#allocation3 + $0xf8] sm:$0xff]  ;;  %vm9835_vm2 = vmmov %vm9833_vm4  ;;  %vm9844_vm11 = vcmask 517120  }
 0x2ac   : > { %3671 = vst.msk [vmem:[#allocation4 + $0x41] sm:$0xff] %vm9831_vm12, %v3602_v17  ;;  %6330 = vmatmul.mubr.msk.f32.gmra.mrb[30].mxu0 %vm2071_vm13, %v2135_v36  ;;  %vm9834_vm13 = vmmov %vm9833_vm4 }
 0x2ad   : > { %6348 = vmatprep.mubr.msk.f32.mxu0 %vm9832_vm15, %v3954_v18  ;;  %vm9836_vm5 = vmmov %vm9835_vm2 }
 0x2ae   : > { %vm9837_vm14 = vmmov %vm9835_vm2 }
 0x2af   : > { %v3956_v49 = vld [vmem:[#allocation5 + $0x30] sm:$0xff]  ;;  %vm9838_vm0 = vmmov %vm9835_vm2 }
 0x2b0   : > { %4155 = vmatprep.mubr.f32.mxu1 %v3956_v49  ;;  %6349 = vmatmul.mubr.msk.f32.vlgmr.msra.gmra.mrb[32].mxu0 %vm9833_vm4, %v3959_v4  ;;  %vm9839_vm6 = vmmov %vm9838_vm0 }
 0x2b1   : > { %4156 = vmatmul.mubr.f32.gmra.mrb[2].mxu1 %v3955_v52  ;;  %vm9840_vm7 = vmmov %vm9838_vm0 }
 0x2b2   : > { %v2493_v2 = vsel %vm9840_vm7, %v6310_v48, -inf  ;;  %vm9841_vm8 = vmmov %vm9838_vm0  ;;  %vm9854_vm7 = vcmask 1044484  }
 0x2b3   : > { %v3760_v44 = vld [vmem:[#allocation4 + $0x40] sm:$0xff]  ;;  %vm9842_vm9 = vmmov %vm9838_vm0 }
 0x2b4   : > { %v3696_v34 = vld [vmem:[#allocation4 + $0x41] sm:$0xff]  ;;  %3779 = vrot.lane.b32.xlu0 %v3760_v44, %s9786_s16  ;;  %3688 = vst.msk [vmem:[#allocation5 + $0xa0] sm:$0xff] %vm9835_vm2, %v3760_v44  ;;  %v2490_v58 = vsel %vm9842_vm9, %v2386_v8, -inf  ;;  %vm9843_vm10 = vmmov %vm9838_vm0  ;;  %vm9856_vm9 = vcmask 1046534  }
 0x2b5   : > { %v8656_v3 = vld [vmem:[#allocation4 + $0x42] sm:$0xff]  ;;  %3716 = vrot.lane.b32.xlu1 %v3696_v34, %s9786_s16  ;;  %vm9845_vm12 = vmmov %vm9844_vm11 }
 0x2b6   : > { %3944 = vst.msk [vmem:[#allocation5 + $0x70] sm:$0xff] %vm9834_vm13, %v8656_v3  ;;  %v8665_v42 = vld [vmem:[#allocation4 + $0x41] sm:$0xff]  ;;  %vm9846_vm15 = vmmov %vm9844_vm11 }
 0x2b7   : > { %3753 = vst.msk [vmem:[#allocation5 + $0xa8] sm:$0xff] %vm9836_vm5, %v8656_v3  ;;  %v3872_v20 = vld [vmem:[#allocation4 + $0x40] sm:$0xff]  ;;  %vm9847_vm4 = vmmov %vm9844_vm11 }
 0x2b8   : > { %3816 = vst.msk [vmem:[#allocation5 + $0x88] sm:$0xff] %vm9837_vm14, %v8665_v42  ;;  %vm9848_vm13 = vmmov %vm9847_vm4 }
 0x2b9   : > { %3880 = vst.msk [vmem:[#allocation5 + $0x68] sm:$0xff] %vm9838_vm0, %v3872_v20  ;;  %vm9849_vm2 = vmmov %vm9847_vm4  ;;  %vm9852_vm0 = vcmask 1041409  }
 0x2ba   : > { %vm9850_vm5 = vmmov %vm9849_vm2 }
 0x2bb   : > { %vm9851_vm14 = vmmov %vm9849_vm2 }
 0x2bd   : > { %v3964_v23 = vld [vmem:[#allocation5 + $0x70] sm:$0xff] }
 0x2be   : > { %6351 = vmatprep.mubr.msk.f32.mxu0 %vm9839_vm6, %v3964_v23  ;;  %vm9853_vm6 = vcmask 1043459  }
 0x2c7   : > { %v6313_v29 = vpop.f32.mrb[18].mxu0 }
 0x2c8   : > { %v2494_v51 = vsel %vm9841_vm8, %v6313_v29, -inf  ;;  %v2396_v11 = vpop.f32.mrb[19].mxu0  ;;  %vm9855_vm8 = vcmask 1045509  }
 0x2c9   : > { %v2495_v63 = vmax.f32 %v2493_v2, %v2494_v51  ;;  %v2491_v25 = vsel %vm9843_vm10, %v2396_v11, -inf  ;;  %vm9857_vm10 = vcmask 1047559  }
 0x2ca   : > { %v2492_v41 = vmax.f32 %v2490_v58, %v2491_v25 }
 0x2cb   : > { %v2683_v45 = vcombine.high %v2495_v63, %v2495_v63  ;;  %v2690_v62 = vrot.slane %v2495_v63, %v7904_v56 }
 0x2cc   : > { %v2666_v7 = vcombine.high %v2492_v41, %v2492_v41  ;;  %v2673_v40 = vrot.slane %v2492_v41, %v7904_v56 }
 0x2cd   : > { %v2697_v5 = vrot.slane %v2683_v45, %v7904_v56  ;;  %v2698_v57 = vcombine.high %v2690_v62, %v2690_v62  ;;  %v3119_v16 = vsel %vm9844_vm11, %v2690_v62, -inf  ;;  %vm9858_vm11 = vcmask 523264  }
 0x2ce   : > { %v3120_v38 = vrot.slane %v3119_v16, 4  ;;  %v2680_v9 = vrot.slane %v2666_v7, %v7904_v56  ;;  %v2681_v27 = vcombine.high %v2673_v40, %v2673_v40  ;;  %v3091_v28 = vsel %vm9845_vm12, %v2673_v40, -inf  ;;  %vm9859_vm12 = vmmov %vm9858_vm11 }
 0x2cf   : > { %v2699_v15 = vcombine.high %v2697_v5, %v2697_v5  ;;  %v3126_v1 = vsel %vm9846_vm15, %v2698_v57, -inf  ;;  %v3133_v37 = vsel %vm9847_vm4, %v2697_v5, -inf  ;;  %v3092_v53 = vrot.slane %v3091_v28, 4  ;;  %vm9860_vm15 = vmmov %vm9858_vm11 }
 0x2d0   : > { %v3121_v22 = vmax.f32 %v3119_v16, %v3120_v38  ;;  %v3127_v46 = vrot.slane %v3126_v1, 4  ;;  %v3134_v21 = vrot.slane %v3133_v37, 4  ;;  %v2682_v6 = vcombine.high %v2680_v9, %v2680_v9  ;;  %vm9861_vm4 = vmmov %vm9858_vm11 }
 0x2d1   : > { %v3140_v13 = vsel %vm9848_vm13, %v2699_v15, -inf  ;;  %v3093_v39 = vmax.f32 %v3091_v28, %v3092_v53  ;;  %v3098_v47 = vsel %vm9849_vm2, %v2681_v27, -inf  ;;  %v3105_v31 = vsel %vm9850_vm5, %v2680_v9, -inf  ;;  %vm9862_vm13 = vmmov %vm9861_vm4 }
 0x2d2   : > { %v3122_v19 = vrot.slane %v3121_v22, 2  ;;  %v3128_v12 = vmax.f32 %v3126_v1, %v3127_v46  ;;  %v3135_v55 = vmax.f32 %v3133_v37, %v3134_v21  ;;  %v3141_v32 = vrot.slane %v3140_v13, 4  ;;  %vm9863_vm2 = vmmov %vm9861_vm4 }
 0x2d3   : > { %v3094_v54 = vrot.slane %v3093_v39, 2  ;;  %v3099_v24 = vrot.slane %v3098_v47, 4  ;;  %v3106_v43 = vrot.slane %v3105_v31, 4  ;;  %v3112_v10 = vsel %vm9851_vm14, %v2682_v6, -inf  ;;  %vm9864_vm5 = vmmov %vm9863_vm2 }
 0x2d4   : > { %v3123_v48 = vmax.f32 %v3121_v22, %v3122_v19  ;;  %v3129_v50 = vrot.slane %v3128_v12, 2  ;;  %v3136_v59 = vrot.slane %v3135_v55, 2  ;;  %v3142_v8 = vmax.f32 %v3140_v13, %v3141_v32  ;;  %vm9865_vm14 = vmmov %vm9863_vm2 }
 0x2d5   : > { %v3095_v26 = vmax.f32 %v3093_v39, %v3094_v54  ;;  %v3100_v33 = vmax.f32 %v3098_v47, %v3099_v24  ;;  %v3107_v61 = vmax.f32 %v3105_v31, %v3106_v43  ;;  %v3113_v30 = vrot.slane %v3112_v10, 4 }
 0x2d6   : > { %v3124_v17 = vrot.slane %v3123_v48, 1  ;;  %v3130_v36 = vmax.f32 %v3128_v12, %v3129_v50  ;;  %v3137_v18 = vmax.f32 %v3135_v55, %v3136_v59  ;;  %v3143_v49 = vrot.slane %v3142_v8, 2 }
 0x2d7   : > { %v3096_v4 = vrot.slane %v3095_v26, 1  ;;  %v3101_v52 = vrot.slane %v3100_v33, 2  ;;  %v3108_v44 = vrot.slane %v3107_v61, 2  ;;  %v3114_v34 = vmax.f32 %v3112_v10, %v3113_v30 }
 0x2d8   : > { %v3131_v20 = vrot.slane %v3130_v36, 1  ;;  %v3138_v23 = vrot.slane %v3137_v18, 1  ;;  %v3144_v29 = vmax.f32 %v3142_v8, %v3143_v49  ;;  %v3125_v58 = vmax.f32 %v3123_v48, %v3124_v17 }
 0x2d9   : > { %v3102_v2 = vmax.f32 %v3100_v33, %v3101_v52  ;;  %v3109_v51 = vmax.f32 %v3107_v61, %v3108_v44  ;;  %v3115_v11 = vrot.slane %v3114_v34, 2  ;;  %v3097_v25 = vmax.f32 %v3095_v26, %v3096_v4  ;;  %v3960_v52 = vld [vmem:[#allocation5 + $0x50] sm:$0xff] }
 0x2da   : > { %v3145_v63 = vrot.slane %v3144_v29, 1  ;;  %v3132_v41 = vmax.f32 %v3130_v36, %v3131_v20  ;;  %v3139_v40 = vmax.f32 %v3137_v18, %v3138_v23  ;;  %v3358_v9 = vadd.f32 %v8455_v35, %v3125_v58 }
 0x2db   : > { %v3103_v45 = vrot.slane %v3102_v2, 1  ;;  %v3110_v62 = vrot.slane %v3109_v51, 1  ;;  %v3116_v7 = vmax.f32 %v3114_v34, %v3115_v11  ;;  %v3354_v27 = vadd.f32 %v8455_v35, %v3097_v25 }
 0x2dc   : > { %v3146_v5 = vmax.f32 %v3144_v29, %v3145_v63  ;;  %v3359_v28 = vadd.f32 %v8455_v35, %v3132_v41  ;;  %v3360_v53 = vadd.f32 %v8455_v35, %v3139_v40  ;;  %v3422_v13 = vmax.f32 %v3358_v9, 0.0 }
 0x2dd   : > { %v3104_v57 = vmax.f32 %v3102_v2, %v3103_v45  ;;  %v3111_v16 = vmax.f32 %v3109_v51, %v3110_v62  ;;  %v3117_v38 = vrot.slane %v3116_v7, 1  ;;  %v3418_v39 = vmax.f32 %v3354_v27, 0.0 }
 0x2de   : > { %v3361_v22 = vadd.f32 %v8455_v35, %v3146_v5  ;;  %v3423_v47 = vmax.f32 %v3359_v28, 0.0  ;;  %v3424_v55 = vmax.f32 %v3360_v53, 0.0  ;;  %v3609_v43 = vrot.slane %v3422_v13, 4 }
 0x2df   : > { %v3118_v15 = vmax.f32 %v3116_v7, %v3117_v38  ;;  %v3355_v1 = vadd.f32 %v8455_v35, %v3104_v57  ;;  %v3356_v37 = vadd.f32 %v8455_v35, %v3111_v16 }
 0x2e0   : > { %v3425_v32 = vmax.f32 %v3361_v22, 0.0  ;;  %v3611_v48 = vrot.slane %v3423_v47, 3  ;;  %v3613_v26 = vrot.slane %v3424_v55, 2 }
 0x2e1   : > { %v3357_v46 = vadd.f32 %v8455_v35, %v3118_v15  ;;  %v3419_v21 = vmax.f32 %v3355_v1, 0.0  ;;  %v3420_v6 = vmax.f32 %v3356_v37, 0.0 }
 0x2e2   : > { %v3615_v30 = vrot.slane %v3425_v32, 1 }
 0x2e3   : > { %v3421_v31 = vmax.f32 %v3357_v46, 0.0  ;;  %v3603_v19 = vrot.slane %v3419_v21, 7  ;;  %v3605_v12 = vrot.slane %v3420_v6, 6 }
 0x2e5   : > { %v3604_v54 = vsel %vm9852_vm0, %v3603_v19, %v3418_v39  ;;  %v3607_v24 = vrot.slane %v3421_v31, 5  ;;  %vm9866_vm0 = vmmov %vm9863_vm2 }
 0x2e6   : > { %v3606_v10 = vsel %vm3544_vm3, %v3605_v12, %v3604_v54  ;;  %v3778_v59 = vpop.permute.xlu0 %3777 }
 0x2e7   : > { %v3608_v50 = vsel %vm9853_vm6, %v3607_v24, %v3606_v10  ;;  %v3715_v8 = vpop.permute.xlu1 %3714  ;;  %3799 = vst.msk [vmem:[#allocation5 + $0x58] sm:$0xff] %vm3732_vm1, %v3778_v59  ;;  %v6316_v61 = vpop.f32.mrb[20].mxu0  ;;  %vm9867_vm6 = vmmov %vm9866_vm0 }
 0x2e8   : > { %v3610_v33 = vsel %vm9854_vm7, %v3609_v43, %v3608_v50  ;;  %3736 = vst.msk [vmem:[#allocation5 + $0x78] sm:$0xff] %vm3732_vm1, %v3715_v8  ;;  %v2406_v36 = vpop.f32.mrb[21].mxu0  ;;  %v2499_v51 = vsel %vm9865_vm14, %v6316_v61, -inf  ;;  %vm9868_vm7 = vmmov %vm9866_vm0  ;;  %vm9879_vm14 = vcmask 1044484  }
 0x2e9   : > { %v3612_v17 = vsel %vm9855_vm8, %v3611_v48, %v3610_v33  ;;  %v2496_v63 = vsel %vm9867_vm6, %v2406_v36, -inf  ;;  %vm9869_vm8 = vcmask 517120   ;;  %vm9881_vm6 = vcmask 1046534  }
 0x2ea   : > { %v3614_v18 = vsel %vm9856_vm9, %v3613_v26, %v3612_v17  ;;  %vm9870_vm9 = vmmov %vm9869_vm8 }
 0x2eb   : > { %v3616_v49 = vsel %vm9857_vm10, %v3615_v30, %v3614_v18  ;;  %vm9871_vm10 = vmmov %vm9869_vm8 }
 0x2ec   : > { %3672 = vst.msk [vmem:[#allocation4 + $0x51] sm:$0xff] %vm9858_vm11, %v3616_v49  ;;  %vm9872_vm11 = vmmov %vm9869_vm8 }
 0x2ee   : > { %v3961_v4 = vld [vmem:[#allocation5 + $0x58] sm:$0xff] }
 0x2ef   : > { %4160 = vmatprep.mubr.f32.mxu1 %v3961_v4 }
 0x2f0   : > { %4161 = vmatmul.mubr.f32.gmra.mrb[4].mxu1 %v3960_v52 }
 0x2f3   : > { %v3761_v44 = vld [vmem:[#allocation4 + $0x50] sm:$0xff] }
 0x2f4   : > { %v8705_v34 = vld [vmem:[#allocation4 + $0x51] sm:$0xff]  ;;  %3781 = vrot.lane.b32.xlu0 %v3761_v44, %s9786_s16  ;;  %3689 = vst.msk [vmem:[#allocation5 + $0xc8] sm:$0xff] %vm9860_vm15, %v3761_v44  ;;  %vm9874_vm15 = vmmov %vm9869_vm8 }
 0x2f5   : > { %v8707_v20 = vld [vmem:[#allocation4 + $0x52] sm:$0xff]  ;;  %3718 = vrot.lane.b32.xlu1 %v8705_v34, %s9786_s16  ;;  %3817 = vst.msk [vmem:[#allocation5 + $0xb0] sm:$0xff] %vm9862_vm13, %v8705_v34 }
 0x2f6   : > { %3945 = vst.msk [vmem:[#allocation5 + $0x98] sm:$0xff] %vm9859_vm12, %v8707_v20  ;;  %v3873_v23 = vld [vmem:[#allocation4 + $0x50] sm:$0xff]  ;;  %vm9873_vm12 = vmmov %vm9869_vm8 }
 0x2f7   : > { %3754 = vst.msk [vmem:[#allocation5 + $0xd0] sm:$0xff] %vm9861_vm4, %v8707_v20  ;;  %vm9875_vm4 = vmmov %vm9869_vm8 }
 0x2f8   : > { %3881 = vst.msk [vmem:[#allocation5 + $0x90] sm:$0xff] %vm9863_vm2, %v3873_v23  ;;  %vm9876_vm13 = vmmov %vm9875_vm4  ;;  %vm9877_vm2 = vcmask 1041409  }
 0x2fd   : > { %v3969_v29 = vld [vmem:[#allocation5 + $0x98] sm:$0xff] }
 0x2fe   : > { %6352 = vmatmul.mubr.msk.f32.gmra.mrb[34].mxu0 %vm9864_vm5, %v3969_v29  ;;  %vm9878_vm5 = vcmask 1043459  }
 0x307   : > { %v6319_v2 = vpop.f32.mrb[22].mxu0 }
 0x308   : > { %v2500_v11 = vsel %vm9866_vm0, %v6319_v2, -inf  ;;  %v2416_v58 = vpop.f32.mrb[23].mxu0  ;;  %vm9880_vm0 = vcmask 1045509  }
 0x309   : > { %v2501_v25 = vmax.f32 %v2499_v51, %v2500_v11  ;;  %v2497_v41 = vsel %vm9868_vm7, %v2416_v58, -inf  ;;  %vm9882_vm7 = vcmask 1047559  }
 0x30a   : > { %v2498_v45 = vmax.f32 %v2496_v63, %v2497_v41 }
 0x30b   : > { %v2717_v62 = vcombine.high %v2501_v25, %v2501_v25  ;;  %v2724_v7 = vrot.slane %v2501_v25, %v7904_v56 }
 0x30c   : > { %v2700_v40 = vcombine.high %v2498_v45, %v2498_v45  ;;  %v2707_v5 = vrot.slane %v2498_v45, %v7904_v56 }
 0x30d   : > { %v2731_v57 = vrot.slane %v2717_v62, %v7904_v56  ;;  %v2732_v16 = vcombine.high %v2724_v7, %v2724_v7  ;;  %v3175_v38 = vsel %vm9869_vm8, %v2724_v7, -inf  ;;  %vm9883_vm8 = vcmask 523264  }
 0x30e   : > { %v3176_v9 = vrot.slane %v3175_v38, 4  ;;  %v2714_v27 = vrot.slane %v2700_v40, %v7904_v56  ;;  %v2715_v28 = vcombine.high %v2707_v5, %v2707_v5  ;;  %v3147_v15 = vsel %vm9870_vm9, %v2707_v5, -inf  ;;  %vm9884_vm9 = vmmov %vm9883_vm8 }
 0x30f   : > { %v2733_v1 = vcombine.high %v2731_v57, %v2731_v57  ;;  %v3182_v37 = vsel %vm9871_vm10, %v2732_v16, -inf  ;;  %v3189_v53 = vsel %vm9872_vm11, %v2731_v57, -inf  ;;  %v3148_v22 = vrot.slane %v3147_v15, 4  ;;  %vm9885_vm10 = vmmov %vm9883_vm8 }
 0x310   : > { %v3177_v46 = vmax.f32 %v3175_v38, %v3176_v9  ;;  %v3183_v21 = vrot.slane %v3182_v37, 4  ;;  %v3190_v6 = vrot.slane %v3189_v53, 4  ;;  %v2716_v13 = vcombine.high %v2714_v27, %v2714_v27  ;;  %vm9886_vm11 = vmmov %vm9883_vm8 }
 0x311   : > { %v3196_v39 = vsel %vm9873_vm12, %v2733_v1, -inf  ;;  %v3149_v47 = vmax.f32 %v3147_v15, %v3148_v22  ;;  %v3154_v31 = vsel %vm9874_vm15, %v2715_v28, -inf  ;;  %v3161_v19 = vsel %vm9875_vm4, %v2714_v27, -inf  ;;  %vm9887_vm12 = vmmov %vm9883_vm8 }
 0x312   : > { %v3178_v12 = vrot.slane %v3177_v46, 2  ;;  %v3184_v55 = vmax.f32 %v3182_v37, %v3183_v21  ;;  %v3191_v32 = vmax.f32 %v3189_v53, %v3190_v6  ;;  %v3197_v54 = vrot.slane %v3196_v39, 4  ;;  %vm9888_vm15 = vmmov %vm9883_vm8 }
 0x313   : > { %v3150_v24 = vrot.slane %v3149_v47, 2  ;;  %v3155_v43 = vrot.slane %v3154_v31, 4  ;;  %v3162_v10 = vrot.slane %v3161_v19, 4  ;;  %v3168_v48 = vsel %vm9876_vm13, %v2716_v13, -inf  ;;  %vm9889_vm4 = vmmov %vm9883_vm8 }
 0x314   : > { %v3179_v50 = vmax.f32 %v3177_v46, %v3178_v12  ;;  %v3185_v59 = vrot.slane %v3184_v55, 2  ;;  %v3192_v8 = vrot.slane %v3191_v32, 2  ;;  %v3198_v26 = vmax.f32 %v3196_v39, %v3197_v54  ;;  %vm9890_vm13 = vmmov %vm9889_vm4 }
 0x315   : > { %v3151_v33 = vmax.f32 %v3149_v47, %v3150_v24  ;;  %v3156_v61 = vmax.f32 %v3154_v31, %v3155_v43  ;;  %v3163_v30 = vmax.f32 %v3161_v19, %v3162_v10  ;;  %v3169_v17 = vrot.slane %v3168_v48, 4 }
 0x316   : > { %v3180_v36 = vrot.slane %v3179_v50, 1  ;;  %v3186_v18 = vmax.f32 %v3184_v55, %v3185_v59  ;;  %v3193_v49 = vmax.f32 %v3191_v32, %v3192_v8  ;;  %v3199_v4 = vrot.slane %v3198_v26, 2 }
 0x317   : > { %v3152_v52 = vrot.slane %v3151_v33, 1  ;;  %v3157_v44 = vrot.slane %v3156_v61, 2  ;;  %v3164_v23 = vrot.slane %v3163_v30, 2  ;;  %v3170_v29 = vmax.f32 %v3168_v48, %v3169_v17 }
 0x318   : > { %v3187_v2 = vrot.slane %v3186_v18, 1  ;;  %v3194_v51 = vrot.slane %v3193_v49, 1  ;;  %v3200_v11 = vmax.f32 %v3198_v26, %v3199_v4  ;;  %v3181_v41 = vmax.f32 %v3179_v50, %v3180_v36 }
 0x319   : > { %v3158_v58 = vmax.f32 %v3156_v61, %v3157_v44  ;;  %v3165_v63 = vmax.f32 %v3163_v30, %v3164_v23  ;;  %v3171_v25 = vrot.slane %v3170_v29, 2  ;;  %v3153_v62 = vmax.f32 %v3151_v33, %v3152_v52  ;;  %v3965_v23 = vld [vmem:[#allocation5 + $0x78] sm:$0xff] }
 0x31a   : > { %v3201_v45 = vrot.slane %v3200_v11, 1  ;;  %v3188_v7 = vmax.f32 %v3186_v18, %v3187_v2  ;;  %v3195_v16 = vmax.f32 %v3193_v49, %v3194_v51  ;;  %v3366_v15 = vadd.f32 %v8455_v35, %v3181_v41 }
 0x31b   : > { %v3159_v40 = vrot.slane %v3158_v58, 1  ;;  %v3166_v5 = vrot.slane %v3165_v63, 1  ;;  %v3172_v57 = vmax.f32 %v3170_v29, %v3171_v25  ;;  %v3362_v1 = vadd.f32 %v8455_v35, %v3153_v62 }
 0x31c   : > { %v3202_v38 = vmax.f32 %v3200_v11, %v3201_v45  ;;  %v3367_v37 = vadd.f32 %v8455_v35, %v3188_v7  ;;  %v3368_v21 = vadd.f32 %v8455_v35, %v3195_v16  ;;  %v3430_v31 = vmax.f32 %v3366_v15, 0.0 }
 0x31d   : > { %v3160_v9 = vmax.f32 %v3158_v58, %v3159_v40  ;;  %v3167_v27 = vmax.f32 %v3165_v63, %v3166_v5  ;;  %v3173_v28 = vrot.slane %v3172_v57, 1  ;;  %v3426_v19 = vmax.f32 %v3362_v1, 0.0 }
 0x31e   : > { %v3369_v6 = vadd.f32 %v8455_v35, %v3202_v38  ;;  %v3431_v12 = vmax.f32 %v3367_v37, 0.0  ;;  %v3432_v24 = vmax.f32 %v3368_v21, 0.0  ;;  %v3623_v50 = vrot.slane %v3430_v31, 4 }
 0x31f   : > { %v3174_v53 = vmax.f32 %v3172_v57, %v3173_v28  ;;  %v3363_v22 = vadd.f32 %v8455_v35, %v3160_v9  ;;  %v3364_v46 = vadd.f32 %v8455_v35, %v3167_v27 }
 0x320   : > { %v3433_v43 = vmax.f32 %v3369_v6, 0.0  ;;  %v3625_v8 = vrot.slane %v3431_v12, 3  ;;  %v3627_v61 = vrot.slane %v3432_v24, 2 }
 0x321   : > { %v3365_v13 = vadd.f32 %v8455_v35, %v3174_v53  ;;  %v3427_v39 = vmax.f32 %v3363_v22, 0.0  ;;  %v3428_v47 = vmax.f32 %v3364_v46, 0.0 }
 0x322   : > { %v3629_v36 = vrot.slane %v3433_v43, 1 }
 0x323   : > { %v3429_v55 = vmax.f32 %v3365_v13, 0.0  ;;  %v3617_v32 = vrot.slane %v3427_v39, 7  ;;  %v3619_v54 = vrot.slane %v3428_v47, 6 }
 0x325   : > { %v3618_v10 = vsel %vm9877_vm2, %v3617_v32, %v3426_v19  ;;  %v3621_v48 = vrot.slane %v3429_v55, 5  ;;  %vm9891_vm2 = vmmov %vm9889_vm4 }
 0x326   : > { %v3620_v59 = vsel %vm3544_vm3, %v3619_v54, %v3618_v10  ;;  %v3780_v35 = vpop.permute.xlu0 %3779 }
 0x327   : > { %v3622_v26 = vsel %vm9878_vm5, %v3621_v48, %v3620_v59  ;;  %v3717_v33 = vpop.permute.xlu1 %3716  ;;  %3800 = vst.msk [vmem:[#allocation5 + $0x80] sm:$0xff] %vm3732_vm1, %v3780_v35  ;;  %v6322_v17 = vpop.f32.mrb[24].mxu0  ;;  %vm9892_vm5 = vmmov %vm9891_vm2 }
 0x328   : > { %v3624_v30 = vsel %vm9879_vm14, %v3623_v50, %v3622_v26  ;;  %3737 = vst.msk [vmem:[#allocation5 + $0xa0] sm:$0xff] %vm3732_vm1, %v3717_v33  ;;  %v2426_v49 = vpop.f32.mrb[25].mxu0  ;;  %v2505_v63 = vsel %vm9890_vm13, %v6322_v17, -inf  ;;  %vm9893_vm14 = vmmov %vm9891_vm2  ;;  %vm9904_vm13 = vcmask 1044484  }
 0x329   : > { %v3626_v18 = vsel %vm9880_vm0, %v3625_v8, %v3624_v30  ;;  %v2502_v45 = vsel %vm9892_vm5, %v2426_v49, -inf  ;;  %vm9894_vm0 = vcmask 517120   ;;  %vm9906_vm5 = vcmask 1046534  }
 0x32a   : > { %v3628_v4 = vsel %vm9881_vm6, %v3627_v61, %v3626_v18  ;;  %vm9895_vm6 = vmmov %vm9894_vm0 }
 0x32b   : > { %v3630_v52 = vsel %vm9882_vm7, %v3629_v36, %v3628_v4  ;;  %vm9896_vm7 = vmmov %vm9894_vm0 }
 0x32c   : > { %3673 = vst.msk [vmem:[#allocation4 + $0x61] sm:$0xff] %vm9883_vm8, %v3630_v52  ;;  %vm9897_vm8 = vmmov %vm9894_vm0 }
 0x32e   : > { %v3966_v44 = vld [vmem:[#allocation5 + $0x80] sm:$0xff] }
 0x32f   : > { %4165 = vmatprep.mubr.f32.mxu1 %v3966_v44 }
 0x330   : > { %4166 = vmatmul.mubr.f32.gmra.mrb[6].mxu1 %v3965_v23 }
 0x333   : > { %v3762_v29 = vld [vmem:[#allocation4 + $0x60] sm:$0xff] }
 0x334   : > { %v8755_v2 = vld [vmem:[#allocation4 + $0x61] sm:$0xff]  ;;  %3783 = vrot.lane.b32.xlu0 %v3762_v29, %s9786_s16  ;;  %3690 = vst.msk [vmem:[#allocation5 + $0xf0] sm:$0xff] %vm9885_vm10, %v3762_v29  ;;  %vm9899_vm10 = vmmov %vm9894_vm0 }
 0x335   : > { %v8757_v51 = vld [vmem:[#allocation4 + $0x62] sm:$0xff]  ;;  %3720 = vrot.lane.b32.xlu1 %v8755_v2, %s9786_s16  ;;  %3818 = vst.msk [vmem:[#allocation5 + $0xd8] sm:$0xff] %vm9887_vm12, %v8755_v2  ;;  %vm9901_vm12 = vmmov %vm9894_vm0 }
 0x336   : > { %3946 = vst.msk [vmem:[#allocation5 + $0xc0] sm:$0xff] %vm9884_vm9, %v8757_v51  ;;  %vm9898_vm9 = vmmov %vm9894_vm0 }
 0x337   : > { %3755 = vst.msk [vmem:[#allocation5 + $0xf8] sm:$0xff] %vm9886_vm11, %v8757_v51  ;;  %vm9900_vm11 = vmmov %vm9894_vm0 }
 0x338   : > { %3882 = vst.msk [vmem:[#allocation5 + $0xb8] sm:$0xff] %vm9888_vm15, %v3762_v29  ;;  %vm9902_vm15 = vcmask 1041409  }
 0x33d   : > { %v3974_v11 = vld [vmem:[#allocation5 + $0xc0] sm:$0xff] }
 0x33e   : > { %6354 = vmatprep.mubr.msk.f32.mxu0 %vm9889_vm4, %v3974_v11  ;;  %vm9903_vm4 = vcmask 1043459  }
 0x349   : > { %v6325_v58 = vpop.f32.mrb[26].mxu0 }
 0x34a   : > { %v2506_v25 = vsel %vm9891_vm2, %v6325_v58, -inf  ;;  %v2436_v41 = vpop.f32.mrb[27].mxu0  ;;  %vm9905_vm2 = vcmask 1045509  }
 0x34b   : > { %v2507_v62 = vmax.f32 %v2505_v63, %v2506_v25  ;;  %v2503_v7 = vsel %vm9893_vm14, %v2436_v41, -inf  ;;  %vm9907_vm14 = vcmask 1047559  }
 0x34c   : > { %v2504_v40 = vmax.f32 %v2502_v45, %v2503_v7 }
 0x34d   : > { %v2751_v5 = vcombine.high %v2507_v62, %v2507_v62  ;;  %v2758_v57 = vrot.slane %v2507_v62, %v7904_v56 }
 0x34e   : > { %v2734_v16 = vcombine.high %v2504_v40, %v2504_v40  ;;  %v2741_v38 = vrot.slane %v2504_v40, %v7904_v56 }
 0x34f   : > { %v2765_v9 = vrot.slane %v2751_v5, %v7904_v56  ;;  %v2766_v27 = vcombine.high %v2758_v57, %v2758_v57  ;;  %v3231_v28 = vsel %vm9894_vm0, %v2758_v57, -inf  ;;  %vm9908_vm0 = vcmask 523264  }
 0x350   : > { %v3232_v15 = vrot.slane %v3231_v28, 4  ;;  %v2748_v1 = vrot.slane %v2734_v16, %v7904_v56  ;;  %v2749_v37 = vcombine.high %v2741_v38, %v2741_v38  ;;  %v3203_v53 = vsel %vm9895_vm6, %v2741_v38, -inf  ;;  %vm9909_vm6 = vmmov %vm9908_vm0 }
 0x351   : > { %v2767_v22 = vcombine.high %v2765_v9, %v2765_v9  ;;  %v3238_v46 = vsel %vm9896_vm7, %v2766_v27, -inf  ;;  %v3245_v21 = vsel %vm9897_vm8, %v2765_v9, -inf  ;;  %v3204_v6 = vrot.slane %v3203_v53, 4  ;;  %vm9910_vm7 = vmmov %vm9908_vm0 }
 0x352   : > { %v3233_v13 = vmax.f32 %v3231_v28, %v3232_v15  ;;  %v3239_v39 = vrot.slane %v3238_v46, 4  ;;  %v3246_v47 = vrot.slane %v3245_v21, 4  ;;  %v2750_v31 = vcombine.high %v2748_v1, %v2748_v1  ;;  %vm9911_vm8 = vmmov %vm9908_vm0 }
 0x353   : > { %v3252_v19 = vsel %vm9898_vm9, %v2767_v22, -inf  ;;  %v3205_v12 = vmax.f32 %v3203_v53, %v3204_v6  ;;  %v3210_v55 = vsel %vm9899_vm10, %v2749_v37, -inf  ;;  %v3217_v32 = vsel %vm9900_vm11, %v2748_v1, -inf  ;;  %v8790_v22 = vld [vmem:[%s9732_s2] ss:$0 sm:$0xff]  ;;  %vm9912_vm9 = vmmov %vm9908_vm0 }
 0x354   : > { %v3234_v54 = vrot.slane %v3233_v13, 2  ;;  %v3240_v24 = vmax.f32 %v3238_v46, %v3239_v39  ;;  %v3247_v43 = vmax.f32 %v3245_v21, %v3246_v47  ;;  %v3253_v10 = vrot.slane %v3252_v19, 4  ;;  %vm9913_vm10 = vmmov %vm9908_vm0 }
 0x355   : > { %v3206_v48 = vrot.slane %v3205_v12, 2  ;;  %v3211_v50 = vrot.slane %v3210_v55, 4  ;;  %v3218_v59 = vrot.slane %v3217_v32, 4  ;;  %v3224_v8 = vsel %vm9901_vm12, %v2750_v31, -inf  ;;  %vm9914_vm11 = vmmov %vm9908_vm0 }
 0x356   : > { %v3235_v26 = vmax.f32 %v3233_v13, %v3234_v54  ;;  %v3241_v35 = vrot.slane %v3240_v24, 2  ;;  %v3248_v33 = vrot.slane %v3247_v43, 2  ;;  %v3254_v61 = vmax.f32 %v3252_v19, %v3253_v10  ;;  %vm9915_vm12 = vmmov %vm9908_vm0 }
 0x357   : > { %v3207_v30 = vmax.f32 %v3205_v12, %v3206_v48  ;;  %v3212_v17 = vmax.f32 %v3210_v55, %v3211_v50  ;;  %v3219_v36 = vmax.f32 %v3217_v32, %v3218_v59  ;;  %v3225_v18 = vrot.slane %v3224_v8, 4 }
 0x358   : > { %v3236_v49 = vrot.slane %v3235_v26, 1  ;;  %v3242_v4 = vmax.f32 %v3240_v24, %v3241_v35  ;;  %v3249_v52 = vmax.f32 %v3247_v43, %v3248_v33  ;;  %v3255_v44 = vrot.slane %v3254_v61, 2 }
 0x359   : > { %v3208_v23 = vrot.slane %v3207_v30, 1  ;;  %v3213_v29 = vrot.slane %v3212_v17, 2  ;;  %v3220_v11 = vrot.slane %v3219_v36, 2  ;;  %v3226_v58 = vmax.f32 %v3224_v8, %v3225_v18 }
 0x35a   : > { %v3243_v63 = vrot.slane %v3242_v4, 1  ;;  %v3250_v25 = vrot.slane %v3249_v52, 1  ;;  %v3256_v41 = vmax.f32 %v3254_v61, %v3255_v44  ;;  %v3237_v40 = vmax.f32 %v3235_v26, %v3236_v49 }
 0x35b   : > { %v3214_v45 = vmax.f32 %v3212_v17, %v3213_v29  ;;  %v3221_v62 = vmax.f32 %v3219_v36, %v3220_v11  ;;  %v3227_v7 = vrot.slane %v3226_v58, 2  ;;  %v3209_v57 = vmax.f32 %v3207_v30, %v3208_v23 }
 0x35c   : > { %v3257_v5 = vrot.slane %v3256_v41, 1  ;;  %v3244_v16 = vmax.f32 %v3242_v4, %v3243_v63  ;;  %v3251_v28 = vmax.f32 %v3249_v52, %v3250_v25  ;;  %v3374_v46 = vadd.f32 %v8790_v22, %v3237_v40  ;;  %v3970_v25 = vld [vmem:[#allocation5 + $0xa0] sm:$0xff] }
 0x35d   : > { %v3215_v38 = vrot.slane %v3214_v45, 1  ;;  %v3222_v9 = vrot.slane %v3221_v62, 1  ;;  %v3228_v27 = vmax.f32 %v3226_v58, %v3227_v7  ;;  %v3370_v21 = vadd.f32 %v8790_v22, %v3209_v57 }
 0x35e   : > { %v3258_v15 = vmax.f32 %v3256_v41, %v3257_v5  ;;  %v3375_v6 = vadd.f32 %v8790_v22, %v3244_v16  ;;  %v3376_v31 = vadd.f32 %v8790_v22, %v3251_v28  ;;  %v3438_v54 = vmax.f32 %v3374_v46, 0.0  ;;  %v3821_v5 = vld [vmem:[#allocation4 + $0x12] sm:$0xff] }
 0x35f   : > { %v3216_v1 = vmax.f32 %v3214_v45, %v3215_v38  ;;  %v3223_v37 = vmax.f32 %v3221_v62, %v3222_v9  ;;  %v3229_v53 = vrot.slane %v3228_v27, 1  ;;  %v3434_v24 = vmax.f32 %v3370_v21, 0.0  ;;  %v3822_v38 = vld [vmem:[#allocation4 + $0x22] sm:$0xff]  ;;  %v4022_v46 = vld [vmem:[%s9733_s3 + $0x100] sm:$0xff] }
 0x360   : > { %v3377_v19 = vadd.f32 %v8790_v22, %v3258_v15  ;;  %v3439_v43 = vmax.f32 %v3375_v6, 0.0  ;;  %v3440_v59 = vmax.f32 %v3376_v31, 0.0  ;;  %v3637_v17 = vrot.slane %v3438_v54, 4 }
 0x361   : > { %v3230_v13 = vmax.f32 %v3228_v27, %v3229_v53  ;;  %v3371_v39 = vadd.f32 %v8790_v22, %v3216_v1  ;;  %v3372_v47 = vadd.f32 %v8790_v22, %v3223_v37  ;;  %v3823_v27 = vld [vmem:[#allocation4 + $0x32] sm:$0xff] }
 0x362   : > { %v3441_v35 = vmax.f32 %v3377_v19, 0.0  ;;  %v3639_v49 = vrot.slane %v3439_v43, 3  ;;  %v3641_v52 = vrot.slane %v3440_v59, 2  ;;  %v4038_v37 = vld [vmem:[%s9733_s3 + $0x180] sm:$0xff]  ;;  %v4039_v53 = vld [vmem:[%s9733_s3 + $0x188] sm:$0xff] }
 0x363   : > { %v3373_v12 = vadd.f32 %v8790_v22, %v3230_v13  ;;  %v3435_v55 = vmax.f32 %v3371_v39, 0.0  ;;  %v3436_v32 = vmax.f32 %v3372_v47, 0.0  ;;  %v6459_v39 = vpack.c.bf16 %v4039_v53, %v4038_v37  ;;  %v4023_v47 = vld [vmem:[%s9733_s3 + $0x108] sm:$0xff] }
 0x364   : > { %v3643_v23 = vrot.slane %v3441_v35, 1  ;;  %v6461_v19 = vpack.c.bf16 %v4023_v47, %v4022_v46 }
 0x365   : > { %v3437_v10 = vmax.f32 %v3373_v12, 0.0  ;;  %v3631_v48 = vrot.slane %v3435_v55, 7  ;;  %v3633_v50 = vrot.slane %v3436_v32, 6  ;;  %v6328_v30 = vpop.f32.mrb[28].mxu0  ;;  %6460 = vmatprep.subr.bf16.mxu1 %v6459_v39 }
 0x366   : > { %v3782_v8 = vpop.permute.xlu0 %3781  ;;  %v2446_v18 = vpop.f32.mrb[29].mxu0  ;;  %v2511_v28 = vsel %vm9915_vm12, %v6328_v30, -inf  ;;  %6462 = vmatpush3.bf16.msra.mxu1 %v6461_v19  ;;  %vm9929_vm12 = vcmask 1044484  }
 0x367   : > { %v3719_v26 = vpop.permute.xlu1 %3718  ;;  %v3632_v33 = vsel %vm9902_vm15, %v3631_v48, %v3434_v24  ;;  %v3635_v61 = vrot.slane %v3437_v10, 5  ;;  %3801 = vst.msk [vmem:[#allocation5 + $0xa8] sm:$0xff] %vm3732_vm1, %v3782_v8  ;;  %vm9916_vm15 = vmmov %vm9908_vm0 }
 0x368   : > { %3738 = vst.msk [vmem:[#allocation5 + $0xc8] sm:$0xff] %vm3732_vm1, %v3719_v26  ;;  %v3634_v36 = vsel %vm3544_vm3, %v3633_v50, %v3632_v33 }
 0x369   : > { %v3636_v4 = vsel %vm9903_vm4, %v3635_v61, %v3634_v36  ;;  %vm9917_vm4 = vmmov %vm9908_vm0 }
 0x36a   : > { %v3638_v44 = vsel %vm9904_vm13, %v3637_v17, %v3636_v4  ;;  %v2508_v21 = vsel %vm9917_vm4, %v2446_v18, -inf  ;;  %vm9918_vm13 = vmmov %vm9908_vm0  ;;  %vm9931_vm4 = vcmask 1046534  }
 0x36b   : > { %v3640_v29 = vsel %vm9905_vm2, %v3639_v49, %v3638_v44  ;;  %vm9919_vm2 = vcmask 517120  }
 0x36c   : > { %v3642_v11 = vsel %vm9906_vm5, %v3641_v52, %v3640_v29  ;;  %vm9920_vm5 = vmmov %vm9919_vm2 }
 0x36d   : > { %v3644_v58 = vsel %vm9907_vm14, %v3643_v23, %v3642_v11  ;;  %vm9921_vm14 = vmmov %vm9919_vm2 }
 0x36e   : > { %3674 = vst.msk [vmem:[#allocation4 + $0x71] sm:$0xff] %vm9908_vm0, %v3644_v58  ;;  %v3971_v63 = vld [vmem:[#allocation5 + $0xa8] sm:$0xff]  ;;  %vm9922_vm0 = vmmov %vm9919_vm2 }
 0x36f   : > { %4170 = vmatprep.mubr.f32.mxu1 %v3971_v63 }
 0x370   : > { %4171 = vmatmul.mubr.f32.gmra.mrb[8].mxu1 %v3970_v25 }
 0x375   : > { %v3763_v41 = vld [vmem:[#allocation4 + $0x70] sm:$0xff] }
 0x376   : > { %v8810_v45 = vld [vmem:[#allocation4 + $0x71] sm:$0xff]  ;;  %3785 = vrot.lane.b32.xlu0 %v3763_v41, %s9786_s16  ;;  %3691 = vst.msk [vmem:[#allocation5 + $0x118] sm:$0xff] %vm9910_vm7, %v3763_v41  ;;  %v6006_v7 = vpop.f32.mrb[0].mxu1  ;;  %vm9924_vm7 = vmmov %vm9922_vm0 }
 0x377   : > { %v8812_v62 = vld [vmem:[#allocation4 + $0x72] sm:$0xff]  ;;  %3722 = vrot.lane.b32.xlu1 %v8810_v45, %s9786_s16  ;;  %3819 = vst.msk [vmem:[#allocation5 + $0x100] sm:$0xff] %vm9911_vm8, %v8810_v45  ;;  %v6007_v40 = vpop.f32.mrb[1].mxu1  ;;  %vm9925_vm8 = vmmov %vm9922_vm0 }
 0x378   : > { %3947 = vst.msk [vmem:[#allocation5 + $0xe8] sm:$0xff] %vm9909_vm6, %v8812_v62  ;;  %v8825_v57 = vadd.f32 %v6007_v40, %v6006_v7  ;;  %vm9923_vm6 = vmmov %vm9922_vm0 }
 0x379   : > { %3756 = vst.msk [vmem:[#allocation5 + $0x120] sm:$0xff] %vm9912_vm9, %v8812_v62  ;;  %vm9926_vm9 = vmmov %vm9922_vm0 }
 0x37a   : > { %3883 = vst.msk [vmem:[#allocation5 + $0xe0] sm:$0xff] %vm9913_vm10, %v3763_v41  ;;  %vm9927_vm10 = vcmask 1041409  }
 0x37b   : > { %3837 = vrot.lane.b32.xlu1 %v3821_v5, %s9786_s16 }
 0x37f   : > { %v3979_v16 = vld [vmem:[#allocation5 + $0xe8] sm:$0xff]  ;;  %3839 = vrot.lane.b32.xlu1 %v3822_v38, %s9786_s16  ;;  %v6331_v9 = vpop.f32.mrb[30].mxu0 }
 0x380   : > { %6355 = vmatmul.mubr.msk.f32.gmra.mrb[36].mxu0 %vm9914_vm11, %v3979_v16  ;;  %v2512_v15 = vsel %vm9916_vm15, %v6331_v9, -inf  ;;  %v2456_v1 = vpop.f32.mrb[31].mxu0  ;;  %vm9928_vm11 = vcmask 1043459   ;;  %vm9930_vm15 = vcmask 1045509  }
 0x381   : > { %v2513_v6 = vmax.f32 %v2511_v28, %v2512_v15  ;;  %v2509_v13 = vsel %vm9918_vm13, %v2456_v1, -inf  ;;  %vm9932_vm13 = vcmask 1047559  }
 0x382   : > { %v2510_v31 = vmax.f32 %v2508_v21, %v2509_v13 }
 0x383   : > { %3841 = vrot.lane.b32.xlu1 %v3823_v27, %s9786_s16  ;;  %v2785_v12 = vcombine.high %v2513_v6, %v2513_v6  ;;  %v2792_v55 = vrot.slane %v2513_v6, %v7904_v56  ;;  %v8848_v32 = vpop.f32.mrb[32].mxu0 }
 0x384   : > { %v6009_v54 = vpop.f32.mrb[2].mxu1  ;;  %v2768_v24 = vcombine.high %v2510_v31, %v2510_v31  ;;  %v2775_v43 = vrot.slane %v2510_v31, %v7904_v56  ;;  %v8851_v10 = vpop.f32.mrb[33].mxu0 }
 0x385   : > { %v6010_v48 = vpop.f32.mrb[3].mxu1  ;;  %v2799_v50 = vrot.slane %v2785_v12, %v7904_v56  ;;  %v2800_v59 = vcombine.high %v2792_v55, %v2792_v55  ;;  %v3287_v8 = vsel %vm9919_vm2, %v2792_v55, -inf  ;;  %vm9933_vm2 = vcmask 523264  }
 0x386   : > { %v8855_v26 = vadd.f32 %v6010_v48, %v6009_v54  ;;  %v3288_v35 = vrot.slane %v3287_v8, 4  ;;  %v2782_v33 = vrot.slane %v2768_v24, %v7904_v56  ;;  %v2783_v61 = vcombine.high %v2775_v43, %v2775_v43 }
 0x387   : > { %3843 = vrot.lane.b32.xlu1 %v8656_v3, %s9786_s16  ;;  %v3259_v30 = vsel %vm9920_vm5, %v2775_v43, -inf  ;;  %v2801_v17 = vcombine.high %v2799_v50, %v2799_v50  ;;  %v3294_v36 = vsel %vm9921_vm14, %v2800_v59, -inf  ;;  %v3301_v18 = vsel %vm9922_vm0, %v2799_v50, -inf  ;;  %vm9934_vm5 = vmmov %vm9933_vm2 }
 0x388   : > { %v3260_v49 = vrot.slane %v3259_v30, 4  ;;  %v3289_v4 = vmax.f32 %v3287_v8, %v3288_v35  ;;  %v3295_v52 = vrot.slane %v3294_v36, 4  ;;  %v3302_v44 = vrot.slane %v3301_v18, 4  ;;  %vm9935_vm14 = vmmov %vm9933_vm2 }
 0x389   : > { %v2784_v23 = vcombine.high %v2782_v33, %v2782_v33  ;;  %v3308_v29 = vsel %vm9923_vm6, %v2801_v17, -inf  ;;  %v3266_v3 = vsel %vm9924_vm7, %v2783_v61, -inf  ;;  %v3273_v58 = vsel %vm9925_vm8, %v2782_v33, -inf  ;;  %vm9936_vm0 = vmmov %vm9933_vm2 }
 0x38a   : > { %v3261_v11 = vmax.f32 %v3259_v30, %v3260_v49  ;;  %v3290_v63 = vrot.slane %v3289_v4, 2  ;;  %v3296_v25 = vmax.f32 %v3294_v36, %v3295_v52  ;;  %v3303_v41 = vmax.f32 %v3301_v18, %v3302_v44  ;;  %v4040_v36 = vld [vmem:[%s9733_s3 + $0x190] sm:$0xff]  ;;  %v4041_v18 = vld [vmem:[%s9733_s3 + $0x198] sm:$0xff]  ;;  %vm9937_vm6 = vmmov %vm9936_vm0 }
 0x38b   : > { %3845 = vrot.lane.b32.xlu1 %v8707_v20, %s9786_s16  ;;  %v3309_v7 = vrot.slane %v3308_v29, 4  ;;  %v3267_v5 = vrot.slane %v3266_v3, 4  ;;  %v3274_v16 = vrot.slane %v3273_v58, 4  ;;  %v3280_v38 = vsel %vm9926_vm9, %v2784_v23, -inf  ;;  %v4024_v52 = vld [vmem:[%s9733_s3 + $0x110] sm:$0xff]  ;;  %v4025_v44 = vld [vmem:[%s9733_s3 + $0x118] sm:$0xff]  ;;  %vm9938_vm7 = vmmov %vm9936_vm0 }
 0x38c   : > { %v3262_v40 = vrot.slane %v3261_v11, 2  ;;  %v3291_v9 = vmax.f32 %v3289_v4, %v3290_v63  ;;  %v3297_v27 = vrot.slane %v3296_v25, 2  ;;  %v3304_v28 = vrot.slane %v3303_v41, 2  ;;  %vm9939_vm8 = vmmov %vm9936_vm0 }
 0x38d   : > { %v3310_v15 = vmax.f32 %v3308_v29, %v3309_v7  ;;  %v3268_v37 = vmax.f32 %v3266_v3, %v3267_v5  ;;  %v3275_v53 = vmax.f32 %v3273_v58, %v3274_v16  ;;  %v3281_v46 = vrot.slane %v3280_v38, 4  ;;  %v4042_v3 = vld [vmem:[%s9733_s3 + $0x1a0] sm:$0xff]  ;;  %v4043_v58 = vld [vmem:[%s9733_s3 + $0x1a8] sm:$0xff]  ;;  %vm9940_vm9 = vmmov %vm9936_vm0 }
 0x38e   : > { %v3263_v1 = vmax.f32 %v3261_v11, %v3262_v40  ;;  %v3292_v20 = vrot.slane %v3291_v9, 1  ;;  %v3298_v21 = vmax.f32 %v3296_v25, %v3297_v27  ;;  %v3305_v6 = vmax.f32 %v3303_v41, %v3304_v28  ;;  %v4026_v40 = vld [vmem:[%s9733_s3 + $0x120] sm:$0xff]  ;;  %v4027_v5 = vld [vmem:[%s9733_s3 + $0x128] sm:$0xff]  ;;  %v4044_v27 = vld [vmem:[%s9733_s3 + $0x1b0] sm:$0xff] }
 0x38f   : > { %3847 = vrot.lane.b32.xlu1 %v8757_v51, %s9786_s16  ;;  %v3311_v13 = vrot.slane %v3310_v15, 2  ;;  %v3269_v47 = vrot.slane %v3268_v37, 2  ;;  %v3276_v31 = vrot.slane %v3275_v53, 2  ;;  %v3282_v19 = vmax.f32 %v3280_v38, %v3281_v46  ;;  %v4045_v28 = vld [vmem:[%s9733_s3 + $0x1b8] sm:$0xff] }
 0x390   : > { %v3264_v39 = vrot.slane %v3263_v1, 1  ;;  %v3299_v12 = vrot.slane %v3298_v21, 1  ;;  %v3306_v55 = vrot.slane %v3305_v6, 1  ;;  %v3293_v50 = vmax.f32 %v3291_v9, %v3292_v20 }
 0x391   : > { %v3312_v54 = vmax.f32 %v3310_v15, %v3311_v13  ;;  %v3270_v24 = vmax.f32 %v3268_v37, %v3269_v47  ;;  %v3277_v43 = vmax.f32 %v3275_v53, %v3276_v31  ;;  %v3283_v48 = vrot.slane %v3282_v19, 2 }
 0x392   : > { %v3300_v59 = vmax.f32 %v3298_v21, %v3299_v12  ;;  %v3265_v8 = vmax.f32 %v3263_v1, %v3264_v39  ;;  %v3307_v30 = vmax.f32 %v3305_v6, %v3306_v55  ;;  %v3382_v23 = vadd.f32 %v8790_v22, %v3293_v50  ;;  %v4046_v55 = vld [vmem:[%s9733_s3 + $0x1c0] sm:$0xff] }
 0x393   : > { %3849 = vrot.lane.b32.xlu1 %v8812_v62, %s9786_s16  ;;  %v3313_v51 = vrot.slane %v3312_v54, 1  ;;  %v3271_v35 = vrot.slane %v3270_v24, 1  ;;  %v3278_v33 = vrot.slane %v3277_v43, 1  ;;  %v3284_v61 = vmax.f32 %v3282_v19, %v3283_v48  ;;  %v4028_v19 = vld [vmem:[%s9733_s3 + $0x130] sm:$0xff] }
 0x394   : > { %v3383_v29 = vadd.f32 %v8790_v22, %v3300_v59  ;;  %v3378_v11 = vadd.f32 %v8790_v22, %v3265_v8  ;;  %v6463_v7 = vpack.c.bf16 %v4041_v18, %v4040_v36  ;;  %v3384_v16 = vadd.f32 %v8790_v22, %v3307_v30  ;;  %v4031_v30 = vld [vmem:[%s9733_s3 + $0x148] sm:$0xff]  ;;  %v4048_v18 = vld [vmem:[%s9733_s3 + $0x1d0] sm:$0xff] }
 0x395   : > { %v3314_v17 = vmax.f32 %v3312_v54, %v3313_v51  ;;  %v3272_v49 = vmax.f32 %v3270_v24, %v3271_v35  ;;  %v3279_v4 = vmax.f32 %v3277_v43, %v3278_v33  ;;  %v3285_v62 = vrot.slane %v3284_v61, 1  ;;  %v4047_v54 = vld [vmem:[%s9733_s3 + $0x1c8] sm:$0xff] }
 0x396   : > { %v6465_v9 = vpack.c.bf16 %v4025_v44, %v4024_v52  ;;  %6464 = vmatprep.subr.bf16.mxu1 %v6463_v7  ;;  %v6467_v53 = vpack.c.bf16 %v4043_v58, %v4042_v3  ;;  %v3446_v46 = vmax.f32 %v3382_v23, 0.0  ;;  %v3447_v20 = vmax.f32 %v3383_v29, 0.0  ;;  %v4033_v3 = vld [vmem:[%s9733_s3 + $0x158] sm:$0xff]  ;;  %v4050_v58 = vld [vmem:[%s9733_s3 + $0x1e0] sm:$0xff] }
 0x397   : > { %v3286_v63 = vmax.f32 %v3284_v61, %v3285_v62  ;;  %v3379_v25 = vadd.f32 %v8790_v22, %v3272_v49  ;;  %v3380_v41 = vadd.f32 %v8790_v22, %v3279_v4  ;;  %v3385_v38 = vadd.f32 %v8790_v22, %v3314_v17  ;;  %v4030_v61 = vld [vmem:[%s9733_s3 + $0x140] sm:$0xff]  ;;  %v4049_v49 = vld [vmem:[%s9733_s3 + $0x1d8] sm:$0xff] }
 0x398   : > { %v3442_v21 = vmax.f32 %v3378_v11, 0.0  ;;  %6466 = vmatpush3.bf16.msra.mxu1 %v6465_v9  ;;  %v6469_v6 = vpack.c.bf16 %v4027_v5, %v4026_v40  ;;  %v6471_v31 = vpack.c.bf16 %v4045_v28, %v4044_v27  ;;  %v3448_v12 = vmax.f32 %v3384_v16, 0.0  ;;  %v4032_v11 = vld [vmem:[%s9733_s3 + $0x150] sm:$0xff]  ;;  %v4034_v5 = vld [vmem:[%s9733_s3 + $0x160] sm:$0xff]  ;;  %v4035_v16 = vld [vmem:[%s9733_s3 + $0x168] sm:$0xff] }
 0x399   : > { %v3381_v15 = vadd.f32 %v8790_v22, %v3286_v63  ;;  %v3443_v1 = vmax.f32 %v3379_v25, 0.0  ;;  %v3444_v37 = vmax.f32 %v3380_v41, 0.0  ;;  %6468 = vmatprep.subr.bf16.mxu1 %v6467_v53  ;;  %v4029_v22 = vld [vmem:[%s9733_s3 + $0x138] sm:$0xff]  ;;  %v3449_v24 = vmax.f32 %v3385_v38, 0.0  ;;  %v4051_v63 = vld [vmem:[%s9733_s3 + $0x1e8] sm:$0xff]  ;;  %v4052_v38 = vld [vmem:[%s9733_s3 + $0x1f0] sm:$0xff] }
 0x39a   : > { %v3651_v50 = vrot.slane %v3446_v46, 4  ;;  %v6473_v51 = vpack.c.bf16 %v4029_v22, %v4028_v19  ;;  %v3653_v8 = vrot.slane %v3447_v20, 3  ;;  %v6475_v33 = vpack.c.bf16 %v4047_v54, %v4046_v55  ;;  %v4053_v9 = vld [vmem:[%s9733_s3 + $0x1f8] sm:$0xff]  ;;  %v4036_v28 = vld [vmem:[%s9733_s3 + $0x170] sm:$0xff] }
 0x39b   : > { %v3445_v13 = vmax.f32 %v3381_v15, 0.0  ;;  %v3645_v39 = vrot.slane %v3443_v1, 7  ;;  %v3647_v47 = vrot.slane %v3444_v37, 6  ;;  %v3655_v17 = vrot.slane %v3448_v12, 2  ;;  %v4037_v15 = vld [vmem:[%s9733_s3 + $0x178] sm:$0xff] }
 0x39c   : > { %6470 = vmatpush3.bf16.msra.mxu1 %v6469_v6  ;;  %v3657_v4 = vrot.slane %v3449_v24, 1  ;;  %v6477_v44 = vpack.c.bf16 %v4031_v30, %v4030_v61  ;;  %v6479_v29 = vpack.c.bf16 %v4049_v49, %v4048_v18  ;;  %v6481_v7 = vpack.c.bf16 %v4033_v3, %v4032_v11 }
 0x39d   : > { %v3646_v43 = vsel %vm9927_vm10, %v3645_v39, %v3442_v21  ;;  %v3649_v48 = vrot.slane %v3445_v13, 5  ;;  %6472 = vmatprep.subr.bf16.mxu1 %v6471_v31  ;;  %v6483_v40 = vpack.c.bf16 %v4051_v63, %v4050_v58  ;;  %v6485_v27 = vpack.c.bf16 %v4035_v16, %v4034_v5  ;;  %v3975_v21 = vld [vmem:[#allocation5 + $0xc8] sm:$0xff]  ;;  %v3877_v39 = vld [vmem:[#allocation4 + $0x90] sm:$0xff] }
 0x39e   : > { %v3648_v59 = vsel %vm3544_vm3, %v3647_v47, %v3646_v43  ;;  %v6487_v46 = vpack.c.bf16 %v4053_v9, %v4052_v38  ;;  %v6489_v6 = vpack.c.bf16 %v4037_v15, %v4036_v28  ;;  %3885 = vst.msk [vmem:[#allocation5 + $0x130] sm:$0xff] %vm9938_vm7, %v3877_v39  ;;  %v3941_v47 = vld [vmem:[#allocation4 + $0x92] sm:$0xff]  ;;  %vm4713_vm10 = vcmask 519168   ;;  %vm9949_vm7 = vmmov %vm9937_vm6 }
 0x39f   : > { %v3650_v35 = vsel %vm9928_vm11, %v3649_v48, %v3648_v59  ;;  %3949 = vst.msk [vmem:[#allocation5 + $0x138] sm:$0xff] %vm9939_vm8, %v3941_v47  ;;  %vm9941_vm11 = vcmask 516096   ;;  %vm9950_vm8 = vcmask 517120  }
 0x3a0   : > { %v3652_v36 = vsel %vm9929_vm12, %v3651_v50, %v3650_v35  ;;  %6474 = vmatpush3.bf16.msra.mxu1 %v6473_v51  ;;  %5251 = vst.msk [vmem:[#allocation8] sm:$0xf] %vm4713_vm10, %v6839_v0  ;;  %5253 = vst.msk [vmem:[#allocation8 + $0xc] sm:$0xf] %vm4713_vm10, %v6839_v0 }
 0x3a1   : > { %v3654_v62 = vsel %vm9930_vm15, %v3653_v8, %v3652_v36  ;;  %6476 = vmatprep.subr.bf16.mxu1 %v6475_v33  ;;  %5254 = vst.msk [vmem:[#allocation8] sm:$0x1] %vm9941_vm11, %v6839_v0  ;;  %vm9942_vm12 = vmmov %vm9941_vm11 }
 0x3a2   : > { %v3656_v52 = vsel %vm9931_vm4, %v3655_v17, %v3654_v62  ;;  %5257 = vst.msk [vmem:[#allocation8 + $0xc] sm:$0x1] %vm9942_vm12, %v6839_v0  ;;  %vm9943_vm15 = vmmov %vm9941_vm11 }
 0x3a3   : > { %v3658_v23 = vsel %vm9932_vm13, %v3657_v4, %v3656_v52  ;;  %5258 = vst.msk [vmem:[#allocation8 + $0x3] sm:$0x1] %vm9943_vm15, %v6839_v0  ;;  %vm9944_vm4 = vmmov %vm9941_vm11  ;;  %vm4652_vm13 = vcmask 521216  }
 0x3a4   : > { %3675 = vst.msk [vmem:[#allocation4 + $0x81] sm:$0xff] %vm9933_vm2, %v3658_v23  ;;  %6478 = vmatpush3.bf16.msra.mxu1 %v6477_v44  ;;  %vm9945_vm2 = vmmov %vm9944_vm4 }
 0x3a5   : > { %6480 = vmatprep.subr.bf16.mxu1 %v6479_v29  ;;  %5261 = vst.msk [vmem:[#allocation8 + $0xf] sm:$0x1] %vm9944_vm4, %v6839_v0  ;;  %vm9952_vm11 = vmmov %vm9950_vm8 }
 0x3a6   : > { %v3784_v25 = vpop.permute.xlu0 %3783  ;;  %4653 = vst.msk [vmem:[#allocation6] sm:$0x3f] %vm4652_vm13, %v6839_v0  ;;  %4655 = vst.msk [vmem:[#allocation6 + $0x28] sm:$0x3f] %vm4652_vm13, %v6839_v0 }
 0x3a7   : > { %v3721_v41 = vpop.permute.xlu1 %3720  ;;  %3802 = vst.msk [vmem:[#allocation5 + $0xd0] sm:$0xff] %vm3732_vm1, %v3784_v25  ;;  %vm9953_vm12 = vmmov %vm9937_vm6 }
 0x3a8   : > { %3739 = vst.msk [vmem:[#allocation5 + $0xf0] sm:$0xff] %vm3732_vm1, %v3721_v41  ;;  %6482 = vmatpush3.bf16.msra.mxu1 %v6481_v7  ;;  %vm9954_vm15 = vmmov %vm9937_vm6 }
 0x3a9   : > { %6484 = vmatprep.subr.bf16.mxu1 %v6483_v40  ;;  %4656 = vst.msk [vmem:[#allocation6] sm:$0x1] %vm9945_vm2, %v6839_v0  ;;  %vm9955_vm4 = vmmov %vm9950_vm8 }
 0x3aa   : > { %vm9956_vm13 = vmmov %vm9955_vm4 }
 0x3ab   : > { %v3828_v1 = vld [vmem:[#allocation4 + $0x82] sm:$0xff] }
 0x3ac   : > { %v3764_v37 = vld [vmem:[#allocation4 + $0x80] sm:$0xff]  ;;  %3851 = vrot.lane.b32.xlu1 %v3828_v1, %s9786_s16  ;;  %3948 = vst.msk [vmem:[#allocation5 + $0x110] sm:$0xff] %vm9934_vm5, %v3828_v1  ;;  %6486 = vmatpush3.bf16.msra.mxu1 %v6485_v27  ;;  %vm9946_vm5 = vmmov %vm9945_vm2 }
 0x3ad   : > { %v3892_v53 = vld [vmem:[#allocation4 + $0x81] sm:$0xff]  ;;  %3787 = vrot.lane.b32.xlu0 %v3764_v37, %s9786_s16  ;;  %3884 = vst.msk [vmem:[#allocation5 + $0x108] sm:$0xff] %vm9936_vm0, %v3764_v37  ;;  %6488 = vmatprep.subr.bf16.mxu1 %v6487_v46  ;;  %vm9948_vm0 = vmmov %vm9945_vm2 }
 0x3ae   : > { %3820 = vst.msk [vmem:[#allocation5 + $0x128] sm:$0xff] %vm9935_vm14, %v3892_v53  ;;  %v3976_v20 = vld [vmem:[#allocation5 + $0xd0] sm:$0xff]  ;;  %vm9947_vm14 = vmmov %vm9945_vm2 }
 0x3af   : > { %4175 = vmatprep.mubr.f32.mxu1 %v3976_v20  ;;  %v3980_v24 = vld [vmem:[#allocation5 + $0xf0] sm:$0xff]  ;;  %4662 = vst.msk [vmem:[#allocation6 + $0x5] sm:$0x1] %vm9946_vm5, %v6839_v0  ;;  %vm9957_vm2 = vmmov %vm9937_vm6 }
 0x3b0   : > { %4176 = vmatmul.mubr.f32.gmra.mrb[10].mxu1 %v3975_v21  ;;  %4661 = vst.msk [vmem:[#allocation6 + $0x28] sm:$0x1] %vm9947_vm14, %v6839_v0  ;;  %vm9958_vm5 = vmmov %vm9955_vm4 }
 0x3b1   : > { %3902 = vrot.lane.b32.xlu0 %v8334_v14, %s9786_s16  ;;  %6490 = vmatpush3.bf16.msra.mxu1 %v6489_v6  ;;  %4667 = vst.msk [vmem:[#allocation6 + $0x2d] sm:$0x1] %vm9948_vm0, %v6839_v0  ;;  %vm9959_vm14 = vmmov %vm9955_vm4 }
 0x3b2   : > { %vm9960_vm0 = vmmov %vm9955_vm4 }
 0x3b3   : > { %v3984_v13 = vld [vmem:[#allocation5 + $0x110] sm:$0xff] }
 0x3b4   : > { %6357 = vmatprep.mubr.msk.f32.mxu0 %vm9937_vm6, %v3984_v13 }
 0x3b5   : > { %3904 = vrot.lane.b32.xlu0 %v8517_v60, %s9786_s16 }
 0x3b9   : > { %3906 = vrot.lane.b32.xlu0 %v8665_v42, %s9786_s16  ;;  %v3893_v42 = vld [vmem:[#allocation4 + $0x91] sm:$0xff] }
 0x3bd   : > { %3908 = vrot.lane.b32.xlu0 %v8705_v34, %s9786_s16  ;;  %v3989_v34 = vld [vmem:[#allocation5 + $0x138] sm:$0xff] }
 0x3be   : > { %6358 = vmatmul.mubr.msk.f32.gmra.mrb[38].mxu0 %vm9940_vm9, %v3989_v34  ;;  %vm9951_vm9 = vmmov %vm9950_vm8 }
 0x3c1   : > { %3910 = vrot.lane.b32.xlu0 %v8755_v2, %s9786_s16 }
 0x3c3   : > { %v6012_v14 = vpop.f32.mrb[4].mxu1 }
 0x3c4   : > { %v6013_v31 = vpop.f32.mrb[5].mxu1 }
 0x3c5   : > { %3912 = vrot.lane.b32.xlu0 %v8810_v45, %s9786_s16  ;;  %v8995_v60 = vadd.f32 %v6013_v31, %v6012_v14 }
 0x3c9   : > { %3914 = vrot.lane.b32.xlu0 %v3892_v53, %s9786_s16 }
 0x3cd   : > { %3916 = vrot.lane.b32.xlu0 %v3893_v42, %s9786_s16 }
 0x3d1   : > { %v9000_v19 = vpop.f32.mrb[34].mxu0 }
 0x3d2   : > { %v9002_v2 = vpop.f32.mrb[35].mxu0 }
 0x3e8   : > { %v3786_v22 = vpop.permute.xlu0 %3785 }
 0x3e9   : > { %v3723_v12 = vpop.permute.xlu1 %3722  ;;  %3803 = vst.msk [vmem:[#allocation5 + $0xf8] sm:$0xff] %vm3732_vm1, %v3786_v22  ;;  %v4887_v22 = vld [vmem:[%s9735_s5 + $0x80] sm:$0xff] }
 0x3ea   : > { %3740 = vst.msk [vmem:[#allocation5 + $0x118] sm:$0xff] %vm3732_vm1, %v3723_v12  ;;  %v4888_v12 = vld [vmem:[%s9735_s5 + $0x88] sm:$0xff] }
 0x3ed   : > { %v3838_v45 = vpop.permute.xlu1 %3837 }
 0x3ee   : > { %3861 = vst.msk [vmem:[#allocation5 + $0x10] sm:$0xff] %vm3732_vm1, %v3838_v45  ;;  %v4871_v45 = vld [vmem:[%s9735_s5] sm:$0xff] }
 0x3f0   : > { %v3981_v54 = vld [vmem:[#allocation5 + $0xf8] sm:$0xff] }
 0x3f1   : > { %v3840_v55 = vpop.permute.xlu1 %3839  ;;  %4180 = vmatprep.mubr.f32.mxu1 %v3981_v54  ;;  %v3985_v49 = vld [vmem:[#allocation5 + $0x118] sm:$0xff] }
 0x3f2   : > { %3862 = vst.msk [vmem:[#allocation5 + $0x38] sm:$0xff] %vm3732_vm1, %v3840_v55  ;;  %4181 = vmatmul.mubr.f32.gmra.mrb[12].mxu1 %v3980_v24  ;;  %v6507_v55 = vpack.c.bf16 %v4888_v12, %v4887_v22  ;;  %v4872_v54 = vld [vmem:[%s9735_s5 + $0x8] sm:$0xff]  ;;  %v4889_v24 = vld [vmem:[%s9735_s5 + $0x90] sm:$0xff] }
 0x3f4   : > { %6508 = vmatprep.subr.bf16.mxu1 %v6507_v55 }
 0x3f5   : > { %v3842_v43 = vpop.permute.xlu1 %3841  ;;  %v3952_v52 = vld [vmem:[#allocation5 + $0x10] sm:$0xff] }
 0x3f6   : > { %3863 = vst.msk [vmem:[#allocation5 + $0x60] sm:$0xff] %vm3732_vm1, %v3842_v43  ;;  %v4890_v43 = vld [vmem:[%s9735_s5 + $0x98] sm:$0xff] }
 0x3f9   : > { %v3844_v48 = vpop.permute.xlu1 %3843  ;;  %v3957_v29 = vld [vmem:[#allocation5 + $0x38] sm:$0xff] }
 0x3fa   : > { %3864 = vst.msk [vmem:[#allocation5 + $0x88] sm:$0xff] %vm3732_vm1, %v3844_v48  ;;  %v6509_v48 = vpack.c.bf16 %v4872_v54, %v4871_v45 }
 0x3fd   : > { %v3846_v50 = vpop.permute.xlu1 %3845  ;;  %v3962_v58 = vld [vmem:[#allocation5 + $0x60] sm:$0xff] }
 0x3fe   : > { %3865 = vst.msk [vmem:[#allocation5 + $0xb0] sm:$0xff] %vm3732_vm1, %v3846_v50  ;;  %v6511_v50 = vpack.c.bf16 %v4890_v43, %v4889_v24 }
 0x401   : > { %v3848_v59 = vpop.permute.xlu1 %3847  ;;  %v3967_v41 = vld [vmem:[#allocation5 + $0x88] sm:$0xff] }
 0x402   : > { %3866 = vst.msk [vmem:[#allocation5 + $0xd8] sm:$0xff] %vm3732_vm1, %v3848_v59  ;;  %v4873_v59 = vld [vmem:[%s9735_s5 + $0x10] sm:$0xff] }
 0x403   : > { %v6015_v8 = vpop.f32.mrb[6].mxu1 }
 0x404   : > { %v6016_v35 = vpop.f32.mrb[7].mxu1 }
 0x405   : > { %v3850_v51 = vpop.permute.xlu1 %3849  ;;  %v9013_v33 = vadd.f32 %v6016_v35, %v6015_v8  ;;  %v3972_v5 = vld [vmem:[#allocation5 + $0xb0] sm:$0xff]  ;;  %v4892_v35 = vld [vmem:[%s9735_s5 + $0xa8] sm:$0xff] }
 0x406   : > { %3867 = vst.msk [vmem:[#allocation5 + $0x100] sm:$0xff] %vm3732_vm1, %v3850_v51  ;;  %v4874_v51 = vld [vmem:[%s9735_s5 + $0x18] sm:$0xff]  ;;  %v4891_v8 = vld [vmem:[%s9735_s5 + $0xa0] sm:$0xff] }
 0x409   : > { %v3977_v9 = vld [vmem:[#allocation5 + $0xd8] sm:$0xff] }
 0x40d   : > { %v3982_v15 = vld [vmem:[#allocation5 + $0x100] sm:$0xff] }
 0x41e   : > { %v3852_v61 = vpop.permute.xlu1 %3851 }
 0x41f   : > { %v3788_v30 = vpop.permute.xlu0 %3787  ;;  %3868 = vst.msk [vmem:[#allocation5 + $0x128] sm:$0xff] %vm3732_vm1, %v3852_v61  ;;  %v4919_v61 = vld [vmem:[%s9735_s5 + $0x180] sm:$0xff] }
 0x420   : > { %3804 = vst.msk [vmem:[#allocation5 + $0x120] sm:$0xff] %vm3732_vm1, %v3788_v30  ;;  %v4920_v30 = vld [vmem:[%s9735_s5 + $0x188] sm:$0xff] }
 0x423   : > { %v3903_v17 = vpop.permute.xlu0 %3902 }
 0x424   : > { %3926 = vst.msk [vmem:[#allocation5 + $0x18] sm:$0xff] %vm3732_vm1, %v3903_v17  ;;  %v6513_v17 = vpack.c.bf16 %v4874_v51, %v4873_v59 }
 0x426   : > { %v3987_v46 = vld [vmem:[#allocation5 + $0x128] sm:$0xff] }
 0x427   : > { %v3905_v36 = vpop.permute.xlu0 %3904  ;;  %v3986_v18 = vld [vmem:[#allocation5 + $0x120] sm:$0xff] }
 0x428   : > { %3927 = vst.msk [vmem:[#allocation5 + $0x40] sm:$0xff] %vm3732_vm1, %v3905_v36  ;;  %4185 = vmatprep.mubr.f32.mxu1 %v3986_v18  ;;  %v6539_v36 = vpack.c.bf16 %v4920_v30, %v4919_v61  ;;  %v4875_v18 = vld [vmem:[%s9735_s5 + $0x20] sm:$0xff] }
 0x429   : > { %4186 = vmatmul.mubr.f32.gmra.mrb[14].mxu1 %v3985_v49  ;;  %v4903_v49 = vld [vmem:[%s9735_s5 + $0x100] sm:$0xff] }
 0x42a   : > { %6540 = vmatprep.subr.bf16.mxu0 %v6539_v36 }
 0x42b   : > { %v3907_v4 = vpop.permute.xlu0 %3906  ;;  %v3953_v62 = vld [vmem:[#allocation5 + $0x18] sm:$0xff] }
 0x42c   : > { %3928 = vst.msk [vmem:[#allocation5 + $0x68] sm:$0xff] %vm3732_vm1, %v3907_v4  ;;  %4255 = vmatprep.mubr.f32.mxu1 %v3953_v62  ;;  %v6515_v4 = vpack.c.bf16 %v4892_v35, %v4891_v8  ;;  %v4876_v62 = vld [vmem:[%s9735_s5 + $0x28] sm:$0xff] }
 0x42d   : > { %4256 = vmatmul.mubr.f32.vlgmr.msra.gmra.mrb[16].mxu1 %v3952_v52  ;;  %v4904_v52 = vld [vmem:[%s9735_s5 + $0x108] sm:$0xff] }
 0x42e   : > { %6510 = vmatpush3.bf16.msra.mxu1 %v6509_v48 }
 0x42f   : > { %v3909_v44 = vpop.permute.xlu0 %3908  ;;  %v3958_v23 = vld [vmem:[#allocation5 + $0x40] sm:$0xff]  ;;  %6512 = vmatprep.subr.bf16.mxu1 %v6511_v50 }
 0x430   : > { %3929 = vst.msk [vmem:[#allocation5 + $0x90] sm:$0xff] %vm3732_vm1, %v3909_v44  ;;  %4260 = vmatprep.mubr.f32.mxu1 %v3958_v23  ;;  %v4893_v44 = vld [vmem:[%s9735_s5 + $0xb0] sm:$0xff]  ;;  %v6541_v23 = vpack.c.bf16 %v4904_v52, %v4903_v49 }
 0x431   : > { %4261 = vmatmul.mubr.f32.gmra.mrb[18].mxu1 %v3957_v29  ;;  %v4894_v29 = vld [vmem:[%s9735_s5 + $0xb8] sm:$0xff] }
 0x432   : > { %6514 = vmatpush3.bf16.msra.mxu1 %v6513_v17  ;;  %6542 = vmatpush3.bf16.msra.mxu0 %v6541_v23 }
 0x433   : > { %v3911_v11 = vpop.permute.xlu0 %3910  ;;  %v3963_v3 = vld [vmem:[#allocation5 + $0x68] sm:$0xff]  ;;  %6516 = vmatprep.subr.bf16.mxu1 %v6515_v4 }
 0x434   : > { %3930 = vst.msk [vmem:[#allocation5 + $0xb8] sm:$0xff] %vm3732_vm1, %v3911_v11  ;;  %4265 = vmatprep.mubr.f32.mxu1 %v3963_v3  ;;  %v4921_v11 = vld [vmem:[%s9735_s5 + $0x190] sm:$0xff]  ;;  %v4922_v3 = vld [vmem:[%s9735_s5 + $0x198] sm:$0xff] }
 0x435   : > { %4266 = vmatmul.mubr.f32.gmra.mrb[20].mxu1 %v3962_v58  ;;  %v6543_v58 = vpack.c.bf16 %v4922_v3, %v4921_v11 }
 0x437   : > { %v3913_v63 = vpop.permute.xlu0 %3912  ;;  %v3968_v25 = vld [vmem:[#allocation5 + $0x90] sm:$0xff]  ;;  %6544 = vmatprep.subr.bf16.mxu0 %v6543_v58 }
 0x438   : > { %3931 = vst.msk [vmem:[#allocation5 + $0xe0] sm:$0xff] %vm3732_vm1, %v3913_v63  ;;  %4270 = vmatprep.mubr.f32.mxu1 %v3968_v25  ;;  %v4905_v63 = vld [vmem:[%s9735_s5 + $0x110] sm:$0xff]  ;;  %v4906_v25 = vld [vmem:[%s9735_s5 + $0x118] sm:$0xff] }
 0x439   : > { %4271 = vmatmul.mubr.f32.gmra.mrb[22].mxu1 %v3967_v41  ;;  %v6517_v41 = vpack.c.bf16 %v4876_v62, %v4875_v18 }
 0x43b   : > { %v3915_v7 = vpop.permute.xlu0 %3914  ;;  %v3973_v40 = vld [vmem:[#allocation5 + $0xb8] sm:$0xff]  ;;  %6518 = vmatpush3.bf16.msra.mxu1 %v6517_v41 }
 0x43c   : > { %3932 = vst.msk [vmem:[#allocation5 + $0x108] sm:$0xff] %vm3732_vm1, %v3915_v7  ;;  %4275 = vmatprep.mubr.f32.mxu1 %v3973_v40  ;;  %v6545_v7 = vpack.c.bf16 %v4906_v25, %v4905_v63  ;;  %v6519_v40 = vpack.c.bf16 %v4894_v29, %v4893_v44 }
 0x43d   : > { %4276 = vmatmul.mubr.f32.gmra.mrb[24].mxu1 %v3972_v5  ;;  %v4877_v5 = vld [vmem:[%s9735_s5 + $0x30] sm:$0xff] }
 0x43e   : > { %6546 = vmatpush3.bf16.msra.mxu0 %v6545_v7  ;;  %6520 = vmatprep.subr.bf16.mxu1 %v6519_v40 }
 0x43f   : > { %v3917_v16 = vpop.permute.xlu0 %3916  ;;  %v3978_v38 = vld [vmem:[#allocation5 + $0xe0] sm:$0xff] }
 0x440   : > { %3933 = vst.msk [vmem:[#allocation5 + $0x130] sm:$0xff] %vm3732_vm1, %v3917_v16  ;;  %4280 = vmatprep.mubr.f32.mxu1 %v3978_v38  ;;  %v4878_v16 = vld [vmem:[%s9735_s5 + $0x38] sm:$0xff] }
 0x441   : > { %4281 = vmatmul.mubr.f32.gmra.mrb[26].mxu1 %v3977_v9  ;;  %v6521_v38 = vpack.c.bf16 %v4878_v16, %v4877_v5 }
 0x443   : > { %v3983_v27 = vld [vmem:[#allocation5 + $0x108] sm:$0xff]  ;;  %v6018_v28 = vpop.f32.mrb[8].mxu1  ;;  %6522 = vmatpush3.bf16.msra.mxu1 %v6521_v38 }
 0x444   : > { %4285 = vmatprep.mubr.f32.mxu1 %v3983_v27  ;;  %v6019_v1 = vpop.f32.mrb[9].mxu1 }
 0x445   : > { %4286 = vmatmul.mubr.f32.gmra.mrb[28].mxu1 %v3982_v15  ;;  %v9025_v37 = vadd.f32 %v6019_v1, %v6018_v28 }
 0x447   : > { %v3988_v53 = vld [vmem:[#allocation5 + $0x130] sm:$0xff] }
 0x448   : > { %4290 = vmatprep.mubr.f32.mxu1 %v3988_v53 }
 0x449   : > { %4291 = vmatmul.mubr.f32.gmra.mrb[30].mxu1 %v3987_v46 }
 0x453   : > { %v9027_v20 = vpop.f32.mrb[36].mxu0 }
 0x454   : > { %v9029_v21 = vpop.f32.mrb[37].mxu0 }
 0x483   : > { %v6021_v6 = vpop.f32.mrb[10].mxu1 }
 0x484   : > { %v6022_v13 = vpop.f32.mrb[11].mxu1 }
 0x485   : > { %v9031_v39 = vadd.f32 %v6022_v13, %v6021_v6 }
 0x491   : > { %v9033_v14 = vpop.f32.mrb[38].mxu0 }
 0x492   : > { %v9047_v47 = vpop.f32.mrb[39].mxu0 }
 0x4c5   : > { %v6024_v31 = vpop.f32.mrb[12].mxu1 }
 0x4c6   : > { %v6025_v42 = vpop.f32.mrb[13].mxu1 }
 0x4c7   : > { %v9059_v34 = vadd.f32 %v6025_v42, %v6024_v31 }
 0x4fc   : > { %v6027_v9 = vpop.f32.mrb[14].mxu1 }
 0x4fd   : > { %v6028_v27 = vpop.f32.mrb[15].mxu1 }
 0x4fe   : > { %v9133_v28 = vadd.f32 %v6028_v27, %v6027_v9 }
 0x500   : > { %v6062_v15 = vpop.f32.mrb[16].mxu1 }
 0x501   : > { %v6063_v1 = vpop.f32.mrb[17].mxu1 }
 0x502   : > { %v6064_v53 = vadd.f32 %v6063_v1, %v6062_v15 }
 0x504   : > { %v4258_v46 = vadd.f32 %v6064_v53, %v8825_v57  ;;  %v6065_v6 = vpop.f32.mrb[18].mxu1 }
 0x505   : > { %v6066_v13 = vpop.f32.mrb[19].mxu1 }
 0x506   : > { %v4363_v31 = vadd.f32 %v8851_v10, %v4258_v46  ;;  %v6067_v42 = vadd.f32 %v6066_v13, %v6065_v6 }
 0x508   : > { %v4263_v22 = vadd.f32 %v6067_v42, %v8855_v26  ;;  %v6068_v12 = vpop.f32.mrb[20].mxu1  ;;  %v4401_v24 = vsel %vm9937_vm6, %v4363_v31, -inf  ;;  %vm9961_vm6 = vcmask 1041409  }
 0x509   : > { %v6069_v45 = vpop.f32.mrb[21].mxu1 }
 0x50a   : > { %v4368_v55 = vadd.f32 %v8848_v32, %v4263_v22  ;;  %v6070_v54 = vadd.f32 %v6069_v45, %v6068_v12 }
 0x50c   : > { %v4402_v43 = vsel %vm9949_vm7, %v4368_v55, -inf  ;;  %v4268_v48 = vadd.f32 %v6070_v54, %v8995_v60  ;;  %v6071_v50 = vpop.f32.mrb[22].mxu1  ;;  %vm9962_vm7 = vmmov %vm9957_vm2 }
 0x50d   : > { %v4403_v57 = vmax.f32 %v4401_v24, %v4402_v43  ;;  %v6072_v59 = vpop.f32.mrb[23].mxu1 }
 0x50e   : > { %v4373_v51 = vadd.f32 %v9002_v2, %v4268_v48  ;;  %v6073_v10 = vadd.f32 %v6072_v59, %v6071_v50 }
 0x50f   : > { %v4417_v8 = vcombine.high %v4403_v57, %v4403_v57  ;;  %v4424_v26 = vrot.slane %v4403_v57, %v7904_v56 }
 0x510   : > { %v4273_v35 = vadd.f32 %v6073_v10, %v9013_v33  ;;  %v6074_v61 = vpop.f32.mrb[24].mxu1  ;;  %v4404_v52 = vsel %vm9953_vm12, %v4373_v51, -inf  ;;  %vm9966_vm12 = vmmov %vm9960_vm0 }
 0x511   : > { %v4431_v32 = vrot.slane %v4417_v8, %v7904_v56  ;;  %v4432_v30 = vcombine.high %v4424_v26, %v4424_v26  ;;  %v4501_v17 = vsel %vm9950_vm8, %v4424_v26, -inf  ;;  %v6075_v36 = vpop.f32.mrb[25].mxu1  ;;  %vm9963_vm8 = vcmask 1043459  }
 0x512   : > { %v4502_v18 = vrot.slane %v4501_v17, 4  ;;  %v4378_v60 = vadd.f32 %v9000_v19, %v4273_v35  ;;  %v6076_v49 = vadd.f32 %v6075_v36, %v6074_v61 }
 0x513   : > { %v4433_v4 = vcombine.high %v4431_v32, %v4431_v32  ;;  %v4508_v2 = vsel %vm9951_vm9, %v4432_v30, -inf  ;;  %v4515_v62 = vsel %vm9952_vm11, %v4431_v32, -inf  ;;  %vm9964_vm9 = vmmov %vm9960_vm0 }
 0x514   : > { %v4503_v44 = vmax.f32 %v4501_v17, %v4502_v18  ;;  %v4509_v33 = vrot.slane %v4508_v2, 4  ;;  %v4516_v23 = vrot.slane %v4515_v62, 4  ;;  %v4405_v29 = vsel %vm9954_vm15, %v4378_v60, -inf  ;;  %v6077_v11 = vpop.f32.mrb[26].mxu1  ;;  %vm9965_vm11 = vmmov %vm9960_vm0 }
 0x515   : > { %v4522_v3 = vsel %vm9955_vm4, %v4433_v4, -inf  ;;  %v4406_v58 = vmax.f32 %v4404_v52, %v4405_v29  ;;  %v4278_v63 = vadd.f32 %v6076_v49, %v9025_v37  ;;  %v6078_v19 = vpop.f32.mrb[27].mxu1  ;;  %vm9967_vm15 = vmmov %vm9957_vm2 }
 0x516   : > { %v4504_v25 = vrot.slane %v4503_v44, 2  ;;  %v4510_v41 = vmax.f32 %v4508_v2, %v4509_v33  ;;  %v4517_v7 = vmax.f32 %v4515_v62, %v4516_v23  ;;  %v4523_v40 = vrot.slane %v4522_v3, 4  ;;  %vm9968_vm4 = vmmov %vm9961_vm6 }
 0x517   : > { %v4434_v5 = vcombine.high %v4406_v58, %v4406_v58  ;;  %v4441_v16 = vrot.slane %v4406_v58, %v7904_v56  ;;  %v4383_v38 = vadd.f32 %v9029_v21, %v4278_v63  ;;  %v6079_v9 = vadd.f32 %v6078_v19, %v6077_v11  ;;  %v9164_v21 = vld [vmem:[%s9734_s4] ss:$0 sm:$0xff] }
 0x518   : > { %v4505_v27 = vmax.f32 %v4503_v44, %v4504_v25  ;;  %v4511_v15 = vrot.slane %v4510_v41, 2  ;;  %v4518_v1 = vrot.slane %v4517_v7, 2  ;;  %v4524_v53 = vmax.f32 %v4522_v3, %v4523_v40  ;;  %v6080_v46 = vpop.f32.mrb[28].mxu1 }
 0x519   : > { %v4448_v6 = vrot.slane %v4434_v5, %v7904_v56  ;;  %v4449_v13 = vcombine.high %v4441_v16, %v4441_v16  ;;  %v4529_v37 = vsel %vm9956_vm13, %v4441_v16, -inf  ;;  %v9159_v31 = vsel %vm9957_vm2, %v4383_v38, -inf  ;;  %v6081_v42 = vpop.f32.mrb[29].mxu1  ;;  %vm9969_vm13 = vmmov %vm9960_vm0 }
 0x51a   : > { %v4506_v22 = vrot.slane %v4505_v27, 1  ;;  %v4512_v12 = vmax.f32 %v4510_v41, %v4511_v15  ;;  %v4519_v45 = vmax.f32 %v4517_v7, %v4518_v1  ;;  %v4525_v55 = vrot.slane %v4524_v53, 2 }
 0x51b   : > { %v4450_v54 = vcombine.high %v4448_v6, %v4448_v6  ;;  %v4530_v24 = vrot.slane %v4529_v37, 4  ;;  %v4536_v43 = vsel %vm9958_vm5, %v4449_v13, -inf  ;;  %v4543_v48 = vsel %vm9959_vm14, %v4448_v6, -inf  ;;  %vm9970_vm5 = vmmov %vm9963_vm8 }
 0x51c   : > { %v4507_v50 = vmax.f32 %v4505_v27, %v4506_v22  ;;  %v4513_v57 = vrot.slane %v4512_v12, 1  ;;  %v4520_v59 = vrot.slane %v4519_v45, 1  ;;  %v4526_v51 = vmax.f32 %v4524_v53, %v4525_v55  ;;  %v6083_v10 = vpop.f32.mrb[30].mxu1  ;;  %vm9971_vm14 = vmmov %vm9957_vm2 }
 0x51d   : > { %v4531_v8 = vmax.f32 %v4529_v37, %v4530_v24  ;;  %v4537_v26 = vrot.slane %v4536_v43, 4  ;;  %v4544_v35 = vrot.slane %v4543_v48, 4  ;;  %v4550_v61 = vsel %vm9960_vm0, %v4450_v54, -inf  ;;  %v6084_v32 = vpop.f32.mrb[31].mxu1 }
 0x51e   : > { %v4514_v30 = vmax.f32 %v4512_v12, %v4513_v57  ;;  %v4521_v17 = vmax.f32 %v4519_v45, %v4520_v59  ;;  %v4527_v36 = vrot.slane %v4526_v51, 1  ;;  %v4620_v18 = vadd.f32 %v9164_v21, %v4507_v50 }
 0x51f   : > { %v4532_v60 = vrot.slane %v4531_v8, 2  ;;  %v4538_v49 = vmax.f32 %v4536_v43, %v4537_v26  ;;  %v4545_v4 = vmax.f32 %v4543_v48, %v4544_v35  ;;  %v4551_v2 = vrot.slane %v4550_v61, 4 }
 0x520   : > { %v4528_v62 = vmax.f32 %v4526_v51, %v4527_v36  ;;  %v4621_v52 = vadd.f32 %v9164_v21, %v4514_v30  ;;  %v4622_v44 = vadd.f32 %v9164_v21, %v4521_v17  ;;  %v4636_v33 = vmax.f32 %v4620_v18, 0.0 }
 0x521   : > { %v4533_v23 = vmax.f32 %v4531_v8, %v4532_v60  ;;  %v4539_v29 = vrot.slane %v4538_v49, 2  ;;  %v4546_v11 = vrot.slane %v4545_v4, 2  ;;  %v4552_v3 = vmax.f32 %v4550_v61, %v4551_v2 }
 0x522   : > { %v4623_v58 = vadd.f32 %v9164_v21, %v4528_v62  ;;  %v4637_v63 = vmax.f32 %v4621_v52, 0.0  ;;  %v4638_v19 = vmax.f32 %v4622_v44, 0.0  ;;  %v4283_v25 = vadd.f32 %v6079_v9, %v9031_v39  ;;  %v4924_v44 = vld [vmem:[%s9735_s5 + $0x1a8] sm:$0xff] }
 0x523   : > { %v4534_v41 = vrot.slane %v4533_v23, 1  ;;  %v4540_v7 = vmax.f32 %v4538_v49, %v4539_v29  ;;  %v4547_v40 = vmax.f32 %v4545_v4, %v4546_v11  ;;  %v4553_v5 = vrot.slane %v4552_v3, 2  ;;  %v4896_v4 = vld [vmem:[%s9735_s5 + $0xc8] sm:$0xff] }
 0x524   : > { %v4639_v16 = vmax.f32 %v4623_v58, 0.0  ;;  %v4684_v38 = vrot.slane %v4637_v63, 7  ;;  %v4686_v27 = vrot.slane %v4638_v19, 6  ;;  %v4388_v15 = vadd.f32 %v9027_v20, %v4283_v25  ;;  %v4880_v58 = vld [vmem:[%s9735_s5 + $0x48] sm:$0xff]  ;;  %v4907_v63 = vld [vmem:[%s9735_s5 + $0x120] sm:$0xff] }
 0x525   : > { %v4535_v1 = vmax.f32 %v4533_v23, %v4534_v41  ;;  %v4541_v53 = vrot.slane %v4540_v7, 1  ;;  %v4548_v6 = vrot.slane %v4547_v40, 1  ;;  %v4554_v13 = vmax.f32 %v4552_v3, %v4553_v5  ;;  %v4908_v19 = vld [vmem:[%s9735_s5 + $0x128] sm:$0xff]  ;;  %v4897_v5 = vld [vmem:[%s9735_s5 + $0xd0] sm:$0xff] }
 0x526   : > { %v4685_v37 = vsel %vm9961_vm6, %v4684_v38, %v4636_v33  ;;  %v4688_v22 = vrot.slane %v4639_v16, 5  ;;  %v4408_v12 = vsel %vm9962_vm7, %v4388_v15, -inf  ;;  %v6082_v45 = vadd.f32 %v6081_v42, %v6080_v46  ;;  %v4879_v33 = vld [vmem:[%s9735_s5 + $0x40] sm:$0xff]  ;;  %v4898_v16 = vld [vmem:[%s9735_s5 + $0xd8] sm:$0xff]  ;;  %vm9972_vm6 = vmmov %vm9957_vm2 }
 0x527   : > { %v4687_v39 = vsel %vm3544_vm3, %v4686_v27, %v4685_v37  ;;  %v4542_v9 = vmax.f32 %v4540_v7, %v4541_v53  ;;  %v4549_v55 = vmax.f32 %v4547_v40, %v4548_v6  ;;  %v4555_v54 = vrot.slane %v4554_v13, 1  ;;  %vm9973_vm7 = vmmov %vm9960_vm0 }
 0x528   : > { %v4689_v24 = vsel %vm9963_vm8, %v4688_v22, %v4687_v39  ;;  %v4624_v43 = vadd.f32 %v9164_v21, %v4535_v1  ;;  %v4409_v20 = vmax.f32 %v9159_v31, %v4408_v12  ;;  %v6085_v48 = vadd.f32 %v6084_v32, %v6083_v10  ;;  %vm9974_vm8 = vmmov %vm9960_vm0 }
 0x529   : > { %4714 = vst.msk [vmem:[#allocation6 + $0x9] sm:$0xf] %vm4713_vm10, %v4689_v24  ;;  %v4556_v50 = vmax.f32 %v4554_v13, %v4555_v54  ;;  %v4625_v57 = vadd.f32 %v9164_v21, %v4542_v9  ;;  %v4626_v59 = vadd.f32 %v9164_v21, %v4549_v55  ;;  %v4288_v46 = vadd.f32 %v6082_v45, %v9059_v34 }
 0x52a   : > { %v4640_v42 = vmax.f32 %v4624_v43, 0.0  ;;  %v4451_v51 = vcombine.high %v4409_v20, %v4409_v20  ;;  %v4458_v8 = vrot.slane %v4409_v20, %v7904_v56  ;;  %v4293_v26 = vadd.f32 %v6085_v48, %v9133_v28  ;;  %v4895_v28 = vld [vmem:[%s9735_s5 + $0xc0] sm:$0xff] }
 0x52b   : > { %v4627_v35 = vadd.f32 %v9164_v21, %v4556_v50  ;;  %v4641_v61 = vmax.f32 %v4625_v57, 0.0  ;;  %v4642_v31 = vmax.f32 %v4626_v59, 0.0  ;;  %v4393_v10 = vadd.f32 %v9047_v47, %v4288_v46 }
 0x52c   : > { %v4465_v32 = vrot.slane %v4451_v51, %v7904_v56  ;;  %v4466_v30 = vcombine.high %v4458_v8, %v4458_v8  ;;  %v4557_v17 = vsel %vm9964_vm9, %v4458_v8, -inf  ;;  %v4398_v36 = vadd.f32 %v9033_v14, %v4293_v26  ;;  %v4923_v14 = vld [vmem:[%s9735_s5 + $0x1a0] sm:$0xff]  ;;  %vm9975_vm9 = vmmov %vm9960_vm0 }
 0x52d   : > { %v4643_v34 = vmax.f32 %v4627_v35, 0.0  ;;  %v4690_v18 = vrot.slane %v4641_v61, 7  ;;  %v4692_v60 = vrot.slane %v4642_v31, 6  ;;  %v4558_v49 = vrot.slane %v4557_v17, 4 }
 0x52e   : > { %v4467_v47 = vcombine.high %v4465_v32, %v4465_v32  ;;  %v4564_v2 = vsel %vm9965_vm11, %v4466_v30, -inf  ;;  %v4571_v62 = vsel %vm9966_vm12, %v4465_v32, -inf  ;;  %v4410_v52 = vsel %vm9967_vm15, %v4393_v10, -inf  ;;  %vm9976_vm11 = vmmov %vm9957_vm2 }
 0x52f   : > { %v4691_v23 = vsel %vm9968_vm4, %v4690_v18, %v4640_v42  ;;  %v4694_v29 = vrot.slane %v4643_v34, 5  ;;  %v4559_v11 = vmax.f32 %v4557_v17, %v4558_v49  ;;  %v4565_v3 = vrot.slane %v4564_v2, 4  ;;  %v4925_v34 = vld [vmem:[%s9735_s5 + $0x1b0] sm:$0xff]  ;;  %vm9977_vm12 = vmmov %vm9968_vm4 }
 0x530   : > { %v4693_v25 = vsel %vm3544_vm3, %v4692_v60, %v4691_v23  ;;  %v4572_v41 = vrot.slane %v4571_v62, 4  ;;  %v4578_v7 = vsel %vm9969_vm13, %v4467_v47, -inf  ;;  %v4411_v40 = vsel %vm9957_vm2, %v4398_v36, -inf  ;;  %v6728_v53 = vld [vmem:[#allocation6 + $0x1] ss:$8 sps:$4 sm:$0xff]   ;;  %vm9978_vm15 = vmmov %vm9970_vm5 }
 0x531   : > { %v4695_v38 = vsel %vm9970_vm5, %v4694_v29, %v4693_v25  ;;  %v4560_v27 = vrot.slane %v4559_v11, 2  ;;  %v4566_v15 = vmax.f32 %v4564_v2, %v4565_v3  ;;  %v4579_v1 = vrot.slane %v4578_v7, 4  ;;  %v6736_v37 = vld [vmem:[#allocation6] ss:$8 sps:$4 sm:$0xff]   ;;  %4742 = vrot.lane.b32.xlu1 %v6728_v53, %s9786_s16  ;;  %vm9979_vm13 = vmmov %vm9970_vm5 }
 0x532   : > { %4715 = vst.msk [vmem:[#allocation6 + $0x11] sm:$0xf] %vm4713_vm10, %v4695_v38  ;;  %v4573_v6 = vmax.f32 %v4571_v62, %v4572_v41  ;;  %v4412_v13 = vmax.f32 %v4410_v52, %v4411_v40  ;;  %v6523_v22 = vpack.c.bf16 %v4896_v4, %v4895_v28  ;;  %v6547_v12 = vpack.c.bf16 %v4924_v44, %v4923_v14  ;;  %v6738_v48 = vld [vmem:[#allocation6 + $0x2] ss:$8 sps:$4 sm:$0xff]   ;;  %vm9980_vm5 = vmmov %vm9957_vm2 }
 0x533   : > { %v4561_v45 = vmax.f32 %v4559_v11, %v4560_v27  ;;  %v4567_v39 = vrot.slane %v4566_v15, 2  ;;  %v4580_v9 = vmax.f32 %v4578_v7, %v4579_v1  ;;  %v6525_v55 = vpack.c.bf16 %v4880_v58, %v4879_v33  ;;  %4730 = vst.msk [vmem:[#allocation7] sm:$0xff] %vm9971_vm14, %v6736_v37  ;;  %v4926_v47 = vld [vmem:[%s9735_s5 + $0x1b8] sm:$0xff]  ;;  %v4881_v44 = vld [vmem:[%s9735_s5 + $0x50] sm:$0xff]  ;;  %v4899_v37 = vld [vmem:[%s9735_s5 + $0xe0] sm:$0xff] }
 0x534   : > { %v4574_v54 = vrot.slane %v4573_v6, 2  ;;  %v4468_v24 = vcombine.high %v4412_v13, %v4412_v13  ;;  %v4475_v43 = vrot.slane %v4412_v13, %v7904_v56  ;;  %6524 = vmatprep.subr.bf16.mxu1 %v6523_v22  ;;  %6548 = vmatprep.subr.bf16.mxu0 %v6547_v12  ;;  %v6549_v20 = vpack.c.bf16 %v4908_v19, %v4907_v63  ;;  %v4882_v33 = vld [vmem:[%s9735_s5 + $0x58] sm:$0xff]  ;;  %v4909_v7 = vld [vmem:[%s9735_s5 + $0x130] sm:$0xff]  ;;  %v4900_v22 = vld [vmem:[%s9735_s5 + $0xe8] sm:$0xff] }
 0x535   : > { %v4562_v50 = vrot.slane %v4561_v45, 1  ;;  %v4568_v57 = vmax.f32 %v4566_v15, %v4567_v39  ;;  %v4581_v59 = vrot.slane %v4580_v9, 2  ;;  %6526 = vmatpush3.bf16.msra.mxu1 %v6525_v55  ;;  %v6527_v46 = vpack.c.bf16 %v4898_v16, %v4897_v5  ;;  %4762 = vst.msk [vmem:[#allocation7 + $0x8] sm:$0xff] %vm9972_vm6, %v6738_v48  ;;  %v4910_v27 = vld [vmem:[%s9735_s5 + $0x138] sm:$0xff]  ;;  %v4927_v12 = vld [vmem:[%s9735_s5 + $0x1c0] sm:$0xff]  ;;  %vm9981_vm14 = vmmov %vm9957_vm2 }
 0x536   : > { %v4575_v42 = vmax.f32 %v4573_v6, %v4574_v54  ;;  %v4482_v51 = vrot.slane %v4468_v24, %v7904_v56  ;;  %v4483_v8 = vcombine.high %v4475_v43, %v4475_v43  ;;  %v4585_v26 = vsel %vm9960_vm0, %v4475_v43, -inf  ;;  %6550 = vmatpush3.bf16.msra.mxu0 %v6549_v20  ;;  %v4928_v54 = vld [vmem:[%s9735_s5 + $0x1c8] sm:$0xff]  ;;  %vm9983_vm0 = vmmov %vm9957_vm2 }
 0x537   : > { %v4563_v35 = vmax.f32 %v4561_v45, %v4562_v50  ;;  %v4569_v61 = vrot.slane %v4568_v57, 1  ;;  %v4582_v31 = vmax.f32 %v4580_v9, %v4581_v59  ;;  %v4586_v10 = vrot.slane %v4585_v26, 4  ;;  %6528 = vmatprep.subr.bf16.mxu1 %v6527_v46  ;;  %v4883_v50 = vld [vmem:[%s9735_s5 + $0x60] sm:$0xff]  ;;  %vm9984_vm6 = vmmov %vm9983_vm0 }
 0x538   : > { %v4576_v32 = vrot.slane %v4575_v42, 1  ;;  %v4484_v30 = vcombine.high %v4482_v51, %v4482_v51  ;;  %v4592_v17 = vsel %vm9973_vm7, %v4483_v8, -inf  ;;  %v4599_v36 = vsel %vm9974_vm8, %v4482_v51, -inf  ;;  %v4911_v59 = vld [vmem:[%s9735_s5 + $0x140] sm:$0xff]  ;;  %vm9985_vm7 = vmmov %vm9983_vm0 }
 0x539   : > { %v4570_v18 = vmax.f32 %v4568_v57, %v4569_v61  ;;  %v4583_v60 = vrot.slane %v4582_v31, 1  ;;  %v4628_v49 = vadd.f32 %v9164_v21, %v4563_v35  ;;  %v4587_v28 = vmax.f32 %v4585_v26, %v4586_v10  ;;  %v6729_v4 = vld [vmem:[#allocation6 + $0xa] ss:$8 sps:$4 sm:$0xff]   ;;  %v4884_v57 = vld [vmem:[%s9735_s5 + $0x68] sm:$0xff]  ;;  %v4901_v35 = vld [vmem:[%s9735_s5 + $0xf0] sm:$0xff] }
 0x53a   : > { %v4577_v2 = vmax.f32 %v4575_v42, %v4576_v32  ;;  %v4593_v62 = vrot.slane %v4592_v17, 4  ;;  %v4600_v52 = vrot.slane %v4599_v36, 4  ;;  %v4606_v14 = vsel %vm9975_vm9, %v4484_v30, -inf  ;;  %4806 = vrot.lane.b32.xlu1 %v6729_v4, %s9786_s16  ;;  %v6730_v58 = vld [vmem:[#allocation6 + $0x8] ss:$8 sps:$4 sm:$0xff]   ;;  %v4912_v26 = vld [vmem:[%s9735_s5 + $0x148] sm:$0xff]  ;;  %vm9986_vm8 = vmmov %vm9983_vm0 }
 0x53b   : > { %v4584_v23 = vmax.f32 %v4582_v31, %v4583_v60  ;;  %v4629_v29 = vadd.f32 %v9164_v21, %v4570_v18  ;;  %v4644_v11 = vmax.f32 %v4628_v49, 0.0  ;;  %v4588_v3 = vrot.slane %v4587_v28, 2  ;;  %4774 = vrot.lane.b32.xlu0 %v6730_v58, %s9786_s16  ;;  %v6737_v15 = vld [vmem:[#allocation6 + $0x9] ss:$8 sps:$4 sm:$0xff]   ;;  %vm9987_vm9 = vmmov %vm9983_vm0 }
 0x53c   : > { %v4630_v63 = vadd.f32 %v9164_v21, %v4577_v2  ;;  %v4594_v19 = vmax.f32 %v4592_v17, %v4593_v62  ;;  %v4601_v25 = vmax.f32 %v4599_v36, %v4600_v52  ;;  %v4607_v41 = vrot.slane %v4606_v14, 4  ;;  %4794 = vst.msk [vmem:[#allocation7 + $0x10] sm:$0xff] %vm9976_vm11, %v6737_v15  ;;  %v4902_v61 = vld [vmem:[%s9735_s5 + $0xf8] sm:$0xff]  ;;  %v4929_v17 = vld [vmem:[%s9735_s5 + $0x1d0] sm:$0xff] }
 0x53d   : > { %v4631_v40 = vadd.f32 %v9164_v21, %v4584_v23  ;;  %v4645_v5 = vmax.f32 %v4629_v29, 0.0  ;;  %v4589_v16 = vmax.f32 %v4587_v28, %v4588_v3  ;;  %v6551_v38 = vpack.c.bf16 %v4926_v47, %v4925_v34  ;;  %v4930_v36 = vld [vmem:[%s9735_s5 + $0x1d8] sm:$0xff]  ;;  %v4885_v28 = vld [vmem:[%s9735_s5 + $0x70] sm:$0xff]  ;;  %v4932_v3 = vld [vmem:[%s9735_s5 + $0x1e8] sm:$0xff] }
 0x53e   : > { %v4646_v1 = vmax.f32 %v4630_v63, 0.0  ;;  %v4595_v53 = vrot.slane %v4594_v19, 2  ;;  %v4602_v6 = vrot.slane %v4601_v25, 2  ;;  %v4608_v13 = vmax.f32 %v4606_v14, %v4607_v41  ;;  %v4886_v4 = vld [vmem:[%s9735_s5 + $0x78] sm:$0xff]  ;;  %v4913_v14 = vld [vmem:[%s9735_s5 + $0x150] sm:$0xff] }
 0x53f   : > { %v4647_v45 = vmax.f32 %v4631_v40, 0.0  ;;  %v4696_v39 = vrot.slane %v4645_v5, 7  ;;  %v4590_v9 = vrot.slane %v4589_v16, 1  ;;  %6552 = vmatprep.subr.bf16.mxu0 %v6551_v38  ;;  %v6529_v55 = vpack.c.bf16 %v4882_v33, %v4881_v44  ;;  %v4914_v44 = vld [vmem:[%s9735_s5 + $0x158] sm:$0xff]  ;;  %v4915_v38 = vld [vmem:[%s9735_s5 + $0x160] sm:$0xff]  ;;  %v4933_v15 = vld [vmem:[%s9735_s5 + $0x1f0] sm:$0xff] }
 0x540   : > { %v4698_v24 = vrot.slane %v4646_v1, 6  ;;  %v4596_v43 = vmax.f32 %v4594_v19, %v4595_v53  ;;  %v4603_v20 = vmax.f32 %v4601_v25, %v4602_v6  ;;  %v4609_v48 = vrot.slane %v4608_v13, 2 }
 0x541   : > { %v4697_v46 = vsel %vm9977_vm12, %v4696_v39, %v4644_v11  ;;  %v4700_v42 = vrot.slane %v4647_v45, 5  ;;  %v4591_v51 = vmax.f32 %v4589_v16, %v4590_v9  ;;  %6530 = vmatpush3.bf16.msra.mxu1 %v6529_v55  ;;  %v6553_v8 = vpack.c.bf16 %v4910_v27, %v4909_v7  ;;  %v4931_v11 = vld [vmem:[%s9735_s5 + $0x1e0] sm:$0xff]  ;;  %v4916_v27 = vld [vmem:[%s9735_s5 + $0x168] sm:$0xff] }
 0x542   : > { %v4699_v31 = vsel %vm3544_vm3, %v4698_v24, %v4697_v46  ;;  %v4597_v10 = vrot.slane %v4596_v43, 1  ;;  %v4604_v32 = vrot.slane %v4603_v20, 1  ;;  %v4610_v30 = vmax.f32 %v4608_v13, %v4609_v48 }
 0x543   : > { %v4701_v34 = vsel %vm9978_vm15, %v4700_v42, %v4699_v31  ;;  %v4632_v18 = vadd.f32 %v9164_v21, %v4591_v51  ;;  %6554 = vmatpush3.bf16.msra.mxu0 %v6553_v8  ;;  %v6531_v60 = vpack.c.bf16 %v4900_v22, %v4899_v37  ;;  %v6555_v49 = vpack.c.bf16 %v4928_v54, %v4927_v12  ;;  %v4917_v37 = vld [vmem:[%s9735_s5 + $0x170] sm:$0xff]  ;;  %v4935_v22 = vld [vmem:[%s9735_s5 + $0x200] sm:$0xff]  ;;  %v4936_v12 = vld [vmem:[%s9735_s5 + $0x208] sm:$0xff] }
 0x544   : > { %4716 = vst.msk [vmem:[#allocation6 + $0x19] sm:$0xf] %vm4713_vm10, %v4701_v34  ;;  %v4598_v47 = vmax.f32 %v4596_v43, %v4597_v10  ;;  %v4605_v2 = vmax.f32 %v4603_v20, %v4604_v32  ;;  %v4611_v62 = vrot.slane %v4610_v30, 1  ;;  %v6533_v52 = vpack.c.bf16 %v4884_v57, %v4883_v50  ;;  %v4918_v43 = vld [vmem:[%s9735_s5 + $0x178] sm:$0xff] }
 0x545   : > { %6532 = vmatprep.subr.bf16.mxu1 %v6531_v60  ;;  %6556 = vmatprep.subr.bf16.mxu0 %v6555_v49  ;;  %v6557_v33 = vpack.c.bf16 %v4912_v26, %v4911_v59  ;;  %v6535_v23 = vpack.c.bf16 %v4902_v61, %v4901_v35  ;;  %v6559_v29 = vpack.c.bf16 %v4930_v36, %v4929_v17  ;;  %v4648_v1 = vmax.f32 %v4632_v18, 0.0  ;;  %v4937_v36 = vld [vmem:[%s9735_s5 + $0x210] sm:$0xff]  ;;  %v4938_v34 = vld [vmem:[%s9735_s5 + $0x218] sm:$0xff] }
 0x546   : > { %v4612_v58 = vmax.f32 %v4610_v30, %v4611_v62  ;;  %v4633_v63 = vadd.f32 %v9164_v21, %v4598_v47  ;;  %v4634_v19 = vadd.f32 %v9164_v21, %v4605_v2  ;;  %6534 = vmatpush3.bf16.msra.mxu1 %v6533_v52  ;;  %v6537_v25 = vpack.c.bf16 %v4886_v4, %v4885_v28  ;;  %v4939_v28 = vld [vmem:[%s9735_s5 + $0x220] sm:$0xff]  ;;  %v4940_v4 = vld [vmem:[%s9735_s5 + $0x228] sm:$0xff]  ;;  %v4941_v2 = vld [vmem:[%s9735_s5 + $0x230] sm:$0xff] }
 0x547   : > { %6558 = vmatpush3.bf16.msra.mxu0 %v6557_v33  ;;  %6536 = vmatprep.subr.bf16.mxu1 %v6535_v23  ;;  %v6561_v41 = vpack.c.bf16 %v4914_v44, %v4913_v14  ;;  %v6563_v16 = vpack.c.bf16 %v4932_v3, %v4931_v11  ;;  %v6565_v39 = vpack.c.bf16 %v4916_v27, %v4915_v38  ;;  %v4942_v62 = vld [vmem:[%s9735_s5 + $0x238] sm:$0xff]  ;;  %v5415_v27 = vld [vmem:[%s9737_s7 + $0x8] sm:$0xff] }
 0x548   : > { %v4635_v7 = vadd.f32 %v9164_v21, %v4612_v58  ;;  %v4649_v40 = vmax.f32 %v4633_v63, 0.0  ;;  %v4650_v5 = vmax.f32 %v4634_v19, 0.0  ;;  %6560 = vmatprep.subr.bf16.mxu0 %v6559_v29  ;;  %v4934_v21 = vld [vmem:[%s9735_s5 + $0x1f8] sm:$0xff]  ;;  %v6571_v9 = vpack.c.bf16 %v4936_v12, %v4935_v22  ;;  %v5463_v22 = vld [vmem:[%s9737_s7 + $0x188] sm:$0xff]  ;;  %v5446_v12 = vld [vmem:[%s9737_s7 + $0x100] sm:$0xff] }
 0x549   : > { %v6567_v24 = vpack.c.bf16 %v4934_v21, %v4933_v15  ;;  %v6569_v59 = vpack.c.bf16 %v4918_v43, %v4917_v37  ;;  %v6575_v60 = vpack.c.bf16 %v4938_v34, %v4937_v36  ;;  %v6579_v47 = vpack.c.bf16 %v4940_v4, %v4939_v28  ;;  %v5432_v15 = vld [vmem:[%s9737_s7 + $0x90] sm:$0xff]  ;;  %v5433_v21 = vld [vmem:[%s9737_s7 + $0x98] sm:$0xff]  ;;  %v5462_v37 = vld [vmem:[%s9737_s7 + $0x180] sm:$0xff] }
 0x54a   : > { %v4651_v53 = vmax.f32 %v4635_v7, 0.0  ;;  %v4702_v6 = vrot.slane %v4649_v40, 7  ;;  %v4704_v13 = vrot.slane %v4650_v5, 6  ;;  %6538 = vmatpush3.bf16.msra.mxu1 %v6537_v25  ;;  %v6583_v14 = vpack.c.bf16 %v4942_v62, %v4941_v2  ;;  %v5430_v40 = vld [vmem:[%s9737_s7 + $0x80] sm:$0xff]  ;;  %v5431_v5 = vld [vmem:[%s9737_s7 + $0x88] sm:$0xff]  ;;  %v5469_v4 = vld [vmem:[%s9737_s7 + $0x1b8] sm:$0xff] }
 0x54b   : > { %v6731_v45 = vld [vmem:[#allocation6 + $0x11] ss:$8 sps:$4 sm:$0xff]   ;;  %6562 = vmatpush3.bf16.msra.mxu0 %v6561_v41  ;;  %6572 = vmatprep.subr.bf16.mxu1 %v6571_v9  ;;  %v6587_v38 = vpack.c.bf16 %v5431_v5, %v5430_v40 }
 0x54c   : > { %v4703_v55 = vsel %vm9968_vm4, %v4702_v6, %v4648_v1  ;;  %v4706_v54 = vrot.slane %v4651_v53, 5  ;;  %6564 = vmatprep.subr.bf16.mxu0 %v6563_v16  ;;  %4839 = vrot.lane.b32.xlu0 %v6731_v45, %s9786_s16  ;;  %v6739_v48 = vld [vmem:[#allocation6 + $0x10] ss:$8 sps:$4 sm:$0xff]   ;;  %v6591_v53 = vpack.c.bf16 %v5433_v21, %v5432_v15  ;;  %v5416_v6 = vld [vmem:[%s9737_s7 + $0x10] sm:$0xff] }
 0x54d   : > { %v4705_v20 = vsel %vm3544_vm3, %v4704_v13, %v4703_v55  ;;  %v6741_v57 = vld [vmem:[#allocation6 + $0x12] ss:$8 sps:$4 sm:$0xff]   ;;  %4827 = vst.msk [vmem:[#allocation7 + $0x18] sm:$0xff] %vm9957_vm2, %v6739_v48  ;;  %vm9982_vm3 = vmmov %vm9957_vm2  ;;  %v5417_v13 = vld [vmem:[%s9737_s7 + $0x18] sm:$0xff] }
 0x54e   : > { %v4707_v50 = vsel %vm9979_vm13, %v4706_v54, %v4705_v20  ;;  %v6743_v46 = vld [vmem:[#allocation6 + $0x10] ss:$8 sps:$4 sm:$0xff]   ;;  %4763 = vst.msk [vmem:[#allocation7 + $0x30] sm:$0xff] %vm9980_vm5, %v6741_v57  ;;  %v5465_v57 = vld [vmem:[%s9737_s7 + $0x198] sm:$0xff]  ;;  %vm9992_vm13 = vmmov %vm9968_vm4 }
 0x54f   : > { %4717 = vst.msk [vmem:[#allocation6 + $0x21] sm:$0xf] %vm4713_vm10, %v4707_v50  ;;  %6566 = vmatpush3.bf16.msra.mxu0 %v6565_v39  ;;  %v6744_v42 = vld [vmem:[#allocation6 + $0x12] ss:$8 sps:$4 sm:$0xff]   ;;  %v6593_v39 = vpack.c.bf16 %v5417_v13, %v5416_v6  ;;  %v5464_v50 = vld [vmem:[%s9737_s7 + $0x190] sm:$0xff] }
 0x550   : > { %6568 = vmatprep.subr.bf16.mxu0 %v6567_v24  ;;  %4731 = vst.msk [vmem:[#allocation7 + $0x28] sm:$0xff] %vm9981_vm14, %v6743_v46  ;;  %v6735_v10 = vld [vmem:[#allocation6 + $0x11] ss:$8 sps:$4 sm:$0xff]   ;;  %v5448_v46 = vld [vmem:[%s9737_s7 + $0x110] sm:$0xff]  ;;  %vm5304_vm14 = vcmask 1043968  }
 0x551   : > { %4859 = vst.msk [vmem:[#allocation7 + $0x20] sm:$0xff] %vm9982_vm3, %v6744_v42  ;;  %v5414_v16 = vld [vmem:[%s9737_s7] sm:$0xff]  ;;  %v5447_v45 = vld [vmem:[%s9737_s7 + $0x108] sm:$0xff]  ;;  %v5449_v42 = vld [vmem:[%s9737_s7 + $0x118] sm:$0xff] }
 0x552   : > { %v6589_v1 = vpack.c.bf16 %v5415_v27, %v5414_v16  ;;  %v6621_v55 = vpack.c.bf16 %v5447_v45, %v5446_v12  ;;  %v5434_v54 = vld [vmem:[%s9737_s7 + $0xa0] sm:$0xff]  ;;  %v5435_v24 = vld [vmem:[%s9737_s7 + $0xa8] sm:$0xff]  ;;  %vm9995_vm3 = vmmov %vm9983_vm0 }
 0x553   : > { %6570 = vmatpush3.bf16.msra.mxu0 %v6569_v59  ;;  %v5418_v43 = vld [vmem:[%s9737_s7 + $0x20] sm:$0xff]  ;;  %v6595_v20 = vpack.c.bf16 %v5435_v24, %v5434_v54  ;;  %v5419_v48 = vld [vmem:[%s9737_s7 + $0x28] sm:$0xff]  ;;  %v6623_v59 = vpack.c.bf16 %v5465_v57, %v5464_v50 }
 0x554   : > { %6588 = vmatprep.subr.bf16.mxu0 %v6587_v38  ;;  %v5451_v34 = vld [vmem:[%s9737_s7 + $0x128] sm:$0xff]  ;;  %v5422_v2 = vld [vmem:[%s9737_s7 + $0x40] sm:$0xff] }
 0x556   : > { %v6732_v51 = vld [vmem:[#allocation6 + $0x21] ss:$8 sps:$4 sm:$0xff]  }
 0x557   : > { %v6733_v8 = vld [vmem:[#allocation6 + $0x18] ss:$8 sps:$4 sm:$0xff]   ;;  %4841 = vrot.lane.b32.xlu1 %v6732_v51, %s9786_s16 }
 0x558   : > { %v6740_v26 = vld [vmem:[#allocation6 + $0x20] ss:$8 sps:$4 sm:$0xff]   ;;  %4776 = vrot.lane.b32.xlu0 %v6733_v8, %s9786_s16  ;;  %v4865_v41 = vld [vmem:[#allocation7 + $0x20] sm:$0xff]  ;;  %v6625_v8 = vpack.c.bf16 %v5449_v42, %v5448_v46 }
 0x559   : > { %v6742_v35 = vld [vmem:[#allocation6 + $0x19] ss:$8 sps:$4 sm:$0xff]   ;;  %4828 = vst.msk [vmem:[#allocation7 + $0x40] sm:$0xff] %vm9983_vm0, %v6740_v26  ;;  %v5437_v26 = vld [vmem:[%s9737_s7 + $0xb8] sm:$0xff] }
 0x55a   : > { %v6734_v61 = vld [vmem:[#allocation6 + $0x1a] ss:$8 sps:$4 sm:$0xff]   ;;  %4795 = vst.msk [vmem:[#allocation7 + $0x38] sm:$0xff] %vm9984_vm6, %v6742_v35  ;;  %v6597_v35 = vpack.c.bf16 %v5419_v48, %v5418_v43 }
 0x55b   : > { %v6745_v31 = vld [vmem:[#allocation6 + $0x22] ss:$8 sps:$4 sm:$0xff]   ;;  %4808 = vrot.lane.b32.xlu1 %v6734_v61, %s9786_s16  ;;  %v5466_v61 = vld [vmem:[%s9737_s7 + $0x1a0] sm:$0xff] }
 0x55c   : > { %4860 = vst.msk [vmem:[#allocation7 + $0x48] sm:$0xff] %vm9985_vm7, %v6745_v31  ;;  %4744 = vrot.lane.b32.xlu0 %v6735_v10, %s9786_s16  ;;  %v5436_v51 = vld [vmem:[%s9737_s7 + $0xb0] sm:$0xff]  ;;  %v5467_v31 = vld [vmem:[%s9737_s7 + $0x1a8] sm:$0xff]  ;;  %v5450_v10 = vld [vmem:[%s9737_s7 + $0x120] sm:$0xff] }
 0x55d   : > { %v6627_v36 = vpack.c.bf16 %v5467_v31, %v5466_v61  ;;  %v6629_v28 = vpack.c.bf16 %v5451_v34, %v5450_v10 }
 0x563   : > { %v4870_v7 = vld [vmem:[#allocation7 + $0x48] sm:$0xff] }
 0x5a3   : > { %v4743_v32 = vpop.permute.xlu1 %4742 }
 0x5a4   : > { %4748 = vst.msk [vmem:[#allocation7] sm:$0xff] %vm3732_vm1, %v4743_v32  ;;  %v6599_v32 = vpack.c.bf16 %v5437_v26, %v5436_v51 }
 0x5ab   : > { %v4861_v49 = vld [vmem:[#allocation7] sm:$0xff] }
 0x5ac   : > { %v4807_v30 = vpop.permute.xlu1 %4806 }
 0x5ad   : > { %4812 = vst.msk [vmem:[#allocation7 + $0x10] sm:$0xff] %vm3732_vm1, %v4807_v30  ;;  %v4775_v17 = vpop.permute.xlu0 %4774  ;;  %v5420_v30 = vld [vmem:[%s9737_s7 + $0x30] sm:$0xff] }
 0x5ae   : > { %4780 = vst.msk [vmem:[#allocation7 + $0x8] sm:$0xff] %vm3732_vm1, %v4775_v17  ;;  %v5421_v17 = vld [vmem:[%s9737_s7 + $0x38] sm:$0xff] }
 0x5b4   : > { %v4863_v33 = vld [vmem:[#allocation7 + $0x10] sm:$0xff] }
 0x5b5   : > { %v4862_v18 = vld [vmem:[#allocation7 + $0x8] sm:$0xff] }
 0x5b6   : > { %5013 = vmatprep.mubr.f32.mxu1 %v4862_v18  ;;  %v5438_v18 = vld [vmem:[%s9737_s7 + $0xc0] sm:$0xff] }
 0x5b7   : > { %5014 = vmatmul.mubr.f32.vlgmr.msra.gmra.mrb[32].mxu1 %v4861_v49  ;;  %v5468_v49 = vld [vmem:[%s9737_s7 + $0x1b0] sm:$0xff] }
 0x5b8   : > { %6574 = vmatpush3.bf16.msra.mxu1 %v6571_v9  ;;  %v6619_v9 = vpack.c.bf16 %v5463_v22, %v5462_v37  ;;  %v6631_v62 = vpack.c.bf16 %v5469_v4, %v5468_v49 }
 0x5b9   : > { %6576 = vmatprep.subr.bf16.mxu1 %v6575_v60 }
 0x5bc   : > { %6578 = vmatpush3.bf16.msra.mxu1 %v6575_v60  ;;  %v5439_v60 = vld [vmem:[%s9737_s7 + $0xc8] sm:$0xff] }
 0x5bd   : > { %6580 = vmatprep.subr.bf16.mxu1 %v6579_v47 }
 0x5be   : > { %v4840_v52 = vpop.permute.xlu0 %4839 }
 0x5bf   : > { %4845 = vst.msk [vmem:[#allocation7 + $0x18] sm:$0xff] %vm3732_vm1, %v4840_v52  ;;  %v5452_v52 = vld [vmem:[%s9737_s7 + $0x130] sm:$0xff] }
 0x5c0   : > { %6582 = vmatpush3.bf16.msra.mxu1 %v6579_v47  ;;  %v6601_v47 = vpack.c.bf16 %v5421_v17, %v5420_v30 }
 0x5c1   : > { %6584 = vmatprep.subr.bf16.mxu1 %v6583_v14 }
 0x5c4   : > { %6586 = vmatpush3.bf16.msra.mxu1 %v6583_v14  ;;  %v5453_v14 = vld [vmem:[%s9737_s7 + $0x138] sm:$0xff] }
 0x5c5   : > { %6620 = vmatprep.subr.bf16.mxu1 %v6619_v9 }
 0x5c6   : > { %v4864_v44 = vld [vmem:[#allocation7 + $0x18] sm:$0xff] }
 0x5c7   : > { %5088 = vmatprep.mubr.f32.mxu0 %v4864_v44  ;;  %v6603_v44 = vpack.c.bf16 %v5439_v60, %v5438_v18 }
 0x5c8   : > { %5089 = vmatmul.mubr.f32.vlgmr.msra.gmra.mrb[40].mxu0 %v4863_v33  ;;  %v5423_v33 = vld [vmem:[%s9737_s7 + $0x48] sm:$0xff] }
 0x5c9   : > { %v4842_v23 = vpop.permute.xlu1 %4841  ;;  %6590 = vmatpush3.bf16.msra.mxu0 %v6589_v1 }
 0x5ca   : > { %4846 = vst.msk [vmem:[#allocation7 + $0x40] sm:$0xff] %vm3732_vm1, %v4842_v23  ;;  %v4777_v29 = vpop.permute.xlu0 %4776  ;;  %6592 = vmatprep.subr.bf16.mxu0 %v6591_v53  ;;  %v5470_v23 = vld [vmem:[%s9737_s7 + $0x1c0] sm:$0xff] }
 0x5cb   : > { %4781 = vst.msk [vmem:[#allocation7 + $0x30] sm:$0xff] %vm3732_vm1, %v4777_v29  ;;  %v5471_v29 = vld [vmem:[%s9737_s7 + $0x1c8] sm:$0xff] }
 0x5cd   : > { %v4809_v11 = vpop.permute.xlu1 %4808  ;;  %6594 = vmatpush3.bf16.msra.mxu0 %v6593_v39 }
 0x5ce   : > { %4813 = vst.msk [vmem:[#allocation7 + $0x38] sm:$0xff] %vm3732_vm1, %v4809_v11  ;;  %v4745_v3 = vpop.permute.xlu0 %4744  ;;  %6596 = vmatprep.subr.bf16.mxu0 %v6595_v20  ;;  %v5440_v11 = vld [vmem:[%s9737_s7 + $0xd0] sm:$0xff] }
 0x5cf   : > { %4749 = vst.msk [vmem:[#allocation7 + $0x28] sm:$0xff] %vm3732_vm1, %v4745_v3  ;;  %v5441_v3 = vld [vmem:[%s9737_s7 + $0xd8] sm:$0xff]  ;;  %vm9988_vm1 = vcmask 517120  }
 0x5d0   : > { %vm9989_vm11 = vmmov %vm9988_vm1 }
 0x5d1   : > { %v4869_v58 = vld [vmem:[#allocation7 + $0x40] sm:$0xff]  ;;  %6598 = vmatpush3.bf16.msra.mxu0 %v6597_v35  ;;  %vm9990_vm12 = vmmov %vm9988_vm1 }
 0x5d2   : > { %v4867_v63 = vld [vmem:[#allocation7 + $0x30] sm:$0xff]  ;;  %5093 = vmatprep.mubr.f32.mxu0 %v4869_v58  ;;  %6600 = vmatprep.subr.bf16.mxu0 %v6599_v32  ;;  %v6633_v58 = vpack.c.bf16 %v5453_v14, %v5452_v52  ;;  %vm9991_vm15 = vmmov %vm9988_vm1 }
 0x5d3   : > { %5018 = vmatprep.mubr.f32.mxu1 %v4867_v63  ;;  %v6605_v63 = vpack.c.bf16 %v5423_v33, %v5422_v2  ;;  %vm9993_vm2 = vmmov %vm9988_vm1 }
 0x5d4   : > { %vm9994_vm5 = vmmov %vm9988_vm1 }
 0x5d5   : > { %v4868_v19 = vld [vmem:[#allocation7 + $0x38] sm:$0xff]  ;;  %6602 = vmatpush3.bf16.msra.mxu0 %v6601_v47  ;;  %vm9996_vm0 = vmmov %vm9988_vm1 }
 0x5d6   : > { %v4866_v25 = vld [vmem:[#allocation7 + $0x28] sm:$0xff]  ;;  %5094 = vmatmul.mubr.f32.gmra.mrb[42].mxu0 %v4868_v19  ;;  %v6635_v19 = vpack.c.bf16 %v5471_v29, %v5470_v23  ;;  %6604 = vmatprep.subr.bf16.mxu0 %v6603_v44  ;;  %vm9997_vm6 = vmmov %vm9996_vm0 }
 0x5d7   : > { %5019 = vmatmul.mubr.f32.gmra.mrb[34].mxu1 %v4866_v25  ;;  %v6607_v25 = vpack.c.bf16 %v5441_v3, %v5440_v11  ;;  %vm9998_vm7 = vmmov %vm9996_vm0 }
 0x5d8   : > { %6376 = vmatprep.mubr.msk.f32.mxu1 %vm9986_vm8, %v4865_v41  ;;  %v5424_v41 = vld [vmem:[%s9737_s7 + $0x50] sm:$0xff]  ;;  %vm9999_vm8 = vmmov %vm9995_vm3 }
 0x5d9   : > { %6606 = vmatpush3.bf16.msra.mxu0 %v6605_v63  ;;  %v5931_v63 = vld [vmem:[%s9736_s6] ss:$0 sm:$0xff] }
 0x5da   : > { %6608 = vmatprep.subr.bf16.mxu0 %v6607_v25 }
 0x5db   : > { %6377 = vmatmul.mubr.msk.f32.vlgmr.msra.gmra.mrb[36].mxu1 %vm9987_vm9, %v4870_v7  ;;  %v5425_v7 = vld [vmem:[%s9737_s7 + $0x58] sm:$0xff] }
 0x5dc   : > { %6622 = vmatpush3.bf16.msra.mxu1 %v6621_v55  ;;  %v6609_v40 = vpack.c.bf16 %v5425_v7, %v5424_v41 }
 0x5dd   : > { %6624 = vmatprep.subr.bf16.mxu1 %v6623_v59 }
 0x5de   : > { %6610 = vmatpush3.bf16.msra.mxu0 %v6609_v40 }
 0x5e0   : > { %6626 = vmatpush3.bf16.msra.mxu1 %v6625_v8 }
 0x5e1   : > { %6628 = vmatprep.subr.bf16.mxu1 %v6627_v36 }
 0x5e4   : > { %6630 = vmatpush3.bf16.msra.mxu1 %v6629_v28 }
 0x5e5   : > { %6632 = vmatprep.subr.bf16.mxu1 %v6631_v62 }
 0x5e8   : > { %6634 = vmatpush3.bf16.msra.mxu1 %v6633_v58 }
 0x5e9   : > { %6636 = vmatprep.subr.bf16.mxu1 %v6635_v19 }
 0x68a   : > { %v6134_v5 = vpop.f32.mrb[32].mxu1 }
 0x68b   : > { %v6135_v16 = vpop.f32.mrb[33].mxu1 }
 0x68c   : > { %v6136_v38 = vadd.f32 %v6135_v16, %v6134_v5 }
 0x69b   : > { %v6172_v27 = vpop.f32.mrb[40].mxu0 }
 0x69c   : > { %v6173_v15 = vpop.f32.mrb[41].mxu0 }
 0x69d   : > { %v6174_v21 = vadd.f32 %v6173_v15, %v6172_v27 }
 0x69f   : > { %v5091_v1 = vadd.f32 %v6174_v21, %v6136_v38 }
 0x6a9   : > { %v6175_v53 = vpop.f32.mrb[42].mxu0 }
 0x6aa   : > { %v6137_v6 = vpop.f32.mrb[34].mxu1  ;;  %v6176_v13 = vpop.f32.mrb[43].mxu0 }
 0x6ab   : > { %v6138_v37 = vpop.f32.mrb[35].mxu1  ;;  %v6177_v22 = vadd.f32 %v6176_v13, %v6175_v53  ;;  %v5454_v13 = vld [vmem:[%s9737_s7 + $0x140] sm:$0xff] }
 0x6ac   : > { %v6139_v12 = vadd.f32 %v6138_v37, %v6137_v6  ;;  %v5455_v37 = vld [vmem:[%s9737_s7 + $0x148] sm:$0xff] }
 0x6ae   : > { %v5096_v45 = vadd.f32 %v6177_v22, %v6139_v12  ;;  %v6378_v39 = vpop.f32.mrb[36].mxu1  ;;  %v5442_v22 = vld [vmem:[%s9737_s7 + $0xe0] sm:$0xff]  ;;  %v6637_v12 = vpack.c.bf16 %v5455_v37, %v5454_v13 }
 0x6af   : > { %v5165_v9 = vpop.f32.mrb[37].mxu1 }
 0x6b0   : > { %v5171_v55 = vadd.f32 %v6378_v39, %v5096_v45  ;;  %v5166_v54 = vadd.f32 %v5165_v9, %v5091_v1  ;;  %v5443_v45 = vld [vmem:[%s9737_s7 + $0xe8] sm:$0xff]  ;;  %v5426_v39 = vld [vmem:[%s9737_s7 + $0x60] sm:$0xff]  ;;  %6638 = vmatpush3.bf16.msra.mxu1 %v6637_v12 }
 0x6b1   : > { %v5427_v9 = vld [vmem:[%s9737_s7 + $0x68] sm:$0xff] }
 0x6b2   : > { %v5177_v24 = vcombine.high %v5171_v55, %v5171_v55  ;;  %v5176_v43 = vcombine.high %v5166_v54, %v5166_v54  ;;  %v5183_v20 = vsel %vm4713_vm10, %v5171_v55, -inf  ;;  %v5180_v50 = vsel %vm4713_vm10, %v5166_v54, -inf }
 0x6b3   : > { %v6611_v55 = vpack.c.bf16 %v5443_v45, %v5442_v22  ;;  %v6613_v54 = vpack.c.bf16 %v5427_v9, %v5426_v39  ;;  %v5730_v22 = vld [vmem:[%s9739_s9 + $0x8] sm:$0xff]  ;;  %v5731_v45 = vld [vmem:[%s9739_s9 + $0x10] sm:$0xff]  ;;  %v5732_v39 = vld [vmem:[%s9739_s9 + $0x18] sm:$0xff] }
 0x6b4   : > { %v5184_v48 = vsel %vm4713_vm10, %v5177_v24, -inf  ;;  %v5181_v57 = vsel %vm4713_vm10, %v5176_v43, -inf  ;;  %v5472_v24 = vld [vmem:[%s9737_s7 + $0x1d0] sm:$0xff]  ;;  %v5473_v43 = vld [vmem:[%s9737_s7 + $0x1d8] sm:$0xff]  ;;  %v5733_v9 = vld [vmem:[%s9739_s9 + $0x20] sm:$0xff] }
 0x6b5   : > { %v5185_v59 = vmax.f32 %v5183_v20, %v5184_v48  ;;  %v5182_v46 = vmax.f32 %v5180_v50, %v5181_v57  ;;  %v6639_v20 = vpack.c.bf16 %v5473_v43, %v5472_v24  ;;  %6612 = vmatprep.subr.bf16.mxu0 %v6611_v55  ;;  %v5456_v48 = vld [vmem:[%s9737_s7 + $0x150] sm:$0xff]  ;;  %v5457_v50 = vld [vmem:[%s9737_s7 + $0x158] sm:$0xff]  ;;  %v6667_v55 = vpack.c.bf16 %v5732_v39, %v5731_v45 }
 0x6b6   : > { %v5444_v57 = vld [vmem:[%s9737_s7 + $0xf0] sm:$0xff]  ;;  %6614 = vmatpush3.bf16.msra.mxu0 %v6613_v54  ;;  %v5734_v54 = vld [vmem:[%s9739_s9 + $0x28] sm:$0xff] }
 0x6b7   : > { %v5202_v42 = vrot.slane %v5185_v59, %v7904_v56  ;;  %v5194_v51 = vrot.slane %v5182_v46, %v7904_v56  ;;  %6640 = vmatprep.subr.bf16.mxu1 %v6639_v20  ;;  %v6641_v59 = vpack.c.bf16 %v5457_v50, %v5456_v48  ;;  %v5445_v46 = vld [vmem:[%s9737_s7 + $0xf8] sm:$0xff]  ;;  %v6670_v24 = vpack.c.bf16 %v5734_v54, %v5733_v9  ;;  %v5735_v43 = vld [vmem:[%s9739_s9 + $0x30] sm:$0xff] }
 0x6b8   : > { %v5736_v20 = vld [vmem:[%s9739_s9 + $0x38] sm:$0xff] }
 0x6b9   : > { %v5203_v8 = vcombine.high %v5202_v42, %v5202_v42  ;;  %v5222_v26 = vsel %vm9988_vm1, %v5202_v42, -inf  ;;  %v5195_v35 = vcombine.high %v5194_v51, %v5194_v51  ;;  %v5208_v61 = vsel %vm9989_vm11, %v5194_v51, -inf  ;;  %v5428_v42 = vld [vmem:[%s9737_s7 + $0x70] sm:$0xff]  ;;  %v5429_v51 = vld [vmem:[%s9737_s7 + $0x78] sm:$0xff]  ;;  %6642 = vmatpush3.bf16.msra.mxu1 %v6641_v59 }
 0x6ba   : > { %v5223_v31 = vrot.slane %v5222_v26, 4  ;;  %v5209_v10 = vrot.slane %v5208_v61, 4  ;;  %v6673_v48 = vpack.c.bf16 %v5736_v20, %v5735_v43 }
 0x6bb   : > { %v5229_v32 = vsel %vm9990_vm12, %v5203_v8, -inf  ;;  %v5215_v30 = vsel %vm9991_vm15, %v5195_v35, -inf  ;;  %v6615_v8 = vpack.c.bf16 %v5445_v46, %v5444_v57  ;;  %v5474_v35 = vld [vmem:[%s9737_s7 + $0x1e0] sm:$0xff] }
 0x6bc   : > { %v5224_v17 = vmax.f32 %v5222_v26, %v5223_v31  ;;  %v5230_v36 = vrot.slane %v5229_v32, 4  ;;  %v5210_v34 = vmax.f32 %v5208_v61, %v5209_v10  ;;  %v5216_v18 = vrot.slane %v5215_v30, 4  ;;  %v5475_v61 = vld [vmem:[%s9737_s7 + $0x1e8] sm:$0xff]  ;;  %v5458_v31 = vld [vmem:[%s9737_s7 + $0x160] sm:$0xff] }
 0x6bd   : > { %v6617_v26 = vpack.c.bf16 %v5429_v51, %v5428_v42  ;;  %v6643_v10 = vpack.c.bf16 %v5475_v61, %v5474_v35  ;;  %6616 = vmatprep.subr.bf16.mxu0 %v6615_v8 }
 0x6be   : > { %v5225_v60 = vrot.slane %v5224_v17, 2  ;;  %v5231_v49 = vmax.f32 %v5229_v32, %v5230_v36  ;;  %v5211_v28 = vrot.slane %v5210_v34, 2  ;;  %v5217_v4 = vmax.f32 %v5215_v30, %v5216_v18  ;;  %v5459_v32 = vld [vmem:[%s9737_s7 + $0x168] sm:$0xff] }
 0x6bf   : > { %6618 = vmatpush3.bf16.msra.mxu0 %v6617_v26  ;;  %6644 = vmatprep.subr.bf16.mxu1 %v6643_v10 }
 0x6c0   : > { %v5226_v47 = vmax.f32 %v5224_v17, %v5225_v60  ;;  %v5232_v2 = vrot.slane %v5231_v49, 2  ;;  %v5212_v62 = vmax.f32 %v5210_v34, %v5211_v28  ;;  %v5218_v52 = vrot.slane %v5217_v4, 2 }
 0x6c1   : > { %v6645_v17 = vpack.c.bf16 %v5459_v32, %v5458_v31 }
 0x6c2   : > { %v5227_v14 = vrot.slane %v5226_v47, 1  ;;  %v5233_v44 = vmax.f32 %v5231_v49, %v5232_v2  ;;  %v5213_v33 = vrot.slane %v5212_v62, 1  ;;  %v5219_v23 = vmax.f32 %v5217_v4, %v5218_v52  ;;  %v5477_v2 = vld [vmem:[%s9737_s7 + $0x1f8] sm:$0xff] }
 0x6c3   : > { %6646 = vmatpush3.bf16.msra.mxu1 %v6645_v17 }
 0x6c4   : > { %v5228_v29 = vmax.f32 %v5226_v47, %v5227_v14  ;;  %v5234_v11 = vrot.slane %v5233_v44, 1  ;;  %v5214_v3 = vmax.f32 %v5212_v62, %v5213_v33  ;;  %v5220_v58 = vrot.slane %v5219_v23, 1  ;;  %v5476_v47 = vld [vmem:[%s9737_s7 + $0x1f0] sm:$0xff] }
 0x6c5   : > { %v6851_v62 = vmov 0.0|0.0   ;;  %v6647_v52 = vpack.c.bf16 %v5477_v2, %v5476_v47  ;;  %v5460_v14 = vld [vmem:[%s9737_s7 + $0x170] sm:$0xff] }
 0x6c6   : > { %v5235_v19 = vmax.f32 %v5233_v44, %v5234_v11  ;;  %v5221_v25 = vmax.f32 %v5219_v23, %v5220_v58  ;;  %v5245_v41 = vadd.f32 %v5931_v63, %v5228_v29  ;;  %v5243_v40 = vadd.f32 %v5931_v63, %v5214_v3  ;;  %6651 = vmatprep.subr.bf16.mxu0 %v6851_v62  ;;  %v5461_v44 = vld [vmem:[%s9737_s7 + $0x178] sm:$0xff] }
 0x6c7   : > { %6648 = vmatprep.subr.bf16.mxu1 %v6647_v52  ;;  %v6649_v33 = vpack.c.bf16 %v5461_v44, %v5460_v14 }
 0x6c8   : > { %v5246_v7 = vadd.f32 %v5931_v63, %v5235_v19  ;;  %v5244_v5 = vadd.f32 %v5931_v63, %v5221_v25  ;;  %v5249_v27 = vmax.f32 %v5245_v41, 0.0  ;;  %v5247_v21 = vmax.f32 %v5243_v40, 0.0  ;;  %v5478_v63 = vld [vmem:[%s9737_s7 + $0x200] sm:$0xff]  ;;  %v5479_v19 = vld [vmem:[%s9737_s7 + $0x208] sm:$0xff]  ;;  %v5480_v40 = vld [vmem:[%s9737_s7 + $0x210] sm:$0xff] }
 0x6c9   : > { %6650 = vmatpush3.bf16.msra.mxu1 %v6649_v33 }
 0x6ca   : > { %v5250_v16 = vmax.f32 %v5246_v7, 0.0  ;;  %v5248_v38 = vmax.f32 %v5244_v5, 0.0  ;;  %6663 = vmatprep.subr.bf16.mxu1 %v6851_v62  ;;  %v6652_v7 = vpack.c.bf16 %v5479_v19, %v5478_v63  ;;  %v5481_v5 = vld [vmem:[%s9737_s7 + $0x218] sm:$0xff] }
 0x6cc   : > { %v5268_v15 = vrot.slane %v5250_v16, 7  ;;  %v5266_v1 = vrot.slane %v5248_v38, 7 }
 0x6ce   : > { %v5269_v53 = vsel %vm9968_vm4, %v5268_v15, %v5249_v27  ;;  %v5267_v6 = vsel %vm9992_vm13, %v5266_v1, %v5247_v21  ;;  %v6655_v27 = vpack.c.bf16 %v5481_v5, %v5480_v40  ;;  %v5482_v15 = vld [vmem:[%s9737_s7 + $0x220] sm:$0xff]  ;;  %v5483_v21 = vld [vmem:[%s9737_s7 + $0x228] sm:$0xff] }
 0x6cf   : > { %5274 = vst.msk [vmem:[#allocation8 + $0x9] sm:$0x3] %vm9993_vm2, %v5269_v53  ;;  %v6658_v1 = vpack.c.bf16 %v5483_v21, %v5482_v15  ;;  %v5484_v53 = vld [vmem:[%s9737_s7 + $0x230] sm:$0xff] }
 0x6d0   : > { %5273 = vst.msk [vmem:[#allocation8 + $0x5] sm:$0x3] %vm9994_vm5, %v5267_v6  ;;  %v5485_v6 = vld [vmem:[%s9737_s7 + $0x238] sm:$0xff] }
 0x6d1   : > { %v6661_v13 = vpack.c.bf16 %v5485_v6, %v5484_v53 }
 0x6d6   : > { %v6771_v18 = vld.sshfl [vmem:[#allocation8 + $0x9] sm:$0xf pattern:$0x76325410] }
 0x6d7   : > { %v6766_v30 = vld.sshfl [vmem:[#allocation8 + $0x1] sm:$0xf pattern:$0x76325410] }
 0x6d8   : > { %v6767_v36 = vld.sshfl [vmem:[#allocation8 + $0x4] sm:$0xf pattern:$0x76325410]  ;;  %5301 = vrot.lane.b32.xlu0 %v6766_v30, %s9786_s16 }
 0x6d9   : > { %v6769_v34 = vld.sshfl [vmem:[#allocation8 + $0x6] sm:$0xf pattern:$0x76325410]  ;;  %5332 = vrot.lane.b32.xlu1 %v6767_v36, %s9786_s16 }
 0x6da   : > { %v6768_v60 = vld.sshfl [vmem:[#allocation8] sm:$0xf pattern:$0x76325410] }
 0x6db   : > { %v6770_v49 = vld.sshfl [vmem:[#allocation8 + $0x2] sm:$0xf pattern:$0x76325410]  ;;  %5288 = vst.msk [vmem:[#allocation9] sm:$0xf] %vm4713_vm10, %v6768_v60 }
 0x6dc   : > { %v6772_v28 = vld.sshfl [vmem:[#allocation8 + $0x5] sm:$0xf pattern:$0x76325410]  ;;  %5362 = vrot.lane.b32.xlu0 %v6769_v34, %s9786_s16  ;;  %5319 = vst.msk [vmem:[#allocation9 + $0x4] sm:$0xf] %vm4713_vm10, %v6770_v49 }
 0x6dd   : > { %v6773_v4 = vld.sshfl [vmem:[#allocation8 + $0x8] sm:$0xf pattern:$0x76325410]  ;;  %5393 = vrot.lane.b32.xlu1 %v6771_v18, %s9786_s16  ;;  %5349 = vst.msk [vmem:[#allocation9 + $0x8] sm:$0xf] %vm4713_vm10, %v6772_v28 }
 0x6de   : > { %5380 = vst.msk [vmem:[#allocation9 + $0xc] sm:$0xf] %vm4713_vm10, %v6773_v4  ;;  %v6774_v23 = vld.sshfl [vmem:[#allocation8 + $0xa] sm:$0xf pattern:$0x76325410] }
 0x6df   : > { %5410 = vst.msk [vmem:[#allocation9 + $0x10] sm:$0xf] %vm4713_vm10, %v6774_v23  ;;  %vm6852_vm10 = vmmov 0   ;;  %v5726_v4 = vld [vmem:[%s9738_s8] sm:$0x1] }
 0x6e6   : > { %v5413_v37 = vld [vmem:[#allocation9 + $0x10] sm:$0xf] }
 0x74a   : > { %v5302_v29 = vpop.permute.xlu0 %5301 }
 0x74b   : > { %5305 = vst.msk [vmem:[#allocation9] sm:$0xf] %vm5304_vm14, %v5302_v29  ;;  %v5333_v11 = vpop.permute.xlu1 %5332 }
 0x74c   : > { %5335 = vst.msk [vmem:[#allocation9 + $0x4] sm:$0xf] %vm5304_vm14, %v5333_v11 }
 0x74e   : > { %v5363_v3 = vpop.permute.xlu0 %5362 }
 0x74f   : > { %5365 = vst.msk [vmem:[#allocation9 + $0x8] sm:$0xf] %vm5304_vm14, %v5363_v3  ;;  %v5394_v58 = vpop.permute.xlu1 %5393 }
 0x750   : > { %5396 = vst.msk [vmem:[#allocation9 + $0xc] sm:$0xf] %vm5304_vm14, %v5394_v58 }
 0x753   : > { %v5411_v25 = vld [vmem:[#allocation9] sm:$0xff] }
 0x754   : > { %v5489_v41 = vcombine.high %v5411_v25, %v5411_v25 }
 0x756   : > { %5559 = vmatprep.mubr.f32.mxu0 %v5489_v41 }
 0x757   : > { %5560 = vmatmul.mubr.f32.vlgmr.msra.gmra.mrb[44].mxu0 %v5411_v25  ;;  %v5412_v16 = vld [vmem:[#allocation9 + $0x8] sm:$0xff] }
 0x758   : > { %6653 = vmatpush3.bf16.msra.mxu0 %v6652_v7  ;;  %v5490_v38 = vcombine.high %v5412_v16, %v5412_v16  ;;  %6395 = vmatprep.mubr.msk.f32.mxu0 %vm6852_vm10, %v6839_v0 }
 0x759   : > { %6654 = vmatprep.subr.bf16.mxu0 %v6851_v62 }
 0x75a   : > { %5629 = vmatprep.mubr.f32.mxu1 %v5490_v38 }
 0x75b   : > { %5630 = vmatmul.mubr.f32.vlgmr.msra.gmra.mrb[38].mxu1 %v5412_v16 }
 0x75c   : > { %6656 = vmatpush3.bf16.msra.mxu0 %v6655_v27  ;;  %6414 = vmatprep.mubr.msk.f32.mxu1 %vm6852_vm10, %v6839_v0  ;;  %v5729_v0 = vld [vmem:[%s9739_s9] sm:$0xff] }
 0x75d   : > { %6657 = vmatprep.subr.bf16.mxu0 %v6851_v62  ;;  %v6664_v12 = vpack.c.bf16 %v5730_v22, %v5729_v0 }
 0x75f   : > { %6665 = vmatpush3.bf16.msra.mxu1 %v6664_v12 }
 0x760   : > { %6659 = vmatpush3.bf16.msra.mxu0 %v6658_v1  ;;  %6666 = vmatprep.subr.bf16.mxu1 %v6851_v62 }
 0x761   : > { %6660 = vmatprep.subr.bf16.mxu0 %v6851_v62 }
 0x763   : > { %6668 = vmatpush3.bf16.msra.mxu1 %v6667_v55 }
 0x764   : > { %6662 = vmatpush3.bf16.msra.mxu0 %v6661_v13  ;;  %6669 = vmatprep.subr.bf16.mxu1 %v6851_v62 }
 0x767   : > { %6396 = vmatmul.mubr.msk.f32.vlgmr.msra.gmra.mrb[46].mxu0 %vm9995_vm3, %v5413_v37  ;;  %6671 = vmatpush3.bf16.msra.mxu1 %v6670_v24 }
 0x768   : > { %6672 = vmatprep.subr.bf16.mxu1 %v6851_v62  ;;  %v5737_v62 = vld [vmem:[%s9740_s10] sm:$0x1] }
 0x76b   : > { %6674 = vmatpush3.bf16.msra.mxu1 %v6673_v48 }
 0x82a   : > { %v6220_v50 = vpop.f32.mrb[44].mxu0 }
 0x82b   : > { %v6221_v57 = vpop.f32.mrb[45].mxu0 }
 0x82c   : > { %v6222_v59 = vadd.f32 %v6221_v57, %v6220_v50 }
 0x82e   : > { %v6255_v46 = vpop.f32.mrb[38].mxu1 }
 0x82f   : > { %v6256_v42 = vpop.f32.mrb[39].mxu1 }
 0x830   : > { %v6257_v51 = vadd.f32 %v6256_v42, %v6255_v46 }
 0x832   : > { %v5632_v8 = vadd.f32 %v6257_v51, %v6222_v59 }
 0x83a   : > { %v5701_v26 = vpop.f32.mrb[46].mxu0 }
 0x83b   : > { %v5702_v35 = vadd.f32 %v5701_v26, %v5632_v8  ;;  %v6397_v61 = vpop.f32.mrb[47].mxu0 }
 0x83d   : > { %v5712_v31 = vrot.slane %v5702_v35, %v7904_v56 }
 0x83f   : > { %v5713_v10 = vcombine.high %v5712_v31, %v5712_v31  ;;  %v5716_v32 = vsel %vm9996_vm0, %v5712_v31, -inf }
 0x841   : > { %v5717_v30 = vsel %vm9997_vm6, %v5713_v10, -inf }
 0x842   : > { %v5718_v17 = vmax.f32 %v5716_v32, %v5717_v30 }
 0x844   : > { %v5719_v36 = vsel %vm9998_vm7, %v5718_v17, -inf }
 0x845   : > { %v5720_v34 = vrot.slane %v5719_v36, 4 }
 0x847   : > { %v5721_v18 = vmax.f32 %v5719_v36, %v5720_v34 }
 0x849   : > { %v5722_v60 = vrot.slane %v5721_v18, 2 }
 0x84b   : > { %v5723_v49 = vmax.f32 %v5721_v18, %v5722_v60 }
 0x84d   : > { %v5724_v28 = vrot.slane %v5723_v49, 1 }
 0x84f   : > { %v5725_v56 = vmax.f32 %v5723_v49, %v5724_v28 }
 0x851   : > { %v5727_v47 = vadd.f32 %v5726_v4, %v5725_v56 }
 0x853   : > { %v5728_v2 = vmax.f32 %v5727_v47, 0.0 }
 0x855   : > { %6415 = vmatmul.mubr.msk.f32.vlgmr.msra.gmra.mrb[40].mxu1 %vm9999_vm8, %v5728_v2 }
 0x928   : > { %v5807_v52 = vpop.f32.mrb[40].mxu1 }
 0x929   : > { %v5808_v14 = vadd.f32 %v5807_v52, %v5737_v62  ;;  %v6416_v44 = vpop.f32.mrb[41].mxu1 }
 0x92b   : > { %5811 = vst [vmem:[%s378_s24] sm:$0x1] %v5808_v14 }
 0x92c   : > { %6788 = shalt.err (!%p6785_p3)
}
 0x92d   : > { %s6789_s15 = scalar_lea.hbm %s9688_s12, 16  ;;  %s6793_s24 = scalar_lea.hbm %s9741_s11, 32 }
 0x92e   : > { %p6790_p4 = scmp.ne.s32.totalorder %s9688_s12, %s6789_s15  ;;  %p6794_p9 = scmp.lt.u32.totalorder %s9688_s12, %s9741_s11 }
 0x92f   : > { %p6795_p10 = scmp.lt.u32.totalorder %s6793_s24, %s6789_s15  ;;  %p6797_p12 = scmp.lt.u32.totalorder %s6789_s15, %s9688_s12 }
 0x930   : > { %p6791_p7 = pnand %p6790_p4, %p6952_p5 }
 0x931   : > { %p6796_p11 = por %p6795_p10, %p6794_p9 }
 0x932   : > { %p6792_p8 = pneg %p6791_p7 }
 0x933   : > { %p6798_p13 = por %p6797_p12, %p6796_p11 }
 0x935   : > { %p6799_p0 = pnand %p6798_p13, %p6792_p8 }
 0x937   : > { %6802 = shalt.err (!%p6799_p0)
}
 0x938   : > { %6675 = dma.vmem_to_hbm [thread:$0]  (%p6952_p5), %s9690_s30, 16, %s9688_s12, %s5813_s14  }
 0x939 PF: > { %p6681_p1 = scmp.ge.s32.totalorder %s6837_s20, 2  ;;  %s5837_s13 = sand.u32 1, %s6825_s17  }
 0x93a   : > { %s5838_s21 = scalar_lea.sflag [#allocation11], %s5837_s13 }
 0x93b   : > { %p6678_p2 = pnand %p6681_p1, %p6956_p6 }
 0x93d   : > { %6820 = dma.done.wait (!%p6678_p2), %s5838_s21, 16  }
 0x93e   : > { %6822 = vsyncadd (!%p6678_p2), %s5838_s21, 4294967280  ;;  %p21_p3 = scmp.ge.s32.totalorder %s6939_s23, 4   ;;  %s10000_s17 = smov %s6829_s18 }
 0x93f   : > { %s10001_s18 = smov %s6833_s19  ;;  %s10002_s19 = smov %s6950_s26 }
 0x940   : > { %s10003_s20 = smov %s6939_s23  ;;  %23 = sbr.rel (!%p21_p3) target bundleno = 6 (0x6), region = 111 }
 0x947   :  { %5842 = vsyncpa [#allocation11], 1 }
 0x948   :  { %5844 = vsyncpa [#allocation11 + $0x1], 1 }

</bundles_post_ra>
